<compile_context>
chip_gen: v7x
topology: tpu7x:2x2x1
jax: 0.10.0
libtpu: 0.0.40
codegen_flags: <defaults>
</compile_context>

<pallas_src>
import functools

import jax
import jax.numpy as jnp
import numpy as np
from jax.experimental import pallas as pl
from jax.experimental.pallas import tpu as pltpu


# ----------------------------------------------------------------------------
# Tiling helpers (divisor-exact: no padding, no trailing slice)
# ----------------------------------------------------------------------------
@functools.lru_cache(maxsize=1)
def _min_grid_steps():
    """>=4 blocks on v7x (2 TensorCores share the grid); 1 elsewhere."""
    try:
        kind = jax.devices()[0].device_kind.lower()
    except Exception:
        return 1
    return 4 if ("v7" in kind or "tpu7" in kind) else 1


def _choose_lane_tile(n, max_tile=8192):
    """Largest divisor of n that is a multiple of 128 and <= cap."""
    if n < 128 or n % 128 != 0:
        return n                      # full-extent block is always legal
    cap = min(n, max_tile)
    steps = _min_grid_steps()
    if steps > 1:
        cap = min(cap, max(128, (n // steps) // 128 * 128))
    d = cap - cap % 128
    while d >= 128:
        if n % d == 0:
            return d
        d -= 128
    return n


def _largest_divisor_leq(n, cap):
    for d in range(min(n, cap), 0, -1):
        if n % d == 0:
            return d
    return n


# ----------------------------------------------------------------------------
# Pallas kernel 1: fused  Y = [tanh]( W^T @ X + b [+ R] ), channels-first
#   wt: (Co, Ci), x: (Ci, N), b: (Co, 1), r: (Co, N)  ->  y: (Co, N)
# ----------------------------------------------------------------------------
def _make_mm_kernel(apply_tanh: bool, has_residual: bool):
    if has_residual:
        def kernel(w_ref, x_ref, b_ref, r_ref, o_ref):
            y = jnp.dot(w_ref[...], x_ref[...],
                        preferred_element_type=jnp.float32)
            y = y + b_ref[...] + r_ref[...]
            if apply_tanh:
                y = jnp.tanh(y)
            o_ref[...] = y
    else:
        def kernel(w_ref, x_ref, b_ref, o_ref):
            y = jnp.dot(w_ref[...], x_ref[...],
                        preferred_element_type=jnp.float32)
            y = y + b_ref[...]
            if apply_tanh:
                y = jnp.tanh(y)
            o_ref[...] = y
    return kernel


def fused_matmul(wt, x, b, residual=None, apply_tanh=False, max_tile=8192):
    """wt: (Co, Ci), x: (Ci, N), b: (Co, 1) -> (Co, N), lane-dense output."""
    Co, Ci = wt.shape
    N = x.shape[1]
    tn = _choose_lane_tile(N, max_tile)
    grid = (N // tn,)

    in_specs = [
        pl.BlockSpec((Co, Ci), lambda i: (0, 0)),
        pl.BlockSpec((Ci, tn), lambda i: (0, i)),
        pl.BlockSpec((Co, 1), lambda i: (0, 0)),
    ]
    args = [wt, x, b]
    if residual is not None:
        in_specs.append(pl.BlockSpec((Co, tn), lambda i: (0, i)))
        args.append(residual)

    return pl.pallas_call(
        _make_mm_kernel(apply_tanh, residual is not None),
        out_shape=jax.ShapeDtypeStruct((Co, N), jnp.float32),
        grid=grid,
        in_specs=in_specs,
        out_specs=pl.BlockSpec((Co, tn), lambda i: (0, i)),
        compiler_params=pltpu.CompilerParams(
            dimension_semantics=("parallel",)),
    )(*args)


# ----------------------------------------------------------------------------
# Pallas kernel 2: fused projection head (channels-first)
#   Y = W2^T @ tanh(W1^T @ X + b1) + b2      -> (Cout, N), lane-dense
# ----------------------------------------------------------------------------
def _head_kernel(w1_ref, b1_ref, w2_ref, b2_ref, x_ref, o_ref):
    h = jnp.dot(w1_ref[...], x_ref[...], preferred_element_type=jnp.float32)
    h = jnp.tanh(h + b1_ref[...])
    y = jnp.dot(w2_ref[...], h, preferred_element_type=jnp.float32)
    o_ref[...] = y + b2_ref[...]


def fused_head(x, w1t, b1, w2t, b2, max_tile=8192):
    """x: (Ci, N); w1t: (Ch, Ci); w2t: (Cout, Ch) -> (Cout, N)."""
    Ci, N = x.shape
    Ch = w1t.shape[0]
    Cout = w2t.shape[0]
    tn = _choose_lane_tile(N, max_tile)
    return pl.pallas_call(
        _head_kernel,
        out_shape=jax.ShapeDtypeStruct((Cout, N), jnp.float32),
        grid=(N // tn,),
        in_specs=[
            pl.BlockSpec((Ch, Ci), lambda i: (0, 0)),
            pl.BlockSpec((Ch, 1), lambda i: (0, 0)),
            pl.BlockSpec((Cout, Ch), lambda i: (0, 0)),
            pl.BlockSpec((Cout, 1), lambda i: (0, 0)),
            pl.BlockSpec((Ci, tn), lambda i: (0, i)),
        ],
        out_specs=pl.BlockSpec((Cout, tn), lambda i: (0, i)),
        compiler_params=pltpu.CompilerParams(
            dimension_semantics=("parallel",)),
    )(w1t, b1, w2t, b2, x)


# ----------------------------------------------------------------------------
# Pallas kernel 3: batched per-Fourier-mode complex mixing (real embedding)
#   out[m] = [ar|ai][m] @ [[wr, wi], [-wi, wr]][m]      one einsum per step
# ----------------------------------------------------------------------------
def _cmix_kernel(a_ref, w_ref, o_ref):
    o_ref[...] = jnp.einsum("mbi,mio->mbo", a_ref[...], w_ref[...],
                            preferred_element_type=jnp.float32)


def spectral_mode_matmul(a_tilde, w_tilde, mode_tile=128):
    """a_tilde: (M, B, 2Ci); w_tilde: (M, 2Ci, 2Co) -> (M, B, 2Co)."""
    M, B, Ci2 = a_tilde.shape
    Co2 = w_tilde.shape[2]
    mt = _largest_divisor_leq(M, mode_tile)   # exact divisor -> no padding
    a_spec = pl.BlockSpec((mt, B, Ci2), lambda m: (m, 0, 0))
    w_spec = pl.BlockSpec((mt, Ci2, Co2), lambda m: (m, 0, 0))
    o_spec = pl.BlockSpec((mt, B, Co2), lambda m: (m, 0, 0))
    return pl.pallas_call(
        _cmix_kernel,
        out_shape=jax.ShapeDtypeStruct((M, B, Co2), jnp.float32),
        grid=(M // mt,),
        in_specs=[a_spec, w_spec],
        out_specs=o_spec,
        compiler_params=pltpu.CompilerParams(
            dimension_semantics=("parallel",)),
    )(a_tilde, w_tilde)


# ----------------------------------------------------------------------------
# SpectralConv2dV2 (channels-first): rfft2 -> low/high modes -> mix -> irfft2
# ----------------------------------------------------------------------------
def spectral_conv2d_cf(x_cf4, w_tilde):
    """x_cf4: (Ci, B, H, W) f32.  w_tilde: (2*m1, m2, 2Ci, 2Co) real-embedded
    weights; first m1 rows = low-frequency block (W1), last m1 = high (W2)."""
    Ci, B, H, W = x_cf4.shape
    two_m1, m2, Ci2, Co2 = w_tilde.shape
    m1 = two_m1 // 2
    Co = Co2 // 2
    Wf = W // 2 + 1

    # TODO(synk): rfft2 / irfft2 have no Pallas equivalent; they stay in jnp.fft.
    x_ft = jnp.fft.rfft2(x_cf4, axes=(2, 3))              # (Ci, B, H, Wf) c64

    low = x_ft[:, :, :m1, :m2]                            # (Ci, B, m1, m2)
    high = x_ft[:, :, H - m1:, :m2]                       # (Ci, B, m1, m2)
    blk = jnp.concatenate([low, high], axis=2)            # (Ci, B, 2m1, m2)
    blk = blk.transpose(2, 3, 1, 0).reshape(two_m1 * m2, B, Ci)   # (M, B, Ci)
    a_tilde = jnp.concatenate([jnp.real(blk), jnp.imag(blk)], axis=-1)

    o_tilde = spectral_mode_matmul(
        a_tilde, w_tilde.reshape(two_m1 * m2, Ci2, Co2))  # (M, B, 2Co)
    out_c = jax.lax.complex(o_tilde[..., :Co], o_tilde[..., Co:])
    out_c = out_c.reshape(two_m1, m2, B, Co).transpose(3, 2, 0, 1)

    out_ft = jnp.zeros((Co, B, H, Wf), dtype=jnp.complex64)
    out_ft = out_ft.at[:, :, :m1, :m2].set(out_c[:, :, :m1])
    out_ft = out_ft.at[:, :, H - m1:, :m2].set(out_c[:, :, m1:])
    return jnp.fft.irfft2(out_ft, s=(H, W), axes=(2, 3))  # (Co, B, H, W)


# ----------------------------------------------------------------------------
# Full FNN2d forward (channels-first internally; one transpose in, one out)
# ----------------------------------------------------------------------------
def fnn2d_forward(params, x, y=None):
    del y  # unused by the reference module's forward
    B, Cin, H, W = x.shape
    N = B * H * W

    x_cf = x.transpose(1, 0, 2, 3).reshape(Cin, N)                 # (Cin, N)
    h = fused_matmul(params["fc0_wt"], x_cf, params["fc0_b"])      # (C0, N)

    n_layers = len(params["ws"])
    for i in range(n_layers):
        w_tilde = params["sp"][i]
        Ci = h.shape[0]
        Co = w_tilde.shape[-1] // 2
        # K(u): spectral conv on the channels-first view
        x1 = spectral_conv2d_cf(h.reshape(Ci, B, H, W), w_tilde)
        # W(u): pointwise Conv1d == channel matmul, fused with +x1 and tanh
        wwt, wb = params["ws"][i]
        h = fused_matmul(wwt, h, wb, residual=x1.reshape(Co, N),
                         apply_tanh=(i != n_layers - 1))

    # fc1 + tanh + fc2 fused in one kernel; output is (out_dim, N) lane-dense
    out = fused_head(h, params["fc1_wt"], params["fc1_b"],
                     params["fc2_wt"], params["fc2_b"])
    out_dim = out.shape[0]
    return out.reshape(out_dim, B, H, W).transpose(1, 0, 2, 3)


# ----------------------------------------------------------------------------
# Deterministic parameter init (raw PyTorch-style shapes)
# ----------------------------------------------------------------------------
def init_params(key, modes1, modes2, layers, in_dim, out_dim, fc_dim):
    state = {"k": key}

    def nxt():
        state["k"], sub = jax.random.split(state["k"])
        return sub

    params = {}
    bnd = 1.0 / float(in_dim) ** 0.5
    params["fc0_w"] = jax.random.uniform(nxt(), (in_dim, layers[0]),
                                         jnp.float32, -bnd, bnd)
    params["fc0_b"] = jax.random.uniform(nxt(), (layers[0],),
                                         jnp.float32, -bnd, bnd)
    sp, ws = [], []
    for ci, co, m1, m2 in zip(layers, layers[1:], modes1, modes2):
        scale = 1.0 / (ci * co)
        w1r = scale * jax.random.uniform(nxt(), (ci, co, m1, m2), jnp.float32)
        w1i = scale * jax.random.uniform(nxt(), (ci, co, m1, m2), jnp.float32)
        w2r = scale * jax.random.uniform(nxt(), (ci, co, m1, m2), jnp.float32)
        w2i = scale * jax.random.uniform(nxt(), (ci, co, m1, m2), jnp.float32)
        sp.append((w1r, w1i, w2r, w2i))
        b = 1.0 / float(ci) ** 0.5
        # Conv1d(ci, co, 1) weight (co, ci, 1) stored transposed as (ci, co)
        ws.append((jax.random.uniform(nxt(), (ci, co), jnp.float32, -b, b),
                   jax.random.uniform(nxt(), (co,), jnp.float32, -b, b)))
    params["sp"] = sp
    params["ws"] = ws
    b = 1.0 / float(layers[-1]) ** 0.5
    params["fc1_w"] = jax.random.uniform(nxt(), (layers[-1], fc_dim),
                                         jnp.float32, -b, b)
    params["fc1_b"] = jax.random.uniform(nxt(), (fc_dim,), jnp.float32, -b, b)
    b = 1.0 / float(fc_dim) ** 0.5
    params["fc2_w"] = jax.random.uniform(nxt(), (fc_dim, out_dim),
                                         jnp.float32, -b, b)
    params["fc2_b"] = jax.random.uniform(nxt(), (out_dim,), jnp.float32, -b, b)
    return params


def preprocess_params(params):
    """One-time weight re-layout hoisted out of the forward pass:
      * pointwise weights transposed to (Co, Ci), biases to (Co, 1)
      * spectral weights (Ci, Co, m1, m2) -> mode-major real embedding
        (2*m1, m2, 2Ci, 2Co) with W_tilde = [[wr, wi], [-wi, wr]];
        low-frequency (W1) and high-frequency (W2) stacked along axis 0."""
    pp = {}
    pp["fc0_wt"] = params["fc0_w"].T
    pp["fc0_b"] = params["fc0_b"].reshape(-1, 1)
    pp["fc1_wt"] = params["fc1_w"].T
    pp["fc1_b"] = params["fc1_b"].reshape(-1, 1)
    pp["fc2_wt"] = params["fc2_w"].T
    pp["fc2_b"] = params["fc2_b"].reshape(-1, 1)
    pp["ws"] = [(w.T, b.reshape(-1, 1)) for w, b in params["ws"]]

    def to_modes(w):                                   # (Ci,Co,m1,m2)->(m1,m2,Ci,Co)
        return jnp.transpose(w, (2, 3, 0, 1))

    def embed(wr, wi):                                 # -> (m1, m2, 2Ci, 2Co)
        top = jnp.concatenate([wr, wi], axis=-1)
        bot = jnp.concatenate([-wi, wr], axis=-1)
        return jnp.concatenate([top, bot], axis=-2)

    sp = []
    for w1r, w1i, w2r, w2i in params["sp"]:
        wt1 = embed(to_modes(w1r), to_modes(w1i))
        wt2 = embed(to_modes(w2r), to_modes(w2i))
        sp.append(jnp.concatenate([wt1, wt2], axis=0))  # (2*m1, m2, 2Ci, 2Co)
    pp["sp"] = sp
    return pp


# ----------------------------------------------------------------------------
# Pure-jnp reference (for a correctness check of the Pallas path)
# ----------------------------------------------------------------------------
def fnn2d_reference(params, x):
    P = jax.lax.Precision.HIGHEST
    B, _, H, W = x.shape
    h = (jnp.einsum("bchw,cd->bdhw", x, params["fc0_w"], precision=P)
         + params["fc0_b"][None, :, None, None])
    n_layers = len(params["ws"])
    for i in range(n_layers):
        w1r, w1i, w2r, w2i = params["sp"][i]
        m1, m2 = w1r.shape[2], w1r.shape[3]
        Co = w1r.shape[1]
        w1 = jax.lax.complex(w1r, w1i)
        w2 = jax.lax.complex(w2r, w2i)
        hf = jnp.fft.rfft2(h)
        out_ft = jnp.zeros((B, Co, H, W // 2 + 1), dtype=jnp.complex64)
        out_ft = out_ft.at[:, :, :m1, :m2].set(
            jnp.einsum("bixy,ioxy->boxy", hf[:, :, :m1, :m2], w1, precision=P))
        out_ft = out_ft.at[:, :, H - m1:, :m2].set(
            jnp.einsum("bixy,ioxy->boxy", hf[:, :, H - m1:, :m2], w2,
                       precision=P))
        x1 = jnp.fft.irfft2(out_ft, s=(H, W))
        ww, wb = params["ws"][i]
        x2 = (jnp.einsum("bchw,cd->bdhw", h, ww, precision=P)
              + wb[None, :, None, None])
        h = x1 + x2
        if i != n_layers - 1:
            h = jnp.tanh(h)
    h = (jnp.einsum("bchw,cd->bdhw", h, params["fc1_w"], precision=P)
         + params["fc1_b"][None, :, None, None])
    h = jnp.tanh(h)
    h = (jnp.einsum("bchw,cd->bdhw", h, params["fc2_w"], precision=P)
         + params["fc2_b"][None, :, None, None])
    return h


if __name__ == "__main__":
    key = jax.random.PRNGKey(0)
    modes1 = [8, 8, 8]
    modes2 = [8, 8, 8]
    layers = [32, 32, 32, 32]        # width = 32
    in_dim, out_dim, fc_dim = 3, 1, 64

    pkey, xkey = jax.random.split(key)
    params = init_params(pkey, modes1, modes2, layers, in_dim, out_dim, fc_dim)
    pparams = preprocess_params(params)   # static weight re-layout, done once
    x = jax.random.normal(xkey, (2, in_dim, 16, 16), jnp.float32)
    y = None  # `y` is unused by FNN2d.forward

    fwd = jax.jit(fnn2d_forward)
    out = fwd(pparams, x, y)
    out = jax.block_until_ready(out)
    assert out.shape == (2, out_dim, 16, 16), out.shape

    ref = fnn2d_reference(params, x)
    ref = jax.block_until_ready(ref)
    err = float(np.max(np.abs(np.asarray(out) - np.asarray(ref))))
    assert np.allclose(np.asarray(out), np.asarray(ref),
                       rtol=1e-2, atol=1e-3), err

    print("KERNEL_OK")
</pallas_src>

<mosaic_0001>
module attributes {stable_mosaic.version = 11 : i64} {
  func.func @kernel(%arg0: i32, %arg1: memref<32x3xf32, #tpu.memory_space<vmem>>, %arg2: memref<3x512xf32, #tpu.memory_space<vmem>>, %arg3: memref<32x1xf32, #tpu.memory_space<vmem>>, %arg4: memref<32x512xf32, #tpu.memory_space<vmem>>) attributes {dimension_semantics = [#tpu.dimension_semantics<parallel>], iteration_bounds = array<i64: 1>, scalar_prefetch = 0 : i64, scratch_operands = 0 : i64, tpu.core_type = #tpu.core_type<tc>, window_params = [{pipeline_mode = #tpu.pipeline_mode<synchronous>, transform_indices = @transform_0, window_bounds = array<i64: 32, 3>}, {transform_indices = @transform_1, window_bounds = array<i64: 3, 512>}, {pipeline_mode = #tpu.pipeline_mode<synchronous>, transform_indices = @transform_2, window_bounds = array<i64: 32, 1>}, {transform_indices = @transform_3, window_bounds = array<i64: 32, 512>}]} {
    %c0 = arith.constant 0 : index
    %c0_0 = arith.constant 0 : index
    %0 = vector.load %arg1[%c0, %c0_0] : memref<32x3xf32, #tpu.memory_space<vmem>>, vector<32x3xf32>
    %c0_1 = arith.constant 0 : index
    %c0_2 = arith.constant 0 : index
    %1 = vector.load %arg2[%c0_1, %c0_2] : memref<3x512xf32, #tpu.memory_space<vmem>>, vector<3x512xf32>
    %cst = arith.constant dense<0.000000e+00> : vector<32x512xf32>
    %2 = tpu.matmul %0, %1, %cst {dimension_numbers = #tpu.dot_dimension_numbers<[1], [0], [0], [1], [0, 0, 1, 1], [], []>} : vector<32x3xf32>, vector<3x512xf32>, vector<32x512xf32> -> vector<32x512xf32>
    %c0_3 = arith.constant 0 : index
    %c0_4 = arith.constant 0 : index
    %3 = vector.load %arg3[%c0_3, %c0_4] : memref<32x1xf32, #tpu.memory_space<vmem>>, vector<32x1xf32>
    %4 = vector.broadcast %3 : vector<32x1xf32> to vector<32x512xf32>
    %5 = arith.addf %2, %4 : vector<32x512xf32>
    %c0_5 = arith.constant 0 : index
    %c0_6 = arith.constant 0 : index
    %6 = vector.load %arg4[%c0_5, %c0_6] : memref<32x512xf32, #tpu.memory_space<vmem>>, vector<32x512xf32>
    tpu.vector_store %arg4[%c0_5, %c0_6], %5 {strides = array<i32>} : memref<32x512xf32, #tpu.memory_space<vmem>>, vector<32x512xf32>,
    return
  }
  func.func @transform_0(%arg0: i32) -> (i32, i32) {
    %c0_i32 = arith.constant 0 : i32
    %c0_i32_0 = arith.constant 0 : i32
    %c0_i32_1 = arith.constant 0 : i32
    return %c0_i32, %c0_i32_0 : i32, i32
  }
  func.func @transform_1(%arg0: i32) -> (i32, i32) {
    %c0_i32 = arith.constant 0 : i32
    %c0_i32_0 = arith.constant 0 : i32
    return %c0_i32, %arg0 : i32, i32
  }
  func.func @transform_2(%arg0: i32) -> (i32, i32) {
    %c0_i32 = arith.constant 0 : i32
    %c0_i32_0 = arith.constant 0 : i32
    %c0_i32_1 = arith.constant 0 : i32
    return %c0_i32, %c0_i32_0 : i32, i32
  }
  func.func @transform_3(%arg0: i32) -> (i32, i32) {
    %c0_i32 = arith.constant 0 : i32
    %c0_i32_0 = arith.constant 0 : i32
    return %c0_i32, %arg0 : i32, i32
  }
}

module attributes {stable_mosaic.version = 11 : i64} {
  func.func @_cmix_kernel(%arg0: i32, %arg1: memref<128x2x64xf32, #tpu.memory_space<vmem>>, %arg2: memref<128x64x64xf32, #tpu.memory_space<vmem>>, %arg3: memref<128x2x64xf32, #tpu.memory_space<vmem>>) attributes {dimension_semantics = [#tpu.dimension_semantics<parallel>], iteration_bounds = array<i64: 1>, scalar_prefetch = 0 : i64, scratch_operands = 0 : i64, tpu.core_type = #tpu.core_type<tc>, window_params = [{transform_indices = @transform_0, window_bounds = array<i64: 128, 2, 64>}, {transform_indices = @transform_1, window_bounds = array<i64: 128, 64, 64>}, {transform_indices = @transform_2, window_bounds = array<i64: 128, 2, 64>}]} {
    %c0 = arith.constant 0 : index
    %c0_0 = arith.constant 0 : index
    %c0_1 = arith.constant 0 : index
    %0 = vector.load %arg1[%c0, %c0_0, %c0_1] : memref<128x2x64xf32, #tpu.memory_space<vmem>>, vector<128x2x64xf32>
    %c0_2 = arith.constant 0 : index
    %c0_3 = arith.constant 0 : index
    %c0_4 = arith.constant 0 : index
    %1 = vector.load %arg2[%c0_2, %c0_3, %c0_4] : memref<128x64x64xf32, #tpu.memory_space<vmem>>, vector<128x64x64xf32>
    "tpu.trace_start"() <{level = 10 : i32, message = "mbi,mio->mbo"}> : () -> ()
    %cst = arith.constant dense<0.000000e+00> : vector<128x2x64xf32>
    %2 = tpu.matmul %0, %1, %cst {dimension_numbers = #tpu.dot_dimension_numbers<[2], [1], [1], [2], [0, 0, 0, 1, 1, 2], [0], [0]>} : vector<128x2x64xf32>, vector<128x64x64xf32>, vector<128x2x64xf32> -> vector<128x2x64xf32>
    "tpu.trace_stop"() : () -> ()
    %c0_5 = arith.constant 0 : index
    %c0_6 = arith.constant 0 : index
    %c0_7 = arith.constant 0 : index
    %3 = vector.load %arg3[%c0_5, %c0_6, %c0_7] : memref<128x2x64xf32, #tpu.memory_space<vmem>>, vector<128x2x64xf32>
    tpu.vector_store %arg3[%c0_5, %c0_6, %c0_7], %2 {strides = array<i32>} : memref<128x2x64xf32, #tpu.memory_space<vmem>>, vector<128x2x64xf32>,
    return
  }
  func.func @transform_0(%arg0: i32) -> (i32, i32, i32) {
    %c0_i32 = arith.constant 0 : i32
    %c0_i32_0 = arith.constant 0 : i32
    %c0_i32_1 = arith.constant 0 : i32
    return %arg0, %c0_i32, %c0_i32_0 : i32, i32, i32
  }
  func.func @transform_1(%arg0: i32) -> (i32, i32, i32) {
    %c0_i32 = arith.constant 0 : i32
    %c0_i32_0 = arith.constant 0 : i32
    %c0_i32_1 = arith.constant 0 : i32
    return %arg0, %c0_i32, %c0_i32_0 : i32, i32, i32
  }
  func.func @transform_2(%arg0: i32) -> (i32, i32, i32) {
    %c0_i32 = arith.constant 0 : i32
    %c0_i32_0 = arith.constant 0 : i32
    %c0_i32_1 = arith.constant 0 : i32
    return %arg0, %c0_i32, %c0_i32_0 : i32, i32, i32
  }
}

module attributes {stable_mosaic.version = 11 : i64} {
  func.func @kernel(%arg0: i32, %arg1: memref<32x32xf32, #tpu.memory_space<vmem>>, %arg2: memref<32x512xf32, #tpu.memory_space<vmem>>, %arg3: memref<32x1xf32, #tpu.memory_space<vmem>>, %arg4: memref<32x512xf32, #tpu.memory_space<vmem>>, %arg5: memref<32x512xf32, #tpu.memory_space<vmem>>) attributes {dimension_semantics = [#tpu.dimension_semantics<parallel>], iteration_bounds = array<i64: 1>, scalar_prefetch = 0 : i64, scratch_operands = 0 : i64, tpu.core_type = #tpu.core_type<tc>, window_params = [{pipeline_mode = #tpu.pipeline_mode<synchronous>, transform_indices = @transform_0, window_bounds = array<i64: 32, 32>}, {transform_indices = @transform_1, window_bounds = array<i64: 32, 512>}, {pipeline_mode = #tpu.pipeline_mode<synchronous>, transform_indices = @transform_2, window_bounds = array<i64: 32, 1>}, {transform_indices = @transform_3, window_bounds = array<i64: 32, 512>}, {transform_indices = @transform_4, window_bounds = array<i64: 32, 512>}]} {
    %c0 = arith.constant 0 : index
    %c0_0 = arith.constant 0 : index
    %0 = vector.load %arg1[%c0, %c0_0] : memref<32x32xf32, #tpu.memory_space<vmem>>, vector<32x32xf32>
    %c0_1 = arith.constant 0 : index
    %c0_2 = arith.constant 0 : index
    %1 = vector.load %arg2[%c0_1, %c0_2] : memref<32x512xf32, #tpu.memory_space<vmem>>, vector<32x512xf32>
    %cst = arith.constant dense<0.000000e+00> : vector<32x512xf32>
    %2 = tpu.matmul %0, %1, %cst {dimension_numbers = #tpu.dot_dimension_numbers<[1], [0], [0], [1], [0, 0, 1, 1], [], []>} : vector<32x32xf32>, vector<32x512xf32>, vector<32x512xf32> -> vector<32x512xf32>
    %c0_3 = arith.constant 0 : index
    %c0_4 = arith.constant 0 : index
    %3 = vector.load %arg3[%c0_3, %c0_4] : memref<32x1xf32, #tpu.memory_space<vmem>>, vector<32x1xf32>
    %4 = vector.broadcast %3 : vector<32x1xf32> to vector<32x512xf32>
    %5 = arith.addf %2, %4 : vector<32x512xf32>
    %c0_5 = arith.constant 0 : index
    %c0_6 = arith.constant 0 : index
    %6 = vector.load %arg4[%c0_5, %c0_6] : memref<32x512xf32, #tpu.memory_space<vmem>>, vector<32x512xf32>
    %7 = arith.addf %5, %6 : vector<32x512xf32>
    %8 = math.tanh %7 : vector<32x512xf32>
    %c0_7 = arith.constant 0 : index
    %c0_8 = arith.constant 0 : index
    %9 = vector.load %arg5[%c0_7, %c0_8] : memref<32x512xf32, #tpu.memory_space<vmem>>, vector<32x512xf32>
    tpu.vector_store %arg5[%c0_7, %c0_8], %8 {strides = array<i32>} : memref<32x512xf32, #tpu.memory_space<vmem>>, vector<32x512xf32>,
    return
  }
  func.func @transform_0(%arg0: i32) -> (i32, i32) {
    %c0_i32 = arith.constant 0 : i32
    %c0_i32_0 = arith.constant 0 : i32
    %c0_i32_1 = arith.constant 0 : i32
    return %c0_i32, %c0_i32_0 : i32, i32
  }
  func.func @transform_1(%arg0: i32) -> (i32, i32) {
    %c0_i32 = arith.constant 0 : i32
    %c0_i32_0 = arith.constant 0 : i32
    return %c0_i32, %arg0 : i32, i32
  }
  func.func @transform_2(%arg0: i32) -> (i32, i32) {
    %c0_i32 = arith.constant 0 : i32
    %c0_i32_0 = arith.constant 0 : i32
    %c0_i32_1 = arith.constant 0 : i32
    return %c0_i32, %c0_i32_0 : i32, i32
  }
  func.func @transform_3(%arg0: i32) -> (i32, i32) {
    %c0_i32 = arith.constant 0 : i32
    %c0_i32_0 = arith.constant 0 : i32
    return %c0_i32, %arg0 : i32, i32
  }
  func.func @transform_4(%arg0: i32) -> (i32, i32) {
    %c0_i32 = arith.constant 0 : i32
    %c0_i32_0 = arith.constant 0 : i32
    return %c0_i32, %arg0 : i32, i32
  }
}

module attributes {stable_mosaic.version = 11 : i64} {
  func.func @kernel(%arg0: i32, %arg1: memref<32x32xf32, #tpu.memory_space<vmem>>, %arg2: memref<32x512xf32, #tpu.memory_space<vmem>>, %arg3: memref<32x1xf32, #tpu.memory_space<vmem>>, %arg4: memref<32x512xf32, #tpu.memory_space<vmem>>, %arg5: memref<32x512xf32, #tpu.memory_space<vmem>>) attributes {dimension_semantics = [#tpu.dimension_semantics<parallel>], iteration_bounds = array<i64: 1>, scalar_prefetch = 0 : i64, scratch_operands = 0 : i64, tpu.core_type = #tpu.core_type<tc>, window_params = [{pipeline_mode = #tpu.pipeline_mode<synchronous>, transform_indices = @transform_0, window_bounds = array<i64: 32, 32>}, {transform_indices = @transform_1, window_bounds = array<i64: 32, 512>}, {pipeline_mode = #tpu.pipeline_mode<synchronous>, transform_indices = @transform_2, window_bounds = array<i64: 32, 1>}, {transform_indices = @transform_3, window_bounds = array<i64: 32, 512>}, {transform_indices = @transform_4, window_bounds = array<i64: 32, 512>}]} {
    %c0 = arith.constant 0 : index
    %c0_0 = arith.constant 0 : index
    %0 = vector.load %arg1[%c0, %c0_0] : memref<32x32xf32, #tpu.memory_space<vmem>>, vector<32x32xf32>
    %c0_1 = arith.constant 0 : index
    %c0_2 = arith.constant 0 : index
    %1 = vector.load %arg2[%c0_1, %c0_2] : memref<32x512xf32, #tpu.memory_space<vmem>>, vector<32x512xf32>
    %cst = arith.constant dense<0.000000e+00> : vector<32x512xf32>
    %2 = tpu.matmul %0, %1, %cst {dimension_numbers = #tpu.dot_dimension_numbers<[1], [0], [0], [1], [0, 0, 1, 1], [], []>} : vector<32x32xf32>, vector<32x512xf32>, vector<32x512xf32> -> vector<32x512xf32>
    %c0_3 = arith.constant 0 : index
    %c0_4 = arith.constant 0 : index
    %3 = vector.load %arg3[%c0_3, %c0_4] : memref<32x1xf32, #tpu.memory_space<vmem>>, vector<32x1xf32>
    %4 = vector.broadcast %3 : vector<32x1xf32> to vector<32x512xf32>
    %5 = arith.addf %2, %4 : vector<32x512xf32>
    %c0_5 = arith.constant 0 : index
    %c0_6 = arith.constant 0 : index
    %6 = vector.load %arg4[%c0_5, %c0_6] : memref<32x512xf32, #tpu.memory_space<vmem>>, vector<32x512xf32>
    %7 = arith.addf %5, %6 : vector<32x512xf32>
    %c0_7 = arith.constant 0 : index
    %c0_8 = arith.constant 0 : index
    %8 = vector.load %arg5[%c0_7, %c0_8] : memref<32x512xf32, #tpu.memory_space<vmem>>, vector<32x512xf32>
    tpu.vector_store %arg5[%c0_7, %c0_8], %7 {strides = array<i32>} : memref<32x512xf32, #tpu.memory_space<vmem>>, vector<32x512xf32>,
    return
  }
  func.func @transform_0(%arg0: i32) -> (i32, i32) {
    %c0_i32 = arith.constant 0 : i32
    %c0_i32_0 = arith.constant 0 : i32
    %c0_i32_1 = arith.constant 0 : i32
    return %c0_i32, %c0_i32_0 : i32, i32
  }
  func.func @transform_1(%arg0: i32) -> (i32, i32) {
    %c0_i32 = arith.constant 0 : i32
    %c0_i32_0 = arith.constant 0 : i32
    return %c0_i32, %arg0 : i32, i32
  }
  func.func @transform_2(%arg0: i32) -> (i32, i32) {
    %c0_i32 = arith.constant 0 : i32
    %c0_i32_0 = arith.constant 0 : i32
    %c0_i32_1 = arith.constant 0 : i32
    return %c0_i32, %c0_i32_0 : i32, i32
  }
  func.func @transform_3(%arg0: i32) -> (i32, i32) {
    %c0_i32 = arith.constant 0 : i32
    %c0_i32_0 = arith.constant 0 : i32
    return %c0_i32, %arg0 : i32, i32
  }
  func.func @transform_4(%arg0: i32) -> (i32, i32) {
    %c0_i32 = arith.constant 0 : i32
    %c0_i32_0 = arith.constant 0 : i32
    return %c0_i32, %arg0 : i32, i32
  }
}

module attributes {stable_mosaic.version = 11 : i64} {
  func.func @_head_kernel(%arg0: i32, %arg1: memref<64x32xf32, #tpu.memory_space<vmem>>, %arg2: memref<64x1xf32, #tpu.memory_space<vmem>>, %arg3: memref<1x64xf32, #tpu.memory_space<vmem>>, %arg4: memref<1x1xf32, #tpu.memory_space<vmem>>, %arg5: memref<32x512xf32, #tpu.memory_space<vmem>>, %arg6: memref<1x512xf32, #tpu.memory_space<vmem>>) attributes {dimension_semantics = [#tpu.dimension_semantics<parallel>], iteration_bounds = array<i64: 1>, scalar_prefetch = 0 : i64, scratch_operands = 0 : i64, tpu.core_type = #tpu.core_type<tc>, window_params = [{pipeline_mode = #tpu.pipeline_mode<synchronous>, transform_indices = @transform_0, window_bounds = array<i64: 64, 32>}, {pipeline_mode = #tpu.pipeline_mode<synchronous>, transform_indices = @transform_1, window_bounds = array<i64: 64, 1>}, {pipeline_mode = #tpu.pipeline_mode<synchronous>, transform_indices = @transform_2, window_bounds = array<i64: 1, 64>}, {pipeline_mode = #tpu.pipeline_mode<synchronous>, transform_indices = @transform_3, window_bounds = array<i64: 1, 1>}, {transform_indices = @transform_4, window_bounds = array<i64: 32, 512>}, {transform_indices = @transform_5, window_bounds = array<i64: 1, 512>}]} {
    %c0 = arith.constant 0 : index
    %c0_0 = arith.constant 0 : index
    %0 = vector.load %arg1[%c0, %c0_0] : memref<64x32xf32, #tpu.memory_space<vmem>>, vector<64x32xf32>
    %c0_1 = arith.constant 0 : index
    %c0_2 = arith.constant 0 : index
    %1 = vector.load %arg5[%c0_1, %c0_2] : memref<32x512xf32, #tpu.memory_space<vmem>>, vector<32x512xf32>
    %cst = arith.constant dense<0.000000e+00> : vector<64x512xf32>
    %2 = tpu.matmul %0, %1, %cst {dimension_numbers = #tpu.dot_dimension_numbers<[1], [0], [0], [1], [0, 0, 1, 1], [], []>} : vector<64x32xf32>, vector<32x512xf32>, vector<64x512xf32> -> vector<64x512xf32>
    %c0_3 = arith.constant 0 : index
    %c0_4 = arith.constant 0 : index
    %3 = vector.load %arg2[%c0_3, %c0_4] : memref<64x1xf32, #tpu.memory_space<vmem>>, vector<64x1xf32>
    %4 = vector.broadcast %3 : vector<64x1xf32> to vector<64x512xf32>
    %5 = arith.addf %2, %4 : vector<64x512xf32>
    %6 = math.tanh %5 : vector<64x512xf32>
    %c0_5 = arith.constant 0 : index
    %c0_6 = arith.constant 0 : index
    %7 = vector.load %arg3[%c0_5, %c0_6] : memref<1x64xf32, #tpu.memory_space<vmem>>, vector<1x64xf32>
    %cst_7 = arith.constant dense<0.000000e+00> : vector<1x512xf32>
    %8 = tpu.matmul %7, %6, %cst_7 {dimension_numbers = #tpu.dot_dimension_numbers<[1], [0], [0], [1], [0, 0, 1, 1], [], []>} : vector<1x64xf32>, vector<64x512xf32>, vector<1x512xf32> -> vector<1x512xf32>
    %c0_8 = arith.constant 0 : index
    %c0_9 = arith.constant 0 : index
    %9 = vector.load %arg4[%c0_8, %c0_9] : memref<1x1xf32, #tpu.memory_space<vmem>>, vector<1x1xf32>
    %10 = vector.broadcast %9 : vector<1x1xf32> to vector<1x512xf32>
    %11 = arith.addf %8, %10 : vector<1x512xf32>
    %c0_10 = arith.constant 0 : index
    %c0_11 = arith.constant 0 : index
    %12 = vector.load %arg6[%c0_10, %c0_11] : memref<1x512xf32, #tpu.memory_space<vmem>>, vector<1x512xf32>
    tpu.vector_store %arg6[%c0_10, %c0_11], %11 {strides = array<i32>} : memref<1x512xf32, #tpu.memory_space<vmem>>, vector<1x512xf32>,
    return
  }
  func.func @transform_0(%arg0: i32) -> (i32, i32) {
    %c0_i32 = arith.constant 0 : i32
    %c0_i32_0 = arith.constant 0 : i32
    %c0_i32_1 = arith.constant 0 : i32
    return %c0_i32, %c0_i32_0 : i32, i32
  }
  func.func @transform_1(%arg0: i32) -> (i32, i32) {
    %c0_i32 = arith.constant 0 : i32
    %c0_i32_0 = arith.constant 0 : i32
    %c0_i32_1 = arith.constant 0 : i32
    return %c0_i32, %c0_i32_0 : i32, i32
  }
  func.func @transform_2(%arg0: i32) -> (i32, i32) {
    %c0_i32 = arith.constant 0 : i32
    %c0_i32_0 = arith.constant 0 : i32
    %c0_i32_1 = arith.constant 0 : i32
    return %c0_i32, %c0_i32_0 : i32, i32
  }
  func.func @transform_3(%arg0: i32) -> (i32, i32) {
    %c0_i32 = arith.constant 0 : i32
    %c0_i32_0 = arith.constant 0 : i32
    %c0_i32_1 = arith.constant 0 : i32
    return %c0_i32, %c0_i32_0 : i32, i32
  }
  func.func @transform_4(%arg0: i32) -> (i32, i32) {
    %c0_i32 = arith.constant 0 : i32
    %c0_i32_0 = arith.constant 0 : i32
    return %c0_i32, %arg0 : i32, i32
  }
  func.func @transform_5(%arg0: i32) -> (i32, i32) {
    %c0_i32 = arith.constant 0 : i32
    %c0_i32_0 = arith.constant 0 : i32
    return %c0_i32, %arg0 : i32, i32
  }
}

</mosaic_0001>

<bundles_post_ra>
// kernel: fnn2d_forward.8
= control target key start
LH: loop header
LB: loop body
LE: loop exit
PB: predicated region body
PF: predicated region fallthrough
CT: control target
= control target key end

     0   :  { %vm61_vm0 = vcmask 1042432   ;;  %v286_v2 = vmov 0.0   ;;  %v287_v5 = vmov 0   ;;  %vm48_vm1 = vcmask 23552   ;;  %s398_s1 = inlined_call_operand.vmem [shape: f32[3,512], index: 1, kind: input, shape index: {}]   ;;  %s399_s0 = inlined_call_operand.vmem [shape: f32[32,3], index: 0, kind: input, shape index: {}]   ;;  %s400_s2 = inlined_call_operand.vmem [shape: f32[32,1], index: 2, kind: input, shape index: {}]   ;;  %s401_s3 = inlined_call_operand.vmem [shape: f32[32,512], index: 3, kind: output, shape index: {}]  }
   0x1   :  { %v18_v0 = vld [vmem:[%s398_s1] sm:$0x77]  ;;  %v19_v1 = vld [vmem:[%s398_s1 + $0x8] sm:$0x77]  ;;  %134 = vmatprep.mubr.f32.mxu0 %v286_v2  ;;  %223 = vmatprep.mubr.f32.mxu1 %v286_v2  ;;  %v22_v8 = vld [vmem:[%s400_s2 + $0x10] sm:$0xff] }
   0x2   :  { %v46_v3 = vcombine.high %v18_v0, %v18_v0  ;;  %v47_v4 = vcombine.high %v19_v1, %v19_v1  ;;  %282 = vset.pattern.permute.xlu0 %v287_v5  ;;  %283 = vset.pattern.permute.xlu1 %v287_v5  ;;  %v14_v6 = vld [vmem:[%s399_s0] sm:$0xff]  ;;  %v15_v9 = vld [vmem:[%s399_s0 + $0x8] sm:$0xff]  ;;  %v23_v11 = vld [vmem:[%s400_s2 + $0x18] sm:$0xff] }
   0x3   :  { %v20_v7 = vld [vmem:[%s400_s2] sm:$0xff]  ;;  %36 = vperm.xlu1 %283, %v22_v8   ;;  %v21_v10 = vld [vmem:[%s400_s2 + $0x8] sm:$0xff]  ;;  %v16_v12 = vld [vmem:[%s399_s0 + $0x10] sm:$0xff] }
   0x4   :  { %268 = vmatprep.subr.msk.mxu0 %vm61_vm0, %v46_v3  ;;  %274 = vmatprep.subr.msk.mxu1 %vm61_vm0, %v47_v4  ;;  %v17_v13 = vld [vmem:[%s399_s0 + $0x18] sm:$0xff] }
   0x5   :  { %269 = vmatpush1.msk.msra.mxu0 %vm61_vm0, %v18_v0  ;;  %275 = vmatpush1.msk.msra.mxu1 %vm61_vm0, %v19_v1 }
   0x6   :  { %270 = vmatmul.mubr.msk.f32.vlgmr.msra.gmra.mrb[0].mxu0 %vm48_vm1, %v14_v6  ;;  %276 = vmatmul.mubr.msk.f32.vlgmr.msra.gmra.mrb[0].mxu1 %vm48_vm1, %v14_v6 }
   0x7   :  { %140 = vmatprep.mubr.f32.mxu0 %v286_v2  ;;  %229 = vmatprep.mubr.f32.mxu1 %v286_v2 }
   0x8   :  { %26 = vperm.xlu0 %282, %v20_v7   ;;  %41 = vperm.xlu1 %283, %v23_v11  }
   0xa   :  { %271 = vmatmul.mubr.msk.f32.gmra.mrb[2].mxu0 %vm48_vm1, %v15_v9  ;;  %277 = vmatmul.mubr.msk.f32.gmra.mrb[2].mxu1 %vm48_vm1, %v15_v9 }
   0xb   :  { %146 = vmatprep.mubr.f32.mxu0 %v286_v2  ;;  %235 = vmatprep.mubr.f32.mxu1 %v286_v2 }
   0xc   :  { %31 = vperm.xlu0 %282, %v21_v10  }
   0xe   :  { %272 = vmatmul.mubr.msk.f32.gmra.mrb[4].mxu0 %vm48_vm1, %v16_v12  ;;  %278 = vmatmul.mubr.msk.f32.gmra.mrb[4].mxu1 %vm48_vm1, %v16_v12 }
   0xf   :  { %152 = vmatprep.mubr.f32.mxu0 %v286_v2  ;;  %241 = vmatprep.mubr.f32.mxu1 %v286_v2 }
  0x12   :  { %273 = vmatmul.mubr.msk.f32.gmra.mrb[6].mxu0 %vm48_vm1, %v17_v13  ;;  %279 = vmatmul.mubr.msk.f32.gmra.mrb[6].mxu1 %vm48_vm1, %v17_v13 }
  0x82   :  { %v37_v24 = vpop.permute.xlu1 %36 }
  0x87   :  { %v27_v14 = vpop.permute.xlu0 %26  ;;  %v42_v41 = vpop.permute.xlu1 %41 }
  0x8b   :  { %v32_v23 = vpop.permute.xlu0 %31 }
  0xd9   :  { %v136_v15 = vpop.f32.mrb[0].mxu0  ;;  %v225_v16 = vpop.f32.mrb[0].mxu1 }
  0xda   :  { %v137_v17 = vadd.f32 %v136_v15, %v27_v14  ;;  %v226_v18 = vadd.f32 %v225_v16, %v27_v14  ;;  %v138_v19 = vpop.f32.mrb[1].mxu0  ;;  %v227_v20 = vpop.f32.mrb[1].mxu1 }
  0xdb   :  { %v139_v21 = vadd.f32 %v138_v19, %v27_v14  ;;  %v228_v22 = vadd.f32 %v227_v20, %v27_v14 }
  0xdc   :  { %248 = vst [vmem:[%s401_s3] sm:$0xff] %v137_v17  ;;  %250 = vst [vmem:[%s401_s3 + $0x10] sm:$0xff] %v226_v18 }
  0xdd   :  { %249 = vst [vmem:[%s401_s3 + $0x8] sm:$0xff] %v139_v21  ;;  %251 = vst [vmem:[%s401_s3 + $0x18] sm:$0xff] %v228_v22  ;;  %v142_v25 = vpop.f32.mrb[2].mxu0  ;;  %v231_v26 = vpop.f32.mrb[2].mxu1 }
  0xde   :  { %v143_v27 = vadd.f32 %v142_v25, %v32_v23  ;;  %v232_v28 = vadd.f32 %v231_v26, %v32_v23  ;;  %v144_v29 = vpop.f32.mrb[3].mxu0  ;;  %v233_v30 = vpop.f32.mrb[3].mxu1 }
  0xdf   :  { %v145_v31 = vadd.f32 %v144_v29, %v32_v23  ;;  %v234_v32 = vadd.f32 %v233_v30, %v32_v23 }
  0xe0   :  { %252 = vst [vmem:[%s401_s3 + $0x20] sm:$0xff] %v143_v27  ;;  %254 = vst [vmem:[%s401_s3 + $0x30] sm:$0xff] %v232_v28 }
  0xe1   :  { %253 = vst [vmem:[%s401_s3 + $0x28] sm:$0xff] %v145_v31  ;;  %255 = vst [vmem:[%s401_s3 + $0x38] sm:$0xff] %v234_v32  ;;  %v148_v33 = vpop.f32.mrb[4].mxu0  ;;  %v237_v34 = vpop.f32.mrb[4].mxu1 }
  0xe2   :  { %v149_v35 = vadd.f32 %v148_v33, %v37_v24  ;;  %v238_v36 = vadd.f32 %v237_v34, %v37_v24  ;;  %v150_v37 = vpop.f32.mrb[5].mxu0  ;;  %v239_v38 = vpop.f32.mrb[5].mxu1 }
  0xe3   :  { %v151_v39 = vadd.f32 %v150_v37, %v37_v24  ;;  %v240_v40 = vadd.f32 %v239_v38, %v37_v24 }
  0xe4   :  { %256 = vst [vmem:[%s401_s3 + $0x40] sm:$0xff] %v149_v35  ;;  %258 = vst [vmem:[%s401_s3 + $0x50] sm:$0xff] %v238_v36 }
  0xe5   :  { %257 = vst [vmem:[%s401_s3 + $0x48] sm:$0xff] %v151_v39  ;;  %259 = vst [vmem:[%s401_s3 + $0x58] sm:$0xff] %v240_v40  ;;  %v154_v42 = vpop.f32.mrb[6].mxu0  ;;  %v243_v43 = vpop.f32.mrb[6].mxu1 }
  0xe6   :  { %v155_v44 = vadd.f32 %v154_v42, %v42_v41  ;;  %v244_v45 = vadd.f32 %v243_v43, %v42_v41  ;;  %v156_v46 = vpop.f32.mrb[7].mxu0  ;;  %v245_v47 = vpop.f32.mrb[7].mxu1 }
  0xe7   :  { %v157_v48 = vadd.f32 %v156_v46, %v42_v41  ;;  %v246_v49 = vadd.f32 %v245_v47, %v42_v41 }
  0xe8   :  { %260 = vst [vmem:[%s401_s3 + $0x60] sm:$0xff] %v155_v44  ;;  %262 = vst [vmem:[%s401_s3 + $0x70] sm:$0xff] %v244_v45 }
  0xe9   :  { %261 = vst [vmem:[%s401_s3 + $0x68] sm:$0xff] %v157_v48  ;;  %263 = vst [vmem:[%s401_s3 + $0x78] sm:$0xff] %v246_v49 }

// kernel: reverse.6
= control target key start
LH: loop header
LB: loop body
LE: loop exit
PB: predicated region body
PF: predicated region fallthrough
CT: control target
= control target key end

     0   :  { %s344_s0 = inlined_call_operand.vmem [shape: f32[32,2,16,7], index: 0, kind: input, shape index: {}]   ;;  %s345_s1 = inlined_call_operand.vmem [shape: f32[32,2,16,7], index: 1, kind: output, shape index: {}]  }
   0x1   :  { %v112_v0 = vld [vmem:[%s344_s0 + $0x60] sm:$0xff]  ;;  %v113_v1 = vld [vmem:[%s344_s0 + $0xd0] sm:$0xff]  ;;  %v138_v14 = vld [vmem:[%s344_s0 + $0x68] sm:$0xff] }
   0x2   :  { %v115_v2 = vld [vmem:[%s344_s0 + $0x50] sm:$0xff]  ;;  %4 = vst [vmem:[%s345_s1] sm:$0xff] %v112_v0  ;;  %114 = vst [vmem:[%s345_s1 + $0x70] sm:$0xff] %v113_v1  ;;  %v117_v3 = vld [vmem:[%s344_s0 + $0xc0] sm:$0xff] }
   0x3   :  { %116 = vst [vmem:[%s345_s1 + $0x10] sm:$0xff] %v115_v2  ;;  %v119_v4 = vld [vmem:[%s344_s0 + $0x40] sm:$0xff]  ;;  %v121_v5 = vld [vmem:[%s344_s0 + $0xb0] sm:$0xff]  ;;  %118 = vst [vmem:[%s345_s1 + $0x80] sm:$0xff] %v117_v3 }
   0x4   :  { %120 = vst [vmem:[%s345_s1 + $0x20] sm:$0xff] %v119_v4  ;;  %122 = vst [vmem:[%s345_s1 + $0x90] sm:$0xff] %v121_v5  ;;  %v123_v6 = vld [vmem:[%s344_s0 + $0x30] sm:$0xff]  ;;  %v125_v7 = vld [vmem:[%s344_s0 + $0xa0] sm:$0xff] }
   0x5   :  { %v127_v8 = vld [vmem:[%s344_s0 + $0x20] sm:$0xff]  ;;  %124 = vst [vmem:[%s345_s1 + $0x30] sm:$0xff] %v123_v6  ;;  %126 = vst [vmem:[%s345_s1 + $0xa0] sm:$0xff] %v125_v7  ;;  %v129_v9 = vld [vmem:[%s344_s0 + $0x90] sm:$0xff] }
   0x6   :  { %128 = vst [vmem:[%s345_s1 + $0x40] sm:$0xff] %v127_v8  ;;  %v131_v10 = vld [vmem:[%s344_s0 + $0x10] sm:$0xff]  ;;  %v133_v11 = vld [vmem:[%s344_s0 + $0x80] sm:$0xff]  ;;  %130 = vst [vmem:[%s345_s1 + $0xb0] sm:$0xff] %v129_v9 }
   0x7   :  { %132 = vst [vmem:[%s345_s1 + $0x50] sm:$0xff] %v131_v10  ;;  %134 = vst [vmem:[%s345_s1 + $0xc0] sm:$0xff] %v133_v11  ;;  %v49_v12 = vld [vmem:[%s344_s0] sm:$0xff]  ;;  %v136_v13 = vld [vmem:[%s344_s0 + $0x70] sm:$0xff] }
   0x8   :  { %135 = vst [vmem:[%s345_s1 + $0x60] sm:$0xff] %v49_v12  ;;  %137 = vst [vmem:[%s345_s1 + $0xd0] sm:$0xff] %v136_v13  ;;  %v140_v15 = vld [vmem:[%s344_s0 + $0xd8] sm:$0xff]  ;;  %v144_v17 = vld [vmem:[%s344_s0 + $0xc8] sm:$0xff] }
   0x9   :  { %139 = vst [vmem:[%s345_s1 + $0x8] sm:$0xff] %v138_v14  ;;  %v142_v16 = vld [vmem:[%s344_s0 + $0x58] sm:$0xff]  ;;  %141 = vst [vmem:[%s345_s1 + $0x78] sm:$0xff] %v140_v15  ;;  %v146_v18 = vld [vmem:[%s344_s0 + $0x48] sm:$0xff] }
   0xa   :  { %143 = vst [vmem:[%s345_s1 + $0x18] sm:$0xff] %v142_v16  ;;  %145 = vst [vmem:[%s345_s1 + $0x88] sm:$0xff] %v144_v17  ;;  %v148_v19 = vld [vmem:[%s344_s0 + $0xb8] sm:$0xff]  ;;  %v152_v21 = vld [vmem:[%s344_s0 + $0xa8] sm:$0xff] }
   0xb   :  { %v150_v20 = vld [vmem:[%s344_s0 + $0x38] sm:$0xff]  ;;  %147 = vst [vmem:[%s345_s1 + $0x28] sm:$0xff] %v146_v18  ;;  %149 = vst [vmem:[%s345_s1 + $0x98] sm:$0xff] %v148_v19  ;;  %v154_v22 = vld [vmem:[%s344_s0 + $0x28] sm:$0xff] }
   0xc   :  { %151 = vst [vmem:[%s345_s1 + $0x38] sm:$0xff] %v150_v20  ;;  %v156_v23 = vld [vmem:[%s344_s0 + $0x98] sm:$0xff]  ;;  %153 = vst [vmem:[%s345_s1 + $0xa8] sm:$0xff] %v152_v21  ;;  %v160_v25 = vld [vmem:[%s344_s0 + $0x88] sm:$0xff] }
   0xd   :  { %155 = vst [vmem:[%s345_s1 + $0x48] sm:$0xff] %v154_v22  ;;  %157 = vst [vmem:[%s345_s1 + $0xb8] sm:$0xff] %v156_v23  ;;  %v158_v24 = vld [vmem:[%s344_s0 + $0x18] sm:$0xff]  ;;  %v162_v26 = vld [vmem:[%s344_s0 + $0x8] sm:$0xff] }
   0xe   :  { %159 = vst [vmem:[%s345_s1 + $0x58] sm:$0xff] %v158_v24  ;;  %161 = vst [vmem:[%s345_s1 + $0xc8] sm:$0xff] %v160_v25  ;;  %v164_v27 = vld [vmem:[%s344_s0 + $0x78] sm:$0xff] }
   0xf   :  { %163 = vst [vmem:[%s345_s1 + $0x68] sm:$0xff] %v162_v26  ;;  %165 = vst [vmem:[%s345_s1 + $0xd8] sm:$0xff] %v164_v27 }

// kernel: fnn2d_forward.10
= control target key start
LH: loop header
LB: loop body
LE: loop exit
PB: predicated region body
PF: predicated region fallthrough
CT: control target
= control target key end

     0   :  { %v380_v3 = vmov 0.0   ;;  %v381_v8 = vmov 0   ;;  %vm61_vm0 = vcmask 261120   ;;  %s583_s1 = inlined_call_operand.vmem [shape: f32[32,512], index: 1, kind: input, shape index: {}]   ;;  %s584_s2 = inlined_call_operand.vmem [shape: f32[32,1], index: 2, kind: input, shape index: {}]   ;;  %s585_s0 = inlined_call_operand.vmem [shape: f32[32,32], index: 0, kind: input, shape index: {}]   ;;  %s586_s3 = inlined_call_operand.vmem [shape: f32[32,512], index: 3, kind: input, shape index: {}]   ;;  %s587_s4 = inlined_call_operand.vmem [shape: f32[32,512], index: 4, kind: output, shape index: {}]  }
   0x1   :  { %v22_v0 = vld [vmem:[%s583_s1 + $0x8] sm:$0xff]  ;;  %v24_v2 = vld [vmem:[%s583_s1 + $0x18] sm:$0xff]  ;;  %138 = vmatprep.mubr.f32.mxu0 %v380_v3  ;;  %227 = vmatprep.mubr.f32.mxu1 %v380_v3  ;;  %v21_v6 = vld [vmem:[%s583_s1] sm:$0xff] }
   0x2   :  { %v26_v1 = vld [vmem:[%s583_s1 + $0x28] sm:$0xff]  ;;  %v28_v5 = vld [vmem:[%s583_s1 + $0x38] sm:$0xff]  ;;  %v25_v7 = vld [vmem:[%s583_s1 + $0x20] sm:$0xff]  ;;  %346 = vset.pattern.permute.xlu0 %v381_v8  ;;  %347 = vset.pattern.permute.xlu1 %v381_v8 }
   0x3   :  { %v328_v4 = vpack.c.bf16 %v26_v1, %v22_v0  ;;  %v336_v9 = vpack.c.bf16 %v28_v5, %v24_v2  ;;  %v330_v10 = vpack.c.bf16 %v25_v7, %v21_v6  ;;  %v23_v11 = vld [vmem:[%s583_s1 + $0x10] sm:$0xff]  ;;  %v30_v13 = vld [vmem:[%s583_s1 + $0x48] sm:$0xff]  ;;  %v32_v16 = vld [vmem:[%s583_s1 + $0x58] sm:$0xff] }
   0x4   :  { %v27_v12 = vld [vmem:[%s583_s1 + $0x30] sm:$0xff]  ;;  %v34_v15 = vld [vmem:[%s583_s1 + $0x68] sm:$0xff]  ;;  %v36_v17 = vld [vmem:[%s583_s1 + $0x78] sm:$0xff] }
   0x5   :  { %329 = vmatprep.subr.bf16.mxu0 %v328_v4  ;;  %v338_v14 = vpack.c.bf16 %v27_v12, %v23_v11  ;;  %337 = vmatprep.subr.bf16.mxu1 %v336_v9  ;;  %v332_v18 = vpack.c.bf16 %v34_v15, %v30_v13  ;;  %v340_v19 = vpack.c.bf16 %v36_v17, %v32_v16  ;;  %v29_v20 = vld [vmem:[%s583_s1 + $0x40] sm:$0xff]  ;;  %v31_v22 = vld [vmem:[%s583_s1 + $0x50] sm:$0xff]  ;;  %v38_v29 = vld [vmem:[%s584_s2 + $0x8] sm:$0xff] }
   0x6   :  { %331 = vmatpush1.bf16.msra.mxu0 %v330_v10  ;;  %v33_v21 = vld [vmem:[%s583_s1 + $0x60] sm:$0xff]  ;;  %v35_v24 = vld [vmem:[%s583_s1 + $0x70] sm:$0xff]  ;;  %v40_v30 = vld [vmem:[%s584_s2 + $0x18] sm:$0xff] }
   0x7   :  { %339 = vmatpush1.bf16.msra.mxu1 %v338_v14  ;;  %v334_v23 = vpack.c.bf16 %v33_v21, %v29_v20  ;;  %333 = vmatprep.subr.bf16.mxu0 %v332_v18  ;;  %v342_v25 = vpack.c.bf16 %v35_v24, %v31_v22  ;;  %v37_v26 = vld [vmem:[%s584_s2] sm:$0xff]  ;;  %v39_v27 = vld [vmem:[%s584_s2 + $0x10] sm:$0xff]  ;;  %v18_v31 = vld [vmem:[%s585_s0 + $0x8] sm:$0xff] }
   0x8   :  { %341 = vmatprep.subr.bf16.mxu1 %v340_v19  ;;  %43 = vperm.xlu0 %346, %v37_v26   ;;  %v17_v28 = vld [vmem:[%s585_s0] sm:$0xff]  ;;  %v19_v32 = vld [vmem:[%s585_s0 + $0x10] sm:$0xff]  ;;  %v20_v33 = vld [vmem:[%s585_s0 + $0x18] sm:$0xff] }
   0x9   :  { %53 = vperm.xlu1 %347, %v39_v27   ;;  %v252_v36 = vld [vmem:[%s586_s3] sm:$0xff]  ;;  %v254_v39 = vld [vmem:[%s586_s3 + $0x10] sm:$0xff]  ;;  %v253_v41 = vld [vmem:[%s586_s3 + $0x8] sm:$0xff] }
   0xa   :  { %335 = vmatpush1.bf16.msra.mxu0 %v334_v23  ;;  %v255_v45 = vld [vmem:[%s586_s3 + $0x18] sm:$0xff]  ;;  %v256_v52 = vld [vmem:[%s586_s3 + $0x20] sm:$0xff]  ;;  %v258_v56 = vld [vmem:[%s586_s3 + $0x30] sm:$0xff] }
   0xb   :  { %343 = vmatpush1.bf16.msra.mxu1 %v342_v25  ;;  %v257_v58 = vld [vmem:[%s586_s3 + $0x28] sm:$0xff]  ;;  %v259_v63 = vld [vmem:[%s586_s3 + $0x38] sm:$0xff]  ;;  %v260_v5 = vld [vmem:[%s586_s3 + $0x40] sm:$0xff] }
   0xc   :  { %48 = vperm.xlu0 %346, %v38_v29   ;;  %v262_v9 = vld [vmem:[%s586_s3 + $0x50] sm:$0xff]  ;;  %v261_v11 = vld [vmem:[%s586_s3 + $0x48] sm:$0xff]  ;;  %v263_v15 = vld [vmem:[%s586_s3 + $0x58] sm:$0xff] }
   0xd   :  { %320 = vmatmul.mubr.msk.f32.vlgmr.msra.gmra.mrb[0].mxu0 %vm61_vm0, %v17_v28  ;;  %58 = vperm.xlu1 %347, %v40_v30   ;;  %v264_v22 = vld [vmem:[%s586_s3 + $0x60] sm:$0xff]  ;;  %v266_v26 = vld [vmem:[%s586_s3 + $0x70] sm:$0xff] }
   0xe   :  { %324 = vmatmul.mubr.msk.f32.vlgmr.msra.gmra.mrb[0].mxu1 %vm61_vm0, %v17_v28  ;;  %144 = vmatprep.mubr.f32.mxu0 %v380_v3  ;;  %v265_v28 = vld [vmem:[%s586_s3 + $0x68] sm:$0xff] }
   0xf   :  { %233 = vmatprep.mubr.f32.mxu1 %v380_v3 }
  0x11   :  { %321 = vmatmul.mubr.msk.f32.gmra.mrb[2].mxu0 %vm61_vm0, %v18_v31 }
  0x12   :  { %325 = vmatmul.mubr.msk.f32.gmra.mrb[2].mxu1 %vm61_vm0, %v18_v31  ;;  %150 = vmatprep.mubr.f32.mxu0 %v380_v3 }
  0x13   :  { %239 = vmatprep.mubr.f32.mxu1 %v380_v3 }
  0x15   :  { %322 = vmatmul.mubr.msk.f32.gmra.mrb[4].mxu0 %vm61_vm0, %v19_v32 }
  0x16   :  { %326 = vmatmul.mubr.msk.f32.gmra.mrb[4].mxu1 %vm61_vm0, %v19_v32  ;;  %156 = vmatprep.mubr.f32.mxu0 %v380_v3  ;;  %v267_v32 = vld [vmem:[%s586_s3 + $0x78] sm:$0xff] }
  0x17   :  { %245 = vmatprep.mubr.f32.mxu1 %v380_v3 }
  0x19   :  { %323 = vmatmul.mubr.msk.f32.gmra.mrb[6].mxu0 %vm61_vm0, %v20_v33 }
  0x1a   :  { %327 = vmatmul.mubr.msk.f32.gmra.mrb[6].mxu1 %vm61_vm0, %v20_v33 }
  0x87   :  { %v44_v34 = vpop.permute.xlu0 %43 }
  0x88   :  { %v54_v60 = vpop.permute.xlu1 %53 }
  0x8b   :  { %v49_v46 = vpop.permute.xlu0 %48 }
  0x8c   :  { %v59_v19 = vpop.permute.xlu1 %58 }
  0xe0   :  { %v140_v35 = vpop.f32.mrb[0].mxu0 }
  0xe1   :  { %v141_v37 = vadd.f32 %v140_v35, %v44_v34  ;;  %v229_v38 = vpop.f32.mrb[0].mxu1  ;;  %v142_v40 = vpop.f32.mrb[1].mxu0 }
  0xe2   :  { %v230_v42 = vadd.f32 %v229_v38, %v44_v34  ;;  %v143_v43 = vadd.f32 %v142_v40, %v44_v34  ;;  %v231_v44 = vpop.f32.mrb[1].mxu1 }
  0xe3   :  { %v268_v47 = vadd.f32 %v252_v36, %v141_v37  ;;  %v232_v48 = vadd.f32 %v231_v44, %v44_v34 }
  0xe4   :  { %v270_v49 = vadd.f32 %v254_v39, %v230_v42  ;;  %v269_v50 = vadd.f32 %v253_v41, %v143_v43  ;;  %v146_v51 = vpop.f32.mrb[2].mxu0 }
  0xe5   :  { %348 = vtanh.f32 %v268_v47  ;;  %v271_v53 = vadd.f32 %v255_v45, %v232_v48  ;;  %v147_v54 = vadd.f32 %v146_v51, %v49_v46  ;;  %v235_v55 = vpop.f32.mrb[2].mxu1  ;;  %v148_v57 = vpop.f32.mrb[3].mxu0 }
  0xe6   :  { %350 = vtanh.f32 %v270_v49  ;;  %v236_v59 = vadd.f32 %v235_v55, %v49_v46  ;;  %v149_v61 = vadd.f32 %v148_v57, %v49_v46  ;;  %v237_v62 = vpop.f32.mrb[3].mxu1 }
  0xe7   :  { %352 = vtanh.f32 %v269_v50  ;;  %v272_v0 = vadd.f32 %v256_v52, %v147_v54  ;;  %v238_v1 = vadd.f32 %v237_v62, %v49_v46 }
  0xe8   :  { %354 = vtanh.f32 %v271_v53  ;;  %v274_v2 = vadd.f32 %v258_v56, %v236_v59  ;;  %v273_v3 = vadd.f32 %v257_v58, %v149_v61  ;;  %v152_v4 = vpop.f32.mrb[4].mxu0 }
  0xe9   :  { %356 = vtanh.f32 %v272_v0  ;;  %v275_v6 = vadd.f32 %v259_v63, %v238_v1  ;;  %v153_v7 = vadd.f32 %v152_v4, %v54_v60  ;;  %v241_v8 = vpop.f32.mrb[4].mxu1  ;;  %v154_v10 = vpop.f32.mrb[5].mxu0 }
  0xea   :  { %358 = vtanh.f32 %v274_v2  ;;  %v242_v12 = vadd.f32 %v241_v8, %v54_v60  ;;  %v155_v13 = vadd.f32 %v154_v10, %v54_v60  ;;  %v243_v14 = vpop.f32.mrb[5].mxu1 }
  0xeb   :  { %360 = vtanh.f32 %v273_v3  ;;  %v276_v16 = vadd.f32 %v260_v5, %v153_v7  ;;  %v244_v17 = vadd.f32 %v243_v14, %v54_v60 }
  0xec   :  { %362 = vtanh.f32 %v275_v6  ;;  %v278_v18 = vadd.f32 %v262_v9, %v242_v12  ;;  %v277_v20 = vadd.f32 %v261_v11, %v155_v13  ;;  %v158_v21 = vpop.f32.mrb[6].mxu0 }
  0xed   :  { %364 = vtanh.f32 %v276_v16  ;;  %v279_v23 = vadd.f32 %v263_v15, %v244_v17  ;;  %v159_v24 = vadd.f32 %v158_v21, %v59_v19  ;;  %v247_v25 = vpop.f32.mrb[6].mxu1  ;;  %v160_v27 = vpop.f32.mrb[7].mxu0 }
  0xee   :  { %366 = vtanh.f32 %v278_v18  ;;  %v248_v29 = vadd.f32 %v247_v25, %v59_v19  ;;  %v161_v30 = vadd.f32 %v160_v27, %v59_v19  ;;  %v249_v31 = vpop.f32.mrb[7].mxu1 }
  0xef   :  { %v349_v33 = vpop.eup %348  ;;  %368 = vtanh.f32 %v277_v20  ;;  %v280_v34 = vadd.f32 %v264_v22, %v159_v24  ;;  %v250_v35 = vadd.f32 %v249_v31, %v59_v19 }
  0xf0   :  { %v351_v36 = vpop.eup %350  ;;  %300 = vst [vmem:[%s587_s4] sm:$0xff] %v349_v33  ;;  %370 = vtanh.f32 %v279_v23  ;;  %v282_v37 = vadd.f32 %v266_v26, %v248_v29  ;;  %v281_v38 = vadd.f32 %v265_v28, %v161_v30 }
  0xf1   :  { %v353_v39 = vpop.eup %352  ;;  %302 = vst [vmem:[%s587_s4 + $0x10] sm:$0xff] %v351_v36  ;;  %372 = vtanh.f32 %v280_v34  ;;  %v283_v40 = vadd.f32 %v267_v32, %v250_v35 }
  0xf2   :  { %v355_v41 = vpop.eup %354  ;;  %301 = vst [vmem:[%s587_s4 + $0x8] sm:$0xff] %v353_v39  ;;  %374 = vtanh.f32 %v282_v37 }
  0xf3   :  { %v357_v42 = vpop.eup %356  ;;  %303 = vst [vmem:[%s587_s4 + $0x18] sm:$0xff] %v355_v41  ;;  %376 = vtanh.f32 %v281_v38 }
  0xf4   :  { %v359_v43 = vpop.eup %358  ;;  %304 = vst [vmem:[%s587_s4 + $0x20] sm:$0xff] %v357_v42  ;;  %378 = vtanh.f32 %v283_v40 }
  0xf5   :  { %v361_v44 = vpop.eup %360  ;;  %306 = vst [vmem:[%s587_s4 + $0x30] sm:$0xff] %v359_v43 }
  0xf6   :  { %v363_v45 = vpop.eup %362  ;;  %305 = vst [vmem:[%s587_s4 + $0x28] sm:$0xff] %v361_v44 }
  0xf7   :  { %v365_v46 = vpop.eup %364  ;;  %307 = vst [vmem:[%s587_s4 + $0x38] sm:$0xff] %v363_v45 }
  0xf8   :  { %v367_v47 = vpop.eup %366  ;;  %308 = vst [vmem:[%s587_s4 + $0x40] sm:$0xff] %v365_v46 }
  0xf9   :  { %v369_v48 = vpop.eup %368  ;;  %310 = vst [vmem:[%s587_s4 + $0x50] sm:$0xff] %v367_v47 }
  0xfa   :  { %v371_v49 = vpop.eup %370  ;;  %309 = vst [vmem:[%s587_s4 + $0x48] sm:$0xff] %v369_v48 }
  0xfb   :  { %v373_v50 = vpop.eup %372  ;;  %311 = vst [vmem:[%s587_s4 + $0x58] sm:$0xff] %v371_v49 }
  0xfc   :  { %v375_v51 = vpop.eup %374  ;;  %312 = vst [vmem:[%s587_s4 + $0x60] sm:$0xff] %v373_v50 }
  0xfd   :  { %v377_v52 = vpop.eup %376  ;;  %314 = vst [vmem:[%s587_s4 + $0x70] sm:$0xff] %v375_v51 }
  0xfe   :  { %v379_v53 = vpop.eup %378  ;;  %313 = vst [vmem:[%s587_s4 + $0x68] sm:$0xff] %v377_v52 }
  0xff   :  { %315 = vst [vmem:[%s587_s4 + $0x78] sm:$0xff] %v379_v53 }

// kernel: fnn2d_forward.9
= control target key start
LH: loop header
LB: loop body
LE: loop exit
PB: predicated region body
PF: predicated region fallthrough
CT: control target
= control target key end

     0   :  { %v15892_v0 = vmov 0.0|0.0   ;;  %vm15893_vm0 = vmmov 0   ;;  %v15894_v8 = vmov 0.0   ;;  %vm1163_vm1 = vcmask 523264   ;;  %s20774_s1 = inlined_call_operand.vmem [shape: f32[128,64,64], index: 1, kind: input, shape index: {}]   ;;  %s20775_s0 = inlined_call_operand.vmem [shape: f32[128,2,64], index: 0, kind: input, shape index: {}]   ;;  %s20776_s2 = inlined_call_operand.vmem [shape: f32[128,2,64], index: 2, kind: output, shape index: {}]  }
   0x1   :  { %14353 = vmatprep.subr.bf16.mxu0 %v15892_v0  ;;  %14365 = vmatprep.subr.bf16.mxu1 %v15892_v0  ;;  %v139_v1 = vld [vmem:[%s20774_s1] sm:$0xff]  ;;  %v140_v2 = vld [vmem:[%s20774_s1 + $0x8] sm:$0xff]  ;;  %v141_v6 = vld [vmem:[%s20774_s1 + $0x10] sm:$0xff]  ;;  %vm10508_vm2 = vcmask 517120  }
   0x2   :  { %v147_v3 = vld [vmem:[%s20774_s1 + $0x40] sm:$0xff]  ;;  %v14354_v4 = vpack.c.bf16 %v140_v2, %v139_v1  ;;  %v148_v5 = vld [vmem:[%s20774_s1 + $0x48] sm:$0xff]  ;;  %v142_v7 = vld [vmem:[%s20774_s1 + $0x18] sm:$0xff]  ;;  %11937 = vmatprep.mubr.msk.f32.mxu0 %vm15893_vm0, %v15894_v8  ;;  %11956 = vmatprep.mubr.msk.f32.mxu1 %vm15893_vm0, %v15894_v8 }
   0x3   :  { %v14366_v9 = vpack.c.bf16 %v148_v5, %v147_v3  ;;  %v149_v10 = vld [vmem:[%s20774_s1 + $0x50] sm:$0xff]  ;;  %v150_v11 = vld [vmem:[%s20774_s1 + $0x58] sm:$0xff]  ;;  %v14357_v12 = vpack.c.bf16 %v142_v7, %v141_v6  ;;  %v143_v14 = vld [vmem:[%s20774_s1 + $0x20] sm:$0xff] }
   0x4   :  { %14355 = vmatpush3.bf16.msra.mxu0 %v14354_v4  ;;  %v14369_v13 = vpack.c.bf16 %v150_v11, %v149_v10  ;;  %v144_v15 = vld [vmem:[%s20774_s1 + $0x28] sm:$0xff]  ;;  %v151_v16 = vld [vmem:[%s20774_s1 + $0x60] sm:$0xff]  ;;  %v145_v20 = vld [vmem:[%s20774_s1 + $0x30] sm:$0xff] }
   0x5   :  { %14367 = vmatpush3.bf16.msra.mxu1 %v14366_v9  ;;  %14356 = vmatprep.subr.bf16.mxu0 %v15892_v0  ;;  %v152_v17 = vld [vmem:[%s20774_s1 + $0x68] sm:$0xff]  ;;  %v14360_v18 = vpack.c.bf16 %v144_v15, %v143_v14  ;;  %v146_v21 = vld [vmem:[%s20774_s1 + $0x38] sm:$0xff]  ;;  %v153_v22 = vld [vmem:[%s20774_s1 + $0x70] sm:$0xff] }
   0x6   :  { %14368 = vmatprep.subr.bf16.mxu1 %v15892_v0  ;;  %v14372_v19 = vpack.c.bf16 %v152_v17, %v151_v16  ;;  %v154_v23 = vld [vmem:[%s20774_s1 + $0x78] sm:$0xff]  ;;  %v14363_v24 = vpack.c.bf16 %v146_v21, %v145_v20  ;;  %v155_v26 = vld [vmem:[%s20774_s1 + $0x80] sm:$0xff]  ;;  %v156_v27 = vld [vmem:[%s20774_s1 + $0x88] sm:$0xff] }
   0x7   :  { %v14375_v25 = vpack.c.bf16 %v154_v23, %v153_v22  ;;  %v163_v28 = vld [vmem:[%s20774_s1 + $0xc0] sm:$0xff]  ;;  %v164_v29 = vld [vmem:[%s20774_s1 + $0xc8] sm:$0xff]  ;;  %v14378_v31 = vpack.c.bf16 %v156_v27, %v155_v26  ;;  %v157_v34 = vld [vmem:[%s20774_s1 + $0x90] sm:$0xff] }
   0x8   :  { %14358 = vmatpush3.bf16.msra.mxu0 %v14357_v12  ;;  %v11_v30 = vld [vmem:[%s20775_s0] sm:$0x3]  ;;  %v12_v32 = vld [vmem:[%s20775_s0 + $0x2] sm:$0x3]  ;;  %v14390_v33 = vpack.c.bf16 %v164_v29, %v163_v28  ;;  %v158_v35 = vld [vmem:[%s20774_s1 + $0x98] sm:$0xff] }
   0x9   :  { %14370 = vmatpush3.bf16.msra.mxu1 %v14369_v13  ;;  %14359 = vmatprep.subr.bf16.mxu0 %v15892_v0  ;;  %v165_v36 = vld [vmem:[%s20774_s1 + $0xd0] sm:$0xff]  ;;  %v166_v37 = vld [vmem:[%s20774_s1 + $0xd8] sm:$0xff]  ;;  %v14381_v38 = vpack.c.bf16 %v158_v35, %v157_v34  ;;  %v159_v40 = vld [vmem:[%s20774_s1 + $0xa0] sm:$0xff] }
   0xa   :  { %14371 = vmatprep.subr.bf16.mxu1 %v15892_v0  ;;  %v14393_v39 = vpack.c.bf16 %v166_v37, %v165_v36  ;;  %v160_v41 = vld [vmem:[%s20774_s1 + $0xa8] sm:$0xff]  ;;  %v167_v42 = vld [vmem:[%s20774_s1 + $0xe0] sm:$0xff]  ;;  %v161_v46 = vld [vmem:[%s20774_s1 + $0xb0] sm:$0xff] }
   0xb   :  { %v168_v43 = vld [vmem:[%s20774_s1 + $0xe8] sm:$0xff]  ;;  %v14384_v44 = vpack.c.bf16 %v160_v41, %v159_v40  ;;  %v162_v47 = vld [vmem:[%s20774_s1 + $0xb8] sm:$0xff]  ;;  %v169_v48 = vld [vmem:[%s20774_s1 + $0xf0] sm:$0xff] }
   0xc   :  { %14361 = vmatpush3.bf16.msra.mxu0 %v14360_v18  ;;  %v14396_v45 = vpack.c.bf16 %v168_v43, %v167_v42  ;;  %v170_v49 = vld [vmem:[%s20774_s1 + $0xf8] sm:$0xff]  ;;  %v14387_v50 = vpack.c.bf16 %v162_v47, %v161_v46  ;;  %v171_v52 = vld [vmem:[%s20774_s1 + $0x100] sm:$0xff]  ;;  %v172_v53 = vld [vmem:[%s20774_s1 + $0x108] sm:$0xff] }
   0xd   :  { %14373 = vmatpush3.bf16.msra.mxu1 %v14372_v19  ;;  %14362 = vmatprep.subr.bf16.mxu0 %v15892_v0  ;;  %v14399_v51 = vpack.c.bf16 %v170_v49, %v169_v48  ;;  %v179_v54 = vld [vmem:[%s20774_s1 + $0x140] sm:$0xff]  ;;  %v180_v55 = vld [vmem:[%s20774_s1 + $0x148] sm:$0xff]  ;;  %v14402_v57 = vpack.c.bf16 %v172_v53, %v171_v52  ;;  %v173_v60 = vld [vmem:[%s20774_s1 + $0x110] sm:$0xff] }
   0xe   :  { %14374 = vmatprep.subr.bf16.mxu1 %v15892_v0  ;;  %v13_v56 = vld [vmem:[%s20775_s0 + $0x4] sm:$0x3]  ;;  %v14_v58 = vld [vmem:[%s20775_s0 + $0x6] sm:$0x3]  ;;  %v14414_v59 = vpack.c.bf16 %v180_v55, %v179_v54  ;;  %v174_v61 = vld [vmem:[%s20774_s1 + $0x118] sm:$0xff] }
   0xf   :  { %v181_v62 = vld [vmem:[%s20774_s1 + $0x150] sm:$0xff]  ;;  %v182_v63 = vld [vmem:[%s20774_s1 + $0x158] sm:$0xff]  ;;  %v14405_v1 = vpack.c.bf16 %v174_v61, %v173_v60  ;;  %v175_v3 = vld [vmem:[%s20774_s1 + $0x120] sm:$0xff] }
  0x10   :  { %14364 = vmatpush3.bf16.msra.mxu0 %v14363_v24  ;;  %v14417_v2 = vpack.c.bf16 %v182_v63, %v181_v62  ;;  %v176_v4 = vld [vmem:[%s20774_s1 + $0x128] sm:$0xff]  ;;  %v183_v5 = vld [vmem:[%s20774_s1 + $0x160] sm:$0xff]  ;;  %v177_v10 = vld [vmem:[%s20774_s1 + $0x130] sm:$0xff] }
  0x11   :  { %14376 = vmatpush3.bf16.msra.mxu1 %v14375_v25  ;;  %14377 = vmatprep.subr.bf16.mxu0 %v15892_v0  ;;  %v184_v6 = vld [vmem:[%s20774_s1 + $0x168] sm:$0xff]  ;;  %v14408_v7 = vpack.c.bf16 %v176_v4, %v175_v3  ;;  %v178_v11 = vld [vmem:[%s20774_s1 + $0x138] sm:$0xff]  ;;  %v185_v12 = vld [vmem:[%s20774_s1 + $0x170] sm:$0xff] }
  0x12   :  { %14389 = vmatprep.subr.bf16.mxu1 %v15892_v0  ;;  %v14420_v9 = vpack.c.bf16 %v184_v6, %v183_v5  ;;  %v186_v13 = vld [vmem:[%s20774_s1 + $0x178] sm:$0xff]  ;;  %v14411_v14 = vpack.c.bf16 %v178_v11, %v177_v10  ;;  %v187_v16 = vld [vmem:[%s20774_s1 + $0x180] sm:$0xff]  ;;  %v188_v17 = vld [vmem:[%s20774_s1 + $0x188] sm:$0xff] }
  0x13   :  { %11938 = vmatmul.mubr.msk.f32.vlgmr.msra.gmra.mrb[0].mxu0 %vm1163_vm1, %v11_v30  ;;  %v14423_v15 = vpack.c.bf16 %v186_v13, %v185_v12  ;;  %v195_v18 = vld [vmem:[%s20774_s1 + $0x1c0] sm:$0xff]  ;;  %v196_v19 = vld [vmem:[%s20774_s1 + $0x1c8] sm:$0xff]  ;;  %v14426_v21 = vpack.c.bf16 %v188_v17, %v187_v16  ;;  %v189_v24 = vld [vmem:[%s20774_s1 + $0x190] sm:$0xff] }
  0x14   :  { %11957 = vmatmul.mubr.msk.f32.vlgmr.msra.gmra.mrb[0].mxu1 %vm1163_vm1, %v12_v32  ;;  %14379 = vmatpush3.bf16.msra.mxu0 %v14378_v31  ;;  %v15_v20 = vld [vmem:[%s20775_s0 + $0x8] sm:$0x3]  ;;  %v16_v22 = vld [vmem:[%s20775_s0 + $0xa] sm:$0x3]  ;;  %v14438_v23 = vpack.c.bf16 %v196_v19, %v195_v18  ;;  %v190_v25 = vld [vmem:[%s20774_s1 + $0x198] sm:$0xff] }
  0x15   :  { %14391 = vmatpush3.bf16.msra.mxu1 %v14390_v33  ;;  %14380 = vmatprep.subr.bf16.mxu0 %v15892_v0  ;;  %v197_v26 = vld [vmem:[%s20774_s1 + $0x1d0] sm:$0xff]  ;;  %v198_v27 = vld [vmem:[%s20774_s1 + $0x1d8] sm:$0xff]  ;;  %v14429_v28 = vpack.c.bf16 %v190_v25, %v189_v24  ;;  %v191_v30 = vld [vmem:[%s20774_s1 + $0x1a0] sm:$0xff] }
  0x16   :  { %14392 = vmatprep.subr.bf16.mxu1 %v15892_v0  ;;  %11975 = vmatprep.mubr.msk.f32.mxu0 %vm15893_vm0, %v15894_v8  ;;  %v14441_v29 = vpack.c.bf16 %v198_v27, %v197_v26  ;;  %v192_v31 = vld [vmem:[%s20774_s1 + $0x1a8] sm:$0xff]  ;;  %v199_v32 = vld [vmem:[%s20774_s1 + $0x1e0] sm:$0xff]  ;;  %v193_v36 = vld [vmem:[%s20774_s1 + $0x1b0] sm:$0xff] }
  0x17   :  { %11994 = vmatprep.mubr.msk.f32.mxu1 %vm15893_vm0, %v15894_v8  ;;  %v200_v33 = vld [vmem:[%s20774_s1 + $0x1e8] sm:$0xff]  ;;  %v14432_v34 = vpack.c.bf16 %v192_v31, %v191_v30  ;;  %v194_v37 = vld [vmem:[%s20774_s1 + $0x1b8] sm:$0xff]  ;;  %v203_v42 = vld [vmem:[%s20774_s1 + $0x200] sm:$0xff] }
  0x18   :  { %14382 = vmatpush3.bf16.msra.mxu0 %v14381_v38  ;;  %v14444_v35 = vpack.c.bf16 %v200_v33, %v199_v32  ;;  %v201_v38 = vld [vmem:[%s20774_s1 + $0x1f0] sm:$0xff]  ;;  %v14435_v40 = vpack.c.bf16 %v194_v37, %v193_v36  ;;  %v204_v43 = vld [vmem:[%s20774_s1 + $0x208] sm:$0xff]  ;;  %v214_v53 = vld [vmem:[%s20774_s1 + $0x258] sm:$0xff] }
  0x19   :  { %14394 = vmatpush3.bf16.msra.mxu1 %v14393_v39  ;;  %14383 = vmatprep.subr.bf16.mxu0 %v15892_v0  ;;  %v202_v39 = vld [vmem:[%s20774_s1 + $0x1f8] sm:$0xff]  ;;  %v17_v46 = vld [vmem:[%s20775_s0 + $0xc] sm:$0x3]  ;;  %v14450_v47 = vpack.c.bf16 %v204_v43, %v203_v42  ;;  %v18_v48 = vld [vmem:[%s20775_s0 + $0xe] sm:$0x3] }
  0x1a   :  { %14395 = vmatprep.subr.bf16.mxu1 %v15892_v0  ;;  %v14447_v41 = vpack.c.bf16 %v202_v39, %v201_v38  ;;  %v213_v52 = vld [vmem:[%s20774_s1 + $0x250] sm:$0xff]  ;;  %v210_v63 = vld [vmem:[%s20774_s1 + $0x238] sm:$0xff]  ;;  %v219_v5 = vld [vmem:[%s20774_s1 + $0x280] sm:$0xff] }
  0x1b   :  { %v14465_v55 = vpack.c.bf16 %v214_v53, %v213_v52  ;;  %v209_v62 = vld [vmem:[%s20774_s1 + $0x230] sm:$0xff]  ;;  %v220_v6 = vld [vmem:[%s20774_s1 + $0x288] sm:$0xff]  ;;  %v230_v17 = vld [vmem:[%s20774_s1 + $0x2d8] sm:$0xff] }
  0x1c   :  { %14385 = vmatpush3.bf16.msra.mxu0 %v14384_v44  ;;  %v211_v44 = vld [vmem:[%s20774_s1 + $0x240] sm:$0xff]  ;;  %v14459_v3 = vpack.c.bf16 %v210_v63, %v209_v62  ;;  %v19_v10 = vld [vmem:[%s20775_s0 + $0x10] sm:$0x3]  ;;  %v14474_v11 = vpack.c.bf16 %v220_v6, %v219_v5  ;;  %v20_v12 = vld [vmem:[%s20775_s0 + $0x12] sm:$0x3] }
  0x1d   :  { %14397 = vmatpush3.bf16.msra.mxu1 %v14396_v45  ;;  %14386 = vmatprep.subr.bf16.mxu0 %v15892_v0  ;;  %v212_v45 = vld [vmem:[%s20774_s1 + $0x248] sm:$0xff]  ;;  %v229_v16 = vld [vmem:[%s20774_s1 + $0x2d0] sm:$0xff]  ;;  %v226_v27 = vld [vmem:[%s20774_s1 + $0x2b8] sm:$0xff] }
  0x1e   :  { %14398 = vmatprep.subr.bf16.mxu1 %v15892_v0  ;;  %v14462_v49 = vpack.c.bf16 %v212_v45, %v211_v44  ;;  %v14489_v19 = vpack.c.bf16 %v230_v17, %v229_v16  ;;  %v225_v26 = vld [vmem:[%s20774_s1 + $0x2b0] sm:$0xff]  ;;  %v235_v32 = vld [vmem:[%s20774_s1 + $0x300] sm:$0xff]  ;;  %v236_v33 = vld [vmem:[%s20774_s1 + $0x308] sm:$0xff] }
  0x1f   :  { %v14483_v30 = vpack.c.bf16 %v226_v27, %v225_v26  ;;  %v21_v36 = vld [vmem:[%s20775_s0 + $0x14] sm:$0x3]  ;;  %v14498_v37 = vpack.c.bf16 %v236_v33, %v235_v32  ;;  %v22_v38 = vld [vmem:[%s20775_s0 + $0x16] sm:$0x3]  ;;  %v246_v43 = vld [vmem:[%s20774_s1 + $0x358] sm:$0xff] }
  0x20   :  { %14388 = vmatpush3.bf16.msra.mxu0 %v14387_v50  ;;  %v205_v50 = vld [vmem:[%s20774_s1 + $0x210] sm:$0xff]  ;;  %v242_v53 = vld [vmem:[%s20774_s1 + $0x338] sm:$0xff] }
  0x21   :  { %14400 = vmatpush3.bf16.msra.mxu1 %v14399_v51  ;;  %14401 = vmatprep.subr.bf16.mxu0 %v15892_v0  ;;  %v206_v51 = vld [vmem:[%s20774_s1 + $0x218] sm:$0xff]  ;;  %v245_v42 = vld [vmem:[%s20774_s1 + $0x350] sm:$0xff] }
  0x22   :  { %14413 = vmatprep.subr.bf16.mxu1 %v15892_v0  ;;  %v14453_v54 = vpack.c.bf16 %v206_v51, %v205_v50  ;;  %v14513_v45 = vpack.c.bf16 %v246_v43, %v245_v42  ;;  %v241_v52 = vld [vmem:[%s20774_s1 + $0x330] sm:$0xff]  ;;  %v23_v62 = vld [vmem:[%s20775_s0 + $0x18] sm:$0x3]  ;;  %v25_v26 = vld [vmem:[%s20775_s0 + $0x1c] sm:$0x3] }
  0x23   :  { %11976 = vmatmul.mubr.msk.f32.vlgmr.msra.gmra.mrb[2].mxu0 %vm1163_vm1, %v13_v56  ;;  %v207_v56 = vld [vmem:[%s20774_s1 + $0x220] sm:$0xff]  ;;  %v261_v5 = vld [vmem:[%s20774_s1 + $0x3d0] sm:$0xff]  ;;  %v262_v6 = vld [vmem:[%s20774_s1 + $0x3d8] sm:$0xff] }
  0x24   :  { %11995 = vmatmul.mubr.msk.f32.vlgmr.msra.gmra.mrb[2].mxu1 %vm1163_vm1, %v14_v58  ;;  %14403 = vmatpush3.bf16.msra.mxu0 %v14402_v57  ;;  %v208_v57 = vld [vmem:[%s20774_s1 + $0x228] sm:$0xff]  ;;  %v215_v58 = vld [vmem:[%s20774_s1 + $0x260] sm:$0xff]  ;;  %v257_v16 = vld [vmem:[%s20774_s1 + $0x3b0] sm:$0xff] }
  0x25   :  { %14415 = vmatpush3.bf16.msra.mxu1 %v14414_v59  ;;  %14404 = vmatprep.subr.bf16.mxu0 %v15892_v0  ;;  %v216_v59 = vld [vmem:[%s20774_s1 + $0x268] sm:$0xff]  ;;  %v14456_v60 = vpack.c.bf16 %v208_v57, %v207_v56  ;;  %v14507_v56 = vpack.c.bf16 %v242_v53, %v241_v52  ;;  %v258_v17 = vld [vmem:[%s20774_s1 + $0x3b8] sm:$0xff]  ;;  %v277_v32 = vld [vmem:[%s20774_s1 + $0x450] sm:$0xff] }
  0x26   :  { %14416 = vmatprep.subr.bf16.mxu1 %v15892_v0  ;;  %12013 = vmatprep.mubr.msk.f32.mxu0 %vm15893_vm0, %v15894_v8  ;;  %v14468_v61 = vpack.c.bf16 %v216_v59, %v215_v58  ;;  %v251_v58 = vld [vmem:[%s20774_s1 + $0x380] sm:$0xff]  ;;  %v252_v59 = vld [vmem:[%s20774_s1 + $0x388] sm:$0xff]  ;;  %v278_v33 = vld [vmem:[%s20774_s1 + $0x458] sm:$0xff] }
  0x27   :  { %12032 = vmatprep.mubr.msk.f32.mxu1 %vm15893_vm0, %v15894_v8  ;;  %v14522_v63 = vpack.c.bf16 %v252_v59, %v251_v58  ;;  %v273_v42 = vld [vmem:[%s20774_s1 + $0x430] sm:$0xff]  ;;  %v274_v43 = vld [vmem:[%s20774_s1 + $0x438] sm:$0xff]  ;;  %v27_v52 = vld [vmem:[%s20775_s0 + $0x20] sm:$0x3] }
  0x28   :  { %14406 = vmatpush3.bf16.msra.mxu0 %v14405_v1  ;;  %v217_v1 = vld [vmem:[%s20774_s1 + $0x270] sm:$0xff]  ;;  %v294_v59 = vld [vmem:[%s20774_s1 + $0x4d8] sm:$0xff] }
  0x29   :  { %14418 = vmatpush3.bf16.msra.mxu1 %v14417_v2  ;;  %14407 = vmatprep.subr.bf16.mxu0 %v15892_v0  ;;  %v218_v2 = vld [vmem:[%s20774_s1 + $0x278] sm:$0xff]  ;;  %v293_v58 = vld [vmem:[%s20774_s1 + $0x4d0] sm:$0xff] }
  0x2a   :  { %14419 = vmatprep.subr.bf16.mxu1 %v15892_v0  ;;  %v14471_v4 = vpack.c.bf16 %v218_v2, %v217_v1  ;;  %v24_v1 = vld [vmem:[%s20775_s0 + $0x1a] sm:$0x3] }
  0x2c   :  { %14409 = vmatpush3.bf16.msra.mxu0 %v14408_v7  ;;  %v227_v7 = vld [vmem:[%s20774_s1 + $0x2c0] sm:$0xff] }
  0x2d   :  { %14421 = vmatpush3.bf16.msra.mxu1 %v14420_v9  ;;  %14410 = vmatprep.subr.bf16.mxu0 %v15892_v0  ;;  %v228_v9 = vld [vmem:[%s20774_s1 + $0x2c8] sm:$0xff] }
  0x2e   :  { %14422 = vmatprep.subr.bf16.mxu1 %v15892_v0  ;;  %v14486_v13 = vpack.c.bf16 %v228_v9, %v227_v7  ;;  %v14537_v9 = vpack.c.bf16 %v262_v6, %v261_v5  ;;  %v289_v5 = vld [vmem:[%s20774_s1 + $0x4b0] sm:$0xff]  ;;  %v290_v6 = vld [vmem:[%s20774_s1 + $0x4b8] sm:$0xff] }
  0x30   :  { %14412 = vmatpush3.bf16.msra.mxu0 %v14411_v14  ;;  %v221_v14 = vld [vmem:[%s20774_s1 + $0x290] sm:$0xff] }
  0x31   :  { %14424 = vmatpush3.bf16.msra.mxu1 %v14423_v15  ;;  %14425 = vmatprep.subr.bf16.mxu0 %v15892_v0  ;;  %v222_v15 = vld [vmem:[%s20774_s1 + $0x298] sm:$0xff] }
  0x32   :  { %14437 = vmatprep.subr.bf16.mxu1 %v15892_v0  ;;  %v14477_v18 = vpack.c.bf16 %v222_v15, %v221_v14 }
  0x33   :  { %12014 = vmatmul.mubr.msk.f32.vlgmr.msra.gmra.mrb[4].mxu0 %vm1163_vm1, %v15_v20  ;;  %v223_v20 = vld [vmem:[%s20774_s1 + $0x2a0] sm:$0xff] }
  0x34   :  { %12033 = vmatmul.mubr.msk.f32.vlgmr.msra.gmra.mrb[4].mxu1 %vm1163_vm1, %v16_v22  ;;  %14427 = vmatpush3.bf16.msra.mxu0 %v14426_v21  ;;  %v224_v21 = vld [vmem:[%s20774_s1 + $0x2a8] sm:$0xff]  ;;  %v231_v22 = vld [vmem:[%s20774_s1 + $0x2e0] sm:$0xff] }
  0x35   :  { %14439 = vmatpush3.bf16.msra.mxu1 %v14438_v23  ;;  %14428 = vmatprep.subr.bf16.mxu0 %v15892_v0  ;;  %v232_v23 = vld [vmem:[%s20774_s1 + $0x2e8] sm:$0xff]  ;;  %v14480_v24 = vpack.c.bf16 %v224_v21, %v223_v20  ;;  %v14531_v20 = vpack.c.bf16 %v258_v17, %v257_v16  ;;  %v29_v16 = vld [vmem:[%s20775_s0 + $0x24] sm:$0x3] }
  0x36   :  { %14440 = vmatprep.subr.bf16.mxu1 %v15892_v0  ;;  %12051 = vmatprep.mubr.msk.f32.mxu0 %vm15893_vm0, %v15894_v8  ;;  %v14492_v25 = vpack.c.bf16 %v232_v23, %v231_v22  ;;  %v267_v22 = vld [vmem:[%s20774_s1 + $0x400] sm:$0xff]  ;;  %v268_v23 = vld [vmem:[%s20774_s1 + $0x408] sm:$0xff] }
  0x37   :  { %12070 = vmatprep.mubr.msk.f32.mxu1 %vm15893_vm0, %v15894_v8  ;;  %v14546_v27 = vpack.c.bf16 %v268_v23, %v267_v22  ;;  %v309_v22 = vld [vmem:[%s20774_s1 + $0x550] sm:$0xff]  ;;  %v310_v23 = vld [vmem:[%s20774_s1 + $0x558] sm:$0xff] }
  0x38   :  { %14430 = vmatpush3.bf16.msra.mxu0 %v14429_v28  ;;  %v233_v28 = vld [vmem:[%s20774_s1 + $0x2f0] sm:$0xff] }
  0x39   :  { %14442 = vmatpush3.bf16.msra.mxu1 %v14441_v29  ;;  %14431 = vmatprep.subr.bf16.mxu0 %v15892_v0  ;;  %v234_v29 = vld [vmem:[%s20774_s1 + $0x2f8] sm:$0xff] }
  0x3a   :  { %14443 = vmatprep.subr.bf16.mxu1 %v15892_v0  ;;  %v14495_v31 = vpack.c.bf16 %v234_v29, %v233_v28  ;;  %v26_v28 = vld [vmem:[%s20775_s0 + $0x1e] sm:$0x3] }
  0x3c   :  { %14433 = vmatpush3.bf16.msra.mxu0 %v14432_v34  ;;  %v243_v34 = vld [vmem:[%s20774_s1 + $0x340] sm:$0xff] }
  0x3d   :  { %14445 = vmatpush3.bf16.msra.mxu1 %v14444_v35  ;;  %14434 = vmatprep.subr.bf16.mxu0 %v15892_v0  ;;  %v244_v35 = vld [vmem:[%s20774_s1 + $0x348] sm:$0xff] }
  0x3e   :  { %14446 = vmatprep.subr.bf16.mxu1 %v15892_v0  ;;  %v14510_v39 = vpack.c.bf16 %v244_v35, %v243_v34  ;;  %v14561_v35 = vpack.c.bf16 %v278_v33, %v277_v32  ;;  %v305_v32 = vld [vmem:[%s20774_s1 + $0x530] sm:$0xff]  ;;  %v306_v33 = vld [vmem:[%s20774_s1 + $0x538] sm:$0xff] }
  0x40   :  { %14436 = vmatpush3.bf16.msra.mxu0 %v14435_v40  ;;  %v237_v40 = vld [vmem:[%s20774_s1 + $0x310] sm:$0xff] }
  0x41   :  { %14448 = vmatpush3.bf16.msra.mxu1 %v14447_v41  ;;  %14449 = vmatprep.subr.bf16.mxu0 %v15892_v0  ;;  %v238_v41 = vld [vmem:[%s20774_s1 + $0x318] sm:$0xff] }
  0x42   :  { %14461 = vmatprep.subr.bf16.mxu1 %v15892_v0  ;;  %v14501_v44 = vpack.c.bf16 %v238_v41, %v237_v40 }
  0x43   :  { %12052 = vmatmul.mubr.msk.f32.vlgmr.msra.gmra.mrb[6].mxu0 %vm1163_vm1, %v17_v46  ;;  %v239_v46 = vld [vmem:[%s20774_s1 + $0x320] sm:$0xff] }
  0x44   :  { %12071 = vmatmul.mubr.msk.f32.vlgmr.msra.gmra.mrb[6].mxu1 %vm1163_vm1, %v18_v48  ;;  %14451 = vmatpush3.bf16.msra.mxu0 %v14450_v47  ;;  %v240_v47 = vld [vmem:[%s20774_s1 + $0x328] sm:$0xff]  ;;  %v247_v48 = vld [vmem:[%s20774_s1 + $0x360] sm:$0xff] }
  0x45   :  { %14463 = vmatpush3.bf16.msra.mxu1 %v14462_v49  ;;  %14452 = vmatprep.subr.bf16.mxu0 %v15892_v0  ;;  %v248_v49 = vld [vmem:[%s20774_s1 + $0x368] sm:$0xff]  ;;  %v14504_v50 = vpack.c.bf16 %v240_v47, %v239_v46  ;;  %v14555_v46 = vpack.c.bf16 %v274_v43, %v273_v42 }
  0x46   :  { %14464 = vmatprep.subr.bf16.mxu1 %v15892_v0  ;;  %12089 = vmatprep.mubr.msk.f32.mxu0 %vm15893_vm0, %v15894_v8  ;;  %v14516_v51 = vpack.c.bf16 %v248_v49, %v247_v48  ;;  %v283_v48 = vld [vmem:[%s20774_s1 + $0x480] sm:$0xff]  ;;  %v284_v49 = vld [vmem:[%s20774_s1 + $0x488] sm:$0xff] }
  0x47   :  { %12108 = vmatprep.mubr.msk.f32.mxu1 %vm15893_vm0, %v15894_v8  ;;  %v14570_v53 = vpack.c.bf16 %v284_v49, %v283_v48  ;;  %v31_v42 = vld [vmem:[%s20775_s0 + $0x28] sm:$0x3]  ;;  %v325_v48 = vld [vmem:[%s20774_s1 + $0x5d0] sm:$0xff]  ;;  %v326_v49 = vld [vmem:[%s20774_s1 + $0x5d8] sm:$0xff] }
  0x48   :  { %14454 = vmatpush3.bf16.msra.mxu0 %v14453_v54  ;;  %v249_v54 = vld [vmem:[%s20774_s1 + $0x370] sm:$0xff] }
  0x49   :  { %14466 = vmatpush3.bf16.msra.mxu1 %v14465_v55  ;;  %14455 = vmatprep.subr.bf16.mxu0 %v15892_v0  ;;  %v250_v55 = vld [vmem:[%s20774_s1 + $0x378] sm:$0xff] }
  0x4a   :  { %14467 = vmatprep.subr.bf16.mxu1 %v15892_v0  ;;  %v14519_v57 = vpack.c.bf16 %v250_v55, %v249_v54  ;;  %v28_v54 = vld [vmem:[%s20775_s0 + $0x22] sm:$0x3] }
  0x4c   :  { %14457 = vmatpush3.bf16.msra.mxu0 %v14456_v60  ;;  %v259_v60 = vld [vmem:[%s20774_s1 + $0x3c0] sm:$0xff] }
  0x4d   :  { %14469 = vmatpush3.bf16.msra.mxu1 %v14468_v61  ;;  %14458 = vmatprep.subr.bf16.mxu0 %v15892_v0  ;;  %v260_v61 = vld [vmem:[%s20774_s1 + $0x3c8] sm:$0xff] }
  0x4e   :  { %14470 = vmatprep.subr.bf16.mxu1 %v15892_v0  ;;  %v14534_v2 = vpack.c.bf16 %v260_v61, %v259_v60  ;;  %v14585_v61 = vpack.c.bf16 %v294_v59, %v293_v58  ;;  %v321_v58 = vld [vmem:[%s20774_s1 + $0x5b0] sm:$0xff]  ;;  %v322_v59 = vld [vmem:[%s20774_s1 + $0x5b8] sm:$0xff] }
  0x50   :  { %14460 = vmatpush3.bf16.msra.mxu0 %v14459_v3  ;;  %v253_v3 = vld [vmem:[%s20774_s1 + $0x390] sm:$0xff] }
  0x51   :  { %14472 = vmatpush3.bf16.msra.mxu1 %v14471_v4  ;;  %14473 = vmatprep.subr.bf16.mxu0 %v15892_v0  ;;  %v254_v4 = vld [vmem:[%s20774_s1 + $0x398] sm:$0xff] }
  0x52   :  { %14485 = vmatprep.subr.bf16.mxu1 %v15892_v0  ;;  %v14525_v7 = vpack.c.bf16 %v254_v4, %v253_v3 }
  0x53   :  { %12090 = vmatmul.mubr.msk.f32.vlgmr.msra.gmra.mrb[8].mxu0 %vm1163_vm1, %v19_v10  ;;  %v255_v10 = vld [vmem:[%s20774_s1 + $0x3a0] sm:$0xff] }
  0x54   :  { %12109 = vmatmul.mubr.msk.f32.vlgmr.msra.gmra.mrb[8].mxu1 %vm1163_vm1, %v20_v12  ;;  %14475 = vmatpush3.bf16.msra.mxu0 %v14474_v11  ;;  %v256_v11 = vld [vmem:[%s20774_s1 + $0x3a8] sm:$0xff]  ;;  %v263_v12 = vld [vmem:[%s20774_s1 + $0x3e0] sm:$0xff] }
  0x55   :  { %14487 = vmatpush3.bf16.msra.mxu1 %v14486_v13  ;;  %14476 = vmatprep.subr.bf16.mxu0 %v15892_v0  ;;  %v264_v13 = vld [vmem:[%s20774_s1 + $0x3e8] sm:$0xff]  ;;  %v14528_v14 = vpack.c.bf16 %v256_v11, %v255_v10  ;;  %v14579_v10 = vpack.c.bf16 %v290_v6, %v289_v5 }
  0x56   :  { %14488 = vmatprep.subr.bf16.mxu1 %v15892_v0  ;;  %12127 = vmatprep.mubr.msk.f32.mxu0 %vm15893_vm0, %v15894_v8  ;;  %v14540_v15 = vpack.c.bf16 %v264_v13, %v263_v12  ;;  %v299_v12 = vld [vmem:[%s20774_s1 + $0x500] sm:$0xff]  ;;  %v300_v13 = vld [vmem:[%s20774_s1 + $0x508] sm:$0xff] }
  0x57   :  { %12146 = vmatprep.mubr.msk.f32.mxu1 %vm15893_vm0, %v15894_v8  ;;  %v14594_v17 = vpack.c.bf16 %v300_v13, %v299_v12  ;;  %v33_v5 = vld [vmem:[%s20775_s0 + $0x2c] sm:$0x3]  ;;  %v341_v12 = vld [vmem:[%s20774_s1 + $0x650] sm:$0xff]  ;;  %v342_v13 = vld [vmem:[%s20774_s1 + $0x658] sm:$0xff] }
  0x58   :  { %14478 = vmatpush3.bf16.msra.mxu0 %v14477_v18  ;;  %v265_v18 = vld [vmem:[%s20774_s1 + $0x3f0] sm:$0xff] }
  0x59   :  { %14490 = vmatpush3.bf16.msra.mxu1 %v14489_v19  ;;  %14479 = vmatprep.subr.bf16.mxu0 %v15892_v0  ;;  %v266_v19 = vld [vmem:[%s20774_s1 + $0x3f8] sm:$0xff] }
  0x5a   :  { %14491 = vmatprep.subr.bf16.mxu1 %v15892_v0  ;;  %v14543_v21 = vpack.c.bf16 %v266_v19, %v265_v18  ;;  %v30_v18 = vld [vmem:[%s20775_s0 + $0x26] sm:$0x3] }
  0x5c   :  { %14481 = vmatpush3.bf16.msra.mxu0 %v14480_v24  ;;  %v275_v24 = vld [vmem:[%s20774_s1 + $0x440] sm:$0xff] }
  0x5d   :  { %14493 = vmatpush3.bf16.msra.mxu1 %v14492_v25  ;;  %14482 = vmatprep.subr.bf16.mxu0 %v15892_v0  ;;  %v276_v25 = vld [vmem:[%s20774_s1 + $0x448] sm:$0xff] }
  0x5e   :  { %14494 = vmatprep.subr.bf16.mxu1 %v15892_v0  ;;  %v14558_v29 = vpack.c.bf16 %v276_v25, %v275_v24  ;;  %v14609_v25 = vpack.c.bf16 %v310_v23, %v309_v22  ;;  %v337_v22 = vld [vmem:[%s20774_s1 + $0x630] sm:$0xff]  ;;  %v338_v23 = vld [vmem:[%s20774_s1 + $0x638] sm:$0xff] }
  0x60   :  { %14484 = vmatpush3.bf16.msra.mxu0 %v14483_v30  ;;  %v269_v30 = vld [vmem:[%s20774_s1 + $0x410] sm:$0xff] }
  0x61   :  { %14496 = vmatpush3.bf16.msra.mxu1 %v14495_v31  ;;  %14497 = vmatprep.subr.bf16.mxu0 %v15892_v0  ;;  %v270_v31 = vld [vmem:[%s20774_s1 + $0x418] sm:$0xff] }
  0x62   :  { %14509 = vmatprep.subr.bf16.mxu1 %v15892_v0  ;;  %v14549_v34 = vpack.c.bf16 %v270_v31, %v269_v30 }
  0x63   :  { %12128 = vmatmul.mubr.msk.f32.vlgmr.msra.gmra.mrb[10].mxu0 %vm1163_vm1, %v21_v36  ;;  %v271_v36 = vld [vmem:[%s20774_s1 + $0x420] sm:$0xff] }
  0x64   :  { %12147 = vmatmul.mubr.msk.f32.vlgmr.msra.gmra.mrb[10].mxu1 %vm1163_vm1, %v22_v38  ;;  %14499 = vmatpush3.bf16.msra.mxu0 %v14498_v37  ;;  %v272_v37 = vld [vmem:[%s20774_s1 + $0x428] sm:$0xff]  ;;  %v279_v38 = vld [vmem:[%s20774_s1 + $0x460] sm:$0xff] }
  0x65   :  { %14511 = vmatpush3.bf16.msra.mxu1 %v14510_v39  ;;  %14500 = vmatprep.subr.bf16.mxu0 %v15892_v0  ;;  %v280_v39 = vld [vmem:[%s20774_s1 + $0x468] sm:$0xff]  ;;  %v14552_v40 = vpack.c.bf16 %v272_v37, %v271_v36  ;;  %v14603_v36 = vpack.c.bf16 %v306_v33, %v305_v32  ;;  %v35_v32 = vld [vmem:[%s20775_s0 + $0x30] sm:$0x3] }
  0x66   :  { %14512 = vmatprep.subr.bf16.mxu1 %v15892_v0  ;;  %12165 = vmatprep.mubr.msk.f32.mxu0 %vm15893_vm0, %v15894_v8  ;;  %v14564_v41 = vpack.c.bf16 %v280_v39, %v279_v38  ;;  %v315_v38 = vld [vmem:[%s20774_s1 + $0x580] sm:$0xff]  ;;  %v316_v39 = vld [vmem:[%s20774_s1 + $0x588] sm:$0xff] }
  0x67   :  { %12184 = vmatprep.mubr.msk.f32.mxu1 %vm15893_vm0, %v15894_v8  ;;  %v14618_v43 = vpack.c.bf16 %v316_v39, %v315_v38  ;;  %v357_v38 = vld [vmem:[%s20774_s1 + $0x6d0] sm:$0xff]  ;;  %v358_v39 = vld [vmem:[%s20774_s1 + $0x6d8] sm:$0xff] }
  0x68   :  { %14502 = vmatpush3.bf16.msra.mxu0 %v14501_v44  ;;  %v281_v44 = vld [vmem:[%s20774_s1 + $0x470] sm:$0xff] }
  0x69   :  { %14514 = vmatpush3.bf16.msra.mxu1 %v14513_v45  ;;  %14503 = vmatprep.subr.bf16.mxu0 %v15892_v0  ;;  %v282_v45 = vld [vmem:[%s20774_s1 + $0x478] sm:$0xff] }
  0x6a   :  { %14515 = vmatprep.subr.bf16.mxu1 %v15892_v0  ;;  %v14567_v47 = vpack.c.bf16 %v282_v45, %v281_v44  ;;  %v32_v44 = vld [vmem:[%s20775_s0 + $0x2a] sm:$0x3] }
  0x6c   :  { %14505 = vmatpush3.bf16.msra.mxu0 %v14504_v50  ;;  %v291_v50 = vld [vmem:[%s20774_s1 + $0x4c0] sm:$0xff] }
  0x6d   :  { %14517 = vmatpush3.bf16.msra.mxu1 %v14516_v51  ;;  %14506 = vmatprep.subr.bf16.mxu0 %v15892_v0  ;;  %v292_v51 = vld [vmem:[%s20774_s1 + $0x4c8] sm:$0xff] }
  0x6e   :  { %14518 = vmatprep.subr.bf16.mxu1 %v15892_v0  ;;  %v14582_v55 = vpack.c.bf16 %v292_v51, %v291_v50  ;;  %v14633_v51 = vpack.c.bf16 %v326_v49, %v325_v48  ;;  %v353_v48 = vld [vmem:[%s20774_s1 + $0x6b0] sm:$0xff]  ;;  %v354_v49 = vld [vmem:[%s20774_s1 + $0x6b8] sm:$0xff] }
  0x70   :  { %14508 = vmatpush3.bf16.msra.mxu0 %v14507_v56  ;;  %v285_v56 = vld [vmem:[%s20774_s1 + $0x490] sm:$0xff] }
  0x71   :  { %14520 = vmatpush3.bf16.msra.mxu1 %v14519_v57  ;;  %14521 = vmatprep.subr.bf16.mxu0 %v15892_v0  ;;  %v286_v57 = vld [vmem:[%s20774_s1 + $0x498] sm:$0xff] }
  0x72   :  { %14533 = vmatprep.subr.bf16.mxu1 %v15892_v0  ;;  %v14573_v60 = vpack.c.bf16 %v286_v57, %v285_v56 }
  0x73   :  { %12166 = vmatmul.mubr.msk.f32.vlgmr.msra.gmra.mrb[12].mxu0 %vm1163_vm1, %v23_v62  ;;  %v287_v62 = vld [vmem:[%s20774_s1 + $0x4a0] sm:$0xff] }
  0x74   :  { %12185 = vmatmul.mubr.msk.f32.vlgmr.msra.gmra.mrb[12].mxu1 %vm1163_vm1, %v24_v1  ;;  %14523 = vmatpush3.bf16.msra.mxu0 %v14522_v63  ;;  %v288_v63 = vld [vmem:[%s20774_s1 + $0x4a8] sm:$0xff]  ;;  %v295_v1 = vld [vmem:[%s20774_s1 + $0x4e0] sm:$0xff] }
  0x75   :  { %14535 = vmatpush3.bf16.msra.mxu1 %v14534_v2  ;;  %14524 = vmatprep.subr.bf16.mxu0 %v15892_v0  ;;  %v296_v2 = vld [vmem:[%s20774_s1 + $0x4e8] sm:$0xff]  ;;  %v14576_v3 = vpack.c.bf16 %v288_v63, %v287_v62  ;;  %v14627_v62 = vpack.c.bf16 %v322_v59, %v321_v58  ;;  %v37_v58 = vld [vmem:[%s20775_s0 + $0x34] sm:$0x3] }
  0x76   :  { %14536 = vmatprep.subr.bf16.mxu1 %v15892_v0  ;;  %12203 = vmatprep.mubr.msk.f32.mxu0 %vm15893_vm0, %v15894_v8  ;;  %v14588_v4 = vpack.c.bf16 %v296_v2, %v295_v1  ;;  %v331_v1 = vld [vmem:[%s20774_s1 + $0x600] sm:$0xff]  ;;  %v332_v2 = vld [vmem:[%s20774_s1 + $0x608] sm:$0xff] }
  0x77   :  { %12222 = vmatprep.mubr.msk.f32.mxu1 %vm15893_vm0, %v15894_v8  ;;  %v14642_v6 = vpack.c.bf16 %v332_v2, %v331_v1  ;;  %v373_v1 = vld [vmem:[%s20774_s1 + $0x750] sm:$0xff]  ;;  %v374_v2 = vld [vmem:[%s20774_s1 + $0x758] sm:$0xff] }
  0x78   :  { %14526 = vmatpush3.bf16.msra.mxu0 %v14525_v7  ;;  %v297_v7 = vld [vmem:[%s20774_s1 + $0x4f0] sm:$0xff] }
  0x79   :  { %14538 = vmatpush3.bf16.msra.mxu1 %v14537_v9  ;;  %14527 = vmatprep.subr.bf16.mxu0 %v15892_v0  ;;  %v298_v9 = vld [vmem:[%s20774_s1 + $0x4f8] sm:$0xff] }
  0x7a   :  { %14539 = vmatprep.subr.bf16.mxu1 %v15892_v0  ;;  %v14591_v11 = vpack.c.bf16 %v298_v9, %v297_v7  ;;  %v34_v7 = vld [vmem:[%s20775_s0 + $0x2e] sm:$0x3] }
  0x7c   :  { %14529 = vmatpush3.bf16.msra.mxu0 %v14528_v14  ;;  %v307_v14 = vld [vmem:[%s20774_s1 + $0x540] sm:$0xff] }
  0x7d   :  { %14541 = vmatpush3.bf16.msra.mxu1 %v14540_v15  ;;  %14530 = vmatprep.subr.bf16.mxu0 %v15892_v0  ;;  %v308_v15 = vld [vmem:[%s20774_s1 + $0x548] sm:$0xff] }
  0x7e   :  { %14542 = vmatprep.subr.bf16.mxu1 %v15892_v0  ;;  %v14606_v19 = vpack.c.bf16 %v308_v15, %v307_v14  ;;  %v14657_v15 = vpack.c.bf16 %v342_v13, %v341_v12 }
  0x80   :  { %14532 = vmatpush3.bf16.msra.mxu0 %v14531_v20  ;;  %v301_v20 = vld [vmem:[%s20774_s1 + $0x510] sm:$0xff] }
  0x81   :  { %14544 = vmatpush3.bf16.msra.mxu1 %v14543_v21  ;;  %14545 = vmatprep.subr.bf16.mxu0 %v15892_v0  ;;  %v302_v21 = vld [vmem:[%s20774_s1 + $0x518] sm:$0xff] }
  0x82   :  { %14557 = vmatprep.subr.bf16.mxu1 %v15892_v0  ;;  %v14597_v24 = vpack.c.bf16 %v302_v21, %v301_v20 }
  0x83   :  { %12204 = vmatmul.mubr.msk.f32.vlgmr.msra.gmra.mrb[14].mxu0 %vm1163_vm1, %v25_v26  ;;  %v303_v26 = vld [vmem:[%s20774_s1 + $0x520] sm:$0xff] }
  0x84   :  { %12223 = vmatmul.mubr.msk.f32.vlgmr.msra.gmra.mrb[14].mxu1 %vm1163_vm1, %v26_v28  ;;  %14547 = vmatpush3.bf16.msra.mxu0 %v14546_v27  ;;  %v304_v27 = vld [vmem:[%s20774_s1 + $0x528] sm:$0xff]  ;;  %v311_v28 = vld [vmem:[%s20774_s1 + $0x560] sm:$0xff] }
  0x85   :  { %14559 = vmatpush3.bf16.msra.mxu1 %v14558_v29  ;;  %14548 = vmatprep.subr.bf16.mxu0 %v15892_v0  ;;  %v312_v29 = vld [vmem:[%s20774_s1 + $0x568] sm:$0xff]  ;;  %v14600_v30 = vpack.c.bf16 %v304_v27, %v303_v26  ;;  %v14651_v26 = vpack.c.bf16 %v338_v23, %v337_v22  ;;  %v379_v22 = vld [vmem:[%s20774_s1 + $0x780] sm:$0xff] }
  0x86   :  { %14560 = vmatprep.subr.bf16.mxu1 %v15892_v0  ;;  %12241 = vmatprep.mubr.msk.f32.mxu0 %vm15893_vm0, %v15894_v8  ;;  %v14612_v31 = vpack.c.bf16 %v312_v29, %v311_v28  ;;  %v347_v28 = vld [vmem:[%s20774_s1 + $0x680] sm:$0xff]  ;;  %v348_v29 = vld [vmem:[%s20774_s1 + $0x688] sm:$0xff] }
  0x87   :  { %12260 = vmatprep.mubr.msk.f32.mxu1 %vm15893_vm0, %v15894_v8  ;;  %v14666_v33 = vpack.c.bf16 %v348_v29, %v347_v28  ;;  %v380_v23 = vld [vmem:[%s20774_s1 + $0x788] sm:$0xff]  ;;  %v40_v28 = vld [vmem:[%s20775_s0 + $0x3a] sm:$0x3] }
  0x88   :  { %14550 = vmatpush3.bf16.msra.mxu0 %v14549_v34  ;;  %v313_v34 = vld [vmem:[%s20774_s1 + $0x570] sm:$0xff] }
  0x89   :  { %14562 = vmatpush3.bf16.msra.mxu1 %v14561_v35  ;;  %14551 = vmatprep.subr.bf16.mxu0 %v15892_v0  ;;  %v314_v35 = vld [vmem:[%s20774_s1 + $0x578] sm:$0xff] }
  0x8a   :  { %14563 = vmatprep.subr.bf16.mxu1 %v15892_v0  ;;  %v14615_v37 = vpack.c.bf16 %v314_v35, %v313_v34  ;;  %v36_v34 = vld [vmem:[%s20775_s0 + $0x32] sm:$0x3] }
  0x8c   :  { %14553 = vmatpush3.bf16.msra.mxu0 %v14552_v40  ;;  %v323_v40 = vld [vmem:[%s20774_s1 + $0x5c0] sm:$0xff] }
  0x8d   :  { %14565 = vmatpush3.bf16.msra.mxu1 %v14564_v41  ;;  %14554 = vmatprep.subr.bf16.mxu0 %v15892_v0  ;;  %v324_v41 = vld [vmem:[%s20774_s1 + $0x5c8] sm:$0xff] }
  0x8e   :  { %14566 = vmatprep.subr.bf16.mxu1 %v15892_v0  ;;  %v14630_v45 = vpack.c.bf16 %v324_v41, %v323_v40  ;;  %v14681_v41 = vpack.c.bf16 %v358_v39, %v357_v38  ;;  %v391_v39 = vld [vmem:[%s20774_s1 + $0x7e0] sm:$0xff] }
  0x90   :  { %14556 = vmatpush3.bf16.msra.mxu0 %v14555_v46  ;;  %v317_v46 = vld [vmem:[%s20774_s1 + $0x590] sm:$0xff] }
  0x91   :  { %14568 = vmatpush3.bf16.msra.mxu1 %v14567_v47  ;;  %14569 = vmatprep.subr.bf16.mxu0 %v15892_v0  ;;  %v318_v47 = vld [vmem:[%s20774_s1 + $0x598] sm:$0xff] }
  0x92   :  { %14581 = vmatprep.subr.bf16.mxu1 %v15892_v0  ;;  %v14621_v50 = vpack.c.bf16 %v318_v47, %v317_v46 }
  0x93   :  { %12242 = vmatmul.mubr.msk.f32.vlgmr.msra.gmra.mrb[16].mxu0 %vm1163_vm1, %v27_v52  ;;  %v319_v52 = vld [vmem:[%s20774_s1 + $0x5a0] sm:$0xff] }
  0x94   :  { %12261 = vmatmul.mubr.msk.f32.vlgmr.msra.gmra.mrb[16].mxu1 %vm1163_vm1, %v28_v54  ;;  %14571 = vmatpush3.bf16.msra.mxu0 %v14570_v53  ;;  %v320_v53 = vld [vmem:[%s20774_s1 + $0x5a8] sm:$0xff]  ;;  %v327_v54 = vld [vmem:[%s20774_s1 + $0x5e0] sm:$0xff] }
  0x95   :  { %14583 = vmatpush3.bf16.msra.mxu1 %v14582_v55  ;;  %14572 = vmatprep.subr.bf16.mxu0 %v15892_v0  ;;  %v328_v55 = vld [vmem:[%s20774_s1 + $0x5e8] sm:$0xff]  ;;  %v14624_v56 = vpack.c.bf16 %v320_v53, %v319_v52  ;;  %v14675_v52 = vpack.c.bf16 %v354_v49, %v353_v48  ;;  %v393_v48 = vld [vmem:[%s20774_s1 + $0x7f0] sm:$0xff]  ;;  %v394_v49 = vld [vmem:[%s20774_s1 + $0x7f8] sm:$0xff] }
  0x96   :  { %14584 = vmatprep.subr.bf16.mxu1 %v15892_v0  ;;  %12279 = vmatprep.mubr.msk.f32.mxu0 %vm15893_vm0, %v15894_v8  ;;  %v14636_v57 = vpack.c.bf16 %v328_v55, %v327_v54  ;;  %v363_v54 = vld [vmem:[%s20774_s1 + $0x700] sm:$0xff]  ;;  %v364_v55 = vld [vmem:[%s20774_s1 + $0x708] sm:$0xff] }
  0x97   :  { %12298 = vmatprep.mubr.msk.f32.mxu1 %vm15893_vm0, %v15894_v8  ;;  %v14690_v59 = vpack.c.bf16 %v364_v55, %v363_v54  ;;  %v403_v54 = vld [vmem:[%s20774_s1 + $0x840] sm:$0xff]  ;;  %v404_v55 = vld [vmem:[%s20774_s1 + $0x848] sm:$0xff] }
  0x98   :  { %14574 = vmatpush3.bf16.msra.mxu0 %v14573_v60  ;;  %v329_v60 = vld [vmem:[%s20774_s1 + $0x5f0] sm:$0xff] }
  0x99   :  { %14586 = vmatpush3.bf16.msra.mxu1 %v14585_v61  ;;  %14575 = vmatprep.subr.bf16.mxu0 %v15892_v0  ;;  %v330_v61 = vld [vmem:[%s20774_s1 + $0x5f8] sm:$0xff] }
  0x9a   :  { %14587 = vmatprep.subr.bf16.mxu1 %v15892_v0  ;;  %v14639_v63 = vpack.c.bf16 %v330_v61, %v329_v60  ;;  %v38_v60 = vld [vmem:[%s20775_s0 + $0x36] sm:$0x3] }
  0x9c   :  { %14577 = vmatpush3.bf16.msra.mxu0 %v14576_v3  ;;  %v339_v3 = vld [vmem:[%s20774_s1 + $0x640] sm:$0xff] }
  0x9d   :  { %14589 = vmatpush3.bf16.msra.mxu1 %v14588_v4  ;;  %14578 = vmatprep.subr.bf16.mxu0 %v15892_v0  ;;  %v340_v4 = vld [vmem:[%s20774_s1 + $0x648] sm:$0xff] }
  0x9e   :  { %14590 = vmatprep.subr.bf16.mxu1 %v15892_v0  ;;  %v14654_v9 = vpack.c.bf16 %v340_v4, %v339_v3  ;;  %v14705_v4 = vpack.c.bf16 %v374_v2, %v373_v1 }
  0xa0   :  { %14580 = vmatpush3.bf16.msra.mxu0 %v14579_v10  ;;  %v333_v10 = vld [vmem:[%s20774_s1 + $0x610] sm:$0xff] }
  0xa1   :  { %14592 = vmatpush3.bf16.msra.mxu1 %v14591_v11  ;;  %14593 = vmatprep.subr.bf16.mxu0 %v15892_v0  ;;  %v334_v11 = vld [vmem:[%s20774_s1 + $0x618] sm:$0xff] }
  0xa2   :  { %14605 = vmatprep.subr.bf16.mxu1 %v15892_v0  ;;  %v14645_v14 = vpack.c.bf16 %v334_v11, %v333_v10  ;;  %v376_v10 = vld [vmem:[%s20774_s1 + $0x768] sm:$0xff] }
  0xa3   :  { %12280 = vmatmul.mubr.msk.f32.vlgmr.msra.gmra.mrb[18].mxu0 %vm1163_vm1, %v29_v16  ;;  %v335_v16 = vld [vmem:[%s20774_s1 + $0x620] sm:$0xff] }
  0xa4   :  { %12299 = vmatmul.mubr.msk.f32.vlgmr.msra.gmra.mrb[18].mxu1 %vm1163_vm1, %v30_v18  ;;  %14595 = vmatpush3.bf16.msra.mxu0 %v14594_v17  ;;  %v336_v17 = vld [vmem:[%s20774_s1 + $0x628] sm:$0xff]  ;;  %v343_v18 = vld [vmem:[%s20774_s1 + $0x660] sm:$0xff] }
  0xa5   :  { %14607 = vmatpush3.bf16.msra.mxu1 %v14606_v19  ;;  %14596 = vmatprep.subr.bf16.mxu0 %v15892_v0  ;;  %v344_v19 = vld [vmem:[%s20774_s1 + $0x668] sm:$0xff]  ;;  %v14648_v20 = vpack.c.bf16 %v336_v17, %v335_v16  ;;  %v369_v16 = vld [vmem:[%s20774_s1 + $0x730] sm:$0xff]  ;;  %v370_v17 = vld [vmem:[%s20774_s1 + $0x738] sm:$0xff] }
  0xa6   :  { %14608 = vmatprep.subr.bf16.mxu1 %v15892_v0  ;;  %12317 = vmatprep.mubr.msk.f32.mxu0 %vm15893_vm0, %v15894_v8  ;;  %v14660_v21 = vpack.c.bf16 %v344_v19, %v343_v18  ;;  %v377_v18 = vld [vmem:[%s20774_s1 + $0x770] sm:$0xff]  ;;  %v378_v19 = vld [vmem:[%s20774_s1 + $0x778] sm:$0xff] }
  0xa7   :  { %12336 = vmatprep.mubr.msk.f32.mxu1 %vm15893_vm0, %v15894_v8 }
  0xa8   :  { %14598 = vmatpush3.bf16.msra.mxu0 %v14597_v24  ;;  %v345_v24 = vld [vmem:[%s20774_s1 + $0x670] sm:$0xff] }
  0xa9   :  { %14610 = vmatpush3.bf16.msra.mxu1 %v14609_v25  ;;  %14599 = vmatprep.subr.bf16.mxu0 %v15892_v0  ;;  %v346_v25 = vld [vmem:[%s20774_s1 + $0x678] sm:$0xff] }
  0xaa   :  { %14611 = vmatprep.subr.bf16.mxu1 %v15892_v0  ;;  %v14663_v27 = vpack.c.bf16 %v346_v25, %v345_v24  ;;  %v387_v24 = vld [vmem:[%s20774_s1 + $0x7c0] sm:$0xff]  ;;  %v388_v25 = vld [vmem:[%s20774_s1 + $0x7c8] sm:$0xff] }
  0xab   :  { %v14726_v29 = vpack.c.bf16 %v388_v25, %v387_v24  ;;  %v43_v24 = vld [vmem:[%s20775_s0 + $0x40] sm:$0x3] }
  0xac   :  { %14601 = vmatpush3.bf16.msra.mxu0 %v14600_v30  ;;  %v355_v30 = vld [vmem:[%s20774_s1 + $0x6c0] sm:$0xff] }
  0xad   :  { %14613 = vmatpush3.bf16.msra.mxu1 %v14612_v31  ;;  %14602 = vmatprep.subr.bf16.mxu0 %v15892_v0  ;;  %v356_v31 = vld [vmem:[%s20774_s1 + $0x6c8] sm:$0xff] }
  0xae   :  { %14614 = vmatprep.subr.bf16.mxu1 %v15892_v0  ;;  %v14678_v35 = vpack.c.bf16 %v356_v31, %v355_v30  ;;  %v381_v30 = vld [vmem:[%s20774_s1 + $0x790] sm:$0xff]  ;;  %v382_v31 = vld [vmem:[%s20774_s1 + $0x798] sm:$0xff] }
  0xb0   :  { %14604 = vmatpush3.bf16.msra.mxu0 %v14603_v36  ;;  %v349_v36 = vld [vmem:[%s20774_s1 + $0x690] sm:$0xff] }
  0xb1   :  { %14616 = vmatpush3.bf16.msra.mxu1 %v14615_v37  ;;  %14617 = vmatprep.subr.bf16.mxu0 %v15892_v0  ;;  %v350_v37 = vld [vmem:[%s20774_s1 + $0x698] sm:$0xff] }
  0xb2   :  { %14629 = vmatprep.subr.bf16.mxu1 %v15892_v0  ;;  %v14669_v40 = vpack.c.bf16 %v350_v37, %v349_v36  ;;  %v383_v36 = vld [vmem:[%s20774_s1 + $0x7a0] sm:$0xff]  ;;  %v384_v37 = vld [vmem:[%s20774_s1 + $0x7a8] sm:$0xff] }
  0xb3   :  { %12318 = vmatmul.mubr.msk.f32.vlgmr.msra.gmra.mrb[20].mxu0 %vm1163_vm1, %v31_v42  ;;  %v351_v42 = vld [vmem:[%s20774_s1 + $0x6a0] sm:$0xff] }
  0xb4   :  { %12337 = vmatmul.mubr.msk.f32.vlgmr.msra.gmra.mrb[20].mxu1 %vm1163_vm1, %v32_v44  ;;  %14619 = vmatpush3.bf16.msra.mxu0 %v14618_v43  ;;  %v352_v43 = vld [vmem:[%s20774_s1 + $0x6a8] sm:$0xff]  ;;  %v359_v44 = vld [vmem:[%s20774_s1 + $0x6e0] sm:$0xff] }
  0xb5   :  { %14631 = vmatpush3.bf16.msra.mxu1 %v14630_v45  ;;  %14620 = vmatprep.subr.bf16.mxu0 %v15892_v0  ;;  %v360_v45 = vld [vmem:[%s20774_s1 + $0x6e8] sm:$0xff]  ;;  %v14672_v46 = vpack.c.bf16 %v352_v43, %v351_v42 }
  0xb6   :  { %14632 = vmatprep.subr.bf16.mxu1 %v15892_v0  ;;  %12355 = vmatprep.mubr.msk.f32.mxu0 %vm15893_vm0, %v15894_v8  ;;  %v14684_v47 = vpack.c.bf16 %v360_v45, %v359_v44  ;;  %v14720_v44 = vpack.c.bf16 %v384_v37, %v383_v36  ;;  %v423_v37 = vld [vmem:[%s20774_s1 + $0x8e0] sm:$0xff] }
  0xb7   :  { %12374 = vmatprep.mubr.msk.f32.mxu1 %vm15893_vm0, %v15894_v8 }
  0xb8   :  { %14622 = vmatpush3.bf16.msra.mxu0 %v14621_v50  ;;  %v361_v50 = vld [vmem:[%s20774_s1 + $0x6f0] sm:$0xff] }
  0xb9   :  { %14634 = vmatpush3.bf16.msra.mxu1 %v14633_v51  ;;  %14623 = vmatprep.subr.bf16.mxu0 %v15892_v0  ;;  %v362_v51 = vld [vmem:[%s20774_s1 + $0x6f8] sm:$0xff] }
  0xba   :  { %14635 = vmatprep.subr.bf16.mxu1 %v15892_v0  ;;  %v14687_v53 = vpack.c.bf16 %v362_v51, %v361_v50  ;;  %v14735_v51 = vpack.c.bf16 %v394_v49, %v393_v48 }
  0xbc   :  { %14625 = vmatpush3.bf16.msra.mxu0 %v14624_v56  ;;  %v371_v56 = vld [vmem:[%s20774_s1 + $0x740] sm:$0xff] }
  0xbd   :  { %14637 = vmatpush3.bf16.msra.mxu1 %v14636_v57  ;;  %14626 = vmatprep.subr.bf16.mxu0 %v15892_v0  ;;  %v372_v57 = vld [vmem:[%s20774_s1 + $0x748] sm:$0xff] }
  0xbe   :  { %14638 = vmatprep.subr.bf16.mxu1 %v15892_v0  ;;  %v14702_v61 = vpack.c.bf16 %v372_v57, %v371_v56  ;;  %v41_v56 = vld [vmem:[%s20775_s0 + $0x3c] sm:$0x3] }
  0xc0   :  { %14628 = vmatpush3.bf16.msra.mxu0 %v14627_v62  ;;  %v365_v62 = vld [vmem:[%s20774_s1 + $0x710] sm:$0xff] }
  0xc1   :  { %14640 = vmatpush3.bf16.msra.mxu1 %v14639_v63  ;;  %14641 = vmatprep.subr.bf16.mxu0 %v15892_v0  ;;  %v366_v63 = vld [vmem:[%s20774_s1 + $0x718] sm:$0xff] }
  0xc2   :  { %14653 = vmatprep.subr.bf16.mxu1 %v15892_v0  ;;  %v14693_v3 = vpack.c.bf16 %v366_v63, %v365_v62  ;;  %v405_v62 = vld [vmem:[%s20774_s1 + $0x850] sm:$0xff]  ;;  %v406_v63 = vld [vmem:[%s20774_s1 + $0x858] sm:$0xff] }
  0xc3   :  { %12356 = vmatmul.mubr.msk.f32.vlgmr.msra.gmra.mrb[22].mxu0 %vm1163_vm1, %v33_v5  ;;  %v367_v5 = vld [vmem:[%s20774_s1 + $0x720] sm:$0xff]  ;;  %v14753_v2 = vpack.c.bf16 %v406_v63, %v405_v62 }
  0xc4   :  { %12375 = vmatmul.mubr.msk.f32.vlgmr.msra.gmra.mrb[22].mxu1 %vm1163_vm1, %v34_v7  ;;  %14643 = vmatpush3.bf16.msra.mxu0 %v14642_v6  ;;  %v368_v6 = vld [vmem:[%s20774_s1 + $0x728] sm:$0xff] }
  0xc5   :  { %14655 = vmatpush3.bf16.msra.mxu1 %v14654_v9  ;;  %14644 = vmatprep.subr.bf16.mxu0 %v15892_v0  ;;  %v375_v9 = vld [vmem:[%s20774_s1 + $0x760] sm:$0xff] }
  0xc6   :  { %14656 = vmatprep.subr.bf16.mxu1 %v15892_v0  ;;  %12393 = vmatprep.mubr.msk.f32.mxu0 %vm15893_vm0, %v15894_v8 }
  0xc7   :  { %12412 = vmatprep.mubr.msk.f32.mxu1 %vm15893_vm0, %v15894_v8 }
  0xc8   :  { %14646 = vmatpush3.bf16.msra.mxu0 %v14645_v14  ;;  %v14696_v14 = vpack.c.bf16 %v368_v6, %v367_v5  ;;  %v407_v6 = vld [vmem:[%s20774_s1 + $0x860] sm:$0xff] }
  0xc9   :  { %14658 = vmatpush3.bf16.msra.mxu1 %v14657_v15  ;;  %14647 = vmatprep.subr.bf16.mxu0 %v15892_v0  ;;  %v14708_v15 = vpack.c.bf16 %v376_v10, %v375_v9 }
  0xca   :  { %14659 = vmatprep.subr.bf16.mxu1 %v15892_v0 }
  0xcc   :  { %14649 = vmatpush3.bf16.msra.mxu0 %v14648_v20  ;;  %v14699_v20 = vpack.c.bf16 %v370_v17, %v369_v16  ;;  %v409_v16 = vld [vmem:[%s20774_s1 + $0x870] sm:$0xff]  ;;  %v410_v17 = vld [vmem:[%s20774_s1 + $0x878] sm:$0xff] }
  0xcd   :  { %14661 = vmatpush3.bf16.msra.mxu1 %v14660_v21  ;;  %14650 = vmatprep.subr.bf16.mxu0 %v15892_v0  ;;  %v14711_v21 = vpack.c.bf16 %v378_v19, %v377_v18  ;;  %v14759_v19 = vpack.c.bf16 %v410_v17, %v409_v16 }
  0xce   :  { %14662 = vmatprep.subr.bf16.mxu1 %v15892_v0 }
  0xd0   :  { %14652 = vmatpush3.bf16.msra.mxu0 %v14651_v26  ;;  %v39_v26 = vld [vmem:[%s20775_s0 + $0x38] sm:$0x3] }
  0xd1   :  { %14664 = vmatpush3.bf16.msra.mxu1 %v14663_v27  ;;  %14665 = vmatprep.subr.bf16.mxu0 %v15892_v0  ;;  %v14714_v27 = vpack.c.bf16 %v380_v23, %v379_v22  ;;  %v419_v22 = vld [vmem:[%s20774_s1 + $0x8c0] sm:$0xff]  ;;  %v420_v23 = vld [vmem:[%s20774_s1 + $0x8c8] sm:$0xff] }
  0xd2   :  { %14677 = vmatprep.subr.bf16.mxu1 %v15892_v0 }
  0xd3   :  { %12394 = vmatmul.mubr.msk.f32.vlgmr.msra.gmra.mrb[24].mxu0 %vm1163_vm1, %v35_v32  ;;  %v389_v32 = vld [vmem:[%s20774_s1 + $0x7d0] sm:$0xff] }
  0xd4   :  { %12413 = vmatmul.mubr.msk.f32.vlgmr.msra.gmra.mrb[24].mxu1 %vm1163_vm1, %v36_v34  ;;  %14667 = vmatpush3.bf16.msra.mxu0 %v14666_v33  ;;  %v390_v33 = vld [vmem:[%s20774_s1 + $0x7d8] sm:$0xff]  ;;  %v14717_v34 = vpack.c.bf16 %v382_v31, %v381_v30  ;;  %v421_v30 = vld [vmem:[%s20774_s1 + $0x8d0] sm:$0xff] }
  0xd5   :  { %14679 = vmatpush3.bf16.msra.mxu1 %v14678_v35  ;;  %14668 = vmatprep.subr.bf16.mxu0 %v15892_v0  ;;  %v14729_v35 = vpack.c.bf16 %v390_v33, %v389_v32  ;;  %v422_v31 = vld [vmem:[%s20774_s1 + $0x8d8] sm:$0xff] }
  0xd6   :  { %14680 = vmatprep.subr.bf16.mxu1 %v15892_v0  ;;  %12431 = vmatprep.mubr.msk.f32.mxu0 %vm15893_vm0, %v15894_v8  ;;  %v14777_v33 = vpack.c.bf16 %v422_v31, %v421_v30 }
  0xd7   :  { %12450 = vmatprep.mubr.msk.f32.mxu1 %vm15893_vm0, %v15894_v8 }
  0xd8   :  { %14670 = vmatpush3.bf16.msra.mxu0 %v14669_v40  ;;  %v392_v40 = vld [vmem:[%s20774_s1 + $0x7e8] sm:$0xff] }
  0xd9   :  { %14682 = vmatpush3.bf16.msra.mxu1 %v14681_v41  ;;  %14671 = vmatprep.subr.bf16.mxu0 %v15892_v0  ;;  %v14732_v45 = vpack.c.bf16 %v392_v40, %v391_v39 }
  0xda   :  { %14683 = vmatprep.subr.bf16.mxu1 %v15892_v0 }
  0xdc   :  { %14673 = vmatpush3.bf16.msra.mxu0 %v14672_v46  ;;  %v385_v46 = vld [vmem:[%s20774_s1 + $0x7b0] sm:$0xff] }
  0xdd   :  { %14685 = vmatpush3.bf16.msra.mxu1 %v14684_v47  ;;  %14674 = vmatprep.subr.bf16.mxu0 %v15892_v0  ;;  %v386_v47 = vld [vmem:[%s20774_s1 + $0x7b8] sm:$0xff] }
  0xde   :  { %14686 = vmatprep.subr.bf16.mxu1 %v15892_v0  ;;  %v14723_v50 = vpack.c.bf16 %v386_v47, %v385_v46  ;;  %v425_v46 = vld [vmem:[%s20774_s1 + $0x8f0] sm:$0xff]  ;;  %v426_v47 = vld [vmem:[%s20774_s1 + $0x8f8] sm:$0xff] }
  0xdf   :  { %v14783_v49 = vpack.c.bf16 %v426_v47, %v425_v46 }
  0xe0   :  { %14676 = vmatpush3.bf16.msra.mxu0 %v14675_v52  ;;  %v395_v52 = vld [vmem:[%s20774_s1 + $0x800] sm:$0xff] }
  0xe1   :  { %14688 = vmatpush3.bf16.msra.mxu1 %v14687_v53  ;;  %14689 = vmatprep.subr.bf16.mxu0 %v15892_v0  ;;  %v396_v53 = vld [vmem:[%s20774_s1 + $0x808] sm:$0xff] }
  0xe2   :  { %14701 = vmatprep.subr.bf16.mxu1 %v15892_v0  ;;  %v14738_v57 = vpack.c.bf16 %v396_v53, %v395_v52  ;;  %v435_v52 = vld [vmem:[%s20774_s1 + $0x940] sm:$0xff]  ;;  %v436_v53 = vld [vmem:[%s20774_s1 + $0x948] sm:$0xff] }
  0xe3   :  { %12432 = vmatmul.mubr.msk.f32.vlgmr.msra.gmra.mrb[26].mxu0 %vm1163_vm1, %v37_v58  ;;  %v42_v58 = vld [vmem:[%s20775_s0 + $0x3e] sm:$0x3] }
  0xe4   :  { %12451 = vmatmul.mubr.msk.f32.vlgmr.msra.gmra.mrb[26].mxu1 %vm1163_vm1, %v38_v60  ;;  %14691 = vmatpush3.bf16.msra.mxu0 %v14690_v59  ;;  %v14750_v59 = vpack.c.bf16 %v404_v55, %v403_v54  ;;  %v397_v60 = vld [vmem:[%s20774_s1 + $0x810] sm:$0xff]  ;;  %v45_v54 = vld [vmem:[%s20775_s0 + $0x44] sm:$0x3] }
  0xe5   :  { %14703 = vmatpush3.bf16.msra.mxu1 %v14702_v61  ;;  %14692 = vmatprep.subr.bf16.mxu0 %v15892_v0  ;;  %v398_v61 = vld [vmem:[%s20774_s1 + $0x818] sm:$0xff] }
  0xe6   :  { %v1233_v7 = vpop.f32.mrb[0].mxu0  ;;  %14704 = vmatprep.subr.bf16.mxu1 %v15892_v0  ;;  %12469 = vmatprep.mubr.msk.f32.mxu0 %vm15893_vm0, %v15894_v8  ;;  %v14741_v1 = vpack.c.bf16 %v398_v61, %v397_v60  ;;  %v437_v60 = vld [vmem:[%s20774_s1 + $0x950] sm:$0xff]  ;;  %v438_v61 = vld [vmem:[%s20774_s1 + $0x958] sm:$0xff] }
  0xe7   :  { %10509 = vst.msk [vmem:[%s20776_s2] sm:$0x3] %vm10508_vm2, %v1233_v7  ;;  %v1306_v11 = vpop.f32.mrb[0].mxu1  ;;  %v11939_v12 = vpop.f32.mrb[1].mxu0  ;;  %12488 = vmatprep.mubr.msk.f32.mxu1 %vm15893_vm0, %v15894_v8  ;;  %v408_v7 = vld [vmem:[%s20774_s1 + $0x868] sm:$0xff]  ;;  %v14801_v63 = vpack.c.bf16 %v438_v61, %v437_v60 }
  0xe8   :  { %10510 = vst.msk [vmem:[%s20776_s2 + $0x2] sm:$0x3] %vm10508_vm2, %v1306_v11  ;;  %v11958_v13 = vpop.f32.mrb[1].mxu1  ;;  %14694 = vmatpush3.bf16.msra.mxu0 %v14693_v3  ;;  %v399_v3 = vld [vmem:[%s20774_s1 + $0x820] sm:$0xff] }
  0xe9   :  { %14706 = vmatpush3.bf16.msra.mxu1 %v14705_v4  ;;  %14695 = vmatprep.subr.bf16.mxu0 %v15892_v0  ;;  %v400_v4 = vld [vmem:[%s20774_s1 + $0x828] sm:$0xff]  ;;  %v14756_v13 = vpack.c.bf16 %v408_v7, %v407_v6 }
  0xea   :  { %14707 = vmatprep.subr.bf16.mxu1 %v15892_v0  ;;  %v14744_v12 = vpack.c.bf16 %v400_v4, %v399_v3  ;;  %v439_v4 = vld [vmem:[%s20774_s1 + $0x960] sm:$0xff] }
  0xec   :  { %14697 = vmatpush3.bf16.msra.mxu0 %v14696_v14  ;;  %v401_v14 = vld [vmem:[%s20774_s1 + $0x830] sm:$0xff] }
  0xed   :  { %14709 = vmatpush3.bf16.msra.mxu1 %v14708_v15  ;;  %14698 = vmatprep.subr.bf16.mxu0 %v15892_v0  ;;  %v402_v15 = vld [vmem:[%s20774_s1 + $0x838] sm:$0xff] }
  0xee   :  { %14710 = vmatprep.subr.bf16.mxu1 %v15892_v0  ;;  %v14747_v18 = vpack.c.bf16 %v402_v15, %v401_v14  ;;  %v441_v14 = vld [vmem:[%s20774_s1 + $0x970] sm:$0xff]  ;;  %v442_v15 = vld [vmem:[%s20774_s1 + $0x978] sm:$0xff] }
  0xef   :  { %v14807_v17 = vpack.c.bf16 %v442_v15, %v441_v14 }
  0xf0   :  { %14700 = vmatpush3.bf16.msra.mxu0 %v14699_v20  ;;  %v411_v20 = vld [vmem:[%s20774_s1 + $0x880] sm:$0xff] }
  0xf1   :  { %14712 = vmatpush3.bf16.msra.mxu1 %v14711_v21  ;;  %14713 = vmatprep.subr.bf16.mxu0 %v15892_v0  ;;  %v412_v21 = vld [vmem:[%s20774_s1 + $0x888] sm:$0xff] }
  0xf2   :  { %14725 = vmatprep.subr.bf16.mxu1 %v15892_v0  ;;  %v14762_v25 = vpack.c.bf16 %v412_v21, %v411_v20  ;;  %v451_v20 = vld [vmem:[%s20774_s1 + $0x9c0] sm:$0xff]  ;;  %v452_v21 = vld [vmem:[%s20774_s1 + $0x9c8] sm:$0xff] }
  0xf3   :  { %12470 = vmatmul.mubr.msk.f32.vlgmr.msra.gmra.mrb[28].mxu0 %vm1163_vm1, %v39_v26  ;;  %v44_v26 = vld [vmem:[%s20775_s0 + $0x42] sm:$0x3] }
  0xf4   :  { %12489 = vmatmul.mubr.msk.f32.vlgmr.msra.gmra.mrb[28].mxu1 %vm1163_vm1, %v40_v28  ;;  %14715 = vmatpush3.bf16.msra.mxu0 %v14714_v27  ;;  %v14774_v27 = vpack.c.bf16 %v420_v23, %v419_v22  ;;  %v413_v28 = vld [vmem:[%s20774_s1 + $0x890] sm:$0xff]  ;;  %v47_v22 = vld [vmem:[%s20775_s0 + $0x48] sm:$0x3] }
  0xf5   :  { %14727 = vmatpush3.bf16.msra.mxu1 %v14726_v29  ;;  %14716 = vmatprep.subr.bf16.mxu0 %v15892_v0  ;;  %v414_v29 = vld [vmem:[%s20774_s1 + $0x898] sm:$0xff] }
  0xf6   :  { %v1379_v38 = vpop.f32.mrb[2].mxu0  ;;  %14728 = vmatprep.subr.bf16.mxu1 %v15892_v0  ;;  %12507 = vmatprep.mubr.msk.f32.mxu0 %vm15893_vm0, %v15894_v8  ;;  %v14765_v32 = vpack.c.bf16 %v414_v29, %v413_v28  ;;  %v453_v28 = vld [vmem:[%s20774_s1 + $0x9d0] sm:$0xff]  ;;  %v454_v29 = vld [vmem:[%s20774_s1 + $0x9d8] sm:$0xff] }
  0xf7   :  { %10511 = vst.msk [vmem:[%s20776_s2 + $0x4] sm:$0x3] %vm10508_vm2, %v1379_v38  ;;  %v1452_v41 = vpop.f32.mrb[2].mxu1  ;;  %v11977_v42 = vpop.f32.mrb[3].mxu0  ;;  %12526 = vmatprep.mubr.msk.f32.mxu1 %vm15893_vm0, %v15894_v8  ;;  %v424_v38 = vld [vmem:[%s20774_s1 + $0x8e8] sm:$0xff]  ;;  %v14825_v31 = vpack.c.bf16 %v454_v29, %v453_v28 }
  0xf8   :  { %10512 = vst.msk [vmem:[%s20776_s2 + $0x6] sm:$0x3] %vm10508_vm2, %v1452_v41  ;;  %v11996_v43 = vpop.f32.mrb[3].mxu1  ;;  %14718 = vmatpush3.bf16.msra.mxu0 %v14717_v34  ;;  %v415_v34 = vld [vmem:[%s20774_s1 + $0x8a0] sm:$0xff] }
  0xf9   :  { %14730 = vmatpush3.bf16.msra.mxu1 %v14729_v35  ;;  %14719 = vmatprep.subr.bf16.mxu0 %v15892_v0  ;;  %v416_v35 = vld [vmem:[%s20774_s1 + $0x8a8] sm:$0xff]  ;;  %v14780_v43 = vpack.c.bf16 %v424_v38, %v423_v37 }
  0xfa   :  { %14731 = vmatprep.subr.bf16.mxu1 %v15892_v0  ;;  %v14768_v42 = vpack.c.bf16 %v416_v35, %v415_v34  ;;  %v455_v35 = vld [vmem:[%s20774_s1 + $0x9e0] sm:$0xff] }
  0xfc   :  { %14721 = vmatpush3.bf16.msra.mxu0 %v14720_v44  ;;  %v417_v44 = vld [vmem:[%s20774_s1 + $0x8b0] sm:$0xff] }
  0xfd   :  { %14733 = vmatpush3.bf16.msra.mxu1 %v14732_v45  ;;  %14722 = vmatprep.subr.bf16.mxu0 %v15892_v0  ;;  %v418_v45 = vld [vmem:[%s20774_s1 + $0x8b8] sm:$0xff] }
  0xfe   :  { %14734 = vmatprep.subr.bf16.mxu1 %v15892_v0  ;;  %v14771_v48 = vpack.c.bf16 %v418_v45, %v417_v44  ;;  %v457_v44 = vld [vmem:[%s20774_s1 + $0x9f0] sm:$0xff]  ;;  %v458_v45 = vld [vmem:[%s20774_s1 + $0x9f8] sm:$0xff] }
  0xff   :  { %v14831_v47 = vpack.c.bf16 %v458_v45, %v457_v44 }
 0x100   :  { %14724 = vmatpush3.bf16.msra.mxu0 %v14723_v50  ;;  %v427_v50 = vld [vmem:[%s20774_s1 + $0x900] sm:$0xff] }
 0x101   :  { %14736 = vmatpush3.bf16.msra.mxu1 %v14735_v51  ;;  %14737 = vmatprep.subr.bf16.mxu0 %v15892_v0  ;;  %v428_v51 = vld [vmem:[%s20774_s1 + $0x908] sm:$0xff] }
 0x102   :  { %14749 = vmatprep.subr.bf16.mxu1 %v15892_v0  ;;  %v14786_v55 = vpack.c.bf16 %v428_v51, %v427_v50  ;;  %v467_v50 = vld [vmem:[%s20774_s1 + $0xa40] sm:$0xff]  ;;  %v468_v51 = vld [vmem:[%s20774_s1 + $0xa48] sm:$0xff] }
 0x103   :  { %12508 = vmatmul.mubr.msk.f32.vlgmr.msra.gmra.mrb[30].mxu0 %vm1163_vm1, %v41_v56  ;;  %v46_v56 = vld [vmem:[%s20775_s0 + $0x46] sm:$0x3] }
 0x104   :  { %12527 = vmatmul.mubr.msk.f32.vlgmr.msra.gmra.mrb[30].mxu1 %vm1163_vm1, %v42_v58  ;;  %14739 = vmatpush3.bf16.msra.mxu0 %v14738_v57  ;;  %v14798_v57 = vpack.c.bf16 %v436_v53, %v435_v52  ;;  %v429_v58 = vld [vmem:[%s20774_s1 + $0x910] sm:$0xff]  ;;  %v49_v52 = vld [vmem:[%s20775_s0 + $0x4c] sm:$0x3] }
 0x105   :  { %14751 = vmatpush3.bf16.msra.mxu1 %v14750_v59  ;;  %14740 = vmatprep.subr.bf16.mxu0 %v15892_v0  ;;  %v430_v59 = vld [vmem:[%s20774_s1 + $0x918] sm:$0xff] }
 0x106   :  { %v1525_v5 = vpop.f32.mrb[4].mxu0  ;;  %14752 = vmatprep.subr.bf16.mxu1 %v15892_v0  ;;  %12545 = vmatprep.mubr.msk.f32.mxu0 %vm15893_vm0, %v15894_v8  ;;  %v14789_v62 = vpack.c.bf16 %v430_v59, %v429_v58  ;;  %v469_v58 = vld [vmem:[%s20774_s1 + $0xa50] sm:$0xff]  ;;  %v470_v59 = vld [vmem:[%s20774_s1 + $0xa58] sm:$0xff] }
 0x107   :  { %10513 = vst.msk [vmem:[%s20776_s2 + $0x8] sm:$0x3] %vm10508_vm2, %v1525_v5  ;;  %v1598_v9 = vpop.f32.mrb[4].mxu1  ;;  %v12015_v10 = vpop.f32.mrb[5].mxu0  ;;  %12564 = vmatprep.mubr.msk.f32.mxu1 %vm15893_vm0, %v15894_v8  ;;  %v440_v5 = vld [vmem:[%s20774_s1 + $0x968] sm:$0xff]  ;;  %v14849_v61 = vpack.c.bf16 %v470_v59, %v469_v58 }
 0x108   :  { %10514 = vst.msk [vmem:[%s20776_s2 + $0xa] sm:$0x3] %vm10508_vm2, %v1598_v9  ;;  %v12034_v11 = vpop.f32.mrb[5].mxu1  ;;  %14742 = vmatpush3.bf16.msra.mxu0 %v14741_v1  ;;  %v431_v1 = vld [vmem:[%s20774_s1 + $0x920] sm:$0xff] }
 0x109   :  { %14754 = vmatpush3.bf16.msra.mxu1 %v14753_v2  ;;  %14743 = vmatprep.subr.bf16.mxu0 %v15892_v0  ;;  %v432_v2 = vld [vmem:[%s20774_s1 + $0x928] sm:$0xff]  ;;  %v14804_v11 = vpack.c.bf16 %v440_v5, %v439_v4 }
 0x10a   :  { %14755 = vmatprep.subr.bf16.mxu1 %v15892_v0  ;;  %v14792_v10 = vpack.c.bf16 %v432_v2, %v431_v1  ;;  %v471_v2 = vld [vmem:[%s20774_s1 + $0xa60] sm:$0xff] }
 0x10c   :  { %14745 = vmatpush3.bf16.msra.mxu0 %v14744_v12  ;;  %v433_v12 = vld [vmem:[%s20774_s1 + $0x930] sm:$0xff] }
 0x10d   :  { %14757 = vmatpush3.bf16.msra.mxu1 %v14756_v13  ;;  %14746 = vmatprep.subr.bf16.mxu0 %v15892_v0  ;;  %v434_v13 = vld [vmem:[%s20774_s1 + $0x938] sm:$0xff] }
 0x10e   :  { %14758 = vmatprep.subr.bf16.mxu1 %v15892_v0  ;;  %v14795_v16 = vpack.c.bf16 %v434_v13, %v433_v12  ;;  %v473_v12 = vld [vmem:[%s20774_s1 + $0xa70] sm:$0xff]  ;;  %v474_v13 = vld [vmem:[%s20774_s1 + $0xa78] sm:$0xff] }
 0x10f   :  { %v14855_v15 = vpack.c.bf16 %v474_v13, %v473_v12 }
 0x110   :  { %14748 = vmatpush3.bf16.msra.mxu0 %v14747_v18  ;;  %v443_v18 = vld [vmem:[%s20774_s1 + $0x980] sm:$0xff] }
 0x111   :  { %14760 = vmatpush3.bf16.msra.mxu1 %v14759_v19  ;;  %14761 = vmatprep.subr.bf16.mxu0 %v15892_v0  ;;  %v444_v19 = vld [vmem:[%s20774_s1 + $0x988] sm:$0xff] }
 0x112   :  { %14773 = vmatprep.subr.bf16.mxu1 %v15892_v0  ;;  %v14810_v23 = vpack.c.bf16 %v444_v19, %v443_v18  ;;  %v483_v18 = vld [vmem:[%s20774_s1 + $0xac0] sm:$0xff]  ;;  %v484_v19 = vld [vmem:[%s20774_s1 + $0xac8] sm:$0xff] }
 0x113   :  { %12546 = vmatmul.mubr.msk.f32.vlgmr.msra.gmra.mrb[32].mxu0 %vm1163_vm1, %v43_v24  ;;  %v48_v24 = vld [vmem:[%s20775_s0 + $0x4a] sm:$0x3] }
 0x114   :  { %12565 = vmatmul.mubr.msk.f32.vlgmr.msra.gmra.mrb[32].mxu1 %vm1163_vm1, %v44_v26  ;;  %14763 = vmatpush3.bf16.msra.mxu0 %v14762_v25  ;;  %v14822_v25 = vpack.c.bf16 %v452_v21, %v451_v20  ;;  %v445_v26 = vld [vmem:[%s20774_s1 + $0x990] sm:$0xff] }
 0x115   :  { %14775 = vmatpush3.bf16.msra.mxu1 %v14774_v27  ;;  %14764 = vmatprep.subr.bf16.mxu0 %v15892_v0  ;;  %v446_v27 = vld [vmem:[%s20774_s1 + $0x998] sm:$0xff]  ;;  %v51_v20 = vld [vmem:[%s20775_s0 + $0x50] sm:$0x3] }
 0x116   :  { %v1671_v36 = vpop.f32.mrb[6].mxu0  ;;  %14776 = vmatprep.subr.bf16.mxu1 %v15892_v0  ;;  %12583 = vmatprep.mubr.msk.f32.mxu0 %vm15893_vm0, %v15894_v8  ;;  %v14813_v30 = vpack.c.bf16 %v446_v27, %v445_v26  ;;  %v485_v26 = vld [vmem:[%s20774_s1 + $0xad0] sm:$0xff]  ;;  %v486_v27 = vld [vmem:[%s20774_s1 + $0xad8] sm:$0xff] }
 0x117   :  { %10515 = vst.msk [vmem:[%s20776_s2 + $0xc] sm:$0x3] %vm10508_vm2, %v1671_v36  ;;  %v1744_v39 = vpop.f32.mrb[6].mxu1  ;;  %v12053_v40 = vpop.f32.mrb[7].mxu0  ;;  %12602 = vmatprep.mubr.msk.f32.mxu1 %vm15893_vm0, %v15894_v8  ;;  %v456_v36 = vld [vmem:[%s20774_s1 + $0x9e8] sm:$0xff]  ;;  %v14873_v29 = vpack.c.bf16 %v486_v27, %v485_v26 }
 0x118   :  { %10516 = vst.msk [vmem:[%s20776_s2 + $0xe] sm:$0x3] %vm10508_vm2, %v1744_v39  ;;  %v12072_v41 = vpop.f32.mrb[7].mxu1  ;;  %14766 = vmatpush3.bf16.msra.mxu0 %v14765_v32  ;;  %v447_v32 = vld [vmem:[%s20774_s1 + $0x9a0] sm:$0xff] }
 0x119   :  { %14778 = vmatpush3.bf16.msra.mxu1 %v14777_v33  ;;  %14767 = vmatprep.subr.bf16.mxu0 %v15892_v0  ;;  %v448_v33 = vld [vmem:[%s20774_s1 + $0x9a8] sm:$0xff]  ;;  %v14828_v41 = vpack.c.bf16 %v456_v36, %v455_v35 }
 0x11a   :  { %14779 = vmatprep.subr.bf16.mxu1 %v15892_v0  ;;  %v14816_v40 = vpack.c.bf16 %v448_v33, %v447_v32  ;;  %v487_v33 = vld [vmem:[%s20774_s1 + $0xae0] sm:$0xff] }
 0x11c   :  { %14769 = vmatpush3.bf16.msra.mxu0 %v14768_v42  ;;  %v449_v42 = vld [vmem:[%s20774_s1 + $0x9b0] sm:$0xff] }
 0x11d   :  { %14781 = vmatpush3.bf16.msra.mxu1 %v14780_v43  ;;  %14770 = vmatprep.subr.bf16.mxu0 %v15892_v0  ;;  %v450_v43 = vld [vmem:[%s20774_s1 + $0x9b8] sm:$0xff] }
 0x11e   :  { %14782 = vmatprep.subr.bf16.mxu1 %v15892_v0  ;;  %v14819_v46 = vpack.c.bf16 %v450_v43, %v449_v42  ;;  %v489_v42 = vld [vmem:[%s20774_s1 + $0xaf0] sm:$0xff]  ;;  %v490_v43 = vld [vmem:[%s20774_s1 + $0xaf8] sm:$0xff] }
 0x11f   :  { %v14879_v45 = vpack.c.bf16 %v490_v43, %v489_v42 }
 0x120   :  { %14772 = vmatpush3.bf16.msra.mxu0 %v14771_v48  ;;  %v459_v48 = vld [vmem:[%s20774_s1 + $0xa00] sm:$0xff] }
 0x121   :  { %14784 = vmatpush3.bf16.msra.mxu1 %v14783_v49  ;;  %14785 = vmatprep.subr.bf16.mxu0 %v15892_v0  ;;  %v460_v49 = vld [vmem:[%s20774_s1 + $0xa08] sm:$0xff] }
 0x122   :  { %14797 = vmatprep.subr.bf16.mxu1 %v15892_v0  ;;  %v14834_v53 = vpack.c.bf16 %v460_v49, %v459_v48  ;;  %v499_v48 = vld [vmem:[%s20774_s1 + $0xb40] sm:$0xff]  ;;  %v500_v49 = vld [vmem:[%s20774_s1 + $0xb48] sm:$0xff] }
 0x123   :  { %12584 = vmatmul.mubr.msk.f32.vlgmr.msra.gmra.mrb[34].mxu0 %vm1163_vm1, %v45_v54  ;;  %v50_v54 = vld [vmem:[%s20775_s0 + $0x4e] sm:$0x3] }
 0x124   :  { %12603 = vmatmul.mubr.msk.f32.vlgmr.msra.gmra.mrb[34].mxu1 %vm1163_vm1, %v46_v56  ;;  %14787 = vmatpush3.bf16.msra.mxu0 %v14786_v55  ;;  %v14846_v55 = vpack.c.bf16 %v468_v51, %v467_v50  ;;  %v461_v56 = vld [vmem:[%s20774_s1 + $0xa10] sm:$0xff] }
 0x125   :  { %14799 = vmatpush3.bf16.msra.mxu1 %v14798_v57  ;;  %14788 = vmatprep.subr.bf16.mxu0 %v15892_v0  ;;  %v462_v57 = vld [vmem:[%s20774_s1 + $0xa18] sm:$0xff]  ;;  %v53_v50 = vld [vmem:[%s20775_s0 + $0x54] sm:$0x3] }
 0x126   :  { %v1817_v3 = vpop.f32.mrb[8].mxu0  ;;  %14800 = vmatprep.subr.bf16.mxu1 %v15892_v0  ;;  %12621 = vmatprep.mubr.msk.f32.mxu0 %vm15893_vm0, %v15894_v8  ;;  %v14837_v60 = vpack.c.bf16 %v462_v57, %v461_v56  ;;  %v501_v56 = vld [vmem:[%s20774_s1 + $0xb50] sm:$0xff]  ;;  %v502_v57 = vld [vmem:[%s20774_s1 + $0xb58] sm:$0xff] }
 0x127   :  { %10517 = vst.msk [vmem:[%s20776_s2 + $0x10] sm:$0x3] %vm10508_vm2, %v1817_v3  ;;  %v1890_v6 = vpop.f32.mrb[8].mxu1  ;;  %v12091_v7 = vpop.f32.mrb[9].mxu0  ;;  %12640 = vmatprep.mubr.msk.f32.mxu1 %vm15893_vm0, %v15894_v8  ;;  %v472_v3 = vld [vmem:[%s20774_s1 + $0xa68] sm:$0xff]  ;;  %v14897_v59 = vpack.c.bf16 %v502_v57, %v501_v56 }
 0x128   :  { %10518 = vst.msk [vmem:[%s20776_s2 + $0x12] sm:$0x3] %vm10508_vm2, %v1890_v6  ;;  %v12110_v9 = vpop.f32.mrb[9].mxu1  ;;  %14790 = vmatpush3.bf16.msra.mxu0 %v14789_v62  ;;  %v463_v62 = vld [vmem:[%s20774_s1 + $0xa20] sm:$0xff] }
 0x129   :  { %14802 = vmatpush3.bf16.msra.mxu1 %v14801_v63  ;;  %14791 = vmatprep.subr.bf16.mxu0 %v15892_v0  ;;  %v464_v63 = vld [vmem:[%s20774_s1 + $0xa28] sm:$0xff]  ;;  %v14852_v9 = vpack.c.bf16 %v472_v3, %v471_v2 }
 0x12a   :  { %14803 = vmatprep.subr.bf16.mxu1 %v15892_v0  ;;  %v14840_v7 = vpack.c.bf16 %v464_v63, %v463_v62  ;;  %v503_v63 = vld [vmem:[%s20774_s1 + $0xb60] sm:$0xff] }
 0x12c   :  { %14793 = vmatpush3.bf16.msra.mxu0 %v14792_v10  ;;  %v465_v10 = vld [vmem:[%s20774_s1 + $0xa30] sm:$0xff] }
 0x12d   :  { %14805 = vmatpush3.bf16.msra.mxu1 %v14804_v11  ;;  %14794 = vmatprep.subr.bf16.mxu0 %v15892_v0  ;;  %v466_v11 = vld [vmem:[%s20774_s1 + $0xa38] sm:$0xff] }
 0x12e   :  { %14806 = vmatprep.subr.bf16.mxu1 %v15892_v0  ;;  %v14843_v14 = vpack.c.bf16 %v466_v11, %v465_v10  ;;  %v505_v10 = vld [vmem:[%s20774_s1 + $0xb70] sm:$0xff]  ;;  %v506_v11 = vld [vmem:[%s20774_s1 + $0xb78] sm:$0xff] }
 0x12f   :  { %v14903_v13 = vpack.c.bf16 %v506_v11, %v505_v10 }
 0x130   :  { %14796 = vmatpush3.bf16.msra.mxu0 %v14795_v16  ;;  %v475_v16 = vld [vmem:[%s20774_s1 + $0xa80] sm:$0xff] }
 0x131   :  { %14808 = vmatpush3.bf16.msra.mxu1 %v14807_v17  ;;  %14809 = vmatprep.subr.bf16.mxu0 %v15892_v0  ;;  %v476_v17 = vld [vmem:[%s20774_s1 + $0xa88] sm:$0xff] }
 0x132   :  { %14821 = vmatprep.subr.bf16.mxu1 %v15892_v0  ;;  %v14858_v21 = vpack.c.bf16 %v476_v17, %v475_v16  ;;  %v515_v16 = vld [vmem:[%s20774_s1 + $0xbc0] sm:$0xff]  ;;  %v516_v17 = vld [vmem:[%s20774_s1 + $0xbc8] sm:$0xff] }
 0x133   :  { %12622 = vmatmul.mubr.msk.f32.vlgmr.msra.gmra.mrb[36].mxu0 %vm1163_vm1, %v47_v22  ;;  %v52_v22 = vld [vmem:[%s20775_s0 + $0x52] sm:$0x3] }
 0x134   :  { %12641 = vmatmul.mubr.msk.f32.vlgmr.msra.gmra.mrb[36].mxu1 %vm1163_vm1, %v48_v24  ;;  %14811 = vmatpush3.bf16.msra.mxu0 %v14810_v23  ;;  %v14870_v23 = vpack.c.bf16 %v484_v19, %v483_v18  ;;  %v477_v24 = vld [vmem:[%s20774_s1 + $0xa90] sm:$0xff]  ;;  %v55_v18 = vld [vmem:[%s20775_s0 + $0x58] sm:$0x3] }
 0x135   :  { %14823 = vmatpush3.bf16.msra.mxu1 %v14822_v25  ;;  %14812 = vmatprep.subr.bf16.mxu0 %v15892_v0  ;;  %v478_v25 = vld [vmem:[%s20774_s1 + $0xa98] sm:$0xff] }
 0x136   :  { %v1963_v34 = vpop.f32.mrb[10].mxu0  ;;  %14824 = vmatprep.subr.bf16.mxu1 %v15892_v0  ;;  %12659 = vmatprep.mubr.msk.f32.mxu0 %vm15893_vm0, %v15894_v8  ;;  %v14861_v28 = vpack.c.bf16 %v478_v25, %v477_v24  ;;  %v517_v24 = vld [vmem:[%s20774_s1 + $0xbd0] sm:$0xff]  ;;  %v518_v25 = vld [vmem:[%s20774_s1 + $0xbd8] sm:$0xff] }
 0x137   :  { %10519 = vst.msk [vmem:[%s20776_s2 + $0x14] sm:$0x3] %vm10508_vm2, %v1963_v34  ;;  %v2036_v37 = vpop.f32.mrb[10].mxu1  ;;  %v12129_v38 = vpop.f32.mrb[11].mxu0  ;;  %12678 = vmatprep.mubr.msk.f32.mxu1 %vm15893_vm0, %v15894_v8  ;;  %v488_v34 = vld [vmem:[%s20774_s1 + $0xae8] sm:$0xff]  ;;  %v14921_v27 = vpack.c.bf16 %v518_v25, %v517_v24 }
 0x138   :  { %10520 = vst.msk [vmem:[%s20776_s2 + $0x16] sm:$0x3] %vm10508_vm2, %v2036_v37  ;;  %v12148_v39 = vpop.f32.mrb[11].mxu1  ;;  %14814 = vmatpush3.bf16.msra.mxu0 %v14813_v30  ;;  %v479_v30 = vld [vmem:[%s20774_s1 + $0xaa0] sm:$0xff] }
 0x139   :  { %14826 = vmatpush3.bf16.msra.mxu1 %v14825_v31  ;;  %14815 = vmatprep.subr.bf16.mxu0 %v15892_v0  ;;  %v480_v31 = vld [vmem:[%s20774_s1 + $0xaa8] sm:$0xff]  ;;  %v14876_v39 = vpack.c.bf16 %v488_v34, %v487_v33 }
 0x13a   :  { %14827 = vmatprep.subr.bf16.mxu1 %v15892_v0  ;;  %v14864_v38 = vpack.c.bf16 %v480_v31, %v479_v30  ;;  %v519_v31 = vld [vmem:[%s20774_s1 + $0xbe0] sm:$0xff] }
 0x13c   :  { %14817 = vmatpush3.bf16.msra.mxu0 %v14816_v40  ;;  %v481_v40 = vld [vmem:[%s20774_s1 + $0xab0] sm:$0xff] }
 0x13d   :  { %14829 = vmatpush3.bf16.msra.mxu1 %v14828_v41  ;;  %14818 = vmatprep.subr.bf16.mxu0 %v15892_v0  ;;  %v482_v41 = vld [vmem:[%s20774_s1 + $0xab8] sm:$0xff] }
 0x13e   :  { %14830 = vmatprep.subr.bf16.mxu1 %v15892_v0  ;;  %v14867_v44 = vpack.c.bf16 %v482_v41, %v481_v40  ;;  %v521_v40 = vld [vmem:[%s20774_s1 + $0xbf0] sm:$0xff]  ;;  %v522_v41 = vld [vmem:[%s20774_s1 + $0xbf8] sm:$0xff] }
 0x13f   :  { %v14927_v43 = vpack.c.bf16 %v522_v41, %v521_v40 }
 0x140   :  { %14820 = vmatpush3.bf16.msra.mxu0 %v14819_v46  ;;  %v491_v46 = vld [vmem:[%s20774_s1 + $0xb00] sm:$0xff] }
 0x141   :  { %14832 = vmatpush3.bf16.msra.mxu1 %v14831_v47  ;;  %14833 = vmatprep.subr.bf16.mxu0 %v15892_v0  ;;  %v492_v47 = vld [vmem:[%s20774_s1 + $0xb08] sm:$0xff] }
 0x142   :  { %14845 = vmatprep.subr.bf16.mxu1 %v15892_v0  ;;  %v14882_v51 = vpack.c.bf16 %v492_v47, %v491_v46  ;;  %v531_v46 = vld [vmem:[%s20774_s1 + $0xc40] sm:$0xff]  ;;  %v532_v47 = vld [vmem:[%s20774_s1 + $0xc48] sm:$0xff] }
 0x143   :  { %12660 = vmatmul.mubr.msk.f32.vlgmr.msra.gmra.mrb[38].mxu0 %vm1163_vm1, %v49_v52  ;;  %v54_v52 = vld [vmem:[%s20775_s0 + $0x56] sm:$0x3] }
 0x144   :  { %12679 = vmatmul.mubr.msk.f32.vlgmr.msra.gmra.mrb[38].mxu1 %vm1163_vm1, %v50_v54  ;;  %14835 = vmatpush3.bf16.msra.mxu0 %v14834_v53  ;;  %v14894_v53 = vpack.c.bf16 %v500_v49, %v499_v48  ;;  %v493_v54 = vld [vmem:[%s20774_s1 + $0xb10] sm:$0xff]  ;;  %v57_v48 = vld [vmem:[%s20775_s0 + $0x5c] sm:$0x3] }
 0x145   :  { %14847 = vmatpush3.bf16.msra.mxu1 %v14846_v55  ;;  %14836 = vmatprep.subr.bf16.mxu0 %v15892_v0  ;;  %v494_v55 = vld [vmem:[%s20774_s1 + $0xb18] sm:$0xff] }
 0x146   :  { %v2109_v1 = vpop.f32.mrb[12].mxu0  ;;  %14848 = vmatprep.subr.bf16.mxu1 %v15892_v0  ;;  %12697 = vmatprep.mubr.msk.f32.mxu0 %vm15893_vm0, %v15894_v8  ;;  %v14885_v58 = vpack.c.bf16 %v494_v55, %v493_v54  ;;  %v533_v54 = vld [vmem:[%s20774_s1 + $0xc50] sm:$0xff]  ;;  %v534_v55 = vld [vmem:[%s20774_s1 + $0xc58] sm:$0xff] }
 0x147   :  { %10521 = vst.msk [vmem:[%s20776_s2 + $0x18] sm:$0x3] %vm10508_vm2, %v2109_v1  ;;  %v2182_v4 = vpop.f32.mrb[12].mxu1  ;;  %v12167_v5 = vpop.f32.mrb[13].mxu0  ;;  %12716 = vmatprep.mubr.msk.f32.mxu1 %vm15893_vm0, %v15894_v8  ;;  %v504_v1 = vld [vmem:[%s20774_s1 + $0xb68] sm:$0xff]  ;;  %v14945_v57 = vpack.c.bf16 %v534_v55, %v533_v54 }
 0x148   :  { %10522 = vst.msk [vmem:[%s20776_s2 + $0x1a] sm:$0x3] %vm10508_vm2, %v2182_v4  ;;  %v12186_v6 = vpop.f32.mrb[13].mxu1  ;;  %14838 = vmatpush3.bf16.msra.mxu0 %v14837_v60  ;;  %v495_v60 = vld [vmem:[%s20774_s1 + $0xb20] sm:$0xff] }
 0x149   :  { %14850 = vmatpush3.bf16.msra.mxu1 %v14849_v61  ;;  %14839 = vmatprep.subr.bf16.mxu0 %v15892_v0  ;;  %v496_v61 = vld [vmem:[%s20774_s1 + $0xb28] sm:$0xff]  ;;  %v14900_v6 = vpack.c.bf16 %v504_v1, %v503_v63 }
 0x14a   :  { %14851 = vmatprep.subr.bf16.mxu1 %v15892_v0  ;;  %v14888_v5 = vpack.c.bf16 %v496_v61, %v495_v60  ;;  %v535_v61 = vld [vmem:[%s20774_s1 + $0xc60] sm:$0xff] }
 0x14c   :  { %14841 = vmatpush3.bf16.msra.mxu0 %v14840_v7  ;;  %v497_v7 = vld [vmem:[%s20774_s1 + $0xb30] sm:$0xff] }
 0x14d   :  { %14853 = vmatpush3.bf16.msra.mxu1 %v14852_v9  ;;  %14842 = vmatprep.subr.bf16.mxu0 %v15892_v0  ;;  %v498_v9 = vld [vmem:[%s20774_s1 + $0xb38] sm:$0xff] }
 0x14e   :  { %14854 = vmatprep.subr.bf16.mxu1 %v15892_v0  ;;  %v14891_v12 = vpack.c.bf16 %v498_v9, %v497_v7  ;;  %v537_v7 = vld [vmem:[%s20774_s1 + $0xc70] sm:$0xff]  ;;  %v538_v9 = vld [vmem:[%s20774_s1 + $0xc78] sm:$0xff] }
 0x14f   :  { %v14951_v11 = vpack.c.bf16 %v538_v9, %v537_v7 }
 0x150   :  { %14844 = vmatpush3.bf16.msra.mxu0 %v14843_v14  ;;  %v507_v14 = vld [vmem:[%s20774_s1 + $0xb80] sm:$0xff] }
 0x151   :  { %14856 = vmatpush3.bf16.msra.mxu1 %v14855_v15  ;;  %14857 = vmatprep.subr.bf16.mxu0 %v15892_v0  ;;  %v508_v15 = vld [vmem:[%s20774_s1 + $0xb88] sm:$0xff] }
 0x152   :  { %14869 = vmatprep.subr.bf16.mxu1 %v15892_v0  ;;  %v14906_v19 = vpack.c.bf16 %v508_v15, %v507_v14  ;;  %v547_v14 = vld [vmem:[%s20774_s1 + $0xcc0] sm:$0xff]  ;;  %v548_v15 = vld [vmem:[%s20774_s1 + $0xcc8] sm:$0xff] }
 0x153   :  { %12698 = vmatmul.mubr.msk.f32.vlgmr.msra.gmra.mrb[40].mxu0 %vm1163_vm1, %v51_v20  ;;  %v56_v20 = vld [vmem:[%s20775_s0 + $0x5a] sm:$0x3] }
 0x154   :  { %12717 = vmatmul.mubr.msk.f32.vlgmr.msra.gmra.mrb[40].mxu1 %vm1163_vm1, %v52_v22  ;;  %14859 = vmatpush3.bf16.msra.mxu0 %v14858_v21  ;;  %v14918_v21 = vpack.c.bf16 %v516_v17, %v515_v16  ;;  %v509_v22 = vld [vmem:[%s20774_s1 + $0xb90] sm:$0xff]  ;;  %v59_v16 = vld [vmem:[%s20775_s0 + $0x60] sm:$0x3] }
 0x155   :  { %14871 = vmatpush3.bf16.msra.mxu1 %v14870_v23  ;;  %14860 = vmatprep.subr.bf16.mxu0 %v15892_v0  ;;  %v510_v23 = vld [vmem:[%s20774_s1 + $0xb98] sm:$0xff] }
 0x156   :  { %v2255_v32 = vpop.f32.mrb[14].mxu0  ;;  %14872 = vmatprep.subr.bf16.mxu1 %v15892_v0  ;;  %12735 = vmatprep.mubr.msk.f32.mxu0 %vm15893_vm0, %v15894_v8  ;;  %v14909_v26 = vpack.c.bf16 %v510_v23, %v509_v22  ;;  %v549_v22 = vld [vmem:[%s20774_s1 + $0xcd0] sm:$0xff]  ;;  %v550_v23 = vld [vmem:[%s20774_s1 + $0xcd8] sm:$0xff] }
 0x157   :  { %10523 = vst.msk [vmem:[%s20776_s2 + $0x1c] sm:$0x3] %vm10508_vm2, %v2255_v32  ;;  %v2328_v35 = vpop.f32.mrb[14].mxu1  ;;  %v12205_v36 = vpop.f32.mrb[15].mxu0  ;;  %12754 = vmatprep.mubr.msk.f32.mxu1 %vm15893_vm0, %v15894_v8  ;;  %v520_v32 = vld [vmem:[%s20774_s1 + $0xbe8] sm:$0xff]  ;;  %v14969_v25 = vpack.c.bf16 %v550_v23, %v549_v22 }
 0x158   :  { %10524 = vst.msk [vmem:[%s20776_s2 + $0x1e] sm:$0x3] %vm10508_vm2, %v2328_v35  ;;  %v12224_v37 = vpop.f32.mrb[15].mxu1  ;;  %14862 = vmatpush3.bf16.msra.mxu0 %v14861_v28  ;;  %v511_v28 = vld [vmem:[%s20774_s1 + $0xba0] sm:$0xff] }
 0x159   :  { %14874 = vmatpush3.bf16.msra.mxu1 %v14873_v29  ;;  %14863 = vmatprep.subr.bf16.mxu0 %v15892_v0  ;;  %v512_v29 = vld [vmem:[%s20774_s1 + $0xba8] sm:$0xff]  ;;  %v14924_v37 = vpack.c.bf16 %v520_v32, %v519_v31 }
 0x15a   :  { %14875 = vmatprep.subr.bf16.mxu1 %v15892_v0  ;;  %v14912_v36 = vpack.c.bf16 %v512_v29, %v511_v28  ;;  %v551_v29 = vld [vmem:[%s20774_s1 + $0xce0] sm:$0xff] }
 0x15c   :  { %14865 = vmatpush3.bf16.msra.mxu0 %v14864_v38  ;;  %v513_v38 = vld [vmem:[%s20774_s1 + $0xbb0] sm:$0xff] }
 0x15d   :  { %14877 = vmatpush3.bf16.msra.mxu1 %v14876_v39  ;;  %14866 = vmatprep.subr.bf16.mxu0 %v15892_v0  ;;  %v514_v39 = vld [vmem:[%s20774_s1 + $0xbb8] sm:$0xff] }
 0x15e   :  { %14878 = vmatprep.subr.bf16.mxu1 %v15892_v0  ;;  %v14915_v42 = vpack.c.bf16 %v514_v39, %v513_v38  ;;  %v553_v38 = vld [vmem:[%s20774_s1 + $0xcf0] sm:$0xff]  ;;  %v554_v39 = vld [vmem:[%s20774_s1 + $0xcf8] sm:$0xff] }
 0x15f   :  { %v14975_v41 = vpack.c.bf16 %v554_v39, %v553_v38 }
 0x160   :  { %14868 = vmatpush3.bf16.msra.mxu0 %v14867_v44  ;;  %v523_v44 = vld [vmem:[%s20774_s1 + $0xc00] sm:$0xff] }
 0x161   :  { %14880 = vmatpush3.bf16.msra.mxu1 %v14879_v45  ;;  %14881 = vmatprep.subr.bf16.mxu0 %v15892_v0  ;;  %v524_v45 = vld [vmem:[%s20774_s1 + $0xc08] sm:$0xff] }
 0x162   :  { %14893 = vmatprep.subr.bf16.mxu1 %v15892_v0  ;;  %v14930_v49 = vpack.c.bf16 %v524_v45, %v523_v44  ;;  %v563_v44 = vld [vmem:[%s20774_s1 + $0xd40] sm:$0xff]  ;;  %v564_v45 = vld [vmem:[%s20774_s1 + $0xd48] sm:$0xff] }
 0x163   :  { %12736 = vmatmul.mubr.msk.f32.vlgmr.msra.gmra.mrb[42].mxu0 %vm1163_vm1, %v53_v50  ;;  %v58_v50 = vld [vmem:[%s20775_s0 + $0x5e] sm:$0x3] }
 0x164   :  { %12755 = vmatmul.mubr.msk.f32.vlgmr.msra.gmra.mrb[42].mxu1 %vm1163_vm1, %v54_v52  ;;  %14883 = vmatpush3.bf16.msra.mxu0 %v14882_v51  ;;  %v14942_v51 = vpack.c.bf16 %v532_v47, %v531_v46  ;;  %v525_v52 = vld [vmem:[%s20774_s1 + $0xc10] sm:$0xff]  ;;  %v61_v46 = vld [vmem:[%s20775_s0 + $0x64] sm:$0x3] }
 0x165   :  { %14895 = vmatpush3.bf16.msra.mxu1 %v14894_v53  ;;  %14884 = vmatprep.subr.bf16.mxu0 %v15892_v0  ;;  %v526_v53 = vld [vmem:[%s20774_s1 + $0xc18] sm:$0xff] }
 0x166   :  { %v2401_v62 = vpop.f32.mrb[16].mxu0  ;;  %14896 = vmatprep.subr.bf16.mxu1 %v15892_v0  ;;  %12773 = vmatprep.mubr.msk.f32.mxu0 %vm15893_vm0, %v15894_v8  ;;  %v14933_v56 = vpack.c.bf16 %v526_v53, %v525_v52  ;;  %v565_v52 = vld [vmem:[%s20774_s1 + $0xd50] sm:$0xff]  ;;  %v566_v53 = vld [vmem:[%s20774_s1 + $0xd58] sm:$0xff] }
 0x167   :  { %10525 = vst.msk [vmem:[%s20776_s2 + $0x20] sm:$0x3] %vm10508_vm2, %v2401_v62  ;;  %v2474_v2 = vpop.f32.mrb[16].mxu1  ;;  %v12243_v3 = vpop.f32.mrb[17].mxu0  ;;  %12792 = vmatprep.mubr.msk.f32.mxu1 %vm15893_vm0, %v15894_v8  ;;  %v536_v62 = vld [vmem:[%s20774_s1 + $0xc68] sm:$0xff]  ;;  %v14993_v55 = vpack.c.bf16 %v566_v53, %v565_v52 }
 0x168   :  { %10526 = vst.msk [vmem:[%s20776_s2 + $0x22] sm:$0x3] %vm10508_vm2, %v2474_v2  ;;  %v12262_v4 = vpop.f32.mrb[17].mxu1  ;;  %14886 = vmatpush3.bf16.msra.mxu0 %v14885_v58  ;;  %v527_v58 = vld [vmem:[%s20774_s1 + $0xc20] sm:$0xff] }
 0x169   :  { %14898 = vmatpush3.bf16.msra.mxu1 %v14897_v59  ;;  %14887 = vmatprep.subr.bf16.mxu0 %v15892_v0  ;;  %v528_v59 = vld [vmem:[%s20774_s1 + $0xc28] sm:$0xff]  ;;  %v14948_v4 = vpack.c.bf16 %v536_v62, %v535_v61 }
 0x16a   :  { %14899 = vmatprep.subr.bf16.mxu1 %v15892_v0  ;;  %v14936_v3 = vpack.c.bf16 %v528_v59, %v527_v58  ;;  %v567_v59 = vld [vmem:[%s20774_s1 + $0xd60] sm:$0xff] }
 0x16c   :  { %14889 = vmatpush3.bf16.msra.mxu0 %v14888_v5  ;;  %v529_v5 = vld [vmem:[%s20774_s1 + $0xc30] sm:$0xff] }
 0x16d   :  { %14901 = vmatpush3.bf16.msra.mxu1 %v14900_v6  ;;  %14890 = vmatprep.subr.bf16.mxu0 %v15892_v0  ;;  %v530_v6 = vld [vmem:[%s20774_s1 + $0xc38] sm:$0xff] }
 0x16e   :  { %14902 = vmatprep.subr.bf16.mxu1 %v15892_v0  ;;  %v14939_v10 = vpack.c.bf16 %v530_v6, %v529_v5  ;;  %v569_v5 = vld [vmem:[%s20774_s1 + $0xd70] sm:$0xff]  ;;  %v570_v6 = vld [vmem:[%s20774_s1 + $0xd78] sm:$0xff] }
 0x16f   :  { %v14999_v9 = vpack.c.bf16 %v570_v6, %v569_v5 }
 0x170   :  { %14892 = vmatpush3.bf16.msra.mxu0 %v14891_v12  ;;  %v539_v12 = vld [vmem:[%s20774_s1 + $0xc80] sm:$0xff] }
 0x171   :  { %14904 = vmatpush3.bf16.msra.mxu1 %v14903_v13  ;;  %14905 = vmatprep.subr.bf16.mxu0 %v15892_v0  ;;  %v540_v13 = vld [vmem:[%s20774_s1 + $0xc88] sm:$0xff] }
 0x172   :  { %14917 = vmatprep.subr.bf16.mxu1 %v15892_v0  ;;  %v14954_v17 = vpack.c.bf16 %v540_v13, %v539_v12  ;;  %v579_v12 = vld [vmem:[%s20774_s1 + $0xdc0] sm:$0xff]  ;;  %v580_v13 = vld [vmem:[%s20774_s1 + $0xdc8] sm:$0xff] }
 0x173   :  { %12774 = vmatmul.mubr.msk.f32.vlgmr.msra.gmra.mrb[44].mxu0 %vm1163_vm1, %v55_v18  ;;  %v60_v18 = vld [vmem:[%s20775_s0 + $0x62] sm:$0x3] }
 0x174   :  { %12793 = vmatmul.mubr.msk.f32.vlgmr.msra.gmra.mrb[44].mxu1 %vm1163_vm1, %v56_v20  ;;  %14907 = vmatpush3.bf16.msra.mxu0 %v14906_v19  ;;  %v14966_v19 = vpack.c.bf16 %v548_v15, %v547_v14  ;;  %v541_v20 = vld [vmem:[%s20774_s1 + $0xc90] sm:$0xff]  ;;  %v63_v14 = vld [vmem:[%s20775_s0 + $0x68] sm:$0x3] }
 0x175   :  { %14919 = vmatpush3.bf16.msra.mxu1 %v14918_v21  ;;  %14908 = vmatprep.subr.bf16.mxu0 %v15892_v0  ;;  %v542_v21 = vld [vmem:[%s20774_s1 + $0xc98] sm:$0xff] }
 0x176   :  { %v2547_v30 = vpop.f32.mrb[18].mxu0  ;;  %14920 = vmatprep.subr.bf16.mxu1 %v15892_v0  ;;  %12811 = vmatprep.mubr.msk.f32.mxu0 %vm15893_vm0, %v15894_v8  ;;  %v14957_v24 = vpack.c.bf16 %v542_v21, %v541_v20  ;;  %v581_v20 = vld [vmem:[%s20774_s1 + $0xdd0] sm:$0xff]  ;;  %v582_v21 = vld [vmem:[%s20774_s1 + $0xdd8] sm:$0xff] }
 0x177   :  { %10527 = vst.msk [vmem:[%s20776_s2 + $0x24] sm:$0x3] %vm10508_vm2, %v2547_v30  ;;  %v2620_v33 = vpop.f32.mrb[18].mxu1  ;;  %v12281_v34 = vpop.f32.mrb[19].mxu0  ;;  %12830 = vmatprep.mubr.msk.f32.mxu1 %vm15893_vm0, %v15894_v8  ;;  %v552_v30 = vld [vmem:[%s20774_s1 + $0xce8] sm:$0xff]  ;;  %v15017_v23 = vpack.c.bf16 %v582_v21, %v581_v20 }
 0x178   :  { %10528 = vst.msk [vmem:[%s20776_s2 + $0x26] sm:$0x3] %vm10508_vm2, %v2620_v33  ;;  %v12300_v35 = vpop.f32.mrb[19].mxu1  ;;  %14910 = vmatpush3.bf16.msra.mxu0 %v14909_v26  ;;  %v543_v26 = vld [vmem:[%s20774_s1 + $0xca0] sm:$0xff] }
 0x179   :  { %14922 = vmatpush3.bf16.msra.mxu1 %v14921_v27  ;;  %14911 = vmatprep.subr.bf16.mxu0 %v15892_v0  ;;  %v544_v27 = vld [vmem:[%s20774_s1 + $0xca8] sm:$0xff]  ;;  %v14972_v35 = vpack.c.bf16 %v552_v30, %v551_v29 }
 0x17a   :  { %14923 = vmatprep.subr.bf16.mxu1 %v15892_v0  ;;  %v14960_v34 = vpack.c.bf16 %v544_v27, %v543_v26  ;;  %v583_v27 = vld [vmem:[%s20774_s1 + $0xde0] sm:$0xff] }
 0x17c   :  { %14913 = vmatpush3.bf16.msra.mxu0 %v14912_v36  ;;  %v545_v36 = vld [vmem:[%s20774_s1 + $0xcb0] sm:$0xff] }
 0x17d   :  { %14925 = vmatpush3.bf16.msra.mxu1 %v14924_v37  ;;  %14914 = vmatprep.subr.bf16.mxu0 %v15892_v0  ;;  %v546_v37 = vld [vmem:[%s20774_s1 + $0xcb8] sm:$0xff] }
 0x17e   :  { %14926 = vmatprep.subr.bf16.mxu1 %v15892_v0  ;;  %v14963_v40 = vpack.c.bf16 %v546_v37, %v545_v36  ;;  %v585_v36 = vld [vmem:[%s20774_s1 + $0xdf0] sm:$0xff]  ;;  %v586_v37 = vld [vmem:[%s20774_s1 + $0xdf8] sm:$0xff] }
 0x17f   :  { %v15023_v39 = vpack.c.bf16 %v586_v37, %v585_v36 }
 0x180   :  { %14916 = vmatpush3.bf16.msra.mxu0 %v14915_v42  ;;  %v555_v42 = vld [vmem:[%s20774_s1 + $0xd00] sm:$0xff] }
 0x181   :  { %14928 = vmatpush3.bf16.msra.mxu1 %v14927_v43  ;;  %14929 = vmatprep.subr.bf16.mxu0 %v15892_v0  ;;  %v556_v43 = vld [vmem:[%s20774_s1 + $0xd08] sm:$0xff] }
 0x182   :  { %14941 = vmatprep.subr.bf16.mxu1 %v15892_v0  ;;  %v14978_v47 = vpack.c.bf16 %v556_v43, %v555_v42  ;;  %v595_v42 = vld [vmem:[%s20774_s1 + $0xe40] sm:$0xff]  ;;  %v596_v43 = vld [vmem:[%s20774_s1 + $0xe48] sm:$0xff] }
 0x183   :  { %12812 = vmatmul.mubr.msk.f32.vlgmr.msra.gmra.mrb[46].mxu0 %vm1163_vm1, %v57_v48  ;;  %v62_v48 = vld [vmem:[%s20775_s0 + $0x66] sm:$0x3] }
 0x184   :  { %12831 = vmatmul.mubr.msk.f32.vlgmr.msra.gmra.mrb[46].mxu1 %vm1163_vm1, %v58_v50  ;;  %14931 = vmatpush3.bf16.msra.mxu0 %v14930_v49  ;;  %v14990_v49 = vpack.c.bf16 %v564_v45, %v563_v44  ;;  %v557_v50 = vld [vmem:[%s20774_s1 + $0xd10] sm:$0xff]  ;;  %v65_v44 = vld [vmem:[%s20775_s0 + $0x6c] sm:$0x3] }
 0x185   :  { %14943 = vmatpush3.bf16.msra.mxu1 %v14942_v51  ;;  %14932 = vmatprep.subr.bf16.mxu0 %v15892_v0  ;;  %v558_v51 = vld [vmem:[%s20774_s1 + $0xd18] sm:$0xff] }
 0x186   :  { %v2693_v60 = vpop.f32.mrb[20].mxu0  ;;  %14944 = vmatprep.subr.bf16.mxu1 %v15892_v0  ;;  %12849 = vmatprep.mubr.msk.f32.mxu0 %vm15893_vm0, %v15894_v8  ;;  %v14981_v54 = vpack.c.bf16 %v558_v51, %v557_v50  ;;  %v597_v50 = vld [vmem:[%s20774_s1 + $0xe50] sm:$0xff]  ;;  %v598_v51 = vld [vmem:[%s20774_s1 + $0xe58] sm:$0xff] }
 0x187   :  { %10529 = vst.msk [vmem:[%s20776_s2 + $0x28] sm:$0x3] %vm10508_vm2, %v2693_v60  ;;  %v2766_v63 = vpop.f32.mrb[20].mxu1  ;;  %v12319_v1 = vpop.f32.mrb[21].mxu0  ;;  %12868 = vmatprep.mubr.msk.f32.mxu1 %vm15893_vm0, %v15894_v8  ;;  %v568_v60 = vld [vmem:[%s20774_s1 + $0xd68] sm:$0xff]  ;;  %v15041_v53 = vpack.c.bf16 %v598_v51, %v597_v50 }
 0x188   :  { %10530 = vst.msk [vmem:[%s20776_s2 + $0x2a] sm:$0x3] %vm10508_vm2, %v2766_v63  ;;  %v12338_v2 = vpop.f32.mrb[21].mxu1  ;;  %14934 = vmatpush3.bf16.msra.mxu0 %v14933_v56  ;;  %v559_v56 = vld [vmem:[%s20774_s1 + $0xd20] sm:$0xff] }
 0x189   :  { %14946 = vmatpush3.bf16.msra.mxu1 %v14945_v57  ;;  %14935 = vmatprep.subr.bf16.mxu0 %v15892_v0  ;;  %v560_v57 = vld [vmem:[%s20774_s1 + $0xd28] sm:$0xff]  ;;  %v14996_v2 = vpack.c.bf16 %v568_v60, %v567_v59 }
 0x18a   :  { %14947 = vmatprep.subr.bf16.mxu1 %v15892_v0  ;;  %v14984_v1 = vpack.c.bf16 %v560_v57, %v559_v56  ;;  %v599_v57 = vld [vmem:[%s20774_s1 + $0xe60] sm:$0xff] }
 0x18c   :  { %14937 = vmatpush3.bf16.msra.mxu0 %v14936_v3  ;;  %v561_v3 = vld [vmem:[%s20774_s1 + $0xd30] sm:$0xff] }
 0x18d   :  { %14949 = vmatpush3.bf16.msra.mxu1 %v14948_v4  ;;  %14938 = vmatprep.subr.bf16.mxu0 %v15892_v0  ;;  %v562_v4 = vld [vmem:[%s20774_s1 + $0xd38] sm:$0xff] }
 0x18e   :  { %14950 = vmatprep.subr.bf16.mxu1 %v15892_v0  ;;  %v14987_v7 = vpack.c.bf16 %v562_v4, %v561_v3  ;;  %v601_v3 = vld [vmem:[%s20774_s1 + $0xe70] sm:$0xff]  ;;  %v602_v4 = vld [vmem:[%s20774_s1 + $0xe78] sm:$0xff] }
 0x18f   :  { %v15047_v6 = vpack.c.bf16 %v602_v4, %v601_v3 }
 0x190   :  { %14940 = vmatpush3.bf16.msra.mxu0 %v14939_v10  ;;  %v571_v10 = vld [vmem:[%s20774_s1 + $0xd80] sm:$0xff] }
 0x191   :  { %14952 = vmatpush3.bf16.msra.mxu1 %v14951_v11  ;;  %14953 = vmatprep.subr.bf16.mxu0 %v15892_v0  ;;  %v572_v11 = vld [vmem:[%s20774_s1 + $0xd88] sm:$0xff] }
 0x192   :  { %14965 = vmatprep.subr.bf16.mxu1 %v15892_v0  ;;  %v15002_v15 = vpack.c.bf16 %v572_v11, %v571_v10  ;;  %v611_v10 = vld [vmem:[%s20774_s1 + $0xec0] sm:$0xff]  ;;  %v612_v11 = vld [vmem:[%s20774_s1 + $0xec8] sm:$0xff] }
 0x193   :  { %12850 = vmatmul.mubr.msk.f32.vlgmr.msra.gmra.mrb[48].mxu0 %vm1163_vm1, %v59_v16  ;;  %v64_v16 = vld [vmem:[%s20775_s0 + $0x6a] sm:$0x3] }
 0x194   :  { %12869 = vmatmul.mubr.msk.f32.vlgmr.msra.gmra.mrb[48].mxu1 %vm1163_vm1, %v60_v18  ;;  %14955 = vmatpush3.bf16.msra.mxu0 %v14954_v17  ;;  %v15014_v17 = vpack.c.bf16 %v580_v13, %v579_v12  ;;  %v573_v18 = vld [vmem:[%s20774_s1 + $0xd90] sm:$0xff] }
 0x195   :  { %14967 = vmatpush3.bf16.msra.mxu1 %v14966_v19  ;;  %14956 = vmatprep.subr.bf16.mxu0 %v15892_v0  ;;  %v574_v19 = vld [vmem:[%s20774_s1 + $0xd98] sm:$0xff]  ;;  %v67_v12 = vld [vmem:[%s20775_s0 + $0x70] sm:$0x3] }
 0x196   :  { %v2839_v28 = vpop.f32.mrb[22].mxu0  ;;  %14968 = vmatprep.subr.bf16.mxu1 %v15892_v0  ;;  %12887 = vmatprep.mubr.msk.f32.mxu0 %vm15893_vm0, %v15894_v8  ;;  %v15005_v22 = vpack.c.bf16 %v574_v19, %v573_v18  ;;  %v613_v18 = vld [vmem:[%s20774_s1 + $0xed0] sm:$0xff]  ;;  %v614_v19 = vld [vmem:[%s20774_s1 + $0xed8] sm:$0xff] }
 0x197   :  { %10531 = vst.msk [vmem:[%s20776_s2 + $0x2c] sm:$0x3] %vm10508_vm2, %v2839_v28  ;;  %v2912_v31 = vpop.f32.mrb[22].mxu1  ;;  %v12357_v32 = vpop.f32.mrb[23].mxu0  ;;  %12906 = vmatprep.mubr.msk.f32.mxu1 %vm15893_vm0, %v15894_v8  ;;  %v584_v28 = vld [vmem:[%s20774_s1 + $0xde8] sm:$0xff]  ;;  %v15065_v21 = vpack.c.bf16 %v614_v19, %v613_v18 }
 0x198   :  { %10532 = vst.msk [vmem:[%s20776_s2 + $0x2e] sm:$0x3] %vm10508_vm2, %v2912_v31  ;;  %v12376_v33 = vpop.f32.mrb[23].mxu1  ;;  %14958 = vmatpush3.bf16.msra.mxu0 %v14957_v24  ;;  %v575_v24 = vld [vmem:[%s20774_s1 + $0xda0] sm:$0xff] }
 0x199   :  { %14970 = vmatpush3.bf16.msra.mxu1 %v14969_v25  ;;  %14959 = vmatprep.subr.bf16.mxu0 %v15892_v0  ;;  %v576_v25 = vld [vmem:[%s20774_s1 + $0xda8] sm:$0xff]  ;;  %v15020_v33 = vpack.c.bf16 %v584_v28, %v583_v27 }
 0x19a   :  { %14971 = vmatprep.subr.bf16.mxu1 %v15892_v0  ;;  %v15008_v32 = vpack.c.bf16 %v576_v25, %v575_v24  ;;  %v615_v25 = vld [vmem:[%s20774_s1 + $0xee0] sm:$0xff] }
 0x19c   :  { %14961 = vmatpush3.bf16.msra.mxu0 %v14960_v34  ;;  %v577_v34 = vld [vmem:[%s20774_s1 + $0xdb0] sm:$0xff] }
 0x19d   :  { %14973 = vmatpush3.bf16.msra.mxu1 %v14972_v35  ;;  %14962 = vmatprep.subr.bf16.mxu0 %v15892_v0  ;;  %v578_v35 = vld [vmem:[%s20774_s1 + $0xdb8] sm:$0xff] }
 0x19e   :  { %14974 = vmatprep.subr.bf16.mxu1 %v15892_v0  ;;  %v15011_v38 = vpack.c.bf16 %v578_v35, %v577_v34  ;;  %v617_v34 = vld [vmem:[%s20774_s1 + $0xef0] sm:$0xff]  ;;  %v618_v35 = vld [vmem:[%s20774_s1 + $0xef8] sm:$0xff] }
 0x19f   :  { %v15071_v37 = vpack.c.bf16 %v618_v35, %v617_v34 }
 0x1a0   :  { %14964 = vmatpush3.bf16.msra.mxu0 %v14963_v40  ;;  %v587_v40 = vld [vmem:[%s20774_s1 + $0xe00] sm:$0xff] }
 0x1a1   :  { %14976 = vmatpush3.bf16.msra.mxu1 %v14975_v41  ;;  %14977 = vmatprep.subr.bf16.mxu0 %v15892_v0  ;;  %v588_v41 = vld [vmem:[%s20774_s1 + $0xe08] sm:$0xff] }
 0x1a2   :  { %14989 = vmatprep.subr.bf16.mxu1 %v15892_v0  ;;  %v15026_v45 = vpack.c.bf16 %v588_v41, %v587_v40  ;;  %v627_v40 = vld [vmem:[%s20774_s1 + $0xf40] sm:$0xff]  ;;  %v628_v41 = vld [vmem:[%s20774_s1 + $0xf48] sm:$0xff] }
 0x1a3   :  { %12888 = vmatmul.mubr.msk.f32.vlgmr.msra.gmra.mrb[50].mxu0 %vm1163_vm1, %v61_v46  ;;  %v66_v46 = vld [vmem:[%s20775_s0 + $0x6e] sm:$0x3] }
 0x1a4   :  { %12907 = vmatmul.mubr.msk.f32.vlgmr.msra.gmra.mrb[50].mxu1 %vm1163_vm1, %v62_v48  ;;  %14979 = vmatpush3.bf16.msra.mxu0 %v14978_v47  ;;  %v15038_v47 = vpack.c.bf16 %v596_v43, %v595_v42  ;;  %v589_v48 = vld [vmem:[%s20774_s1 + $0xe10] sm:$0xff] }
 0x1a5   :  { %14991 = vmatpush3.bf16.msra.mxu1 %v14990_v49  ;;  %14980 = vmatprep.subr.bf16.mxu0 %v15892_v0  ;;  %v590_v49 = vld [vmem:[%s20774_s1 + $0xe18] sm:$0xff]  ;;  %v69_v42 = vld [vmem:[%s20775_s0 + $0x74] sm:$0x3] }
 0x1a6   :  { %v2985_v58 = vpop.f32.mrb[24].mxu0  ;;  %14992 = vmatprep.subr.bf16.mxu1 %v15892_v0  ;;  %12925 = vmatprep.mubr.msk.f32.mxu0 %vm15893_vm0, %v15894_v8  ;;  %v15029_v52 = vpack.c.bf16 %v590_v49, %v589_v48  ;;  %v629_v48 = vld [vmem:[%s20774_s1 + $0xf50] sm:$0xff]  ;;  %v630_v49 = vld [vmem:[%s20774_s1 + $0xf58] sm:$0xff] }
 0x1a7   :  { %10533 = vst.msk [vmem:[%s20776_s2 + $0x30] sm:$0x3] %vm10508_vm2, %v2985_v58  ;;  %v3058_v61 = vpop.f32.mrb[24].mxu1  ;;  %v12395_v62 = vpop.f32.mrb[25].mxu0  ;;  %12944 = vmatprep.mubr.msk.f32.mxu1 %vm15893_vm0, %v15894_v8  ;;  %v600_v58 = vld [vmem:[%s20774_s1 + $0xe68] sm:$0xff]  ;;  %v15089_v51 = vpack.c.bf16 %v630_v49, %v629_v48 }
 0x1a8   :  { %10534 = vst.msk [vmem:[%s20776_s2 + $0x32] sm:$0x3] %vm10508_vm2, %v3058_v61  ;;  %v12414_v63 = vpop.f32.mrb[25].mxu1  ;;  %14982 = vmatpush3.bf16.msra.mxu0 %v14981_v54  ;;  %v591_v54 = vld [vmem:[%s20774_s1 + $0xe20] sm:$0xff] }
 0x1a9   :  { %14994 = vmatpush3.bf16.msra.mxu1 %v14993_v55  ;;  %14983 = vmatprep.subr.bf16.mxu0 %v15892_v0  ;;  %v592_v55 = vld [vmem:[%s20774_s1 + $0xe28] sm:$0xff]  ;;  %v15044_v63 = vpack.c.bf16 %v600_v58, %v599_v57 }
 0x1aa   :  { %14995 = vmatprep.subr.bf16.mxu1 %v15892_v0  ;;  %v15032_v62 = vpack.c.bf16 %v592_v55, %v591_v54  ;;  %v631_v55 = vld [vmem:[%s20774_s1 + $0xf60] sm:$0xff] }
 0x1ac   :  { %14985 = vmatpush3.bf16.msra.mxu0 %v14984_v1  ;;  %v593_v1 = vld [vmem:[%s20774_s1 + $0xe30] sm:$0xff] }
 0x1ad   :  { %14997 = vmatpush3.bf16.msra.mxu1 %v14996_v2  ;;  %14986 = vmatprep.subr.bf16.mxu0 %v15892_v0  ;;  %v594_v2 = vld [vmem:[%s20774_s1 + $0xe38] sm:$0xff] }
 0x1ae   :  { %14998 = vmatprep.subr.bf16.mxu1 %v15892_v0  ;;  %v15035_v5 = vpack.c.bf16 %v594_v2, %v593_v1  ;;  %v633_v1 = vld [vmem:[%s20774_s1 + $0xf70] sm:$0xff]  ;;  %v634_v2 = vld [vmem:[%s20774_s1 + $0xf78] sm:$0xff] }
 0x1af   :  { %v15095_v4 = vpack.c.bf16 %v634_v2, %v633_v1 }
 0x1b0   :  { %14988 = vmatpush3.bf16.msra.mxu0 %v14987_v7  ;;  %v603_v7 = vld [vmem:[%s20774_s1 + $0xe80] sm:$0xff] }
 0x1b1   :  { %15000 = vmatpush3.bf16.msra.mxu1 %v14999_v9  ;;  %15001 = vmatprep.subr.bf16.mxu0 %v15892_v0  ;;  %v604_v9 = vld [vmem:[%s20774_s1 + $0xe88] sm:$0xff] }
 0x1b2   :  { %15013 = vmatprep.subr.bf16.mxu1 %v15892_v0  ;;  %v15050_v13 = vpack.c.bf16 %v604_v9, %v603_v7  ;;  %v643_v7 = vld [vmem:[%s20774_s1 + $0xfc0] sm:$0xff]  ;;  %v644_v9 = vld [vmem:[%s20774_s1 + $0xfc8] sm:$0xff] }
 0x1b3   :  { %12926 = vmatmul.mubr.msk.f32.vlgmr.msra.gmra.mrb[52].mxu0 %vm1163_vm1, %v63_v14  ;;  %v68_v14 = vld [vmem:[%s20775_s0 + $0x72] sm:$0x3] }
 0x1b4   :  { %12945 = vmatmul.mubr.msk.f32.vlgmr.msra.gmra.mrb[52].mxu1 %vm1163_vm1, %v64_v16  ;;  %15003 = vmatpush3.bf16.msra.mxu0 %v15002_v15  ;;  %v15062_v15 = vpack.c.bf16 %v612_v11, %v611_v10  ;;  %v605_v16 = vld [vmem:[%s20774_s1 + $0xe90] sm:$0xff]  ;;  %v71_v10 = vld [vmem:[%s20775_s0 + $0x78] sm:$0x3] }
 0x1b5   :  { %15015 = vmatpush3.bf16.msra.mxu1 %v15014_v17  ;;  %15004 = vmatprep.subr.bf16.mxu0 %v15892_v0  ;;  %v606_v17 = vld [vmem:[%s20774_s1 + $0xe98] sm:$0xff] }
 0x1b6   :  { %v3131_v26 = vpop.f32.mrb[26].mxu0  ;;  %15016 = vmatprep.subr.bf16.mxu1 %v15892_v0  ;;  %12963 = vmatprep.mubr.msk.f32.mxu0 %vm15893_vm0, %v15894_v8  ;;  %v15053_v20 = vpack.c.bf16 %v606_v17, %v605_v16  ;;  %v645_v16 = vld [vmem:[%s20774_s1 + $0xfd0] sm:$0xff]  ;;  %v646_v17 = vld [vmem:[%s20774_s1 + $0xfd8] sm:$0xff] }
 0x1b7   :  { %10535 = vst.msk [vmem:[%s20776_s2 + $0x34] sm:$0x3] %vm10508_vm2, %v3131_v26  ;;  %v3204_v29 = vpop.f32.mrb[26].mxu1  ;;  %v12433_v30 = vpop.f32.mrb[27].mxu0  ;;  %12982 = vmatprep.mubr.msk.f32.mxu1 %vm15893_vm0, %v15894_v8  ;;  %v616_v26 = vld [vmem:[%s20774_s1 + $0xee8] sm:$0xff]  ;;  %v15113_v19 = vpack.c.bf16 %v646_v17, %v645_v16 }
 0x1b8   :  { %10536 = vst.msk [vmem:[%s20776_s2 + $0x36] sm:$0x3] %vm10508_vm2, %v3204_v29  ;;  %v12452_v31 = vpop.f32.mrb[27].mxu1  ;;  %15006 = vmatpush3.bf16.msra.mxu0 %v15005_v22  ;;  %v607_v22 = vld [vmem:[%s20774_s1 + $0xea0] sm:$0xff] }
 0x1b9   :  { %15018 = vmatpush3.bf16.msra.mxu1 %v15017_v23  ;;  %15007 = vmatprep.subr.bf16.mxu0 %v15892_v0  ;;  %v608_v23 = vld [vmem:[%s20774_s1 + $0xea8] sm:$0xff]  ;;  %v15068_v31 = vpack.c.bf16 %v616_v26, %v615_v25 }
 0x1ba   :  { %15019 = vmatprep.subr.bf16.mxu1 %v15892_v0  ;;  %v15056_v30 = vpack.c.bf16 %v608_v23, %v607_v22  ;;  %v647_v23 = vld [vmem:[%s20774_s1 + $0xfe0] sm:$0xff] }
 0x1bc   :  { %15009 = vmatpush3.bf16.msra.mxu0 %v15008_v32  ;;  %v609_v32 = vld [vmem:[%s20774_s1 + $0xeb0] sm:$0xff] }
 0x1bd   :  { %15021 = vmatpush3.bf16.msra.mxu1 %v15020_v33  ;;  %15010 = vmatprep.subr.bf16.mxu0 %v15892_v0  ;;  %v610_v33 = vld [vmem:[%s20774_s1 + $0xeb8] sm:$0xff] }
 0x1be   :  { %15022 = vmatprep.subr.bf16.mxu1 %v15892_v0  ;;  %v15059_v36 = vpack.c.bf16 %v610_v33, %v609_v32  ;;  %v649_v32 = vld [vmem:[%s20774_s1 + $0xff0] sm:$0xff]  ;;  %v650_v33 = vld [vmem:[%s20774_s1 + $0xff8] sm:$0xff] }
 0x1bf   :  { %v15119_v35 = vpack.c.bf16 %v650_v33, %v649_v32 }
 0x1c0   :  { %15012 = vmatpush3.bf16.msra.mxu0 %v15011_v38  ;;  %v619_v38 = vld [vmem:[%s20774_s1 + $0xf00] sm:$0xff] }
 0x1c1   :  { %15024 = vmatpush3.bf16.msra.mxu1 %v15023_v39  ;;  %15025 = vmatprep.subr.bf16.mxu0 %v15892_v0  ;;  %v620_v39 = vld [vmem:[%s20774_s1 + $0xf08] sm:$0xff] }
 0x1c2   :  { %15037 = vmatprep.subr.bf16.mxu1 %v15892_v0  ;;  %v15074_v43 = vpack.c.bf16 %v620_v39, %v619_v38  ;;  %v659_v38 = vld [vmem:[%s20774_s1 + $0x1040] sm:$0xff]  ;;  %v660_v39 = vld [vmem:[%s20774_s1 + $0x1048] sm:$0xff] }
 0x1c3   :  { %12964 = vmatmul.mubr.msk.f32.vlgmr.msra.gmra.mrb[54].mxu0 %vm1163_vm1, %v65_v44  ;;  %v70_v44 = vld [vmem:[%s20775_s0 + $0x76] sm:$0x3] }
 0x1c4   :  { %12983 = vmatmul.mubr.msk.f32.vlgmr.msra.gmra.mrb[54].mxu1 %vm1163_vm1, %v66_v46  ;;  %15027 = vmatpush3.bf16.msra.mxu0 %v15026_v45  ;;  %v15086_v45 = vpack.c.bf16 %v628_v41, %v627_v40  ;;  %v621_v46 = vld [vmem:[%s20774_s1 + $0xf10] sm:$0xff]  ;;  %v73_v40 = vld [vmem:[%s20775_s0 + $0x7c] sm:$0x3] }
 0x1c5   :  { %15039 = vmatpush3.bf16.msra.mxu1 %v15038_v47  ;;  %15028 = vmatprep.subr.bf16.mxu0 %v15892_v0  ;;  %v622_v47 = vld [vmem:[%s20774_s1 + $0xf18] sm:$0xff] }
 0x1c6   :  { %v3277_v56 = vpop.f32.mrb[28].mxu0  ;;  %15040 = vmatprep.subr.bf16.mxu1 %v15892_v0  ;;  %13001 = vmatprep.mubr.msk.f32.mxu0 %vm15893_vm0, %v15894_v8  ;;  %v15077_v50 = vpack.c.bf16 %v622_v47, %v621_v46  ;;  %v661_v46 = vld [vmem:[%s20774_s1 + $0x1050] sm:$0xff]  ;;  %v662_v47 = vld [vmem:[%s20774_s1 + $0x1058] sm:$0xff] }
 0x1c7   :  { %10537 = vst.msk [vmem:[%s20776_s2 + $0x38] sm:$0x3] %vm10508_vm2, %v3277_v56  ;;  %v3350_v59 = vpop.f32.mrb[28].mxu1  ;;  %v12471_v60 = vpop.f32.mrb[29].mxu0  ;;  %13020 = vmatprep.mubr.msk.f32.mxu1 %vm15893_vm0, %v15894_v8  ;;  %v632_v56 = vld [vmem:[%s20774_s1 + $0xf68] sm:$0xff]  ;;  %v15137_v49 = vpack.c.bf16 %v662_v47, %v661_v46 }
 0x1c8   :  { %10538 = vst.msk [vmem:[%s20776_s2 + $0x3a] sm:$0x3] %vm10508_vm2, %v3350_v59  ;;  %v12490_v61 = vpop.f32.mrb[29].mxu1  ;;  %15030 = vmatpush3.bf16.msra.mxu0 %v15029_v52  ;;  %v623_v52 = vld [vmem:[%s20774_s1 + $0xf20] sm:$0xff] }
 0x1c9   :  { %15042 = vmatpush3.bf16.msra.mxu1 %v15041_v53  ;;  %15031 = vmatprep.subr.bf16.mxu0 %v15892_v0  ;;  %v624_v53 = vld [vmem:[%s20774_s1 + $0xf28] sm:$0xff]  ;;  %v15092_v61 = vpack.c.bf16 %v632_v56, %v631_v55 }
 0x1ca   :  { %15043 = vmatprep.subr.bf16.mxu1 %v15892_v0  ;;  %v15080_v60 = vpack.c.bf16 %v624_v53, %v623_v52  ;;  %v663_v53 = vld [vmem:[%s20774_s1 + $0x1060] sm:$0xff] }
 0x1cc   :  { %15033 = vmatpush3.bf16.msra.mxu0 %v15032_v62  ;;  %v625_v62 = vld [vmem:[%s20774_s1 + $0xf30] sm:$0xff] }
 0x1cd   :  { %15045 = vmatpush3.bf16.msra.mxu1 %v15044_v63  ;;  %15034 = vmatprep.subr.bf16.mxu0 %v15892_v0  ;;  %v626_v63 = vld [vmem:[%s20774_s1 + $0xf38] sm:$0xff] }
 0x1ce   :  { %15046 = vmatprep.subr.bf16.mxu1 %v15892_v0  ;;  %v15083_v3 = vpack.c.bf16 %v626_v63, %v625_v62  ;;  %v665_v62 = vld [vmem:[%s20774_s1 + $0x1070] sm:$0xff]  ;;  %v666_v63 = vld [vmem:[%s20774_s1 + $0x1078] sm:$0xff] }
 0x1cf   :  { %v15143_v2 = vpack.c.bf16 %v666_v63, %v665_v62 }
 0x1d0   :  { %15036 = vmatpush3.bf16.msra.mxu0 %v15035_v5  ;;  %v635_v5 = vld [vmem:[%s20774_s1 + $0xf80] sm:$0xff] }
 0x1d1   :  { %15048 = vmatpush3.bf16.msra.mxu1 %v15047_v6  ;;  %15049 = vmatprep.subr.bf16.mxu0 %v15892_v0  ;;  %v636_v6 = vld [vmem:[%s20774_s1 + $0xf88] sm:$0xff] }
 0x1d2   :  { %15061 = vmatprep.subr.bf16.mxu1 %v15892_v0  ;;  %v15098_v11 = vpack.c.bf16 %v636_v6, %v635_v5  ;;  %v675_v5 = vld [vmem:[%s20774_s1 + $0x10c0] sm:$0xff]  ;;  %v676_v6 = vld [vmem:[%s20774_s1 + $0x10c8] sm:$0xff] }
 0x1d3   :  { %13002 = vmatmul.mubr.msk.f32.vlgmr.msra.gmra.mrb[56].mxu0 %vm1163_vm1, %v67_v12  ;;  %v72_v12 = vld [vmem:[%s20775_s0 + $0x7a] sm:$0x3] }
 0x1d4   :  { %13021 = vmatmul.mubr.msk.f32.vlgmr.msra.gmra.mrb[56].mxu1 %vm1163_vm1, %v68_v14  ;;  %15051 = vmatpush3.bf16.msra.mxu0 %v15050_v13  ;;  %v15110_v13 = vpack.c.bf16 %v644_v9, %v643_v7  ;;  %v637_v14 = vld [vmem:[%s20774_s1 + $0xf90] sm:$0xff]  ;;  %v75_v7 = vld [vmem:[%s20775_s0 + $0x80] sm:$0x3] }
 0x1d5   :  { %15063 = vmatpush3.bf16.msra.mxu1 %v15062_v15  ;;  %15052 = vmatprep.subr.bf16.mxu0 %v15892_v0  ;;  %v638_v15 = vld [vmem:[%s20774_s1 + $0xf98] sm:$0xff] }
 0x1d6   :  { %v3423_v24 = vpop.f32.mrb[30].mxu0  ;;  %15064 = vmatprep.subr.bf16.mxu1 %v15892_v0  ;;  %13039 = vmatprep.mubr.msk.f32.mxu0 %vm15893_vm0, %v15894_v8  ;;  %v15101_v18 = vpack.c.bf16 %v638_v15, %v637_v14  ;;  %v677_v14 = vld [vmem:[%s20774_s1 + $0x10d0] sm:$0xff]  ;;  %v678_v15 = vld [vmem:[%s20774_s1 + $0x10d8] sm:$0xff] }
 0x1d7   :  { %10539 = vst.msk [vmem:[%s20776_s2 + $0x3c] sm:$0x3] %vm10508_vm2, %v3423_v24  ;;  %v3496_v27 = vpop.f32.mrb[30].mxu1  ;;  %v12509_v28 = vpop.f32.mrb[31].mxu0  ;;  %13058 = vmatprep.mubr.msk.f32.mxu1 %vm15893_vm0, %v15894_v8  ;;  %v648_v24 = vld [vmem:[%s20774_s1 + $0xfe8] sm:$0xff]  ;;  %v15161_v17 = vpack.c.bf16 %v678_v15, %v677_v14 }
 0x1d8   :  { %10540 = vst.msk [vmem:[%s20776_s2 + $0x3e] sm:$0x3] %vm10508_vm2, %v3496_v27  ;;  %v12528_v29 = vpop.f32.mrb[31].mxu1  ;;  %15054 = vmatpush3.bf16.msra.mxu0 %v15053_v20  ;;  %v639_v20 = vld [vmem:[%s20774_s1 + $0xfa0] sm:$0xff] }
 0x1d9   :  { %15066 = vmatpush3.bf16.msra.mxu1 %v15065_v21  ;;  %15055 = vmatprep.subr.bf16.mxu0 %v15892_v0  ;;  %v640_v21 = vld [vmem:[%s20774_s1 + $0xfa8] sm:$0xff]  ;;  %v15116_v29 = vpack.c.bf16 %v648_v24, %v647_v23 }
 0x1da   :  { %15067 = vmatprep.subr.bf16.mxu1 %v15892_v0  ;;  %v15104_v28 = vpack.c.bf16 %v640_v21, %v639_v20  ;;  %v679_v21 = vld [vmem:[%s20774_s1 + $0x10e0] sm:$0xff] }
 0x1dc   :  { %15057 = vmatpush3.bf16.msra.mxu0 %v15056_v30  ;;  %v641_v30 = vld [vmem:[%s20774_s1 + $0xfb0] sm:$0xff] }
 0x1dd   :  { %15069 = vmatpush3.bf16.msra.mxu1 %v15068_v31  ;;  %15058 = vmatprep.subr.bf16.mxu0 %v15892_v0  ;;  %v642_v31 = vld [vmem:[%s20774_s1 + $0xfb8] sm:$0xff] }
 0x1de   :  { %15070 = vmatprep.subr.bf16.mxu1 %v15892_v0  ;;  %v15107_v34 = vpack.c.bf16 %v642_v31, %v641_v30  ;;  %v681_v30 = vld [vmem:[%s20774_s1 + $0x10f0] sm:$0xff]  ;;  %v682_v31 = vld [vmem:[%s20774_s1 + $0x10f8] sm:$0xff] }
 0x1df   :  { %v15167_v33 = vpack.c.bf16 %v682_v31, %v681_v30 }
 0x1e0   :  { %15060 = vmatpush3.bf16.msra.mxu0 %v15059_v36  ;;  %v651_v36 = vld [vmem:[%s20774_s1 + $0x1000] sm:$0xff] }
 0x1e1   :  { %15072 = vmatpush3.bf16.msra.mxu1 %v15071_v37  ;;  %15073 = vmatprep.subr.bf16.mxu0 %v15892_v0  ;;  %v652_v37 = vld [vmem:[%s20774_s1 + $0x1008] sm:$0xff] }
 0x1e2   :  { %15085 = vmatprep.subr.bf16.mxu1 %v15892_v0  ;;  %v15122_v41 = vpack.c.bf16 %v652_v37, %v651_v36  ;;  %v691_v36 = vld [vmem:[%s20774_s1 + $0x1140] sm:$0xff]  ;;  %v692_v37 = vld [vmem:[%s20774_s1 + $0x1148] sm:$0xff] }
 0x1e3   :  { %13040 = vmatmul.mubr.msk.f32.vlgmr.msra.gmra.mrb[58].mxu0 %vm1163_vm1, %v69_v42  ;;  %v74_v42 = vld [vmem:[%s20775_s0 + $0x7e] sm:$0x3] }
 0x1e4   :  { %13059 = vmatmul.mubr.msk.f32.vlgmr.msra.gmra.mrb[58].mxu1 %vm1163_vm1, %v70_v44  ;;  %15075 = vmatpush3.bf16.msra.mxu0 %v15074_v43  ;;  %v15134_v43 = vpack.c.bf16 %v660_v39, %v659_v38  ;;  %v653_v44 = vld [vmem:[%s20774_s1 + $0x1010] sm:$0xff]  ;;  %v77_v38 = vld [vmem:[%s20775_s0 + $0x84] sm:$0x3] }
 0x1e5   :  { %15087 = vmatpush3.bf16.msra.mxu1 %v15086_v45  ;;  %15076 = vmatprep.subr.bf16.mxu0 %v15892_v0  ;;  %v654_v45 = vld [vmem:[%s20774_s1 + $0x1018] sm:$0xff] }
 0x1e6   :  { %v3569_v54 = vpop.f32.mrb[32].mxu0  ;;  %15088 = vmatprep.subr.bf16.mxu1 %v15892_v0  ;;  %13077 = vmatprep.mubr.msk.f32.mxu0 %vm15893_vm0, %v15894_v8  ;;  %v15125_v48 = vpack.c.bf16 %v654_v45, %v653_v44  ;;  %v693_v44 = vld [vmem:[%s20774_s1 + $0x1150] sm:$0xff]  ;;  %v694_v45 = vld [vmem:[%s20774_s1 + $0x1158] sm:$0xff] }
 0x1e7   :  { %10541 = vst.msk [vmem:[%s20776_s2 + $0x40] sm:$0x3] %vm10508_vm2, %v3569_v54  ;;  %v3642_v57 = vpop.f32.mrb[32].mxu1  ;;  %v12547_v58 = vpop.f32.mrb[33].mxu0  ;;  %13096 = vmatprep.mubr.msk.f32.mxu1 %vm15893_vm0, %v15894_v8  ;;  %v664_v54 = vld [vmem:[%s20774_s1 + $0x1068] sm:$0xff]  ;;  %v15185_v47 = vpack.c.bf16 %v694_v45, %v693_v44 }
 0x1e8   :  { %10542 = vst.msk [vmem:[%s20776_s2 + $0x42] sm:$0x3] %vm10508_vm2, %v3642_v57  ;;  %v12566_v59 = vpop.f32.mrb[33].mxu1  ;;  %15078 = vmatpush3.bf16.msra.mxu0 %v15077_v50  ;;  %v655_v50 = vld [vmem:[%s20774_s1 + $0x1020] sm:$0xff] }
 0x1e9   :  { %15090 = vmatpush3.bf16.msra.mxu1 %v15089_v51  ;;  %15079 = vmatprep.subr.bf16.mxu0 %v15892_v0  ;;  %v656_v51 = vld [vmem:[%s20774_s1 + $0x1028] sm:$0xff]  ;;  %v15140_v59 = vpack.c.bf16 %v664_v54, %v663_v53 }
 0x1ea   :  { %15091 = vmatprep.subr.bf16.mxu1 %v15892_v0  ;;  %v15128_v58 = vpack.c.bf16 %v656_v51, %v655_v50  ;;  %v695_v51 = vld [vmem:[%s20774_s1 + $0x1160] sm:$0xff] }
 0x1ec   :  { %15081 = vmatpush3.bf16.msra.mxu0 %v15080_v60  ;;  %v657_v60 = vld [vmem:[%s20774_s1 + $0x1030] sm:$0xff] }
 0x1ed   :  { %15093 = vmatpush3.bf16.msra.mxu1 %v15092_v61  ;;  %15082 = vmatprep.subr.bf16.mxu0 %v15892_v0  ;;  %v658_v61 = vld [vmem:[%s20774_s1 + $0x1038] sm:$0xff] }
 0x1ee   :  { %15094 = vmatprep.subr.bf16.mxu1 %v15892_v0  ;;  %v15131_v1 = vpack.c.bf16 %v658_v61, %v657_v60  ;;  %v697_v60 = vld [vmem:[%s20774_s1 + $0x1170] sm:$0xff]  ;;  %v698_v61 = vld [vmem:[%s20774_s1 + $0x1178] sm:$0xff] }
 0x1ef   :  { %v15191_v63 = vpack.c.bf16 %v698_v61, %v697_v60 }
 0x1f0   :  { %15084 = vmatpush3.bf16.msra.mxu0 %v15083_v3  ;;  %v667_v3 = vld [vmem:[%s20774_s1 + $0x1080] sm:$0xff] }
 0x1f1   :  { %15096 = vmatpush3.bf16.msra.mxu1 %v15095_v4  ;;  %15097 = vmatprep.subr.bf16.mxu0 %v15892_v0  ;;  %v668_v4 = vld [vmem:[%s20774_s1 + $0x1088] sm:$0xff] }
 0x1f2   :  { %15109 = vmatprep.subr.bf16.mxu1 %v15892_v0  ;;  %v15146_v9 = vpack.c.bf16 %v668_v4, %v667_v3  ;;  %v707_v3 = vld [vmem:[%s20774_s1 + $0x11c0] sm:$0xff]  ;;  %v708_v4 = vld [vmem:[%s20774_s1 + $0x11c8] sm:$0xff] }
 0x1f3   :  { %13078 = vmatmul.mubr.msk.f32.vlgmr.msra.gmra.mrb[60].mxu0 %vm1163_vm1, %v71_v10  ;;  %v76_v10 = vld [vmem:[%s20775_s0 + $0x82] sm:$0x3] }
 0x1f4   :  { %13097 = vmatmul.mubr.msk.f32.vlgmr.msra.gmra.mrb[60].mxu1 %vm1163_vm1, %v72_v12  ;;  %15099 = vmatpush3.bf16.msra.mxu0 %v15098_v11  ;;  %v15158_v11 = vpack.c.bf16 %v676_v6, %v675_v5  ;;  %v669_v12 = vld [vmem:[%s20774_s1 + $0x1090] sm:$0xff]  ;;  %v79_v5 = vld [vmem:[%s20775_s0 + $0x88] sm:$0x3] }
 0x1f5   :  { %15111 = vmatpush3.bf16.msra.mxu1 %v15110_v13  ;;  %15100 = vmatprep.subr.bf16.mxu0 %v15892_v0  ;;  %v670_v13 = vld [vmem:[%s20774_s1 + $0x1098] sm:$0xff] }
 0x1f6   :  { %v3715_v22 = vpop.f32.mrb[34].mxu0  ;;  %15112 = vmatprep.subr.bf16.mxu1 %v15892_v0  ;;  %13115 = vmatprep.mubr.msk.f32.mxu0 %vm15893_vm0, %v15894_v8  ;;  %v15149_v16 = vpack.c.bf16 %v670_v13, %v669_v12  ;;  %v709_v12 = vld [vmem:[%s20774_s1 + $0x11d0] sm:$0xff]  ;;  %v710_v13 = vld [vmem:[%s20774_s1 + $0x11d8] sm:$0xff] }
 0x1f7   :  { %10543 = vst.msk [vmem:[%s20776_s2 + $0x44] sm:$0x3] %vm10508_vm2, %v3715_v22  ;;  %v3788_v25 = vpop.f32.mrb[34].mxu1  ;;  %v12585_v26 = vpop.f32.mrb[35].mxu0  ;;  %13134 = vmatprep.mubr.msk.f32.mxu1 %vm15893_vm0, %v15894_v8  ;;  %v680_v22 = vld [vmem:[%s20774_s1 + $0x10e8] sm:$0xff]  ;;  %v15209_v15 = vpack.c.bf16 %v710_v13, %v709_v12 }
 0x1f8   :  { %10544 = vst.msk [vmem:[%s20776_s2 + $0x46] sm:$0x3] %vm10508_vm2, %v3788_v25  ;;  %v12604_v27 = vpop.f32.mrb[35].mxu1  ;;  %15102 = vmatpush3.bf16.msra.mxu0 %v15101_v18  ;;  %v671_v18 = vld [vmem:[%s20774_s1 + $0x10a0] sm:$0xff] }
 0x1f9   :  { %15114 = vmatpush3.bf16.msra.mxu1 %v15113_v19  ;;  %15103 = vmatprep.subr.bf16.mxu0 %v15892_v0  ;;  %v672_v19 = vld [vmem:[%s20774_s1 + $0x10a8] sm:$0xff]  ;;  %v15164_v27 = vpack.c.bf16 %v680_v22, %v679_v21 }
 0x1fa   :  { %15115 = vmatprep.subr.bf16.mxu1 %v15892_v0  ;;  %v15152_v26 = vpack.c.bf16 %v672_v19, %v671_v18  ;;  %v711_v19 = vld [vmem:[%s20774_s1 + $0x11e0] sm:$0xff] }
 0x1fc   :  { %15105 = vmatpush3.bf16.msra.mxu0 %v15104_v28  ;;  %v673_v28 = vld [vmem:[%s20774_s1 + $0x10b0] sm:$0xff] }
 0x1fd   :  { %15117 = vmatpush3.bf16.msra.mxu1 %v15116_v29  ;;  %15106 = vmatprep.subr.bf16.mxu0 %v15892_v0  ;;  %v674_v29 = vld [vmem:[%s20774_s1 + $0x10b8] sm:$0xff] }
 0x1fe   :  { %15118 = vmatprep.subr.bf16.mxu1 %v15892_v0  ;;  %v15155_v32 = vpack.c.bf16 %v674_v29, %v673_v28  ;;  %v713_v28 = vld [vmem:[%s20774_s1 + $0x11f0] sm:$0xff]  ;;  %v714_v29 = vld [vmem:[%s20774_s1 + $0x11f8] sm:$0xff] }
 0x1ff   :  { %v15215_v31 = vpack.c.bf16 %v714_v29, %v713_v28 }
 0x200   :  { %15108 = vmatpush3.bf16.msra.mxu0 %v15107_v34  ;;  %v683_v34 = vld [vmem:[%s20774_s1 + $0x1100] sm:$0xff] }
 0x201   :  { %15120 = vmatpush3.bf16.msra.mxu1 %v15119_v35  ;;  %15121 = vmatprep.subr.bf16.mxu0 %v15892_v0  ;;  %v684_v35 = vld [vmem:[%s20774_s1 + $0x1108] sm:$0xff] }
 0x202   :  { %15133 = vmatprep.subr.bf16.mxu1 %v15892_v0  ;;  %v15170_v39 = vpack.c.bf16 %v684_v35, %v683_v34  ;;  %v723_v34 = vld [vmem:[%s20774_s1 + $0x1240] sm:$0xff]  ;;  %v724_v35 = vld [vmem:[%s20774_s1 + $0x1248] sm:$0xff] }
 0x203   :  { %13116 = vmatmul.mubr.msk.f32.vlgmr.msra.gmra.mrb[62].mxu0 %vm1163_vm1, %v73_v40  ;;  %v78_v40 = vld [vmem:[%s20775_s0 + $0x86] sm:$0x3] }
 0x204   :  { %13135 = vmatmul.mubr.msk.f32.vlgmr.msra.gmra.mrb[62].mxu1 %vm1163_vm1, %v74_v42  ;;  %15123 = vmatpush3.bf16.msra.mxu0 %v15122_v41  ;;  %v15182_v41 = vpack.c.bf16 %v692_v37, %v691_v36  ;;  %v685_v42 = vld [vmem:[%s20774_s1 + $0x1110] sm:$0xff]  ;;  %v81_v36 = vld [vmem:[%s20775_s0 + $0x8c] sm:$0x3] }
 0x205   :  { %15135 = vmatpush3.bf16.msra.mxu1 %v15134_v43  ;;  %15124 = vmatprep.subr.bf16.mxu0 %v15892_v0  ;;  %v686_v43 = vld [vmem:[%s20774_s1 + $0x1118] sm:$0xff] }
 0x206   :  { %v3861_v52 = vpop.f32.mrb[36].mxu0  ;;  %15136 = vmatprep.subr.bf16.mxu1 %v15892_v0  ;;  %13153 = vmatprep.mubr.msk.f32.mxu0 %vm15893_vm0, %v15894_v8  ;;  %v15173_v46 = vpack.c.bf16 %v686_v43, %v685_v42  ;;  %v725_v42 = vld [vmem:[%s20774_s1 + $0x1250] sm:$0xff]  ;;  %v726_v43 = vld [vmem:[%s20774_s1 + $0x1258] sm:$0xff] }
 0x207   :  { %10545 = vst.msk [vmem:[%s20776_s2 + $0x48] sm:$0x3] %vm10508_vm2, %v3861_v52  ;;  %v3934_v55 = vpop.f32.mrb[36].mxu1  ;;  %v12623_v56 = vpop.f32.mrb[37].mxu0  ;;  %13172 = vmatprep.mubr.msk.f32.mxu1 %vm15893_vm0, %v15894_v8  ;;  %v696_v52 = vld [vmem:[%s20774_s1 + $0x1168] sm:$0xff]  ;;  %v15233_v45 = vpack.c.bf16 %v726_v43, %v725_v42 }
 0x208   :  { %10546 = vst.msk [vmem:[%s20776_s2 + $0x4a] sm:$0x3] %vm10508_vm2, %v3934_v55  ;;  %v12642_v57 = vpop.f32.mrb[37].mxu1  ;;  %15126 = vmatpush3.bf16.msra.mxu0 %v15125_v48  ;;  %v687_v48 = vld [vmem:[%s20774_s1 + $0x1120] sm:$0xff] }
 0x209   :  { %15138 = vmatpush3.bf16.msra.mxu1 %v15137_v49  ;;  %15127 = vmatprep.subr.bf16.mxu0 %v15892_v0  ;;  %v688_v49 = vld [vmem:[%s20774_s1 + $0x1128] sm:$0xff]  ;;  %v15188_v57 = vpack.c.bf16 %v696_v52, %v695_v51 }
 0x20a   :  { %15139 = vmatprep.subr.bf16.mxu1 %v15892_v0  ;;  %v15176_v56 = vpack.c.bf16 %v688_v49, %v687_v48  ;;  %v727_v49 = vld [vmem:[%s20774_s1 + $0x1260] sm:$0xff] }
 0x20c   :  { %15129 = vmatpush3.bf16.msra.mxu0 %v15128_v58  ;;  %v689_v58 = vld [vmem:[%s20774_s1 + $0x1130] sm:$0xff] }
 0x20d   :  { %15141 = vmatpush3.bf16.msra.mxu1 %v15140_v59  ;;  %15130 = vmatprep.subr.bf16.mxu0 %v15892_v0  ;;  %v690_v59 = vld [vmem:[%s20774_s1 + $0x1138] sm:$0xff] }
 0x20e   :  { %15142 = vmatprep.subr.bf16.mxu1 %v15892_v0  ;;  %v15179_v62 = vpack.c.bf16 %v690_v59, %v689_v58  ;;  %v729_v58 = vld [vmem:[%s20774_s1 + $0x1270] sm:$0xff]  ;;  %v730_v59 = vld [vmem:[%s20774_s1 + $0x1278] sm:$0xff] }
 0x20f   :  { %v15239_v61 = vpack.c.bf16 %v730_v59, %v729_v58 }
 0x210   :  { %15132 = vmatpush3.bf16.msra.mxu0 %v15131_v1  ;;  %v699_v1 = vld [vmem:[%s20774_s1 + $0x1180] sm:$0xff] }
 0x211   :  { %15144 = vmatpush3.bf16.msra.mxu1 %v15143_v2  ;;  %15145 = vmatprep.subr.bf16.mxu0 %v15892_v0  ;;  %v700_v2 = vld [vmem:[%s20774_s1 + $0x1188] sm:$0xff] }
 0x212   :  { %15157 = vmatprep.subr.bf16.mxu1 %v15892_v0  ;;  %v15194_v6 = vpack.c.bf16 %v700_v2, %v699_v1  ;;  %v739_v1 = vld [vmem:[%s20774_s1 + $0x12c0] sm:$0xff]  ;;  %v740_v2 = vld [vmem:[%s20774_s1 + $0x12c8] sm:$0xff] }
 0x213   :  { %13154 = vmatmul.mubr.msk.f32.vlgmr.msra.gmra.mrb[64].mxu0 %vm1163_vm1, %v75_v7  ;;  %v80_v7 = vld [vmem:[%s20775_s0 + $0x8a] sm:$0x3] }
 0x214   :  { %13173 = vmatmul.mubr.msk.f32.vlgmr.msra.gmra.mrb[64].mxu1 %vm1163_vm1, %v76_v10  ;;  %15147 = vmatpush3.bf16.msra.mxu0 %v15146_v9  ;;  %v15206_v9 = vpack.c.bf16 %v708_v4, %v707_v3  ;;  %v701_v10 = vld [vmem:[%s20774_s1 + $0x1190] sm:$0xff] }
 0x215   :  { %15159 = vmatpush3.bf16.msra.mxu1 %v15158_v11  ;;  %15148 = vmatprep.subr.bf16.mxu0 %v15892_v0  ;;  %v702_v11 = vld [vmem:[%s20774_s1 + $0x1198] sm:$0xff]  ;;  %v83_v3 = vld [vmem:[%s20775_s0 + $0x90] sm:$0x3] }
 0x216   :  { %v4007_v20 = vpop.f32.mrb[38].mxu0  ;;  %15160 = vmatprep.subr.bf16.mxu1 %v15892_v0  ;;  %13191 = vmatprep.mubr.msk.f32.mxu0 %vm15893_vm0, %v15894_v8  ;;  %v15197_v14 = vpack.c.bf16 %v702_v11, %v701_v10  ;;  %v741_v10 = vld [vmem:[%s20774_s1 + $0x12d0] sm:$0xff]  ;;  %v742_v11 = vld [vmem:[%s20774_s1 + $0x12d8] sm:$0xff] }
 0x217   :  { %10547 = vst.msk [vmem:[%s20776_s2 + $0x4c] sm:$0x3] %vm10508_vm2, %v4007_v20  ;;  %v4080_v23 = vpop.f32.mrb[38].mxu1  ;;  %v12661_v24 = vpop.f32.mrb[39].mxu0  ;;  %13210 = vmatprep.mubr.msk.f32.mxu1 %vm15893_vm0, %v15894_v8  ;;  %v712_v20 = vld [vmem:[%s20774_s1 + $0x11e8] sm:$0xff]  ;;  %v15257_v13 = vpack.c.bf16 %v742_v11, %v741_v10 }
 0x218   :  { %10548 = vst.msk [vmem:[%s20776_s2 + $0x4e] sm:$0x3] %vm10508_vm2, %v4080_v23  ;;  %v12680_v25 = vpop.f32.mrb[39].mxu1  ;;  %15150 = vmatpush3.bf16.msra.mxu0 %v15149_v16  ;;  %v703_v16 = vld [vmem:[%s20774_s1 + $0x11a0] sm:$0xff] }
 0x219   :  { %15162 = vmatpush3.bf16.msra.mxu1 %v15161_v17  ;;  %15151 = vmatprep.subr.bf16.mxu0 %v15892_v0  ;;  %v704_v17 = vld [vmem:[%s20774_s1 + $0x11a8] sm:$0xff]  ;;  %v15212_v25 = vpack.c.bf16 %v712_v20, %v711_v19 }
 0x21a   :  { %15163 = vmatprep.subr.bf16.mxu1 %v15892_v0  ;;  %v15200_v24 = vpack.c.bf16 %v704_v17, %v703_v16  ;;  %v743_v17 = vld [vmem:[%s20774_s1 + $0x12e0] sm:$0xff] }
 0x21c   :  { %15153 = vmatpush3.bf16.msra.mxu0 %v15152_v26  ;;  %v705_v26 = vld [vmem:[%s20774_s1 + $0x11b0] sm:$0xff] }
 0x21d   :  { %15165 = vmatpush3.bf16.msra.mxu1 %v15164_v27  ;;  %15154 = vmatprep.subr.bf16.mxu0 %v15892_v0  ;;  %v706_v27 = vld [vmem:[%s20774_s1 + $0x11b8] sm:$0xff] }
 0x21e   :  { %15166 = vmatprep.subr.bf16.mxu1 %v15892_v0  ;;  %v15203_v30 = vpack.c.bf16 %v706_v27, %v705_v26  ;;  %v745_v26 = vld [vmem:[%s20774_s1 + $0x12f0] sm:$0xff]  ;;  %v746_v27 = vld [vmem:[%s20774_s1 + $0x12f8] sm:$0xff] }
 0x21f   :  { %v15263_v29 = vpack.c.bf16 %v746_v27, %v745_v26 }
 0x220   :  { %15156 = vmatpush3.bf16.msra.mxu0 %v15155_v32  ;;  %v715_v32 = vld [vmem:[%s20774_s1 + $0x1200] sm:$0xff] }
 0x221   :  { %15168 = vmatpush3.bf16.msra.mxu1 %v15167_v33  ;;  %15169 = vmatprep.subr.bf16.mxu0 %v15892_v0  ;;  %v716_v33 = vld [vmem:[%s20774_s1 + $0x1208] sm:$0xff] }
 0x222   :  { %15181 = vmatprep.subr.bf16.mxu1 %v15892_v0  ;;  %v15218_v37 = vpack.c.bf16 %v716_v33, %v715_v32  ;;  %v755_v32 = vld [vmem:[%s20774_s1 + $0x1340] sm:$0xff]  ;;  %v756_v33 = vld [vmem:[%s20774_s1 + $0x1348] sm:$0xff] }
 0x223   :  { %13192 = vmatmul.mubr.msk.f32.vlgmr.msra.gmra.mrb[66].mxu0 %vm1163_vm1, %v77_v38  ;;  %v82_v38 = vld [vmem:[%s20775_s0 + $0x8e] sm:$0x3] }
 0x224   :  { %13211 = vmatmul.mubr.msk.f32.vlgmr.msra.gmra.mrb[66].mxu1 %vm1163_vm1, %v78_v40  ;;  %15171 = vmatpush3.bf16.msra.mxu0 %v15170_v39  ;;  %v15230_v39 = vpack.c.bf16 %v724_v35, %v723_v34  ;;  %v717_v40 = vld [vmem:[%s20774_s1 + $0x1210] sm:$0xff] }
 0x225   :  { %15183 = vmatpush3.bf16.msra.mxu1 %v15182_v41  ;;  %15172 = vmatprep.subr.bf16.mxu0 %v15892_v0  ;;  %v718_v41 = vld [vmem:[%s20774_s1 + $0x1218] sm:$0xff]  ;;  %v85_v34 = vld [vmem:[%s20775_s0 + $0x94] sm:$0x3] }
 0x226   :  { %v4153_v50 = vpop.f32.mrb[40].mxu0  ;;  %15184 = vmatprep.subr.bf16.mxu1 %v15892_v0  ;;  %13229 = vmatprep.mubr.msk.f32.mxu0 %vm15893_vm0, %v15894_v8  ;;  %v15221_v44 = vpack.c.bf16 %v718_v41, %v717_v40  ;;  %v757_v40 = vld [vmem:[%s20774_s1 + $0x1350] sm:$0xff]  ;;  %v758_v41 = vld [vmem:[%s20774_s1 + $0x1358] sm:$0xff] }
 0x227   :  { %10549 = vst.msk [vmem:[%s20776_s2 + $0x50] sm:$0x3] %vm10508_vm2, %v4153_v50  ;;  %v4226_v53 = vpop.f32.mrb[40].mxu1  ;;  %v12699_v54 = vpop.f32.mrb[41].mxu0  ;;  %13248 = vmatprep.mubr.msk.f32.mxu1 %vm15893_vm0, %v15894_v8  ;;  %v728_v50 = vld [vmem:[%s20774_s1 + $0x1268] sm:$0xff]  ;;  %v15281_v43 = vpack.c.bf16 %v758_v41, %v757_v40 }
 0x228   :  { %10550 = vst.msk [vmem:[%s20776_s2 + $0x52] sm:$0x3] %vm10508_vm2, %v4226_v53  ;;  %v12718_v55 = vpop.f32.mrb[41].mxu1  ;;  %15174 = vmatpush3.bf16.msra.mxu0 %v15173_v46  ;;  %v719_v46 = vld [vmem:[%s20774_s1 + $0x1220] sm:$0xff] }
 0x229   :  { %15186 = vmatpush3.bf16.msra.mxu1 %v15185_v47  ;;  %15175 = vmatprep.subr.bf16.mxu0 %v15892_v0  ;;  %v720_v47 = vld [vmem:[%s20774_s1 + $0x1228] sm:$0xff]  ;;  %v15236_v55 = vpack.c.bf16 %v728_v50, %v727_v49 }
 0x22a   :  { %15187 = vmatprep.subr.bf16.mxu1 %v15892_v0  ;;  %v15224_v54 = vpack.c.bf16 %v720_v47, %v719_v46  ;;  %v759_v47 = vld [vmem:[%s20774_s1 + $0x1360] sm:$0xff] }
 0x22c   :  { %15177 = vmatpush3.bf16.msra.mxu0 %v15176_v56  ;;  %v721_v56 = vld [vmem:[%s20774_s1 + $0x1230] sm:$0xff] }
 0x22d   :  { %15189 = vmatpush3.bf16.msra.mxu1 %v15188_v57  ;;  %15178 = vmatprep.subr.bf16.mxu0 %v15892_v0  ;;  %v722_v57 = vld [vmem:[%s20774_s1 + $0x1238] sm:$0xff] }
 0x22e   :  { %15190 = vmatprep.subr.bf16.mxu1 %v15892_v0  ;;  %v15227_v60 = vpack.c.bf16 %v722_v57, %v721_v56  ;;  %v761_v56 = vld [vmem:[%s20774_s1 + $0x1370] sm:$0xff]  ;;  %v762_v57 = vld [vmem:[%s20774_s1 + $0x1378] sm:$0xff] }
 0x22f   :  { %v15287_v59 = vpack.c.bf16 %v762_v57, %v761_v56 }
 0x230   :  { %15180 = vmatpush3.bf16.msra.mxu0 %v15179_v62  ;;  %v731_v62 = vld [vmem:[%s20774_s1 + $0x1280] sm:$0xff] }
 0x231   :  { %15192 = vmatpush3.bf16.msra.mxu1 %v15191_v63  ;;  %15193 = vmatprep.subr.bf16.mxu0 %v15892_v0  ;;  %v732_v63 = vld [vmem:[%s20774_s1 + $0x1288] sm:$0xff] }
 0x232   :  { %15205 = vmatprep.subr.bf16.mxu1 %v15892_v0  ;;  %v15242_v4 = vpack.c.bf16 %v732_v63, %v731_v62  ;;  %v771_v62 = vld [vmem:[%s20774_s1 + $0x13c0] sm:$0xff]  ;;  %v772_v63 = vld [vmem:[%s20774_s1 + $0x13c8] sm:$0xff] }
 0x233   :  { %13230 = vmatmul.mubr.msk.f32.vlgmr.msra.gmra.mrb[68].mxu0 %vm1163_vm1, %v79_v5  ;;  %v84_v5 = vld [vmem:[%s20775_s0 + $0x92] sm:$0x3] }
 0x234   :  { %13249 = vmatmul.mubr.msk.f32.vlgmr.msra.gmra.mrb[68].mxu1 %vm1163_vm1, %v80_v7  ;;  %15195 = vmatpush3.bf16.msra.mxu0 %v15194_v6  ;;  %v15254_v6 = vpack.c.bf16 %v740_v2, %v739_v1  ;;  %v733_v7 = vld [vmem:[%s20774_s1 + $0x1290] sm:$0xff]  ;;  %v87_v1 = vld [vmem:[%s20775_s0 + $0x98] sm:$0x3] }
 0x235   :  { %15207 = vmatpush3.bf16.msra.mxu1 %v15206_v9  ;;  %15196 = vmatprep.subr.bf16.mxu0 %v15892_v0  ;;  %v734_v9 = vld [vmem:[%s20774_s1 + $0x1298] sm:$0xff] }
 0x236   :  { %v4299_v18 = vpop.f32.mrb[42].mxu0  ;;  %15208 = vmatprep.subr.bf16.mxu1 %v15892_v0  ;;  %13267 = vmatprep.mubr.msk.f32.mxu0 %vm15893_vm0, %v15894_v8  ;;  %v15245_v12 = vpack.c.bf16 %v734_v9, %v733_v7  ;;  %v773_v7 = vld [vmem:[%s20774_s1 + $0x13d0] sm:$0xff]  ;;  %v774_v9 = vld [vmem:[%s20774_s1 + $0x13d8] sm:$0xff] }
 0x237   :  { %10551 = vst.msk [vmem:[%s20776_s2 + $0x54] sm:$0x3] %vm10508_vm2, %v4299_v18  ;;  %v4372_v21 = vpop.f32.mrb[42].mxu1  ;;  %v12737_v22 = vpop.f32.mrb[43].mxu0  ;;  %13286 = vmatprep.mubr.msk.f32.mxu1 %vm15893_vm0, %v15894_v8  ;;  %v744_v18 = vld [vmem:[%s20774_s1 + $0x12e8] sm:$0xff]  ;;  %v15305_v11 = vpack.c.bf16 %v774_v9, %v773_v7 }
 0x238   :  { %10552 = vst.msk [vmem:[%s20776_s2 + $0x56] sm:$0x3] %vm10508_vm2, %v4372_v21  ;;  %v12756_v23 = vpop.f32.mrb[43].mxu1  ;;  %15198 = vmatpush3.bf16.msra.mxu0 %v15197_v14  ;;  %v735_v14 = vld [vmem:[%s20774_s1 + $0x12a0] sm:$0xff] }
 0x239   :  { %15210 = vmatpush3.bf16.msra.mxu1 %v15209_v15  ;;  %15199 = vmatprep.subr.bf16.mxu0 %v15892_v0  ;;  %v736_v15 = vld [vmem:[%s20774_s1 + $0x12a8] sm:$0xff]  ;;  %v15260_v23 = vpack.c.bf16 %v744_v18, %v743_v17 }
 0x23a   :  { %15211 = vmatprep.subr.bf16.mxu1 %v15892_v0  ;;  %v15248_v22 = vpack.c.bf16 %v736_v15, %v735_v14  ;;  %v775_v15 = vld [vmem:[%s20774_s1 + $0x13e0] sm:$0xff] }
 0x23c   :  { %15201 = vmatpush3.bf16.msra.mxu0 %v15200_v24  ;;  %v737_v24 = vld [vmem:[%s20774_s1 + $0x12b0] sm:$0xff] }
 0x23d   :  { %15213 = vmatpush3.bf16.msra.mxu1 %v15212_v25  ;;  %15202 = vmatprep.subr.bf16.mxu0 %v15892_v0  ;;  %v738_v25 = vld [vmem:[%s20774_s1 + $0x12b8] sm:$0xff] }
 0x23e   :  { %15214 = vmatprep.subr.bf16.mxu1 %v15892_v0  ;;  %v15251_v28 = vpack.c.bf16 %v738_v25, %v737_v24  ;;  %v777_v24 = vld [vmem:[%s20774_s1 + $0x13f0] sm:$0xff]  ;;  %v778_v25 = vld [vmem:[%s20774_s1 + $0x13f8] sm:$0xff] }
 0x23f   :  { %v15311_v27 = vpack.c.bf16 %v778_v25, %v777_v24 }
 0x240   :  { %15204 = vmatpush3.bf16.msra.mxu0 %v15203_v30  ;;  %v747_v30 = vld [vmem:[%s20774_s1 + $0x1300] sm:$0xff] }
 0x241   :  { %15216 = vmatpush3.bf16.msra.mxu1 %v15215_v31  ;;  %15217 = vmatprep.subr.bf16.mxu0 %v15892_v0  ;;  %v748_v31 = vld [vmem:[%s20774_s1 + $0x1308] sm:$0xff] }
 0x242   :  { %15229 = vmatprep.subr.bf16.mxu1 %v15892_v0  ;;  %v15266_v35 = vpack.c.bf16 %v748_v31, %v747_v30  ;;  %v787_v30 = vld [vmem:[%s20774_s1 + $0x1440] sm:$0xff]  ;;  %v788_v31 = vld [vmem:[%s20774_s1 + $0x1448] sm:$0xff] }
 0x243   :  { %13268 = vmatmul.mubr.msk.f32.vlgmr.msra.gmra.mrb[70].mxu0 %vm1163_vm1, %v81_v36  ;;  %v86_v36 = vld [vmem:[%s20775_s0 + $0x96] sm:$0x3] }
 0x244   :  { %13287 = vmatmul.mubr.msk.f32.vlgmr.msra.gmra.mrb[70].mxu1 %vm1163_vm1, %v82_v38  ;;  %15219 = vmatpush3.bf16.msra.mxu0 %v15218_v37  ;;  %v15278_v37 = vpack.c.bf16 %v756_v33, %v755_v32  ;;  %v749_v38 = vld [vmem:[%s20774_s1 + $0x1310] sm:$0xff]  ;;  %v89_v32 = vld [vmem:[%s20775_s0 + $0x9c] sm:$0x3] }
 0x245   :  { %15231 = vmatpush3.bf16.msra.mxu1 %v15230_v39  ;;  %15220 = vmatprep.subr.bf16.mxu0 %v15892_v0  ;;  %v750_v39 = vld [vmem:[%s20774_s1 + $0x1318] sm:$0xff] }
 0x246   :  { %v4445_v48 = vpop.f32.mrb[44].mxu0  ;;  %15232 = vmatprep.subr.bf16.mxu1 %v15892_v0  ;;  %13305 = vmatprep.mubr.msk.f32.mxu0 %vm15893_vm0, %v15894_v8  ;;  %v15269_v42 = vpack.c.bf16 %v750_v39, %v749_v38  ;;  %v789_v38 = vld [vmem:[%s20774_s1 + $0x1450] sm:$0xff]  ;;  %v790_v39 = vld [vmem:[%s20774_s1 + $0x1458] sm:$0xff] }
 0x247   :  { %10553 = vst.msk [vmem:[%s20776_s2 + $0x58] sm:$0x3] %vm10508_vm2, %v4445_v48  ;;  %v4518_v51 = vpop.f32.mrb[44].mxu1  ;;  %v12775_v52 = vpop.f32.mrb[45].mxu0  ;;  %13324 = vmatprep.mubr.msk.f32.mxu1 %vm15893_vm0, %v15894_v8  ;;  %v760_v48 = vld [vmem:[%s20774_s1 + $0x1368] sm:$0xff]  ;;  %v15329_v41 = vpack.c.bf16 %v790_v39, %v789_v38 }
 0x248   :  { %10554 = vst.msk [vmem:[%s20776_s2 + $0x5a] sm:$0x3] %vm10508_vm2, %v4518_v51  ;;  %v12794_v53 = vpop.f32.mrb[45].mxu1  ;;  %15222 = vmatpush3.bf16.msra.mxu0 %v15221_v44  ;;  %v751_v44 = vld [vmem:[%s20774_s1 + $0x1320] sm:$0xff] }
 0x249   :  { %15234 = vmatpush3.bf16.msra.mxu1 %v15233_v45  ;;  %15223 = vmatprep.subr.bf16.mxu0 %v15892_v0  ;;  %v752_v45 = vld [vmem:[%s20774_s1 + $0x1328] sm:$0xff]  ;;  %v15284_v53 = vpack.c.bf16 %v760_v48, %v759_v47 }
 0x24a   :  { %15235 = vmatprep.subr.bf16.mxu1 %v15892_v0  ;;  %v15272_v52 = vpack.c.bf16 %v752_v45, %v751_v44  ;;  %v791_v45 = vld [vmem:[%s20774_s1 + $0x1460] sm:$0xff] }
 0x24c   :  { %15225 = vmatpush3.bf16.msra.mxu0 %v15224_v54  ;;  %v753_v54 = vld [vmem:[%s20774_s1 + $0x1330] sm:$0xff] }
 0x24d   :  { %15237 = vmatpush3.bf16.msra.mxu1 %v15236_v55  ;;  %15226 = vmatprep.subr.bf16.mxu0 %v15892_v0  ;;  %v754_v55 = vld [vmem:[%s20774_s1 + $0x1338] sm:$0xff] }
 0x24e   :  { %15238 = vmatprep.subr.bf16.mxu1 %v15892_v0  ;;  %v15275_v58 = vpack.c.bf16 %v754_v55, %v753_v54  ;;  %v793_v54 = vld [vmem:[%s20774_s1 + $0x1470] sm:$0xff]  ;;  %v794_v55 = vld [vmem:[%s20774_s1 + $0x1478] sm:$0xff] }
 0x24f   :  { %v15335_v57 = vpack.c.bf16 %v794_v55, %v793_v54 }
 0x250   :  { %15228 = vmatpush3.bf16.msra.mxu0 %v15227_v60  ;;  %v763_v60 = vld [vmem:[%s20774_s1 + $0x1380] sm:$0xff] }
 0x251   :  { %15240 = vmatpush3.bf16.msra.mxu1 %v15239_v61  ;;  %15241 = vmatprep.subr.bf16.mxu0 %v15892_v0  ;;  %v764_v61 = vld [vmem:[%s20774_s1 + $0x1388] sm:$0xff] }
 0x252   :  { %15253 = vmatprep.subr.bf16.mxu1 %v15892_v0  ;;  %v15290_v2 = vpack.c.bf16 %v764_v61, %v763_v60  ;;  %v803_v60 = vld [vmem:[%s20774_s1 + $0x14c0] sm:$0xff]  ;;  %v804_v61 = vld [vmem:[%s20774_s1 + $0x14c8] sm:$0xff] }
 0x253   :  { %13306 = vmatmul.mubr.msk.f32.vlgmr.msra.gmra.mrb[72].mxu0 %vm1163_vm1, %v83_v3  ;;  %v88_v3 = vld [vmem:[%s20775_s0 + $0x9a] sm:$0x3] }
 0x254   :  { %13325 = vmatmul.mubr.msk.f32.vlgmr.msra.gmra.mrb[72].mxu1 %vm1163_vm1, %v84_v5  ;;  %15243 = vmatpush3.bf16.msra.mxu0 %v15242_v4  ;;  %v15302_v4 = vpack.c.bf16 %v772_v63, %v771_v62  ;;  %v765_v5 = vld [vmem:[%s20774_s1 + $0x1390] sm:$0xff]  ;;  %v91_v62 = vld [vmem:[%s20775_s0 + $0xa0] sm:$0x3] }
 0x255   :  { %15255 = vmatpush3.bf16.msra.mxu1 %v15254_v6  ;;  %15244 = vmatprep.subr.bf16.mxu0 %v15892_v0  ;;  %v766_v6 = vld [vmem:[%s20774_s1 + $0x1398] sm:$0xff] }
 0x256   :  { %v4591_v16 = vpop.f32.mrb[46].mxu0  ;;  %15256 = vmatprep.subr.bf16.mxu1 %v15892_v0  ;;  %13343 = vmatprep.mubr.msk.f32.mxu0 %vm15893_vm0, %v15894_v8  ;;  %v15293_v10 = vpack.c.bf16 %v766_v6, %v765_v5  ;;  %v805_v5 = vld [vmem:[%s20774_s1 + $0x14d0] sm:$0xff]  ;;  %v806_v6 = vld [vmem:[%s20774_s1 + $0x14d8] sm:$0xff] }
 0x257   :  { %10555 = vst.msk [vmem:[%s20776_s2 + $0x5c] sm:$0x3] %vm10508_vm2, %v4591_v16  ;;  %v4664_v19 = vpop.f32.mrb[46].mxu1  ;;  %v12813_v20 = vpop.f32.mrb[47].mxu0  ;;  %13362 = vmatprep.mubr.msk.f32.mxu1 %vm15893_vm0, %v15894_v8  ;;  %v776_v16 = vld [vmem:[%s20774_s1 + $0x13e8] sm:$0xff]  ;;  %v15353_v9 = vpack.c.bf16 %v806_v6, %v805_v5 }
 0x258   :  { %10556 = vst.msk [vmem:[%s20776_s2 + $0x5e] sm:$0x3] %vm10508_vm2, %v4664_v19  ;;  %v12832_v21 = vpop.f32.mrb[47].mxu1  ;;  %15246 = vmatpush3.bf16.msra.mxu0 %v15245_v12  ;;  %v767_v12 = vld [vmem:[%s20774_s1 + $0x13a0] sm:$0xff] }
 0x259   :  { %15258 = vmatpush3.bf16.msra.mxu1 %v15257_v13  ;;  %15247 = vmatprep.subr.bf16.mxu0 %v15892_v0  ;;  %v768_v13 = vld [vmem:[%s20774_s1 + $0x13a8] sm:$0xff]  ;;  %v15308_v21 = vpack.c.bf16 %v776_v16, %v775_v15 }
 0x25a   :  { %15259 = vmatprep.subr.bf16.mxu1 %v15892_v0  ;;  %v15296_v20 = vpack.c.bf16 %v768_v13, %v767_v12  ;;  %v807_v13 = vld [vmem:[%s20774_s1 + $0x14e0] sm:$0xff] }
 0x25c   :  { %15249 = vmatpush3.bf16.msra.mxu0 %v15248_v22  ;;  %v769_v22 = vld [vmem:[%s20774_s1 + $0x13b0] sm:$0xff] }
 0x25d   :  { %15261 = vmatpush3.bf16.msra.mxu1 %v15260_v23  ;;  %15250 = vmatprep.subr.bf16.mxu0 %v15892_v0  ;;  %v770_v23 = vld [vmem:[%s20774_s1 + $0x13b8] sm:$0xff] }
 0x25e   :  { %15262 = vmatprep.subr.bf16.mxu1 %v15892_v0  ;;  %v15299_v26 = vpack.c.bf16 %v770_v23, %v769_v22  ;;  %v809_v22 = vld [vmem:[%s20774_s1 + $0x14f0] sm:$0xff]  ;;  %v810_v23 = vld [vmem:[%s20774_s1 + $0x14f8] sm:$0xff] }
 0x25f   :  { %v15359_v25 = vpack.c.bf16 %v810_v23, %v809_v22 }
 0x260   :  { %15252 = vmatpush3.bf16.msra.mxu0 %v15251_v28  ;;  %v779_v28 = vld [vmem:[%s20774_s1 + $0x1400] sm:$0xff] }
 0x261   :  { %15264 = vmatpush3.bf16.msra.mxu1 %v15263_v29  ;;  %15265 = vmatprep.subr.bf16.mxu0 %v15892_v0  ;;  %v780_v29 = vld [vmem:[%s20774_s1 + $0x1408] sm:$0xff] }
 0x262   :  { %15277 = vmatprep.subr.bf16.mxu1 %v15892_v0  ;;  %v15314_v33 = vpack.c.bf16 %v780_v29, %v779_v28  ;;  %v819_v28 = vld [vmem:[%s20774_s1 + $0x1540] sm:$0xff]  ;;  %v820_v29 = vld [vmem:[%s20774_s1 + $0x1548] sm:$0xff] }
 0x263   :  { %13344 = vmatmul.mubr.msk.f32.vlgmr.msra.gmra.mrb[74].mxu0 %vm1163_vm1, %v85_v34  ;;  %v90_v34 = vld [vmem:[%s20775_s0 + $0x9e] sm:$0x3] }
 0x264   :  { %13363 = vmatmul.mubr.msk.f32.vlgmr.msra.gmra.mrb[74].mxu1 %vm1163_vm1, %v86_v36  ;;  %15267 = vmatpush3.bf16.msra.mxu0 %v15266_v35  ;;  %v15326_v35 = vpack.c.bf16 %v788_v31, %v787_v30  ;;  %v781_v36 = vld [vmem:[%s20774_s1 + $0x1410] sm:$0xff]  ;;  %v93_v30 = vld [vmem:[%s20775_s0 + $0xa4] sm:$0x3] }
 0x265   :  { %15279 = vmatpush3.bf16.msra.mxu1 %v15278_v37  ;;  %15268 = vmatprep.subr.bf16.mxu0 %v15892_v0  ;;  %v782_v37 = vld [vmem:[%s20774_s1 + $0x1418] sm:$0xff] }
 0x266   :  { %v4737_v46 = vpop.f32.mrb[48].mxu0  ;;  %15280 = vmatprep.subr.bf16.mxu1 %v15892_v0  ;;  %13381 = vmatprep.mubr.msk.f32.mxu0 %vm15893_vm0, %v15894_v8  ;;  %v15317_v40 = vpack.c.bf16 %v782_v37, %v781_v36  ;;  %v821_v36 = vld [vmem:[%s20774_s1 + $0x1550] sm:$0xff]  ;;  %v822_v37 = vld [vmem:[%s20774_s1 + $0x1558] sm:$0xff] }
 0x267   :  { %10557 = vst.msk [vmem:[%s20776_s2 + $0x60] sm:$0x3] %vm10508_vm2, %v4737_v46  ;;  %v4810_v49 = vpop.f32.mrb[48].mxu1  ;;  %v12851_v50 = vpop.f32.mrb[49].mxu0  ;;  %13400 = vmatprep.mubr.msk.f32.mxu1 %vm15893_vm0, %v15894_v8  ;;  %v792_v46 = vld [vmem:[%s20774_s1 + $0x1468] sm:$0xff]  ;;  %v15377_v39 = vpack.c.bf16 %v822_v37, %v821_v36 }
 0x268   :  { %10558 = vst.msk [vmem:[%s20776_s2 + $0x62] sm:$0x3] %vm10508_vm2, %v4810_v49  ;;  %v12870_v51 = vpop.f32.mrb[49].mxu1  ;;  %15270 = vmatpush3.bf16.msra.mxu0 %v15269_v42  ;;  %v783_v42 = vld [vmem:[%s20774_s1 + $0x1420] sm:$0xff] }
 0x269   :  { %15282 = vmatpush3.bf16.msra.mxu1 %v15281_v43  ;;  %15271 = vmatprep.subr.bf16.mxu0 %v15892_v0  ;;  %v784_v43 = vld [vmem:[%s20774_s1 + $0x1428] sm:$0xff]  ;;  %v15332_v51 = vpack.c.bf16 %v792_v46, %v791_v45 }
 0x26a   :  { %15283 = vmatprep.subr.bf16.mxu1 %v15892_v0  ;;  %v15320_v50 = vpack.c.bf16 %v784_v43, %v783_v42  ;;  %v823_v43 = vld [vmem:[%s20774_s1 + $0x1560] sm:$0xff] }
 0x26c   :  { %15273 = vmatpush3.bf16.msra.mxu0 %v15272_v52  ;;  %v785_v52 = vld [vmem:[%s20774_s1 + $0x1430] sm:$0xff] }
 0x26d   :  { %15285 = vmatpush3.bf16.msra.mxu1 %v15284_v53  ;;  %15274 = vmatprep.subr.bf16.mxu0 %v15892_v0  ;;  %v786_v53 = vld [vmem:[%s20774_s1 + $0x1438] sm:$0xff] }
 0x26e   :  { %15286 = vmatprep.subr.bf16.mxu1 %v15892_v0  ;;  %v15323_v56 = vpack.c.bf16 %v786_v53, %v785_v52  ;;  %v825_v52 = vld [vmem:[%s20774_s1 + $0x1570] sm:$0xff]  ;;  %v826_v53 = vld [vmem:[%s20774_s1 + $0x1578] sm:$0xff] }
 0x26f   :  { %v15383_v55 = vpack.c.bf16 %v826_v53, %v825_v52 }
 0x270   :  { %15276 = vmatpush3.bf16.msra.mxu0 %v15275_v58  ;;  %v795_v58 = vld [vmem:[%s20774_s1 + $0x1480] sm:$0xff] }
 0x271   :  { %15288 = vmatpush3.bf16.msra.mxu1 %v15287_v59  ;;  %15289 = vmatprep.subr.bf16.mxu0 %v15892_v0  ;;  %v796_v59 = vld [vmem:[%s20774_s1 + $0x1488] sm:$0xff] }
 0x272   :  { %15301 = vmatprep.subr.bf16.mxu1 %v15892_v0  ;;  %v15338_v63 = vpack.c.bf16 %v796_v59, %v795_v58  ;;  %v835_v58 = vld [vmem:[%s20774_s1 + $0x15c0] sm:$0xff]  ;;  %v836_v59 = vld [vmem:[%s20774_s1 + $0x15c8] sm:$0xff] }
 0x273   :  { %13382 = vmatmul.mubr.msk.f32.vlgmr.msra.gmra.mrb[76].mxu0 %vm1163_vm1, %v87_v1  ;;  %v92_v1 = vld [vmem:[%s20775_s0 + $0xa2] sm:$0x3] }
 0x274   :  { %13401 = vmatmul.mubr.msk.f32.vlgmr.msra.gmra.mrb[76].mxu1 %vm1163_vm1, %v88_v3  ;;  %15291 = vmatpush3.bf16.msra.mxu0 %v15290_v2  ;;  %v15350_v2 = vpack.c.bf16 %v804_v61, %v803_v60  ;;  %v797_v3 = vld [vmem:[%s20774_s1 + $0x1490] sm:$0xff]  ;;  %v95_v60 = vld [vmem:[%s20775_s0 + $0xa8] sm:$0x3] }
 0x275   :  { %15303 = vmatpush3.bf16.msra.mxu1 %v15302_v4  ;;  %15292 = vmatprep.subr.bf16.mxu0 %v15892_v0  ;;  %v798_v4 = vld [vmem:[%s20774_s1 + $0x1498] sm:$0xff] }
 0x276   :  { %v4883_v14 = vpop.f32.mrb[50].mxu0  ;;  %15304 = vmatprep.subr.bf16.mxu1 %v15892_v0  ;;  %13419 = vmatprep.mubr.msk.f32.mxu0 %vm15893_vm0, %v15894_v8  ;;  %v15341_v7 = vpack.c.bf16 %v798_v4, %v797_v3  ;;  %v837_v3 = vld [vmem:[%s20774_s1 + $0x15d0] sm:$0xff]  ;;  %v838_v4 = vld [vmem:[%s20774_s1 + $0x15d8] sm:$0xff] }
 0x277   :  { %10559 = vst.msk [vmem:[%s20776_s2 + $0x64] sm:$0x3] %vm10508_vm2, %v4883_v14  ;;  %v4956_v17 = vpop.f32.mrb[50].mxu1  ;;  %v12889_v18 = vpop.f32.mrb[51].mxu0  ;;  %13438 = vmatprep.mubr.msk.f32.mxu1 %vm15893_vm0, %v15894_v8  ;;  %v808_v14 = vld [vmem:[%s20774_s1 + $0x14e8] sm:$0xff]  ;;  %v15401_v6 = vpack.c.bf16 %v838_v4, %v837_v3 }
 0x278   :  { %10560 = vst.msk [vmem:[%s20776_s2 + $0x66] sm:$0x3] %vm10508_vm2, %v4956_v17  ;;  %v12908_v19 = vpop.f32.mrb[51].mxu1  ;;  %15294 = vmatpush3.bf16.msra.mxu0 %v15293_v10  ;;  %v799_v10 = vld [vmem:[%s20774_s1 + $0x14a0] sm:$0xff] }
 0x279   :  { %15306 = vmatpush3.bf16.msra.mxu1 %v15305_v11  ;;  %15295 = vmatprep.subr.bf16.mxu0 %v15892_v0  ;;  %v800_v11 = vld [vmem:[%s20774_s1 + $0x14a8] sm:$0xff]  ;;  %v15356_v19 = vpack.c.bf16 %v808_v14, %v807_v13 }
 0x27a   :  { %15307 = vmatprep.subr.bf16.mxu1 %v15892_v0  ;;  %v15344_v18 = vpack.c.bf16 %v800_v11, %v799_v10  ;;  %v839_v11 = vld [vmem:[%s20774_s1 + $0x15e0] sm:$0xff] }
 0x27c   :  { %15297 = vmatpush3.bf16.msra.mxu0 %v15296_v20  ;;  %v801_v20 = vld [vmem:[%s20774_s1 + $0x14b0] sm:$0xff] }
 0x27d   :  { %15309 = vmatpush3.bf16.msra.mxu1 %v15308_v21  ;;  %15298 = vmatprep.subr.bf16.mxu0 %v15892_v0  ;;  %v802_v21 = vld [vmem:[%s20774_s1 + $0x14b8] sm:$0xff] }
 0x27e   :  { %15310 = vmatprep.subr.bf16.mxu1 %v15892_v0  ;;  %v15347_v24 = vpack.c.bf16 %v802_v21, %v801_v20  ;;  %v841_v20 = vld [vmem:[%s20774_s1 + $0x15f0] sm:$0xff]  ;;  %v842_v21 = vld [vmem:[%s20774_s1 + $0x15f8] sm:$0xff] }
 0x27f   :  { %v15407_v23 = vpack.c.bf16 %v842_v21, %v841_v20 }
 0x280   :  { %15300 = vmatpush3.bf16.msra.mxu0 %v15299_v26  ;;  %v811_v26 = vld [vmem:[%s20774_s1 + $0x1500] sm:$0xff] }
 0x281   :  { %15312 = vmatpush3.bf16.msra.mxu1 %v15311_v27  ;;  %15313 = vmatprep.subr.bf16.mxu0 %v15892_v0  ;;  %v812_v27 = vld [vmem:[%s20774_s1 + $0x1508] sm:$0xff] }
 0x282   :  { %15325 = vmatprep.subr.bf16.mxu1 %v15892_v0  ;;  %v15362_v31 = vpack.c.bf16 %v812_v27, %v811_v26  ;;  %v851_v26 = vld [vmem:[%s20774_s1 + $0x1640] sm:$0xff]  ;;  %v852_v27 = vld [vmem:[%s20774_s1 + $0x1648] sm:$0xff] }
 0x283   :  { %13420 = vmatmul.mubr.msk.f32.vlgmr.msra.gmra.mrb[78].mxu0 %vm1163_vm1, %v89_v32  ;;  %v94_v32 = vld [vmem:[%s20775_s0 + $0xa6] sm:$0x3] }
 0x284   :  { %13439 = vmatmul.mubr.msk.f32.vlgmr.msra.gmra.mrb[78].mxu1 %vm1163_vm1, %v90_v34  ;;  %15315 = vmatpush3.bf16.msra.mxu0 %v15314_v33  ;;  %v15374_v33 = vpack.c.bf16 %v820_v29, %v819_v28  ;;  %v813_v34 = vld [vmem:[%s20774_s1 + $0x1510] sm:$0xff]  ;;  %v97_v28 = vld [vmem:[%s20775_s0 + $0xac] sm:$0x3] }
 0x285   :  { %15327 = vmatpush3.bf16.msra.mxu1 %v15326_v35  ;;  %15316 = vmatprep.subr.bf16.mxu0 %v15892_v0  ;;  %v814_v35 = vld [vmem:[%s20774_s1 + $0x1518] sm:$0xff] }
 0x286   :  { %v5029_v44 = vpop.f32.mrb[52].mxu0  ;;  %15328 = vmatprep.subr.bf16.mxu1 %v15892_v0  ;;  %13457 = vmatprep.mubr.msk.f32.mxu0 %vm15893_vm0, %v15894_v8  ;;  %v15365_v38 = vpack.c.bf16 %v814_v35, %v813_v34  ;;  %v853_v34 = vld [vmem:[%s20774_s1 + $0x1650] sm:$0xff]  ;;  %v854_v35 = vld [vmem:[%s20774_s1 + $0x1658] sm:$0xff] }
 0x287   :  { %10561 = vst.msk [vmem:[%s20776_s2 + $0x68] sm:$0x3] %vm10508_vm2, %v5029_v44  ;;  %v5102_v47 = vpop.f32.mrb[52].mxu1  ;;  %v12927_v48 = vpop.f32.mrb[53].mxu0  ;;  %13476 = vmatprep.mubr.msk.f32.mxu1 %vm15893_vm0, %v15894_v8  ;;  %v824_v44 = vld [vmem:[%s20774_s1 + $0x1568] sm:$0xff]  ;;  %v15425_v37 = vpack.c.bf16 %v854_v35, %v853_v34 }
 0x288   :  { %10562 = vst.msk [vmem:[%s20776_s2 + $0x6a] sm:$0x3] %vm10508_vm2, %v5102_v47  ;;  %v12946_v49 = vpop.f32.mrb[53].mxu1  ;;  %15318 = vmatpush3.bf16.msra.mxu0 %v15317_v40  ;;  %v815_v40 = vld [vmem:[%s20774_s1 + $0x1520] sm:$0xff] }
 0x289   :  { %15330 = vmatpush3.bf16.msra.mxu1 %v15329_v41  ;;  %15319 = vmatprep.subr.bf16.mxu0 %v15892_v0  ;;  %v816_v41 = vld [vmem:[%s20774_s1 + $0x1528] sm:$0xff]  ;;  %v15380_v49 = vpack.c.bf16 %v824_v44, %v823_v43 }
 0x28a   :  { %15331 = vmatprep.subr.bf16.mxu1 %v15892_v0  ;;  %v15368_v48 = vpack.c.bf16 %v816_v41, %v815_v40  ;;  %v855_v41 = vld [vmem:[%s20774_s1 + $0x1660] sm:$0xff] }
 0x28c   :  { %15321 = vmatpush3.bf16.msra.mxu0 %v15320_v50  ;;  %v817_v50 = vld [vmem:[%s20774_s1 + $0x1530] sm:$0xff] }
 0x28d   :  { %15333 = vmatpush3.bf16.msra.mxu1 %v15332_v51  ;;  %15322 = vmatprep.subr.bf16.mxu0 %v15892_v0  ;;  %v818_v51 = vld [vmem:[%s20774_s1 + $0x1538] sm:$0xff] }
 0x28e   :  { %15334 = vmatprep.subr.bf16.mxu1 %v15892_v0  ;;  %v15371_v54 = vpack.c.bf16 %v818_v51, %v817_v50  ;;  %v857_v50 = vld [vmem:[%s20774_s1 + $0x1670] sm:$0xff]  ;;  %v858_v51 = vld [vmem:[%s20774_s1 + $0x1678] sm:$0xff] }
 0x28f   :  { %v15431_v53 = vpack.c.bf16 %v858_v51, %v857_v50 }
 0x290   :  { %15324 = vmatpush3.bf16.msra.mxu0 %v15323_v56  ;;  %v827_v56 = vld [vmem:[%s20774_s1 + $0x1580] sm:$0xff] }
 0x291   :  { %15336 = vmatpush3.bf16.msra.mxu1 %v15335_v57  ;;  %15337 = vmatprep.subr.bf16.mxu0 %v15892_v0  ;;  %v828_v57 = vld [vmem:[%s20774_s1 + $0x1588] sm:$0xff] }
 0x292   :  { %15349 = vmatprep.subr.bf16.mxu1 %v15892_v0  ;;  %v15386_v61 = vpack.c.bf16 %v828_v57, %v827_v56  ;;  %v867_v56 = vld [vmem:[%s20774_s1 + $0x16c0] sm:$0xff]  ;;  %v868_v57 = vld [vmem:[%s20774_s1 + $0x16c8] sm:$0xff] }
 0x293   :  { %13458 = vmatmul.mubr.msk.f32.vlgmr.msra.gmra.mrb[80].mxu0 %vm1163_vm1, %v91_v62  ;;  %v96_v62 = vld [vmem:[%s20775_s0 + $0xaa] sm:$0x3] }
 0x294   :  { %13477 = vmatmul.mubr.msk.f32.vlgmr.msra.gmra.mrb[80].mxu1 %vm1163_vm1, %v92_v1  ;;  %15339 = vmatpush3.bf16.msra.mxu0 %v15338_v63  ;;  %v15398_v63 = vpack.c.bf16 %v836_v59, %v835_v58  ;;  %v829_v1 = vld [vmem:[%s20774_s1 + $0x1590] sm:$0xff] }
 0x295   :  { %15351 = vmatpush3.bf16.msra.mxu1 %v15350_v2  ;;  %15340 = vmatprep.subr.bf16.mxu0 %v15892_v0  ;;  %v830_v2 = vld [vmem:[%s20774_s1 + $0x1598] sm:$0xff]  ;;  %v99_v58 = vld [vmem:[%s20775_s0 + $0xb0] sm:$0x3] }
 0x296   :  { %v5175_v12 = vpop.f32.mrb[54].mxu0  ;;  %15352 = vmatprep.subr.bf16.mxu1 %v15892_v0  ;;  %13495 = vmatprep.mubr.msk.f32.mxu0 %vm15893_vm0, %v15894_v8  ;;  %v15389_v5 = vpack.c.bf16 %v830_v2, %v829_v1  ;;  %v869_v1 = vld [vmem:[%s20774_s1 + $0x16d0] sm:$0xff]  ;;  %v870_v2 = vld [vmem:[%s20774_s1 + $0x16d8] sm:$0xff] }
 0x297   :  { %10563 = vst.msk [vmem:[%s20776_s2 + $0x6c] sm:$0x3] %vm10508_vm2, %v5175_v12  ;;  %v5248_v15 = vpop.f32.mrb[54].mxu1  ;;  %v12965_v16 = vpop.f32.mrb[55].mxu0  ;;  %13514 = vmatprep.mubr.msk.f32.mxu1 %vm15893_vm0, %v15894_v8  ;;  %v840_v12 = vld [vmem:[%s20774_s1 + $0x15e8] sm:$0xff]  ;;  %v15449_v4 = vpack.c.bf16 %v870_v2, %v869_v1 }
 0x298   :  { %10564 = vst.msk [vmem:[%s20776_s2 + $0x6e] sm:$0x3] %vm10508_vm2, %v5248_v15  ;;  %v12984_v17 = vpop.f32.mrb[55].mxu1  ;;  %15342 = vmatpush3.bf16.msra.mxu0 %v15341_v7  ;;  %v831_v7 = vld [vmem:[%s20774_s1 + $0x15a0] sm:$0xff] }
 0x299   :  { %15354 = vmatpush3.bf16.msra.mxu1 %v15353_v9  ;;  %15343 = vmatprep.subr.bf16.mxu0 %v15892_v0  ;;  %v832_v9 = vld [vmem:[%s20774_s1 + $0x15a8] sm:$0xff]  ;;  %v15404_v17 = vpack.c.bf16 %v840_v12, %v839_v11 }
 0x29a   :  { %15355 = vmatprep.subr.bf16.mxu1 %v15892_v0  ;;  %v15392_v16 = vpack.c.bf16 %v832_v9, %v831_v7  ;;  %v871_v9 = vld [vmem:[%s20774_s1 + $0x16e0] sm:$0xff] }
 0x29c   :  { %15345 = vmatpush3.bf16.msra.mxu0 %v15344_v18  ;;  %v833_v18 = vld [vmem:[%s20774_s1 + $0x15b0] sm:$0xff] }
 0x29d   :  { %15357 = vmatpush3.bf16.msra.mxu1 %v15356_v19  ;;  %15346 = vmatprep.subr.bf16.mxu0 %v15892_v0  ;;  %v834_v19 = vld [vmem:[%s20774_s1 + $0x15b8] sm:$0xff] }
 0x29e   :  { %15358 = vmatprep.subr.bf16.mxu1 %v15892_v0  ;;  %v15395_v22 = vpack.c.bf16 %v834_v19, %v833_v18  ;;  %v873_v18 = vld [vmem:[%s20774_s1 + $0x16f0] sm:$0xff]  ;;  %v874_v19 = vld [vmem:[%s20774_s1 + $0x16f8] sm:$0xff] }
 0x29f   :  { %v15455_v21 = vpack.c.bf16 %v874_v19, %v873_v18 }
 0x2a0   :  { %15348 = vmatpush3.bf16.msra.mxu0 %v15347_v24  ;;  %v843_v24 = vld [vmem:[%s20774_s1 + $0x1600] sm:$0xff] }
 0x2a1   :  { %15360 = vmatpush3.bf16.msra.mxu1 %v15359_v25  ;;  %15361 = vmatprep.subr.bf16.mxu0 %v15892_v0  ;;  %v844_v25 = vld [vmem:[%s20774_s1 + $0x1608] sm:$0xff] }
 0x2a2   :  { %15373 = vmatprep.subr.bf16.mxu1 %v15892_v0  ;;  %v15410_v29 = vpack.c.bf16 %v844_v25, %v843_v24  ;;  %v883_v24 = vld [vmem:[%s20774_s1 + $0x1740] sm:$0xff]  ;;  %v884_v25 = vld [vmem:[%s20774_s1 + $0x1748] sm:$0xff] }
 0x2a3   :  { %13496 = vmatmul.mubr.msk.f32.vlgmr.msra.gmra.mrb[82].mxu0 %vm1163_vm1, %v93_v30  ;;  %v98_v30 = vld [vmem:[%s20775_s0 + $0xae] sm:$0x3] }
 0x2a4   :  { %13515 = vmatmul.mubr.msk.f32.vlgmr.msra.gmra.mrb[82].mxu1 %vm1163_vm1, %v94_v32  ;;  %15363 = vmatpush3.bf16.msra.mxu0 %v15362_v31  ;;  %v15422_v31 = vpack.c.bf16 %v852_v27, %v851_v26  ;;  %v845_v32 = vld [vmem:[%s20774_s1 + $0x1610] sm:$0xff] }
 0x2a5   :  { %15375 = vmatpush3.bf16.msra.mxu1 %v15374_v33  ;;  %15364 = vmatprep.subr.bf16.mxu0 %v15892_v0  ;;  %v846_v33 = vld [vmem:[%s20774_s1 + $0x1618] sm:$0xff]  ;;  %v101_v26 = vld [vmem:[%s20775_s0 + $0xb4] sm:$0x3] }
 0x2a6   :  { %v5321_v42 = vpop.f32.mrb[56].mxu0  ;;  %15376 = vmatprep.subr.bf16.mxu1 %v15892_v0  ;;  %13533 = vmatprep.mubr.msk.f32.mxu0 %vm15893_vm0, %v15894_v8  ;;  %v15413_v36 = vpack.c.bf16 %v846_v33, %v845_v32  ;;  %v885_v32 = vld [vmem:[%s20774_s1 + $0x1750] sm:$0xff]  ;;  %v886_v33 = vld [vmem:[%s20774_s1 + $0x1758] sm:$0xff] }
 0x2a7   :  { %10565 = vst.msk [vmem:[%s20776_s2 + $0x70] sm:$0x3] %vm10508_vm2, %v5321_v42  ;;  %v5394_v45 = vpop.f32.mrb[56].mxu1  ;;  %v13003_v46 = vpop.f32.mrb[57].mxu0  ;;  %13552 = vmatprep.mubr.msk.f32.mxu1 %vm15893_vm0, %v15894_v8  ;;  %v856_v42 = vld [vmem:[%s20774_s1 + $0x1668] sm:$0xff]  ;;  %v15473_v35 = vpack.c.bf16 %v886_v33, %v885_v32 }
 0x2a8   :  { %10566 = vst.msk [vmem:[%s20776_s2 + $0x72] sm:$0x3] %vm10508_vm2, %v5394_v45  ;;  %v13022_v47 = vpop.f32.mrb[57].mxu1  ;;  %15366 = vmatpush3.bf16.msra.mxu0 %v15365_v38  ;;  %v847_v38 = vld [vmem:[%s20774_s1 + $0x1620] sm:$0xff] }
 0x2a9   :  { %15378 = vmatpush3.bf16.msra.mxu1 %v15377_v39  ;;  %15367 = vmatprep.subr.bf16.mxu0 %v15892_v0  ;;  %v848_v39 = vld [vmem:[%s20774_s1 + $0x1628] sm:$0xff]  ;;  %v15428_v47 = vpack.c.bf16 %v856_v42, %v855_v41 }
 0x2aa   :  { %15379 = vmatprep.subr.bf16.mxu1 %v15892_v0  ;;  %v15416_v46 = vpack.c.bf16 %v848_v39, %v847_v38  ;;  %v887_v39 = vld [vmem:[%s20774_s1 + $0x1760] sm:$0xff] }
 0x2ac   :  { %15369 = vmatpush3.bf16.msra.mxu0 %v15368_v48  ;;  %v849_v48 = vld [vmem:[%s20774_s1 + $0x1630] sm:$0xff] }
 0x2ad   :  { %15381 = vmatpush3.bf16.msra.mxu1 %v15380_v49  ;;  %15370 = vmatprep.subr.bf16.mxu0 %v15892_v0  ;;  %v850_v49 = vld [vmem:[%s20774_s1 + $0x1638] sm:$0xff] }
 0x2ae   :  { %15382 = vmatprep.subr.bf16.mxu1 %v15892_v0  ;;  %v15419_v52 = vpack.c.bf16 %v850_v49, %v849_v48  ;;  %v889_v48 = vld [vmem:[%s20774_s1 + $0x1770] sm:$0xff]  ;;  %v890_v49 = vld [vmem:[%s20774_s1 + $0x1778] sm:$0xff] }
 0x2af   :  { %v15479_v51 = vpack.c.bf16 %v890_v49, %v889_v48 }
 0x2b0   :  { %15372 = vmatpush3.bf16.msra.mxu0 %v15371_v54  ;;  %v859_v54 = vld [vmem:[%s20774_s1 + $0x1680] sm:$0xff] }
 0x2b1   :  { %15384 = vmatpush3.bf16.msra.mxu1 %v15383_v55  ;;  %15385 = vmatprep.subr.bf16.mxu0 %v15892_v0  ;;  %v860_v55 = vld [vmem:[%s20774_s1 + $0x1688] sm:$0xff] }
 0x2b2   :  { %15397 = vmatprep.subr.bf16.mxu1 %v15892_v0  ;;  %v15434_v59 = vpack.c.bf16 %v860_v55, %v859_v54  ;;  %v899_v54 = vld [vmem:[%s20774_s1 + $0x17c0] sm:$0xff]  ;;  %v900_v55 = vld [vmem:[%s20774_s1 + $0x17c8] sm:$0xff] }
 0x2b3   :  { %13534 = vmatmul.mubr.msk.f32.vlgmr.msra.gmra.mrb[84].mxu0 %vm1163_vm1, %v95_v60  ;;  %v100_v60 = vld [vmem:[%s20775_s0 + $0xb2] sm:$0x3] }
 0x2b4   :  { %13553 = vmatmul.mubr.msk.f32.vlgmr.msra.gmra.mrb[84].mxu1 %vm1163_vm1, %v96_v62  ;;  %15387 = vmatpush3.bf16.msra.mxu0 %v15386_v61  ;;  %v15446_v61 = vpack.c.bf16 %v868_v57, %v867_v56  ;;  %v861_v62 = vld [vmem:[%s20774_s1 + $0x1690] sm:$0xff]  ;;  %v103_v56 = vld [vmem:[%s20775_s0 + $0xb8] sm:$0x3] }
 0x2b5   :  { %15399 = vmatpush3.bf16.msra.mxu1 %v15398_v63  ;;  %15388 = vmatprep.subr.bf16.mxu0 %v15892_v0  ;;  %v862_v63 = vld [vmem:[%s20774_s1 + $0x1698] sm:$0xff] }
 0x2b6   :  { %v5467_v10 = vpop.f32.mrb[58].mxu0  ;;  %15400 = vmatprep.subr.bf16.mxu1 %v15892_v0  ;;  %13571 = vmatprep.mubr.msk.f32.mxu0 %vm15893_vm0, %v15894_v8  ;;  %v15437_v3 = vpack.c.bf16 %v862_v63, %v861_v62  ;;  %v901_v62 = vld [vmem:[%s20774_s1 + $0x17d0] sm:$0xff]  ;;  %v902_v63 = vld [vmem:[%s20774_s1 + $0x17d8] sm:$0xff] }
 0x2b7   :  { %10567 = vst.msk [vmem:[%s20776_s2 + $0x74] sm:$0x3] %vm10508_vm2, %v5467_v10  ;;  %v5540_v13 = vpop.f32.mrb[58].mxu1  ;;  %v13041_v14 = vpop.f32.mrb[59].mxu0  ;;  %13590 = vmatprep.mubr.msk.f32.mxu1 %vm15893_vm0, %v15894_v8  ;;  %v872_v10 = vld [vmem:[%s20774_s1 + $0x16e8] sm:$0xff]  ;;  %v15497_v2 = vpack.c.bf16 %v902_v63, %v901_v62 }
 0x2b8   :  { %10568 = vst.msk [vmem:[%s20776_s2 + $0x76] sm:$0x3] %vm10508_vm2, %v5540_v13  ;;  %v13060_v15 = vpop.f32.mrb[59].mxu1  ;;  %15390 = vmatpush3.bf16.msra.mxu0 %v15389_v5  ;;  %v863_v5 = vld [vmem:[%s20774_s1 + $0x16a0] sm:$0xff] }
 0x2b9   :  { %15402 = vmatpush3.bf16.msra.mxu1 %v15401_v6  ;;  %15391 = vmatprep.subr.bf16.mxu0 %v15892_v0  ;;  %v864_v6 = vld [vmem:[%s20774_s1 + $0x16a8] sm:$0xff]  ;;  %v15452_v15 = vpack.c.bf16 %v872_v10, %v871_v9 }
 0x2ba   :  { %15403 = vmatprep.subr.bf16.mxu1 %v15892_v0  ;;  %v15440_v14 = vpack.c.bf16 %v864_v6, %v863_v5  ;;  %v903_v6 = vld [vmem:[%s20774_s1 + $0x17e0] sm:$0xff] }
 0x2bc   :  { %15393 = vmatpush3.bf16.msra.mxu0 %v15392_v16  ;;  %v865_v16 = vld [vmem:[%s20774_s1 + $0x16b0] sm:$0xff] }
 0x2bd   :  { %15405 = vmatpush3.bf16.msra.mxu1 %v15404_v17  ;;  %15394 = vmatprep.subr.bf16.mxu0 %v15892_v0  ;;  %v866_v17 = vld [vmem:[%s20774_s1 + $0x16b8] sm:$0xff] }
 0x2be   :  { %15406 = vmatprep.subr.bf16.mxu1 %v15892_v0  ;;  %v15443_v20 = vpack.c.bf16 %v866_v17, %v865_v16  ;;  %v905_v16 = vld [vmem:[%s20774_s1 + $0x17f0] sm:$0xff]  ;;  %v906_v17 = vld [vmem:[%s20774_s1 + $0x17f8] sm:$0xff] }
 0x2bf   :  { %v15503_v19 = vpack.c.bf16 %v906_v17, %v905_v16 }
 0x2c0   :  { %15396 = vmatpush3.bf16.msra.mxu0 %v15395_v22  ;;  %v875_v22 = vld [vmem:[%s20774_s1 + $0x1700] sm:$0xff] }
 0x2c1   :  { %15408 = vmatpush3.bf16.msra.mxu1 %v15407_v23  ;;  %15409 = vmatprep.subr.bf16.mxu0 %v15892_v0  ;;  %v876_v23 = vld [vmem:[%s20774_s1 + $0x1708] sm:$0xff] }
 0x2c2   :  { %15421 = vmatprep.subr.bf16.mxu1 %v15892_v0  ;;  %v15458_v27 = vpack.c.bf16 %v876_v23, %v875_v22  ;;  %v915_v22 = vld [vmem:[%s20774_s1 + $0x1840] sm:$0xff]  ;;  %v916_v23 = vld [vmem:[%s20774_s1 + $0x1848] sm:$0xff] }
 0x2c3   :  { %13572 = vmatmul.mubr.msk.f32.vlgmr.msra.gmra.mrb[86].mxu0 %vm1163_vm1, %v97_v28  ;;  %v102_v28 = vld [vmem:[%s20775_s0 + $0xb6] sm:$0x3] }
 0x2c4   :  { %13591 = vmatmul.mubr.msk.f32.vlgmr.msra.gmra.mrb[86].mxu1 %vm1163_vm1, %v98_v30  ;;  %15411 = vmatpush3.bf16.msra.mxu0 %v15410_v29  ;;  %v15470_v29 = vpack.c.bf16 %v884_v25, %v883_v24  ;;  %v877_v30 = vld [vmem:[%s20774_s1 + $0x1710] sm:$0xff]  ;;  %v105_v24 = vld [vmem:[%s20775_s0 + $0xbc] sm:$0x3] }
 0x2c5   :  { %15423 = vmatpush3.bf16.msra.mxu1 %v15422_v31  ;;  %15412 = vmatprep.subr.bf16.mxu0 %v15892_v0  ;;  %v878_v31 = vld [vmem:[%s20774_s1 + $0x1718] sm:$0xff] }
 0x2c6   :  { %v5613_v40 = vpop.f32.mrb[60].mxu0  ;;  %15424 = vmatprep.subr.bf16.mxu1 %v15892_v0  ;;  %13609 = vmatprep.mubr.msk.f32.mxu0 %vm15893_vm0, %v15894_v8  ;;  %v15461_v34 = vpack.c.bf16 %v878_v31, %v877_v30  ;;  %v917_v30 = vld [vmem:[%s20774_s1 + $0x1850] sm:$0xff]  ;;  %v918_v31 = vld [vmem:[%s20774_s1 + $0x1858] sm:$0xff] }
 0x2c7   :  { %10569 = vst.msk [vmem:[%s20776_s2 + $0x78] sm:$0x3] %vm10508_vm2, %v5613_v40  ;;  %v5686_v43 = vpop.f32.mrb[60].mxu1  ;;  %v13079_v44 = vpop.f32.mrb[61].mxu0  ;;  %13628 = vmatprep.mubr.msk.f32.mxu1 %vm15893_vm0, %v15894_v8  ;;  %v888_v40 = vld [vmem:[%s20774_s1 + $0x1768] sm:$0xff]  ;;  %v15521_v33 = vpack.c.bf16 %v918_v31, %v917_v30 }
 0x2c8   :  { %10570 = vst.msk [vmem:[%s20776_s2 + $0x7a] sm:$0x3] %vm10508_vm2, %v5686_v43  ;;  %v13098_v45 = vpop.f32.mrb[61].mxu1  ;;  %15414 = vmatpush3.bf16.msra.mxu0 %v15413_v36  ;;  %v879_v36 = vld [vmem:[%s20774_s1 + $0x1720] sm:$0xff] }
 0x2c9   :  { %15426 = vmatpush3.bf16.msra.mxu1 %v15425_v37  ;;  %15415 = vmatprep.subr.bf16.mxu0 %v15892_v0  ;;  %v880_v37 = vld [vmem:[%s20774_s1 + $0x1728] sm:$0xff]  ;;  %v15476_v45 = vpack.c.bf16 %v888_v40, %v887_v39 }
 0x2ca   :  { %15427 = vmatprep.subr.bf16.mxu1 %v15892_v0  ;;  %v15464_v44 = vpack.c.bf16 %v880_v37, %v879_v36  ;;  %v919_v37 = vld [vmem:[%s20774_s1 + $0x1860] sm:$0xff] }
 0x2cc   :  { %15417 = vmatpush3.bf16.msra.mxu0 %v15416_v46  ;;  %v881_v46 = vld [vmem:[%s20774_s1 + $0x1730] sm:$0xff] }
 0x2cd   :  { %15429 = vmatpush3.bf16.msra.mxu1 %v15428_v47  ;;  %15418 = vmatprep.subr.bf16.mxu0 %v15892_v0  ;;  %v882_v47 = vld [vmem:[%s20774_s1 + $0x1738] sm:$0xff] }
 0x2ce   :  { %15430 = vmatprep.subr.bf16.mxu1 %v15892_v0  ;;  %v15467_v50 = vpack.c.bf16 %v882_v47, %v881_v46  ;;  %v921_v46 = vld [vmem:[%s20774_s1 + $0x1870] sm:$0xff]  ;;  %v922_v47 = vld [vmem:[%s20774_s1 + $0x1878] sm:$0xff] }
 0x2cf   :  { %v15527_v49 = vpack.c.bf16 %v922_v47, %v921_v46 }
 0x2d0   :  { %15420 = vmatpush3.bf16.msra.mxu0 %v15419_v52  ;;  %v891_v52 = vld [vmem:[%s20774_s1 + $0x1780] sm:$0xff] }
 0x2d1   :  { %15432 = vmatpush3.bf16.msra.mxu1 %v15431_v53  ;;  %15433 = vmatprep.subr.bf16.mxu0 %v15892_v0  ;;  %v892_v53 = vld [vmem:[%s20774_s1 + $0x1788] sm:$0xff] }
 0x2d2   :  { %15445 = vmatprep.subr.bf16.mxu1 %v15892_v0  ;;  %v15482_v57 = vpack.c.bf16 %v892_v53, %v891_v52  ;;  %v931_v52 = vld [vmem:[%s20774_s1 + $0x18c0] sm:$0xff]  ;;  %v932_v53 = vld [vmem:[%s20774_s1 + $0x18c8] sm:$0xff] }
 0x2d3   :  { %13610 = vmatmul.mubr.msk.f32.vlgmr.msra.gmra.mrb[88].mxu0 %vm1163_vm1, %v99_v58  ;;  %v104_v58 = vld [vmem:[%s20775_s0 + $0xba] sm:$0x3] }
 0x2d4   :  { %13629 = vmatmul.mubr.msk.f32.vlgmr.msra.gmra.mrb[88].mxu1 %vm1163_vm1, %v100_v60  ;;  %15435 = vmatpush3.bf16.msra.mxu0 %v15434_v59  ;;  %v15494_v59 = vpack.c.bf16 %v900_v55, %v899_v54  ;;  %v893_v60 = vld [vmem:[%s20774_s1 + $0x1790] sm:$0xff]  ;;  %v107_v54 = vld [vmem:[%s20775_s0 + $0xc0] sm:$0x3] }
 0x2d5   :  { %15447 = vmatpush3.bf16.msra.mxu1 %v15446_v61  ;;  %15436 = vmatprep.subr.bf16.mxu0 %v15892_v0  ;;  %v894_v61 = vld [vmem:[%s20774_s1 + $0x1798] sm:$0xff] }
 0x2d6   :  { %v5759_v7 = vpop.f32.mrb[62].mxu0  ;;  %15448 = vmatprep.subr.bf16.mxu1 %v15892_v0  ;;  %13647 = vmatprep.mubr.msk.f32.mxu0 %vm15893_vm0, %v15894_v8  ;;  %v15485_v1 = vpack.c.bf16 %v894_v61, %v893_v60  ;;  %v933_v60 = vld [vmem:[%s20774_s1 + $0x18d0] sm:$0xff]  ;;  %v934_v61 = vld [vmem:[%s20774_s1 + $0x18d8] sm:$0xff] }
 0x2d7   :  { %10571 = vst.msk [vmem:[%s20776_s2 + $0x7c] sm:$0x3] %vm10508_vm2, %v5759_v7  ;;  %v5832_v11 = vpop.f32.mrb[62].mxu1  ;;  %v13117_v12 = vpop.f32.mrb[63].mxu0  ;;  %13666 = vmatprep.mubr.msk.f32.mxu1 %vm15893_vm0, %v15894_v8  ;;  %v904_v7 = vld [vmem:[%s20774_s1 + $0x17e8] sm:$0xff]  ;;  %v15545_v63 = vpack.c.bf16 %v934_v61, %v933_v60 }
 0x2d8   :  { %10572 = vst.msk [vmem:[%s20776_s2 + $0x7e] sm:$0x3] %vm10508_vm2, %v5832_v11  ;;  %v13136_v13 = vpop.f32.mrb[63].mxu1  ;;  %15438 = vmatpush3.bf16.msra.mxu0 %v15437_v3  ;;  %v895_v3 = vld [vmem:[%s20774_s1 + $0x17a0] sm:$0xff] }
 0x2d9   :  { %15450 = vmatpush3.bf16.msra.mxu1 %v15449_v4  ;;  %15439 = vmatprep.subr.bf16.mxu0 %v15892_v0  ;;  %v896_v4 = vld [vmem:[%s20774_s1 + $0x17a8] sm:$0xff]  ;;  %v15500_v13 = vpack.c.bf16 %v904_v7, %v903_v6 }
 0x2da   :  { %15451 = vmatprep.subr.bf16.mxu1 %v15892_v0  ;;  %v15488_v12 = vpack.c.bf16 %v896_v4, %v895_v3  ;;  %v935_v4 = vld [vmem:[%s20774_s1 + $0x18e0] sm:$0xff] }
 0x2dc   :  { %15441 = vmatpush3.bf16.msra.mxu0 %v15440_v14  ;;  %v897_v14 = vld [vmem:[%s20774_s1 + $0x17b0] sm:$0xff] }
 0x2dd   :  { %15453 = vmatpush3.bf16.msra.mxu1 %v15452_v15  ;;  %15442 = vmatprep.subr.bf16.mxu0 %v15892_v0  ;;  %v898_v15 = vld [vmem:[%s20774_s1 + $0x17b8] sm:$0xff] }
 0x2de   :  { %15454 = vmatprep.subr.bf16.mxu1 %v15892_v0  ;;  %v15491_v18 = vpack.c.bf16 %v898_v15, %v897_v14  ;;  %v937_v14 = vld [vmem:[%s20774_s1 + $0x18f0] sm:$0xff]  ;;  %v938_v15 = vld [vmem:[%s20774_s1 + $0x18f8] sm:$0xff] }
 0x2df   :  { %v15551_v17 = vpack.c.bf16 %v938_v15, %v937_v14 }
 0x2e0   :  { %15444 = vmatpush3.bf16.msra.mxu0 %v15443_v20  ;;  %v907_v20 = vld [vmem:[%s20774_s1 + $0x1800] sm:$0xff] }
 0x2e1   :  { %15456 = vmatpush3.bf16.msra.mxu1 %v15455_v21  ;;  %15457 = vmatprep.subr.bf16.mxu0 %v15892_v0  ;;  %v908_v21 = vld [vmem:[%s20774_s1 + $0x1808] sm:$0xff] }
 0x2e2   :  { %15469 = vmatprep.subr.bf16.mxu1 %v15892_v0  ;;  %v15506_v25 = vpack.c.bf16 %v908_v21, %v907_v20  ;;  %v947_v20 = vld [vmem:[%s20774_s1 + $0x1940] sm:$0xff]  ;;  %v948_v21 = vld [vmem:[%s20774_s1 + $0x1948] sm:$0xff] }
 0x2e3   :  { %13648 = vmatmul.mubr.msk.f32.vlgmr.msra.gmra.mrb[90].mxu0 %vm1163_vm1, %v101_v26  ;;  %v106_v26 = vld [vmem:[%s20775_s0 + $0xbe] sm:$0x3] }
 0x2e4   :  { %13667 = vmatmul.mubr.msk.f32.vlgmr.msra.gmra.mrb[90].mxu1 %vm1163_vm1, %v102_v28  ;;  %15459 = vmatpush3.bf16.msra.mxu0 %v15458_v27  ;;  %v15518_v27 = vpack.c.bf16 %v916_v23, %v915_v22  ;;  %v909_v28 = vld [vmem:[%s20774_s1 + $0x1810] sm:$0xff]  ;;  %v109_v22 = vld [vmem:[%s20775_s0 + $0xc4] sm:$0x3] }
 0x2e5   :  { %15471 = vmatpush3.bf16.msra.mxu1 %v15470_v29  ;;  %15460 = vmatprep.subr.bf16.mxu0 %v15892_v0  ;;  %v910_v29 = vld [vmem:[%s20774_s1 + $0x1818] sm:$0xff] }
 0x2e6   :  { %v5905_v38 = vpop.f32.mrb[64].mxu0  ;;  %15472 = vmatprep.subr.bf16.mxu1 %v15892_v0  ;;  %13685 = vmatprep.mubr.msk.f32.mxu0 %vm15893_vm0, %v15894_v8  ;;  %v15509_v32 = vpack.c.bf16 %v910_v29, %v909_v28  ;;  %v949_v28 = vld [vmem:[%s20774_s1 + $0x1950] sm:$0xff]  ;;  %v950_v29 = vld [vmem:[%s20774_s1 + $0x1958] sm:$0xff] }
 0x2e7   :  { %10573 = vst.msk [vmem:[%s20776_s2 + $0x80] sm:$0x3] %vm10508_vm2, %v5905_v38  ;;  %v5978_v41 = vpop.f32.mrb[64].mxu1  ;;  %v13155_v42 = vpop.f32.mrb[65].mxu0  ;;  %13704 = vmatprep.mubr.msk.f32.mxu1 %vm15893_vm0, %v15894_v8  ;;  %v920_v38 = vld [vmem:[%s20774_s1 + $0x1868] sm:$0xff]  ;;  %v15569_v31 = vpack.c.bf16 %v950_v29, %v949_v28 }
 0x2e8   :  { %10574 = vst.msk [vmem:[%s20776_s2 + $0x82] sm:$0x3] %vm10508_vm2, %v5978_v41  ;;  %v13174_v43 = vpop.f32.mrb[65].mxu1  ;;  %15462 = vmatpush3.bf16.msra.mxu0 %v15461_v34  ;;  %v911_v34 = vld [vmem:[%s20774_s1 + $0x1820] sm:$0xff] }
 0x2e9   :  { %15474 = vmatpush3.bf16.msra.mxu1 %v15473_v35  ;;  %15463 = vmatprep.subr.bf16.mxu0 %v15892_v0  ;;  %v912_v35 = vld [vmem:[%s20774_s1 + $0x1828] sm:$0xff]  ;;  %v15524_v43 = vpack.c.bf16 %v920_v38, %v919_v37 }
 0x2ea   :  { %15475 = vmatprep.subr.bf16.mxu1 %v15892_v0  ;;  %v15512_v42 = vpack.c.bf16 %v912_v35, %v911_v34  ;;  %v951_v35 = vld [vmem:[%s20774_s1 + $0x1960] sm:$0xff] }
 0x2ec   :  { %15465 = vmatpush3.bf16.msra.mxu0 %v15464_v44  ;;  %v913_v44 = vld [vmem:[%s20774_s1 + $0x1830] sm:$0xff] }
 0x2ed   :  { %15477 = vmatpush3.bf16.msra.mxu1 %v15476_v45  ;;  %15466 = vmatprep.subr.bf16.mxu0 %v15892_v0  ;;  %v914_v45 = vld [vmem:[%s20774_s1 + $0x1838] sm:$0xff] }
 0x2ee   :  { %15478 = vmatprep.subr.bf16.mxu1 %v15892_v0  ;;  %v15515_v48 = vpack.c.bf16 %v914_v45, %v913_v44  ;;  %v953_v44 = vld [vmem:[%s20774_s1 + $0x1970] sm:$0xff]  ;;  %v954_v45 = vld [vmem:[%s20774_s1 + $0x1978] sm:$0xff] }
 0x2ef   :  { %v15575_v47 = vpack.c.bf16 %v954_v45, %v953_v44 }
 0x2f0   :  { %15468 = vmatpush3.bf16.msra.mxu0 %v15467_v50  ;;  %v923_v50 = vld [vmem:[%s20774_s1 + $0x1880] sm:$0xff] }
 0x2f1   :  { %15480 = vmatpush3.bf16.msra.mxu1 %v15479_v51  ;;  %15481 = vmatprep.subr.bf16.mxu0 %v15892_v0  ;;  %v924_v51 = vld [vmem:[%s20774_s1 + $0x1888] sm:$0xff] }
 0x2f2   :  { %15493 = vmatprep.subr.bf16.mxu1 %v15892_v0  ;;  %v15530_v55 = vpack.c.bf16 %v924_v51, %v923_v50  ;;  %v963_v50 = vld [vmem:[%s20774_s1 + $0x19c0] sm:$0xff]  ;;  %v964_v51 = vld [vmem:[%s20774_s1 + $0x19c8] sm:$0xff] }
 0x2f3   :  { %13686 = vmatmul.mubr.msk.f32.vlgmr.msra.gmra.mrb[92].mxu0 %vm1163_vm1, %v103_v56  ;;  %v108_v56 = vld [vmem:[%s20775_s0 + $0xc2] sm:$0x3] }
 0x2f4   :  { %13705 = vmatmul.mubr.msk.f32.vlgmr.msra.gmra.mrb[92].mxu1 %vm1163_vm1, %v104_v58  ;;  %15483 = vmatpush3.bf16.msra.mxu0 %v15482_v57  ;;  %v15542_v57 = vpack.c.bf16 %v932_v53, %v931_v52  ;;  %v925_v58 = vld [vmem:[%s20774_s1 + $0x1890] sm:$0xff]  ;;  %v111_v52 = vld [vmem:[%s20775_s0 + $0xc8] sm:$0x3] }
 0x2f5   :  { %15495 = vmatpush3.bf16.msra.mxu1 %v15494_v59  ;;  %15484 = vmatprep.subr.bf16.mxu0 %v15892_v0  ;;  %v926_v59 = vld [vmem:[%s20774_s1 + $0x1898] sm:$0xff] }
 0x2f6   :  { %v6051_v5 = vpop.f32.mrb[66].mxu0  ;;  %15496 = vmatprep.subr.bf16.mxu1 %v15892_v0  ;;  %13723 = vmatprep.mubr.msk.f32.mxu0 %vm15893_vm0, %v15894_v8  ;;  %v15533_v62 = vpack.c.bf16 %v926_v59, %v925_v58  ;;  %v965_v58 = vld [vmem:[%s20774_s1 + $0x19d0] sm:$0xff]  ;;  %v966_v59 = vld [vmem:[%s20774_s1 + $0x19d8] sm:$0xff] }
 0x2f7   :  { %10575 = vst.msk [vmem:[%s20776_s2 + $0x84] sm:$0x3] %vm10508_vm2, %v6051_v5  ;;  %v6124_v9 = vpop.f32.mrb[66].mxu1  ;;  %v13193_v10 = vpop.f32.mrb[67].mxu0  ;;  %13742 = vmatprep.mubr.msk.f32.mxu1 %vm15893_vm0, %v15894_v8  ;;  %v936_v5 = vld [vmem:[%s20774_s1 + $0x18e8] sm:$0xff]  ;;  %v15593_v61 = vpack.c.bf16 %v966_v59, %v965_v58 }
 0x2f8   :  { %10576 = vst.msk [vmem:[%s20776_s2 + $0x86] sm:$0x3] %vm10508_vm2, %v6124_v9  ;;  %v13212_v11 = vpop.f32.mrb[67].mxu1  ;;  %15486 = vmatpush3.bf16.msra.mxu0 %v15485_v1  ;;  %v927_v1 = vld [vmem:[%s20774_s1 + $0x18a0] sm:$0xff] }
 0x2f9   :  { %15498 = vmatpush3.bf16.msra.mxu1 %v15497_v2  ;;  %15487 = vmatprep.subr.bf16.mxu0 %v15892_v0  ;;  %v928_v2 = vld [vmem:[%s20774_s1 + $0x18a8] sm:$0xff]  ;;  %v15548_v11 = vpack.c.bf16 %v936_v5, %v935_v4 }
 0x2fa   :  { %15499 = vmatprep.subr.bf16.mxu1 %v15892_v0  ;;  %v15536_v10 = vpack.c.bf16 %v928_v2, %v927_v1  ;;  %v967_v2 = vld [vmem:[%s20774_s1 + $0x19e0] sm:$0xff] }
 0x2fc   :  { %15489 = vmatpush3.bf16.msra.mxu0 %v15488_v12  ;;  %v929_v12 = vld [vmem:[%s20774_s1 + $0x18b0] sm:$0xff] }
 0x2fd   :  { %15501 = vmatpush3.bf16.msra.mxu1 %v15500_v13  ;;  %15490 = vmatprep.subr.bf16.mxu0 %v15892_v0  ;;  %v930_v13 = vld [vmem:[%s20774_s1 + $0x18b8] sm:$0xff] }
 0x2fe   :  { %15502 = vmatprep.subr.bf16.mxu1 %v15892_v0  ;;  %v15539_v16 = vpack.c.bf16 %v930_v13, %v929_v12  ;;  %v969_v12 = vld [vmem:[%s20774_s1 + $0x19f0] sm:$0xff]  ;;  %v970_v13 = vld [vmem:[%s20774_s1 + $0x19f8] sm:$0xff] }
 0x2ff   :  { %v15599_v15 = vpack.c.bf16 %v970_v13, %v969_v12 }
 0x300   :  { %15492 = vmatpush3.bf16.msra.mxu0 %v15491_v18  ;;  %v939_v18 = vld [vmem:[%s20774_s1 + $0x1900] sm:$0xff] }
 0x301   :  { %15504 = vmatpush3.bf16.msra.mxu1 %v15503_v19  ;;  %15505 = vmatprep.subr.bf16.mxu0 %v15892_v0  ;;  %v940_v19 = vld [vmem:[%s20774_s1 + $0x1908] sm:$0xff] }
 0x302   :  { %15517 = vmatprep.subr.bf16.mxu1 %v15892_v0  ;;  %v15554_v23 = vpack.c.bf16 %v940_v19, %v939_v18  ;;  %v979_v18 = vld [vmem:[%s20774_s1 + $0x1a40] sm:$0xff]  ;;  %v980_v19 = vld [vmem:[%s20774_s1 + $0x1a48] sm:$0xff] }
 0x303   :  { %13724 = vmatmul.mubr.msk.f32.vlgmr.msra.gmra.mrb[94].mxu0 %vm1163_vm1, %v105_v24  ;;  %v110_v24 = vld [vmem:[%s20775_s0 + $0xc6] sm:$0x3] }
 0x304   :  { %13743 = vmatmul.mubr.msk.f32.vlgmr.msra.gmra.mrb[94].mxu1 %vm1163_vm1, %v106_v26  ;;  %15507 = vmatpush3.bf16.msra.mxu0 %v15506_v25  ;;  %v15566_v25 = vpack.c.bf16 %v948_v21, %v947_v20  ;;  %v941_v26 = vld [vmem:[%s20774_s1 + $0x1910] sm:$0xff]  ;;  %v113_v20 = vld [vmem:[%s20775_s0 + $0xcc] sm:$0x3] }
 0x305   :  { %15519 = vmatpush3.bf16.msra.mxu1 %v15518_v27  ;;  %15508 = vmatprep.subr.bf16.mxu0 %v15892_v0  ;;  %v942_v27 = vld [vmem:[%s20774_s1 + $0x1918] sm:$0xff] }
 0x306   :  { %v6197_v36 = vpop.f32.mrb[68].mxu0  ;;  %15520 = vmatprep.subr.bf16.mxu1 %v15892_v0  ;;  %13761 = vmatprep.mubr.msk.f32.mxu0 %vm15893_vm0, %v15894_v8  ;;  %v15557_v30 = vpack.c.bf16 %v942_v27, %v941_v26  ;;  %v981_v26 = vld [vmem:[%s20774_s1 + $0x1a50] sm:$0xff]  ;;  %v982_v27 = vld [vmem:[%s20774_s1 + $0x1a58] sm:$0xff] }
 0x307   :  { %10577 = vst.msk [vmem:[%s20776_s2 + $0x88] sm:$0x3] %vm10508_vm2, %v6197_v36  ;;  %v6270_v39 = vpop.f32.mrb[68].mxu1  ;;  %v13231_v40 = vpop.f32.mrb[69].mxu0  ;;  %13780 = vmatprep.mubr.msk.f32.mxu1 %vm15893_vm0, %v15894_v8  ;;  %v952_v36 = vld [vmem:[%s20774_s1 + $0x1968] sm:$0xff]  ;;  %v15617_v29 = vpack.c.bf16 %v982_v27, %v981_v26 }
 0x308   :  { %10578 = vst.msk [vmem:[%s20776_s2 + $0x8a] sm:$0x3] %vm10508_vm2, %v6270_v39  ;;  %v13250_v41 = vpop.f32.mrb[69].mxu1  ;;  %15510 = vmatpush3.bf16.msra.mxu0 %v15509_v32  ;;  %v943_v32 = vld [vmem:[%s20774_s1 + $0x1920] sm:$0xff] }
 0x309   :  { %15522 = vmatpush3.bf16.msra.mxu1 %v15521_v33  ;;  %15511 = vmatprep.subr.bf16.mxu0 %v15892_v0  ;;  %v944_v33 = vld [vmem:[%s20774_s1 + $0x1928] sm:$0xff]  ;;  %v15572_v41 = vpack.c.bf16 %v952_v36, %v951_v35 }
 0x30a   :  { %15523 = vmatprep.subr.bf16.mxu1 %v15892_v0  ;;  %v15560_v40 = vpack.c.bf16 %v944_v33, %v943_v32  ;;  %v983_v33 = vld [vmem:[%s20774_s1 + $0x1a60] sm:$0xff] }
 0x30c   :  { %15513 = vmatpush3.bf16.msra.mxu0 %v15512_v42  ;;  %v945_v42 = vld [vmem:[%s20774_s1 + $0x1930] sm:$0xff] }
 0x30d   :  { %15525 = vmatpush3.bf16.msra.mxu1 %v15524_v43  ;;  %15514 = vmatprep.subr.bf16.mxu0 %v15892_v0  ;;  %v946_v43 = vld [vmem:[%s20774_s1 + $0x1938] sm:$0xff] }
 0x30e   :  { %15526 = vmatprep.subr.bf16.mxu1 %v15892_v0  ;;  %v15563_v46 = vpack.c.bf16 %v946_v43, %v945_v42  ;;  %v985_v42 = vld [vmem:[%s20774_s1 + $0x1a70] sm:$0xff]  ;;  %v986_v43 = vld [vmem:[%s20774_s1 + $0x1a78] sm:$0xff] }
 0x30f   :  { %v15623_v45 = vpack.c.bf16 %v986_v43, %v985_v42 }
 0x310   :  { %15516 = vmatpush3.bf16.msra.mxu0 %v15515_v48  ;;  %v955_v48 = vld [vmem:[%s20774_s1 + $0x1980] sm:$0xff] }
 0x311   :  { %15528 = vmatpush3.bf16.msra.mxu1 %v15527_v49  ;;  %15529 = vmatprep.subr.bf16.mxu0 %v15892_v0  ;;  %v956_v49 = vld [vmem:[%s20774_s1 + $0x1988] sm:$0xff] }
 0x312   :  { %15541 = vmatprep.subr.bf16.mxu1 %v15892_v0  ;;  %v15578_v53 = vpack.c.bf16 %v956_v49, %v955_v48  ;;  %v995_v48 = vld [vmem:[%s20774_s1 + $0x1ac0] sm:$0xff]  ;;  %v996_v49 = vld [vmem:[%s20774_s1 + $0x1ac8] sm:$0xff] }
 0x313   :  { %13762 = vmatmul.mubr.msk.f32.vlgmr.msra.gmra.mrb[96].mxu0 %vm1163_vm1, %v107_v54  ;;  %v112_v54 = vld [vmem:[%s20775_s0 + $0xca] sm:$0x3] }
 0x314   :  { %13781 = vmatmul.mubr.msk.f32.vlgmr.msra.gmra.mrb[96].mxu1 %vm1163_vm1, %v108_v56  ;;  %15531 = vmatpush3.bf16.msra.mxu0 %v15530_v55  ;;  %v15590_v55 = vpack.c.bf16 %v964_v51, %v963_v50  ;;  %v957_v56 = vld [vmem:[%s20774_s1 + $0x1990] sm:$0xff] }
 0x315   :  { %15543 = vmatpush3.bf16.msra.mxu1 %v15542_v57  ;;  %15532 = vmatprep.subr.bf16.mxu0 %v15892_v0  ;;  %v958_v57 = vld [vmem:[%s20774_s1 + $0x1998] sm:$0xff]  ;;  %v115_v50 = vld [vmem:[%s20775_s0 + $0xd0] sm:$0x3] }
 0x316   :  { %v6343_v3 = vpop.f32.mrb[70].mxu0  ;;  %15544 = vmatprep.subr.bf16.mxu1 %v15892_v0  ;;  %13799 = vmatprep.mubr.msk.f32.mxu0 %vm15893_vm0, %v15894_v8  ;;  %v15581_v60 = vpack.c.bf16 %v958_v57, %v957_v56  ;;  %v997_v56 = vld [vmem:[%s20774_s1 + $0x1ad0] sm:$0xff]  ;;  %v998_v57 = vld [vmem:[%s20774_s1 + $0x1ad8] sm:$0xff] }
 0x317   :  { %10579 = vst.msk [vmem:[%s20776_s2 + $0x8c] sm:$0x3] %vm10508_vm2, %v6343_v3  ;;  %v6416_v6 = vpop.f32.mrb[70].mxu1  ;;  %v13269_v7 = vpop.f32.mrb[71].mxu0  ;;  %13818 = vmatprep.mubr.msk.f32.mxu1 %vm15893_vm0, %v15894_v8  ;;  %v968_v3 = vld [vmem:[%s20774_s1 + $0x19e8] sm:$0xff]  ;;  %v15641_v59 = vpack.c.bf16 %v998_v57, %v997_v56 }
 0x318   :  { %10580 = vst.msk [vmem:[%s20776_s2 + $0x8e] sm:$0x3] %vm10508_vm2, %v6416_v6  ;;  %v13288_v9 = vpop.f32.mrb[71].mxu1  ;;  %15534 = vmatpush3.bf16.msra.mxu0 %v15533_v62  ;;  %v959_v62 = vld [vmem:[%s20774_s1 + $0x19a0] sm:$0xff] }
 0x319   :  { %15546 = vmatpush3.bf16.msra.mxu1 %v15545_v63  ;;  %15535 = vmatprep.subr.bf16.mxu0 %v15892_v0  ;;  %v960_v63 = vld [vmem:[%s20774_s1 + $0x19a8] sm:$0xff]  ;;  %v15596_v9 = vpack.c.bf16 %v968_v3, %v967_v2 }
 0x31a   :  { %15547 = vmatprep.subr.bf16.mxu1 %v15892_v0  ;;  %v15584_v7 = vpack.c.bf16 %v960_v63, %v959_v62  ;;  %v999_v63 = vld [vmem:[%s20774_s1 + $0x1ae0] sm:$0xff] }
 0x31c   :  { %15537 = vmatpush3.bf16.msra.mxu0 %v15536_v10  ;;  %v961_v10 = vld [vmem:[%s20774_s1 + $0x19b0] sm:$0xff] }
 0x31d   :  { %15549 = vmatpush3.bf16.msra.mxu1 %v15548_v11  ;;  %15538 = vmatprep.subr.bf16.mxu0 %v15892_v0  ;;  %v962_v11 = vld [vmem:[%s20774_s1 + $0x19b8] sm:$0xff] }
 0x31e   :  { %15550 = vmatprep.subr.bf16.mxu1 %v15892_v0  ;;  %v15587_v14 = vpack.c.bf16 %v962_v11, %v961_v10  ;;  %v1001_v10 = vld [vmem:[%s20774_s1 + $0x1af0] sm:$0xff]  ;;  %v1002_v11 = vld [vmem:[%s20774_s1 + $0x1af8] sm:$0xff] }
 0x31f   :  { %v15647_v13 = vpack.c.bf16 %v1002_v11, %v1001_v10 }
 0x320   :  { %15540 = vmatpush3.bf16.msra.mxu0 %v15539_v16  ;;  %v971_v16 = vld [vmem:[%s20774_s1 + $0x1a00] sm:$0xff] }
 0x321   :  { %15552 = vmatpush3.bf16.msra.mxu1 %v15551_v17  ;;  %15553 = vmatprep.subr.bf16.mxu0 %v15892_v0  ;;  %v972_v17 = vld [vmem:[%s20774_s1 + $0x1a08] sm:$0xff] }
 0x322   :  { %15565 = vmatprep.subr.bf16.mxu1 %v15892_v0  ;;  %v15602_v21 = vpack.c.bf16 %v972_v17, %v971_v16  ;;  %v1011_v16 = vld [vmem:[%s20774_s1 + $0x1b40] sm:$0xff]  ;;  %v1012_v17 = vld [vmem:[%s20774_s1 + $0x1b48] sm:$0xff] }
 0x323   :  { %13800 = vmatmul.mubr.msk.f32.vlgmr.msra.gmra.mrb[98].mxu0 %vm1163_vm1, %v109_v22  ;;  %v114_v22 = vld [vmem:[%s20775_s0 + $0xce] sm:$0x3] }
 0x324   :  { %13819 = vmatmul.mubr.msk.f32.vlgmr.msra.gmra.mrb[98].mxu1 %vm1163_vm1, %v110_v24  ;;  %15555 = vmatpush3.bf16.msra.mxu0 %v15554_v23  ;;  %v15614_v23 = vpack.c.bf16 %v980_v19, %v979_v18  ;;  %v973_v24 = vld [vmem:[%s20774_s1 + $0x1a10] sm:$0xff] }
 0x325   :  { %15567 = vmatpush3.bf16.msra.mxu1 %v15566_v25  ;;  %15556 = vmatprep.subr.bf16.mxu0 %v15892_v0  ;;  %v974_v25 = vld [vmem:[%s20774_s1 + $0x1a18] sm:$0xff]  ;;  %v117_v18 = vld [vmem:[%s20775_s0 + $0xd4] sm:$0x3] }
 0x326   :  { %v6489_v34 = vpop.f32.mrb[72].mxu0  ;;  %15568 = vmatprep.subr.bf16.mxu1 %v15892_v0  ;;  %13837 = vmatprep.mubr.msk.f32.mxu0 %vm15893_vm0, %v15894_v8  ;;  %v15605_v28 = vpack.c.bf16 %v974_v25, %v973_v24  ;;  %v1013_v24 = vld [vmem:[%s20774_s1 + $0x1b50] sm:$0xff]  ;;  %v1014_v25 = vld [vmem:[%s20774_s1 + $0x1b58] sm:$0xff] }
 0x327   :  { %10581 = vst.msk [vmem:[%s20776_s2 + $0x90] sm:$0x3] %vm10508_vm2, %v6489_v34  ;;  %v6562_v37 = vpop.f32.mrb[72].mxu1  ;;  %v13307_v38 = vpop.f32.mrb[73].mxu0  ;;  %13856 = vmatprep.mubr.msk.f32.mxu1 %vm15893_vm0, %v15894_v8  ;;  %v984_v34 = vld [vmem:[%s20774_s1 + $0x1a68] sm:$0xff]  ;;  %v15665_v27 = vpack.c.bf16 %v1014_v25, %v1013_v24 }
 0x328   :  { %10582 = vst.msk [vmem:[%s20776_s2 + $0x92] sm:$0x3] %vm10508_vm2, %v6562_v37  ;;  %v13326_v39 = vpop.f32.mrb[73].mxu1  ;;  %15558 = vmatpush3.bf16.msra.mxu0 %v15557_v30  ;;  %v975_v30 = vld [vmem:[%s20774_s1 + $0x1a20] sm:$0xff] }
 0x329   :  { %15570 = vmatpush3.bf16.msra.mxu1 %v15569_v31  ;;  %15559 = vmatprep.subr.bf16.mxu0 %v15892_v0  ;;  %v976_v31 = vld [vmem:[%s20774_s1 + $0x1a28] sm:$0xff]  ;;  %v15620_v39 = vpack.c.bf16 %v984_v34, %v983_v33 }
 0x32a   :  { %15571 = vmatprep.subr.bf16.mxu1 %v15892_v0  ;;  %v15608_v38 = vpack.c.bf16 %v976_v31, %v975_v30  ;;  %v1015_v31 = vld [vmem:[%s20774_s1 + $0x1b60] sm:$0xff] }
 0x32c   :  { %15561 = vmatpush3.bf16.msra.mxu0 %v15560_v40  ;;  %v977_v40 = vld [vmem:[%s20774_s1 + $0x1a30] sm:$0xff] }
 0x32d   :  { %15573 = vmatpush3.bf16.msra.mxu1 %v15572_v41  ;;  %15562 = vmatprep.subr.bf16.mxu0 %v15892_v0  ;;  %v978_v41 = vld [vmem:[%s20774_s1 + $0x1a38] sm:$0xff] }
 0x32e   :  { %15574 = vmatprep.subr.bf16.mxu1 %v15892_v0  ;;  %v15611_v44 = vpack.c.bf16 %v978_v41, %v977_v40  ;;  %v1017_v40 = vld [vmem:[%s20774_s1 + $0x1b70] sm:$0xff]  ;;  %v1018_v41 = vld [vmem:[%s20774_s1 + $0x1b78] sm:$0xff] }
 0x32f   :  { %v15671_v43 = vpack.c.bf16 %v1018_v41, %v1017_v40 }
 0x330   :  { %15564 = vmatpush3.bf16.msra.mxu0 %v15563_v46  ;;  %v987_v46 = vld [vmem:[%s20774_s1 + $0x1a80] sm:$0xff] }
 0x331   :  { %15576 = vmatpush3.bf16.msra.mxu1 %v15575_v47  ;;  %15577 = vmatprep.subr.bf16.mxu0 %v15892_v0  ;;  %v988_v47 = vld [vmem:[%s20774_s1 + $0x1a88] sm:$0xff] }
 0x332   :  { %15589 = vmatprep.subr.bf16.mxu1 %v15892_v0  ;;  %v15626_v51 = vpack.c.bf16 %v988_v47, %v987_v46  ;;  %v1027_v46 = vld [vmem:[%s20774_s1 + $0x1bc0] sm:$0xff]  ;;  %v1028_v47 = vld [vmem:[%s20774_s1 + $0x1bc8] sm:$0xff] }
 0x333   :  { %13838 = vmatmul.mubr.msk.f32.vlgmr.msra.gmra.mrb[100].mxu0 %vm1163_vm1, %v111_v52  ;;  %v116_v52 = vld [vmem:[%s20775_s0 + $0xd2] sm:$0x3] }
 0x334   :  { %13857 = vmatmul.mubr.msk.f32.vlgmr.msra.gmra.mrb[100].mxu1 %vm1163_vm1, %v112_v54  ;;  %15579 = vmatpush3.bf16.msra.mxu0 %v15578_v53  ;;  %v15638_v53 = vpack.c.bf16 %v996_v49, %v995_v48  ;;  %v989_v54 = vld [vmem:[%s20774_s1 + $0x1a90] sm:$0xff]  ;;  %v119_v48 = vld [vmem:[%s20775_s0 + $0xd8] sm:$0x3] }
 0x335   :  { %15591 = vmatpush3.bf16.msra.mxu1 %v15590_v55  ;;  %15580 = vmatprep.subr.bf16.mxu0 %v15892_v0  ;;  %v990_v55 = vld [vmem:[%s20774_s1 + $0x1a98] sm:$0xff] }
 0x336   :  { %v6635_v1 = vpop.f32.mrb[74].mxu0  ;;  %15592 = vmatprep.subr.bf16.mxu1 %v15892_v0  ;;  %13875 = vmatprep.mubr.msk.f32.mxu0 %vm15893_vm0, %v15894_v8  ;;  %v15629_v58 = vpack.c.bf16 %v990_v55, %v989_v54  ;;  %v1029_v54 = vld [vmem:[%s20774_s1 + $0x1bd0] sm:$0xff]  ;;  %v1030_v55 = vld [vmem:[%s20774_s1 + $0x1bd8] sm:$0xff] }
 0x337   :  { %10583 = vst.msk [vmem:[%s20776_s2 + $0x94] sm:$0x3] %vm10508_vm2, %v6635_v1  ;;  %v6708_v4 = vpop.f32.mrb[74].mxu1  ;;  %v13345_v5 = vpop.f32.mrb[75].mxu0  ;;  %13894 = vmatprep.mubr.msk.f32.mxu1 %vm15893_vm0, %v15894_v8  ;;  %v1000_v1 = vld [vmem:[%s20774_s1 + $0x1ae8] sm:$0xff]  ;;  %v15689_v57 = vpack.c.bf16 %v1030_v55, %v1029_v54 }
 0x338   :  { %10584 = vst.msk [vmem:[%s20776_s2 + $0x96] sm:$0x3] %vm10508_vm2, %v6708_v4  ;;  %v13364_v6 = vpop.f32.mrb[75].mxu1  ;;  %15582 = vmatpush3.bf16.msra.mxu0 %v15581_v60  ;;  %v991_v60 = vld [vmem:[%s20774_s1 + $0x1aa0] sm:$0xff] }
 0x339   :  { %15594 = vmatpush3.bf16.msra.mxu1 %v15593_v61  ;;  %15583 = vmatprep.subr.bf16.mxu0 %v15892_v0  ;;  %v992_v61 = vld [vmem:[%s20774_s1 + $0x1aa8] sm:$0xff]  ;;  %v15644_v6 = vpack.c.bf16 %v1000_v1, %v999_v63 }
 0x33a   :  { %15595 = vmatprep.subr.bf16.mxu1 %v15892_v0  ;;  %v15632_v5 = vpack.c.bf16 %v992_v61, %v991_v60  ;;  %v1031_v61 = vld [vmem:[%s20774_s1 + $0x1be0] sm:$0xff] }
 0x33c   :  { %15585 = vmatpush3.bf16.msra.mxu0 %v15584_v7  ;;  %v993_v7 = vld [vmem:[%s20774_s1 + $0x1ab0] sm:$0xff] }
 0x33d   :  { %15597 = vmatpush3.bf16.msra.mxu1 %v15596_v9  ;;  %15586 = vmatprep.subr.bf16.mxu0 %v15892_v0  ;;  %v994_v9 = vld [vmem:[%s20774_s1 + $0x1ab8] sm:$0xff] }
 0x33e   :  { %15598 = vmatprep.subr.bf16.mxu1 %v15892_v0  ;;  %v15635_v12 = vpack.c.bf16 %v994_v9, %v993_v7  ;;  %v1033_v7 = vld [vmem:[%s20774_s1 + $0x1bf0] sm:$0xff]  ;;  %v1034_v9 = vld [vmem:[%s20774_s1 + $0x1bf8] sm:$0xff] }
 0x33f   :  { %v15695_v11 = vpack.c.bf16 %v1034_v9, %v1033_v7 }
 0x340   :  { %15588 = vmatpush3.bf16.msra.mxu0 %v15587_v14  ;;  %v1003_v14 = vld [vmem:[%s20774_s1 + $0x1b00] sm:$0xff] }
 0x341   :  { %15600 = vmatpush3.bf16.msra.mxu1 %v15599_v15  ;;  %15601 = vmatprep.subr.bf16.mxu0 %v15892_v0  ;;  %v1004_v15 = vld [vmem:[%s20774_s1 + $0x1b08] sm:$0xff] }
 0x342   :  { %15613 = vmatprep.subr.bf16.mxu1 %v15892_v0  ;;  %v15650_v19 = vpack.c.bf16 %v1004_v15, %v1003_v14  ;;  %v1043_v14 = vld [vmem:[%s20774_s1 + $0x1c40] sm:$0xff]  ;;  %v1044_v15 = vld [vmem:[%s20774_s1 + $0x1c48] sm:$0xff] }
 0x343   :  { %13876 = vmatmul.mubr.msk.f32.vlgmr.msra.gmra.mrb[102].mxu0 %vm1163_vm1, %v113_v20  ;;  %v118_v20 = vld [vmem:[%s20775_s0 + $0xd6] sm:$0x3] }
 0x344   :  { %13895 = vmatmul.mubr.msk.f32.vlgmr.msra.gmra.mrb[102].mxu1 %vm1163_vm1, %v114_v22  ;;  %15603 = vmatpush3.bf16.msra.mxu0 %v15602_v21  ;;  %v15662_v21 = vpack.c.bf16 %v1012_v17, %v1011_v16  ;;  %v1005_v22 = vld [vmem:[%s20774_s1 + $0x1b10] sm:$0xff]  ;;  %v121_v16 = vld [vmem:[%s20775_s0 + $0xdc] sm:$0x3] }
 0x345   :  { %15615 = vmatpush3.bf16.msra.mxu1 %v15614_v23  ;;  %15604 = vmatprep.subr.bf16.mxu0 %v15892_v0  ;;  %v1006_v23 = vld [vmem:[%s20774_s1 + $0x1b18] sm:$0xff] }
 0x346   :  { %v6781_v32 = vpop.f32.mrb[76].mxu0  ;;  %15616 = vmatprep.subr.bf16.mxu1 %v15892_v0  ;;  %13913 = vmatprep.mubr.msk.f32.mxu0 %vm15893_vm0, %v15894_v8  ;;  %v15653_v26 = vpack.c.bf16 %v1006_v23, %v1005_v22  ;;  %v1045_v22 = vld [vmem:[%s20774_s1 + $0x1c50] sm:$0xff]  ;;  %v1046_v23 = vld [vmem:[%s20774_s1 + $0x1c58] sm:$0xff] }
 0x347   :  { %10585 = vst.msk [vmem:[%s20776_s2 + $0x98] sm:$0x3] %vm10508_vm2, %v6781_v32  ;;  %v6854_v35 = vpop.f32.mrb[76].mxu1  ;;  %v13383_v36 = vpop.f32.mrb[77].mxu0  ;;  %13932 = vmatprep.mubr.msk.f32.mxu1 %vm15893_vm0, %v15894_v8  ;;  %v1016_v32 = vld [vmem:[%s20774_s1 + $0x1b68] sm:$0xff]  ;;  %v15713_v25 = vpack.c.bf16 %v1046_v23, %v1045_v22 }
 0x348   :  { %10586 = vst.msk [vmem:[%s20776_s2 + $0x9a] sm:$0x3] %vm10508_vm2, %v6854_v35  ;;  %v13402_v37 = vpop.f32.mrb[77].mxu1  ;;  %15606 = vmatpush3.bf16.msra.mxu0 %v15605_v28  ;;  %v1007_v28 = vld [vmem:[%s20774_s1 + $0x1b20] sm:$0xff] }
 0x349   :  { %15618 = vmatpush3.bf16.msra.mxu1 %v15617_v29  ;;  %15607 = vmatprep.subr.bf16.mxu0 %v15892_v0  ;;  %v1008_v29 = vld [vmem:[%s20774_s1 + $0x1b28] sm:$0xff]  ;;  %v15668_v37 = vpack.c.bf16 %v1016_v32, %v1015_v31 }
 0x34a   :  { %15619 = vmatprep.subr.bf16.mxu1 %v15892_v0  ;;  %v15656_v36 = vpack.c.bf16 %v1008_v29, %v1007_v28  ;;  %v1047_v29 = vld [vmem:[%s20774_s1 + $0x1c60] sm:$0xff] }
 0x34c   :  { %15609 = vmatpush3.bf16.msra.mxu0 %v15608_v38  ;;  %v1009_v38 = vld [vmem:[%s20774_s1 + $0x1b30] sm:$0xff] }
 0x34d   :  { %15621 = vmatpush3.bf16.msra.mxu1 %v15620_v39  ;;  %15610 = vmatprep.subr.bf16.mxu0 %v15892_v0  ;;  %v1010_v39 = vld [vmem:[%s20774_s1 + $0x1b38] sm:$0xff] }
 0x34e   :  { %15622 = vmatprep.subr.bf16.mxu1 %v15892_v0  ;;  %v15659_v42 = vpack.c.bf16 %v1010_v39, %v1009_v38  ;;  %v1049_v38 = vld [vmem:[%s20774_s1 + $0x1c70] sm:$0xff]  ;;  %v1050_v39 = vld [vmem:[%s20774_s1 + $0x1c78] sm:$0xff] }
 0x34f   :  { %v15719_v41 = vpack.c.bf16 %v1050_v39, %v1049_v38 }
 0x350   :  { %15612 = vmatpush3.bf16.msra.mxu0 %v15611_v44  ;;  %v1019_v44 = vld [vmem:[%s20774_s1 + $0x1b80] sm:$0xff] }
 0x351   :  { %15624 = vmatpush3.bf16.msra.mxu1 %v15623_v45  ;;  %15625 = vmatprep.subr.bf16.mxu0 %v15892_v0  ;;  %v1020_v45 = vld [vmem:[%s20774_s1 + $0x1b88] sm:$0xff] }
 0x352   :  { %15637 = vmatprep.subr.bf16.mxu1 %v15892_v0  ;;  %v15674_v49 = vpack.c.bf16 %v1020_v45, %v1019_v44  ;;  %v1059_v44 = vld [vmem:[%s20774_s1 + $0x1cc0] sm:$0xff]  ;;  %v1060_v45 = vld [vmem:[%s20774_s1 + $0x1cc8] sm:$0xff] }
 0x353   :  { %13914 = vmatmul.mubr.msk.f32.vlgmr.msra.gmra.mrb[104].mxu0 %vm1163_vm1, %v115_v50  ;;  %v120_v50 = vld [vmem:[%s20775_s0 + $0xda] sm:$0x3] }
 0x354   :  { %13933 = vmatmul.mubr.msk.f32.vlgmr.msra.gmra.mrb[104].mxu1 %vm1163_vm1, %v116_v52  ;;  %15627 = vmatpush3.bf16.msra.mxu0 %v15626_v51  ;;  %v15686_v51 = vpack.c.bf16 %v1028_v47, %v1027_v46  ;;  %v1021_v52 = vld [vmem:[%s20774_s1 + $0x1b90] sm:$0xff]  ;;  %v123_v46 = vld [vmem:[%s20775_s0 + $0xe0] sm:$0x3] }
 0x355   :  { %15639 = vmatpush3.bf16.msra.mxu1 %v15638_v53  ;;  %15628 = vmatprep.subr.bf16.mxu0 %v15892_v0  ;;  %v1022_v53 = vld [vmem:[%s20774_s1 + $0x1b98] sm:$0xff] }
 0x356   :  { %v6927_v62 = vpop.f32.mrb[78].mxu0  ;;  %15640 = vmatprep.subr.bf16.mxu1 %v15892_v0  ;;  %13951 = vmatprep.mubr.msk.f32.mxu0 %vm15893_vm0, %v15894_v8  ;;  %v15677_v56 = vpack.c.bf16 %v1022_v53, %v1021_v52  ;;  %v1061_v52 = vld [vmem:[%s20774_s1 + $0x1cd0] sm:$0xff]  ;;  %v1062_v53 = vld [vmem:[%s20774_s1 + $0x1cd8] sm:$0xff] }
 0x357   :  { %10587 = vst.msk [vmem:[%s20776_s2 + $0x9c] sm:$0x3] %vm10508_vm2, %v6927_v62  ;;  %v7000_v2 = vpop.f32.mrb[78].mxu1  ;;  %v13421_v3 = vpop.f32.mrb[79].mxu0  ;;  %13970 = vmatprep.mubr.msk.f32.mxu1 %vm15893_vm0, %v15894_v8  ;;  %v1032_v62 = vld [vmem:[%s20774_s1 + $0x1be8] sm:$0xff]  ;;  %v15737_v55 = vpack.c.bf16 %v1062_v53, %v1061_v52 }
 0x358   :  { %10588 = vst.msk [vmem:[%s20776_s2 + $0x9e] sm:$0x3] %vm10508_vm2, %v7000_v2  ;;  %v13440_v4 = vpop.f32.mrb[79].mxu1  ;;  %15630 = vmatpush3.bf16.msra.mxu0 %v15629_v58  ;;  %v1023_v58 = vld [vmem:[%s20774_s1 + $0x1ba0] sm:$0xff] }
 0x359   :  { %15642 = vmatpush3.bf16.msra.mxu1 %v15641_v59  ;;  %15631 = vmatprep.subr.bf16.mxu0 %v15892_v0  ;;  %v1024_v59 = vld [vmem:[%s20774_s1 + $0x1ba8] sm:$0xff]  ;;  %v15692_v4 = vpack.c.bf16 %v1032_v62, %v1031_v61 }
 0x35a   :  { %15643 = vmatprep.subr.bf16.mxu1 %v15892_v0  ;;  %v15680_v3 = vpack.c.bf16 %v1024_v59, %v1023_v58  ;;  %v1063_v59 = vld [vmem:[%s20774_s1 + $0x1ce0] sm:$0xff] }
 0x35c   :  { %15633 = vmatpush3.bf16.msra.mxu0 %v15632_v5  ;;  %v1025_v5 = vld [vmem:[%s20774_s1 + $0x1bb0] sm:$0xff] }
 0x35d   :  { %15645 = vmatpush3.bf16.msra.mxu1 %v15644_v6  ;;  %15634 = vmatprep.subr.bf16.mxu0 %v15892_v0  ;;  %v1026_v6 = vld [vmem:[%s20774_s1 + $0x1bb8] sm:$0xff] }
 0x35e   :  { %15646 = vmatprep.subr.bf16.mxu1 %v15892_v0  ;;  %v15683_v10 = vpack.c.bf16 %v1026_v6, %v1025_v5  ;;  %v1065_v5 = vld [vmem:[%s20774_s1 + $0x1cf0] sm:$0xff]  ;;  %v1066_v6 = vld [vmem:[%s20774_s1 + $0x1cf8] sm:$0xff] }
 0x35f   :  { %v15743_v9 = vpack.c.bf16 %v1066_v6, %v1065_v5 }
 0x360   :  { %15636 = vmatpush3.bf16.msra.mxu0 %v15635_v12  ;;  %v1035_v12 = vld [vmem:[%s20774_s1 + $0x1c00] sm:$0xff] }
 0x361   :  { %15648 = vmatpush3.bf16.msra.mxu1 %v15647_v13  ;;  %15649 = vmatprep.subr.bf16.mxu0 %v15892_v0  ;;  %v1036_v13 = vld [vmem:[%s20774_s1 + $0x1c08] sm:$0xff] }
 0x362   :  { %15661 = vmatprep.subr.bf16.mxu1 %v15892_v0  ;;  %v15698_v17 = vpack.c.bf16 %v1036_v13, %v1035_v12  ;;  %v1075_v12 = vld [vmem:[%s20774_s1 + $0x1d40] sm:$0xff]  ;;  %v1076_v13 = vld [vmem:[%s20774_s1 + $0x1d48] sm:$0xff] }
 0x363   :  { %13952 = vmatmul.mubr.msk.f32.vlgmr.msra.gmra.mrb[106].mxu0 %vm1163_vm1, %v117_v18  ;;  %v122_v18 = vld [vmem:[%s20775_s0 + $0xde] sm:$0x3] }
 0x364   :  { %13971 = vmatmul.mubr.msk.f32.vlgmr.msra.gmra.mrb[106].mxu1 %vm1163_vm1, %v118_v20  ;;  %15651 = vmatpush3.bf16.msra.mxu0 %v15650_v19  ;;  %v15710_v19 = vpack.c.bf16 %v1044_v15, %v1043_v14  ;;  %v1037_v20 = vld [vmem:[%s20774_s1 + $0x1c10] sm:$0xff]  ;;  %v125_v14 = vld [vmem:[%s20775_s0 + $0xe4] sm:$0x3] }
 0x365   :  { %15663 = vmatpush3.bf16.msra.mxu1 %v15662_v21  ;;  %15652 = vmatprep.subr.bf16.mxu0 %v15892_v0  ;;  %v1038_v21 = vld [vmem:[%s20774_s1 + $0x1c18] sm:$0xff] }
 0x366   :  { %v7073_v30 = vpop.f32.mrb[80].mxu0  ;;  %15664 = vmatprep.subr.bf16.mxu1 %v15892_v0  ;;  %13989 = vmatprep.mubr.msk.f32.mxu0 %vm15893_vm0, %v15894_v8  ;;  %v15701_v24 = vpack.c.bf16 %v1038_v21, %v1037_v20  ;;  %v1077_v20 = vld [vmem:[%s20774_s1 + $0x1d50] sm:$0xff]  ;;  %v1078_v21 = vld [vmem:[%s20774_s1 + $0x1d58] sm:$0xff] }
 0x367   :  { %10589 = vst.msk [vmem:[%s20776_s2 + $0xa0] sm:$0x3] %vm10508_vm2, %v7073_v30  ;;  %v7146_v33 = vpop.f32.mrb[80].mxu1  ;;  %v13459_v34 = vpop.f32.mrb[81].mxu0  ;;  %14008 = vmatprep.mubr.msk.f32.mxu1 %vm15893_vm0, %v15894_v8  ;;  %v1048_v30 = vld [vmem:[%s20774_s1 + $0x1c68] sm:$0xff]  ;;  %v15761_v23 = vpack.c.bf16 %v1078_v21, %v1077_v20 }
 0x368   :  { %10590 = vst.msk [vmem:[%s20776_s2 + $0xa2] sm:$0x3] %vm10508_vm2, %v7146_v33  ;;  %v13478_v35 = vpop.f32.mrb[81].mxu1  ;;  %15654 = vmatpush3.bf16.msra.mxu0 %v15653_v26  ;;  %v1039_v26 = vld [vmem:[%s20774_s1 + $0x1c20] sm:$0xff] }
 0x369   :  { %15666 = vmatpush3.bf16.msra.mxu1 %v15665_v27  ;;  %15655 = vmatprep.subr.bf16.mxu0 %v15892_v0  ;;  %v1040_v27 = vld [vmem:[%s20774_s1 + $0x1c28] sm:$0xff]  ;;  %v15716_v35 = vpack.c.bf16 %v1048_v30, %v1047_v29 }
 0x36a   :  { %15667 = vmatprep.subr.bf16.mxu1 %v15892_v0  ;;  %v15704_v34 = vpack.c.bf16 %v1040_v27, %v1039_v26  ;;  %v1079_v27 = vld [vmem:[%s20774_s1 + $0x1d60] sm:$0xff] }
 0x36c   :  { %15657 = vmatpush3.bf16.msra.mxu0 %v15656_v36  ;;  %v1041_v36 = vld [vmem:[%s20774_s1 + $0x1c30] sm:$0xff] }
 0x36d   :  { %15669 = vmatpush3.bf16.msra.mxu1 %v15668_v37  ;;  %15658 = vmatprep.subr.bf16.mxu0 %v15892_v0  ;;  %v1042_v37 = vld [vmem:[%s20774_s1 + $0x1c38] sm:$0xff] }
 0x36e   :  { %15670 = vmatprep.subr.bf16.mxu1 %v15892_v0  ;;  %v15707_v40 = vpack.c.bf16 %v1042_v37, %v1041_v36  ;;  %v1081_v36 = vld [vmem:[%s20774_s1 + $0x1d70] sm:$0xff]  ;;  %v1082_v37 = vld [vmem:[%s20774_s1 + $0x1d78] sm:$0xff] }
 0x36f   :  { %v15767_v39 = vpack.c.bf16 %v1082_v37, %v1081_v36 }
 0x370   :  { %15660 = vmatpush3.bf16.msra.mxu0 %v15659_v42  ;;  %v1051_v42 = vld [vmem:[%s20774_s1 + $0x1c80] sm:$0xff] }
 0x371   :  { %15672 = vmatpush3.bf16.msra.mxu1 %v15671_v43  ;;  %15673 = vmatprep.subr.bf16.mxu0 %v15892_v0  ;;  %v1052_v43 = vld [vmem:[%s20774_s1 + $0x1c88] sm:$0xff] }
 0x372   :  { %15685 = vmatprep.subr.bf16.mxu1 %v15892_v0  ;;  %v15722_v47 = vpack.c.bf16 %v1052_v43, %v1051_v42  ;;  %v1091_v42 = vld [vmem:[%s20774_s1 + $0x1dc0] sm:$0xff]  ;;  %v1092_v43 = vld [vmem:[%s20774_s1 + $0x1dc8] sm:$0xff] }
 0x373   :  { %13990 = vmatmul.mubr.msk.f32.vlgmr.msra.gmra.mrb[108].mxu0 %vm1163_vm1, %v119_v48  ;;  %v124_v48 = vld [vmem:[%s20775_s0 + $0xe2] sm:$0x3] }
 0x374   :  { %14009 = vmatmul.mubr.msk.f32.vlgmr.msra.gmra.mrb[108].mxu1 %vm1163_vm1, %v120_v50  ;;  %15675 = vmatpush3.bf16.msra.mxu0 %v15674_v49  ;;  %v15734_v49 = vpack.c.bf16 %v1060_v45, %v1059_v44  ;;  %v1053_v50 = vld [vmem:[%s20774_s1 + $0x1c90] sm:$0xff]  ;;  %v127_v44 = vld [vmem:[%s20775_s0 + $0xe8] sm:$0x3] }
 0x375   :  { %15687 = vmatpush3.bf16.msra.mxu1 %v15686_v51  ;;  %15676 = vmatprep.subr.bf16.mxu0 %v15892_v0  ;;  %v1054_v51 = vld [vmem:[%s20774_s1 + $0x1c98] sm:$0xff] }
 0x376   :  { %v7219_v60 = vpop.f32.mrb[82].mxu0  ;;  %15688 = vmatprep.subr.bf16.mxu1 %v15892_v0  ;;  %14027 = vmatprep.mubr.msk.f32.mxu0 %vm15893_vm0, %v15894_v8  ;;  %v15725_v54 = vpack.c.bf16 %v1054_v51, %v1053_v50  ;;  %v1093_v50 = vld [vmem:[%s20774_s1 + $0x1dd0] sm:$0xff]  ;;  %v1094_v51 = vld [vmem:[%s20774_s1 + $0x1dd8] sm:$0xff] }
 0x377   :  { %10591 = vst.msk [vmem:[%s20776_s2 + $0xa4] sm:$0x3] %vm10508_vm2, %v7219_v60  ;;  %v7292_v63 = vpop.f32.mrb[82].mxu1  ;;  %v13497_v1 = vpop.f32.mrb[83].mxu0  ;;  %14046 = vmatprep.mubr.msk.f32.mxu1 %vm15893_vm0, %v15894_v8  ;;  %v1064_v60 = vld [vmem:[%s20774_s1 + $0x1ce8] sm:$0xff]  ;;  %v15785_v53 = vpack.c.bf16 %v1094_v51, %v1093_v50 }
 0x378   :  { %10592 = vst.msk [vmem:[%s20776_s2 + $0xa6] sm:$0x3] %vm10508_vm2, %v7292_v63  ;;  %v13516_v2 = vpop.f32.mrb[83].mxu1  ;;  %15678 = vmatpush3.bf16.msra.mxu0 %v15677_v56  ;;  %v1055_v56 = vld [vmem:[%s20774_s1 + $0x1ca0] sm:$0xff] }
 0x379   :  { %15690 = vmatpush3.bf16.msra.mxu1 %v15689_v57  ;;  %15679 = vmatprep.subr.bf16.mxu0 %v15892_v0  ;;  %v1056_v57 = vld [vmem:[%s20774_s1 + $0x1ca8] sm:$0xff]  ;;  %v15740_v2 = vpack.c.bf16 %v1064_v60, %v1063_v59 }
 0x37a   :  { %15691 = vmatprep.subr.bf16.mxu1 %v15892_v0  ;;  %v15728_v1 = vpack.c.bf16 %v1056_v57, %v1055_v56  ;;  %v1095_v57 = vld [vmem:[%s20774_s1 + $0x1de0] sm:$0xff] }
 0x37c   :  { %15681 = vmatpush3.bf16.msra.mxu0 %v15680_v3  ;;  %v1057_v3 = vld [vmem:[%s20774_s1 + $0x1cb0] sm:$0xff] }
 0x37d   :  { %15693 = vmatpush3.bf16.msra.mxu1 %v15692_v4  ;;  %15682 = vmatprep.subr.bf16.mxu0 %v15892_v0  ;;  %v1058_v4 = vld [vmem:[%s20774_s1 + $0x1cb8] sm:$0xff] }
 0x37e   :  { %15694 = vmatprep.subr.bf16.mxu1 %v15892_v0  ;;  %v15731_v7 = vpack.c.bf16 %v1058_v4, %v1057_v3  ;;  %v1097_v3 = vld [vmem:[%s20774_s1 + $0x1df0] sm:$0xff]  ;;  %v1098_v4 = vld [vmem:[%s20774_s1 + $0x1df8] sm:$0xff] }
 0x37f   :  { %v15791_v6 = vpack.c.bf16 %v1098_v4, %v1097_v3 }
 0x380   :  { %15684 = vmatpush3.bf16.msra.mxu0 %v15683_v10  ;;  %v1067_v10 = vld [vmem:[%s20774_s1 + $0x1d00] sm:$0xff] }
 0x381   :  { %15696 = vmatpush3.bf16.msra.mxu1 %v15695_v11  ;;  %15697 = vmatprep.subr.bf16.mxu0 %v15892_v0  ;;  %v1068_v11 = vld [vmem:[%s20774_s1 + $0x1d08] sm:$0xff] }
 0x382   :  { %15709 = vmatprep.subr.bf16.mxu1 %v15892_v0  ;;  %v15746_v15 = vpack.c.bf16 %v1068_v11, %v1067_v10  ;;  %v1107_v10 = vld [vmem:[%s20774_s1 + $0x1e40] sm:$0xff]  ;;  %v1108_v11 = vld [vmem:[%s20774_s1 + $0x1e48] sm:$0xff] }
 0x383   :  { %14028 = vmatmul.mubr.msk.f32.vlgmr.msra.gmra.mrb[110].mxu0 %vm1163_vm1, %v121_v16  ;;  %v126_v16 = vld [vmem:[%s20775_s0 + $0xe6] sm:$0x3] }
 0x384   :  { %14047 = vmatmul.mubr.msk.f32.vlgmr.msra.gmra.mrb[110].mxu1 %vm1163_vm1, %v122_v18  ;;  %15699 = vmatpush3.bf16.msra.mxu0 %v15698_v17  ;;  %v15758_v17 = vpack.c.bf16 %v1076_v13, %v1075_v12  ;;  %v1069_v18 = vld [vmem:[%s20774_s1 + $0x1d10] sm:$0xff]  ;;  %v129_v12 = vld [vmem:[%s20775_s0 + $0xec] sm:$0x3] }
 0x385   :  { %15711 = vmatpush3.bf16.msra.mxu1 %v15710_v19  ;;  %15700 = vmatprep.subr.bf16.mxu0 %v15892_v0  ;;  %v1070_v19 = vld [vmem:[%s20774_s1 + $0x1d18] sm:$0xff] }
 0x386   :  { %v7365_v28 = vpop.f32.mrb[84].mxu0  ;;  %15712 = vmatprep.subr.bf16.mxu1 %v15892_v0  ;;  %14065 = vmatprep.mubr.msk.f32.mxu0 %vm15893_vm0, %v15894_v8  ;;  %v15749_v22 = vpack.c.bf16 %v1070_v19, %v1069_v18  ;;  %v1109_v18 = vld [vmem:[%s20774_s1 + $0x1e50] sm:$0xff]  ;;  %v1110_v19 = vld [vmem:[%s20774_s1 + $0x1e58] sm:$0xff] }
 0x387   :  { %10593 = vst.msk [vmem:[%s20776_s2 + $0xa8] sm:$0x3] %vm10508_vm2, %v7365_v28  ;;  %v7438_v31 = vpop.f32.mrb[84].mxu1  ;;  %v13535_v32 = vpop.f32.mrb[85].mxu0  ;;  %14084 = vmatprep.mubr.msk.f32.mxu1 %vm15893_vm0, %v15894_v8  ;;  %v1080_v28 = vld [vmem:[%s20774_s1 + $0x1d68] sm:$0xff]  ;;  %v15809_v21 = vpack.c.bf16 %v1110_v19, %v1109_v18 }
 0x388   :  { %10594 = vst.msk [vmem:[%s20776_s2 + $0xaa] sm:$0x3] %vm10508_vm2, %v7438_v31  ;;  %v13554_v33 = vpop.f32.mrb[85].mxu1  ;;  %15702 = vmatpush3.bf16.msra.mxu0 %v15701_v24  ;;  %v1071_v24 = vld [vmem:[%s20774_s1 + $0x1d20] sm:$0xff] }
 0x389   :  { %15714 = vmatpush3.bf16.msra.mxu1 %v15713_v25  ;;  %15703 = vmatprep.subr.bf16.mxu0 %v15892_v0  ;;  %v1072_v25 = vld [vmem:[%s20774_s1 + $0x1d28] sm:$0xff]  ;;  %v15764_v33 = vpack.c.bf16 %v1080_v28, %v1079_v27 }
 0x38a   :  { %15715 = vmatprep.subr.bf16.mxu1 %v15892_v0  ;;  %v15752_v32 = vpack.c.bf16 %v1072_v25, %v1071_v24  ;;  %v1111_v25 = vld [vmem:[%s20774_s1 + $0x1e60] sm:$0xff] }
 0x38c   :  { %15705 = vmatpush3.bf16.msra.mxu0 %v15704_v34  ;;  %v1073_v34 = vld [vmem:[%s20774_s1 + $0x1d30] sm:$0xff] }
 0x38d   :  { %15717 = vmatpush3.bf16.msra.mxu1 %v15716_v35  ;;  %15706 = vmatprep.subr.bf16.mxu0 %v15892_v0  ;;  %v1074_v35 = vld [vmem:[%s20774_s1 + $0x1d38] sm:$0xff] }
 0x38e   :  { %15718 = vmatprep.subr.bf16.mxu1 %v15892_v0  ;;  %v15755_v38 = vpack.c.bf16 %v1074_v35, %v1073_v34  ;;  %v1113_v34 = vld [vmem:[%s20774_s1 + $0x1e70] sm:$0xff]  ;;  %v1114_v35 = vld [vmem:[%s20774_s1 + $0x1e78] sm:$0xff] }
 0x38f   :  { %v15815_v37 = vpack.c.bf16 %v1114_v35, %v1113_v34 }
 0x390   :  { %15708 = vmatpush3.bf16.msra.mxu0 %v15707_v40  ;;  %v1083_v40 = vld [vmem:[%s20774_s1 + $0x1d80] sm:$0xff] }
 0x391   :  { %15720 = vmatpush3.bf16.msra.mxu1 %v15719_v41  ;;  %15721 = vmatprep.subr.bf16.mxu0 %v15892_v0  ;;  %v1084_v41 = vld [vmem:[%s20774_s1 + $0x1d88] sm:$0xff] }
 0x392   :  { %15733 = vmatprep.subr.bf16.mxu1 %v15892_v0  ;;  %v15770_v45 = vpack.c.bf16 %v1084_v41, %v1083_v40  ;;  %v1123_v40 = vld [vmem:[%s20774_s1 + $0x1ec0] sm:$0xff]  ;;  %v1124_v41 = vld [vmem:[%s20774_s1 + $0x1ec8] sm:$0xff] }
 0x393   :  { %14066 = vmatmul.mubr.msk.f32.vlgmr.msra.gmra.mrb[112].mxu0 %vm1163_vm1, %v123_v46  ;;  %v128_v46 = vld [vmem:[%s20775_s0 + $0xea] sm:$0x3] }
 0x394   :  { %14085 = vmatmul.mubr.msk.f32.vlgmr.msra.gmra.mrb[112].mxu1 %vm1163_vm1, %v124_v48  ;;  %15723 = vmatpush3.bf16.msra.mxu0 %v15722_v47  ;;  %v15782_v47 = vpack.c.bf16 %v1092_v43, %v1091_v42  ;;  %v1085_v48 = vld [vmem:[%s20774_s1 + $0x1d90] sm:$0xff] }
 0x395   :  { %15735 = vmatpush3.bf16.msra.mxu1 %v15734_v49  ;;  %15724 = vmatprep.subr.bf16.mxu0 %v15892_v0  ;;  %v1086_v49 = vld [vmem:[%s20774_s1 + $0x1d98] sm:$0xff]  ;;  %v131_v42 = vld [vmem:[%s20775_s0 + $0xf0] sm:$0x3] }
 0x396   :  { %v7511_v58 = vpop.f32.mrb[86].mxu0  ;;  %15736 = vmatprep.subr.bf16.mxu1 %v15892_v0  ;;  %14103 = vmatprep.mubr.msk.f32.mxu0 %vm15893_vm0, %v15894_v8  ;;  %v15773_v52 = vpack.c.bf16 %v1086_v49, %v1085_v48  ;;  %v1125_v48 = vld [vmem:[%s20774_s1 + $0x1ed0] sm:$0xff]  ;;  %v1126_v49 = vld [vmem:[%s20774_s1 + $0x1ed8] sm:$0xff] }
 0x397   :  { %10595 = vst.msk [vmem:[%s20776_s2 + $0xac] sm:$0x3] %vm10508_vm2, %v7511_v58  ;;  %v7584_v61 = vpop.f32.mrb[86].mxu1  ;;  %v13573_v62 = vpop.f32.mrb[87].mxu0  ;;  %14122 = vmatprep.mubr.msk.f32.mxu1 %vm15893_vm0, %v15894_v8  ;;  %v1096_v58 = vld [vmem:[%s20774_s1 + $0x1de8] sm:$0xff]  ;;  %v15833_v51 = vpack.c.bf16 %v1126_v49, %v1125_v48 }
 0x398   :  { %10596 = vst.msk [vmem:[%s20776_s2 + $0xae] sm:$0x3] %vm10508_vm2, %v7584_v61  ;;  %v13592_v63 = vpop.f32.mrb[87].mxu1  ;;  %15726 = vmatpush3.bf16.msra.mxu0 %v15725_v54  ;;  %v1087_v54 = vld [vmem:[%s20774_s1 + $0x1da0] sm:$0xff] }
 0x399   :  { %15738 = vmatpush3.bf16.msra.mxu1 %v15737_v55  ;;  %15727 = vmatprep.subr.bf16.mxu0 %v15892_v0  ;;  %v1088_v55 = vld [vmem:[%s20774_s1 + $0x1da8] sm:$0xff]  ;;  %v15788_v63 = vpack.c.bf16 %v1096_v58, %v1095_v57 }
 0x39a   :  { %15739 = vmatprep.subr.bf16.mxu1 %v15892_v0  ;;  %v15776_v62 = vpack.c.bf16 %v1088_v55, %v1087_v54  ;;  %v1127_v55 = vld [vmem:[%s20774_s1 + $0x1ee0] sm:$0xff] }
 0x39c   :  { %15729 = vmatpush3.bf16.msra.mxu0 %v15728_v1  ;;  %v1089_v1 = vld [vmem:[%s20774_s1 + $0x1db0] sm:$0xff] }
 0x39d   :  { %15741 = vmatpush3.bf16.msra.mxu1 %v15740_v2  ;;  %15730 = vmatprep.subr.bf16.mxu0 %v15892_v0  ;;  %v1090_v2 = vld [vmem:[%s20774_s1 + $0x1db8] sm:$0xff] }
 0x39e   :  { %15742 = vmatprep.subr.bf16.mxu1 %v15892_v0  ;;  %v15779_v5 = vpack.c.bf16 %v1090_v2, %v1089_v1  ;;  %v1129_v1 = vld [vmem:[%s20774_s1 + $0x1ef0] sm:$0xff]  ;;  %v1130_v2 = vld [vmem:[%s20774_s1 + $0x1ef8] sm:$0xff] }
 0x39f   :  { %v15839_v4 = vpack.c.bf16 %v1130_v2, %v1129_v1  ;;  %v137_v2 = vld [vmem:[%s20775_s0 + $0xfc] sm:$0x3] }
 0x3a0   :  { %15732 = vmatpush3.bf16.msra.mxu0 %v15731_v7  ;;  %v1099_v7 = vld [vmem:[%s20774_s1 + $0x1e00] sm:$0xff] }
 0x3a1   :  { %15744 = vmatpush3.bf16.msra.mxu1 %v15743_v9  ;;  %15745 = vmatprep.subr.bf16.mxu0 %v15892_v0  ;;  %v1100_v9 = vld [vmem:[%s20774_s1 + $0x1e08] sm:$0xff] }
 0x3a2   :  { %15757 = vmatprep.subr.bf16.mxu1 %v15892_v0  ;;  %v15794_v13 = vpack.c.bf16 %v1100_v9, %v1099_v7  ;;  %v1139_v7 = vld [vmem:[%s20774_s1 + $0x1f40] sm:$0xff]  ;;  %v1140_v9 = vld [vmem:[%s20774_s1 + $0x1f48] sm:$0xff] }
 0x3a3   :  { %14104 = vmatmul.mubr.msk.f32.vlgmr.msra.gmra.mrb[114].mxu0 %vm1163_vm1, %v125_v14  ;;  %v130_v14 = vld [vmem:[%s20775_s0 + $0xee] sm:$0x3] }
 0x3a4   :  { %14123 = vmatmul.mubr.msk.f32.vlgmr.msra.gmra.mrb[114].mxu1 %vm1163_vm1, %v126_v16  ;;  %15747 = vmatpush3.bf16.msra.mxu0 %v15746_v15  ;;  %v15806_v15 = vpack.c.bf16 %v1108_v11, %v1107_v10  ;;  %v1101_v16 = vld [vmem:[%s20774_s1 + $0x1e10] sm:$0xff] }
 0x3a5   :  { %15759 = vmatpush3.bf16.msra.mxu1 %v15758_v17  ;;  %15748 = vmatprep.subr.bf16.mxu0 %v15892_v0  ;;  %v1102_v17 = vld [vmem:[%s20774_s1 + $0x1e18] sm:$0xff]  ;;  %v133_v10 = vld [vmem:[%s20775_s0 + $0xf4] sm:$0x3] }
 0x3a6   :  { %v7657_v26 = vpop.f32.mrb[88].mxu0  ;;  %15760 = vmatprep.subr.bf16.mxu1 %v15892_v0  ;;  %14141 = vmatprep.mubr.msk.f32.mxu0 %vm15893_vm0, %v15894_v8  ;;  %v15797_v20 = vpack.c.bf16 %v1102_v17, %v1101_v16  ;;  %v1141_v16 = vld [vmem:[%s20774_s1 + $0x1f50] sm:$0xff]  ;;  %v1142_v17 = vld [vmem:[%s20774_s1 + $0x1f58] sm:$0xff] }
 0x3a7   :  { %10597 = vst.msk [vmem:[%s20776_s2 + $0xb0] sm:$0x3] %vm10508_vm2, %v7657_v26  ;;  %v7730_v29 = vpop.f32.mrb[88].mxu1  ;;  %v13611_v30 = vpop.f32.mrb[89].mxu0  ;;  %14160 = vmatprep.mubr.msk.f32.mxu1 %vm15893_vm0, %v15894_v8  ;;  %v1112_v26 = vld [vmem:[%s20774_s1 + $0x1e68] sm:$0xff]  ;;  %v15857_v19 = vpack.c.bf16 %v1142_v17, %v1141_v16 }
 0x3a8   :  { %10598 = vst.msk [vmem:[%s20776_s2 + $0xb2] sm:$0x3] %vm10508_vm2, %v7730_v29  ;;  %v13630_v31 = vpop.f32.mrb[89].mxu1  ;;  %15750 = vmatpush3.bf16.msra.mxu0 %v15749_v22  ;;  %v1103_v22 = vld [vmem:[%s20774_s1 + $0x1e20] sm:$0xff] }
 0x3a9   :  { %15762 = vmatpush3.bf16.msra.mxu1 %v15761_v23  ;;  %15751 = vmatprep.subr.bf16.mxu0 %v15892_v0  ;;  %v1104_v23 = vld [vmem:[%s20774_s1 + $0x1e28] sm:$0xff]  ;;  %v15812_v31 = vpack.c.bf16 %v1112_v26, %v1111_v25 }
 0x3aa   :  { %15763 = vmatprep.subr.bf16.mxu1 %v15892_v0  ;;  %v15800_v30 = vpack.c.bf16 %v1104_v23, %v1103_v22  ;;  %v1143_v23 = vld [vmem:[%s20774_s1 + $0x1f60] sm:$0xff] }
 0x3ac   :  { %15753 = vmatpush3.bf16.msra.mxu0 %v15752_v32  ;;  %v1105_v32 = vld [vmem:[%s20774_s1 + $0x1e30] sm:$0xff] }
 0x3ad   :  { %15765 = vmatpush3.bf16.msra.mxu1 %v15764_v33  ;;  %15754 = vmatprep.subr.bf16.mxu0 %v15892_v0  ;;  %v1106_v33 = vld [vmem:[%s20774_s1 + $0x1e38] sm:$0xff] }
 0x3ae   :  { %15766 = vmatprep.subr.bf16.mxu1 %v15892_v0  ;;  %v15803_v36 = vpack.c.bf16 %v1106_v33, %v1105_v32  ;;  %v1145_v32 = vld [vmem:[%s20774_s1 + $0x1f70] sm:$0xff]  ;;  %v1146_v33 = vld [vmem:[%s20774_s1 + $0x1f78] sm:$0xff] }
 0x3af   :  { %v15863_v35 = vpack.c.bf16 %v1146_v33, %v1145_v32 }
 0x3b0   :  { %15756 = vmatpush3.bf16.msra.mxu0 %v15755_v38  ;;  %v1115_v38 = vld [vmem:[%s20774_s1 + $0x1e80] sm:$0xff] }
 0x3b1   :  { %15768 = vmatpush3.bf16.msra.mxu1 %v15767_v39  ;;  %15769 = vmatprep.subr.bf16.mxu0 %v15892_v0  ;;  %v1116_v39 = vld [vmem:[%s20774_s1 + $0x1e88] sm:$0xff] }
 0x3b2   :  { %15781 = vmatprep.subr.bf16.mxu1 %v15892_v0  ;;  %v15818_v43 = vpack.c.bf16 %v1116_v39, %v1115_v38  ;;  %v1155_v38 = vld [vmem:[%s20774_s1 + $0x1fc0] sm:$0xff]  ;;  %v1156_v39 = vld [vmem:[%s20774_s1 + $0x1fc8] sm:$0xff] }
 0x3b3   :  { %14142 = vmatmul.mubr.msk.f32.vlgmr.msra.gmra.mrb[116].mxu0 %vm1163_vm1, %v127_v44  ;;  %v132_v44 = vld [vmem:[%s20775_s0 + $0xf2] sm:$0x3] }
 0x3b4   :  { %14161 = vmatmul.mubr.msk.f32.vlgmr.msra.gmra.mrb[116].mxu1 %vm1163_vm1, %v128_v46  ;;  %15771 = vmatpush3.bf16.msra.mxu0 %v15770_v45  ;;  %v15830_v45 = vpack.c.bf16 %v1124_v41, %v1123_v40  ;;  %v1117_v46 = vld [vmem:[%s20774_s1 + $0x1e90] sm:$0xff]  ;;  %v135_v40 = vld [vmem:[%s20775_s0 + $0xf8] sm:$0x3] }
 0x3b5   :  { %15783 = vmatpush3.bf16.msra.mxu1 %v15782_v47  ;;  %15772 = vmatprep.subr.bf16.mxu0 %v15892_v0  ;;  %v1118_v47 = vld [vmem:[%s20774_s1 + $0x1e98] sm:$0xff] }
 0x3b6   :  { %v7803_v56 = vpop.f32.mrb[90].mxu0  ;;  %15784 = vmatprep.subr.bf16.mxu1 %v15892_v0  ;;  %14179 = vmatprep.mubr.msk.f32.mxu0 %vm15893_vm0, %v15894_v8  ;;  %v15821_v50 = vpack.c.bf16 %v1118_v47, %v1117_v46  ;;  %v1157_v46 = vld [vmem:[%s20774_s1 + $0x1fd0] sm:$0xff]  ;;  %v1158_v47 = vld [vmem:[%s20774_s1 + $0x1fd8] sm:$0xff] }
 0x3b7   :  { %10599 = vst.msk [vmem:[%s20776_s2 + $0xb4] sm:$0x3] %vm10508_vm2, %v7803_v56  ;;  %v7876_v59 = vpop.f32.mrb[90].mxu1  ;;  %v13649_v60 = vpop.f32.mrb[91].mxu0  ;;  %14198 = vmatprep.mubr.msk.f32.mxu1 %vm15893_vm0, %v15894_v8  ;;  %v1128_v56 = vld [vmem:[%s20774_s1 + $0x1ee8] sm:$0xff]  ;;  %v15881_v49 = vpack.c.bf16 %v1158_v47, %v1157_v46 }
 0x3b8   :  { %10600 = vst.msk [vmem:[%s20776_s2 + $0xb6] sm:$0x3] %vm10508_vm2, %v7876_v59  ;;  %v13668_v61 = vpop.f32.mrb[91].mxu1  ;;  %15774 = vmatpush3.bf16.msra.mxu0 %v15773_v52  ;;  %v1119_v52 = vld [vmem:[%s20774_s1 + $0x1ea0] sm:$0xff] }
 0x3b9   :  { %15786 = vmatpush3.bf16.msra.mxu1 %v15785_v53  ;;  %15775 = vmatprep.subr.bf16.mxu0 %v15892_v0  ;;  %v1120_v53 = vld [vmem:[%s20774_s1 + $0x1ea8] sm:$0xff]  ;;  %v15836_v61 = vpack.c.bf16 %v1128_v56, %v1127_v55 }
 0x3ba   :  { %15787 = vmatprep.subr.bf16.mxu1 %v15892_v0  ;;  %v15824_v60 = vpack.c.bf16 %v1120_v53, %v1119_v52  ;;  %v1159_v53 = vld [vmem:[%s20774_s1 + $0x1fe0] sm:$0xff] }
 0x3bc   :  { %15777 = vmatpush3.bf16.msra.mxu0 %v15776_v62  ;;  %v1121_v62 = vld [vmem:[%s20774_s1 + $0x1eb0] sm:$0xff] }
 0x3bd   :  { %15789 = vmatpush3.bf16.msra.mxu1 %v15788_v63  ;;  %15778 = vmatprep.subr.bf16.mxu0 %v15892_v0  ;;  %v1122_v63 = vld [vmem:[%s20774_s1 + $0x1eb8] sm:$0xff] }
 0x3be   :  { %15790 = vmatprep.subr.bf16.mxu1 %v15892_v0  ;;  %v15827_v3 = vpack.c.bf16 %v1122_v63, %v1121_v62  ;;  %v1162_v62 = vld [vmem:[%s20774_s1 + $0x1ff8] sm:$0xff] }
 0x3c0   :  { %15780 = vmatpush3.bf16.msra.mxu0 %v15779_v5  ;;  %v1131_v5 = vld [vmem:[%s20774_s1 + $0x1f00] sm:$0xff] }
 0x3c1   :  { %15792 = vmatpush3.bf16.msra.mxu1 %v15791_v6  ;;  %15793 = vmatprep.subr.bf16.mxu0 %v15892_v0  ;;  %v1132_v6 = vld [vmem:[%s20774_s1 + $0x1f08] sm:$0xff] }
 0x3c2   :  { %15805 = vmatprep.subr.bf16.mxu1 %v15892_v0  ;;  %v15842_v11 = vpack.c.bf16 %v1132_v6, %v1131_v5 }
 0x3c3   :  { %14180 = vmatmul.mubr.msk.f32.vlgmr.msra.gmra.mrb[118].mxu0 %vm1163_vm1, %v129_v12  ;;  %v134_v12 = vld [vmem:[%s20775_s0 + $0xf6] sm:$0x3] }
 0x3c4   :  { %14199 = vmatmul.mubr.msk.f32.vlgmr.msra.gmra.mrb[118].mxu1 %vm1163_vm1, %v130_v14  ;;  %15795 = vmatpush3.bf16.msra.mxu0 %v15794_v13  ;;  %v15854_v13 = vpack.c.bf16 %v1140_v9, %v1139_v7  ;;  %v1133_v14 = vld [vmem:[%s20774_s1 + $0x1f10] sm:$0xff] }
 0x3c5   :  { %15807 = vmatpush3.bf16.msra.mxu1 %v15806_v15  ;;  %15796 = vmatprep.subr.bf16.mxu0 %v15892_v0  ;;  %v1134_v15 = vld [vmem:[%s20774_s1 + $0x1f18] sm:$0xff] }
 0x3c6   :  { %v7949_v24 = vpop.f32.mrb[92].mxu0  ;;  %15808 = vmatprep.subr.bf16.mxu1 %v15892_v0  ;;  %14217 = vmatprep.mubr.msk.f32.mxu0 %vm15893_vm0, %v15894_v8  ;;  %v15845_v18 = vpack.c.bf16 %v1134_v15, %v1133_v14 }
 0x3c7   :  { %10601 = vst.msk [vmem:[%s20776_s2 + $0xb8] sm:$0x3] %vm10508_vm2, %v7949_v24  ;;  %v8022_v27 = vpop.f32.mrb[92].mxu1  ;;  %v13687_v28 = vpop.f32.mrb[93].mxu0  ;;  %14236 = vmatprep.mubr.msk.f32.mxu1 %vm15893_vm0, %v15894_v8  ;;  %v1144_v24 = vld [vmem:[%s20774_s1 + $0x1f68] sm:$0xff] }
 0x3c8   :  { %10602 = vst.msk [vmem:[%s20776_s2 + $0xba] sm:$0x3] %vm10508_vm2, %v8022_v27  ;;  %v13706_v29 = vpop.f32.mrb[93].mxu1  ;;  %15798 = vmatpush3.bf16.msra.mxu0 %v15797_v20  ;;  %v1135_v20 = vld [vmem:[%s20774_s1 + $0x1f20] sm:$0xff] }
 0x3c9   :  { %15810 = vmatpush3.bf16.msra.mxu1 %v15809_v21  ;;  %15799 = vmatprep.subr.bf16.mxu0 %v15892_v0  ;;  %v1136_v21 = vld [vmem:[%s20774_s1 + $0x1f28] sm:$0xff]  ;;  %v15860_v29 = vpack.c.bf16 %v1144_v24, %v1143_v23 }
 0x3ca   :  { %15811 = vmatprep.subr.bf16.mxu1 %v15892_v0  ;;  %v15848_v28 = vpack.c.bf16 %v1136_v21, %v1135_v20 }
 0x3cc   :  { %15801 = vmatpush3.bf16.msra.mxu0 %v15800_v30  ;;  %v1137_v30 = vld [vmem:[%s20774_s1 + $0x1f30] sm:$0xff] }
 0x3cd   :  { %15813 = vmatpush3.bf16.msra.mxu1 %v15812_v31  ;;  %15802 = vmatprep.subr.bf16.mxu0 %v15892_v0  ;;  %v1138_v31 = vld [vmem:[%s20774_s1 + $0x1f38] sm:$0xff] }
 0x3ce   :  { %15814 = vmatprep.subr.bf16.mxu1 %v15892_v0  ;;  %v15851_v34 = vpack.c.bf16 %v1138_v31, %v1137_v30 }
 0x3d0   :  { %15804 = vmatpush3.bf16.msra.mxu0 %v15803_v36  ;;  %v1147_v36 = vld [vmem:[%s20774_s1 + $0x1f80] sm:$0xff] }
 0x3d1   :  { %15816 = vmatpush3.bf16.msra.mxu1 %v15815_v37  ;;  %15817 = vmatprep.subr.bf16.mxu0 %v15892_v0  ;;  %v1148_v37 = vld [vmem:[%s20774_s1 + $0x1f88] sm:$0xff] }
 0x3d2   :  { %15829 = vmatprep.subr.bf16.mxu1 %v15892_v0  ;;  %v15866_v41 = vpack.c.bf16 %v1148_v37, %v1147_v36 }
 0x3d3   :  { %14218 = vmatmul.mubr.msk.f32.vlgmr.msra.gmra.mrb[120].mxu0 %vm1163_vm1, %v131_v42  ;;  %v136_v42 = vld [vmem:[%s20775_s0 + $0xfa] sm:$0x3] }
 0x3d4   :  { %14237 = vmatmul.mubr.msk.f32.vlgmr.msra.gmra.mrb[120].mxu1 %vm1163_vm1, %v132_v44  ;;  %15819 = vmatpush3.bf16.msra.mxu0 %v15818_v43  ;;  %v15878_v43 = vpack.c.bf16 %v1156_v39, %v1155_v38  ;;  %v1149_v44 = vld [vmem:[%s20774_s1 + $0x1f90] sm:$0xff] }
 0x3d5   :  { %15831 = vmatpush3.bf16.msra.mxu1 %v15830_v45  ;;  %15820 = vmatprep.subr.bf16.mxu0 %v15892_v0  ;;  %v1150_v45 = vld [vmem:[%s20774_s1 + $0x1f98] sm:$0xff] }
 0x3d6   :  { %v8095_v54 = vpop.f32.mrb[94].mxu0  ;;  %15832 = vmatprep.subr.bf16.mxu1 %v15892_v0  ;;  %14255 = vmatprep.mubr.msk.f32.mxu0 %vm15893_vm0, %v15894_v8  ;;  %v15869_v48 = vpack.c.bf16 %v1150_v45, %v1149_v44 }
 0x3d7   :  { %10603 = vst.msk [vmem:[%s20776_s2 + $0xbc] sm:$0x3] %vm10508_vm2, %v8095_v54  ;;  %v8168_v57 = vpop.f32.mrb[94].mxu1  ;;  %v13725_v58 = vpop.f32.mrb[95].mxu0  ;;  %14274 = vmatprep.mubr.msk.f32.mxu1 %vm15893_vm0, %v15894_v8  ;;  %v1160_v54 = vld [vmem:[%s20774_s1 + $0x1fe8] sm:$0xff] }
 0x3d8   :  { %10604 = vst.msk [vmem:[%s20776_s2 + $0xbe] sm:$0x3] %vm10508_vm2, %v8168_v57  ;;  %v13744_v59 = vpop.f32.mrb[95].mxu1  ;;  %15822 = vmatpush3.bf16.msra.mxu0 %v15821_v50  ;;  %v1151_v50 = vld [vmem:[%s20774_s1 + $0x1fa0] sm:$0xff] }
 0x3d9   :  { %15834 = vmatpush3.bf16.msra.mxu1 %v15833_v51  ;;  %15823 = vmatprep.subr.bf16.mxu0 %v15892_v0  ;;  %v1152_v51 = vld [vmem:[%s20774_s1 + $0x1fa8] sm:$0xff]  ;;  %v15884_v59 = vpack.c.bf16 %v1160_v54, %v1159_v53 }
 0x3da   :  { %15835 = vmatprep.subr.bf16.mxu1 %v15892_v0  ;;  %v15872_v58 = vpack.c.bf16 %v1152_v51, %v1151_v50 }
 0x3dc   :  { %15825 = vmatpush3.bf16.msra.mxu0 %v15824_v60  ;;  %v1153_v60 = vld [vmem:[%s20774_s1 + $0x1fb0] sm:$0xff] }
 0x3dd   :  { %15837 = vmatpush3.bf16.msra.mxu1 %v15836_v61  ;;  %15826 = vmatprep.subr.bf16.mxu0 %v15892_v0  ;;  %v1161_v61 = vld [vmem:[%s20774_s1 + $0x1ff0] sm:$0xff] }
 0x3de   :  { %15838 = vmatprep.subr.bf16.mxu1 %v15892_v0  ;;  %v15887_v1 = vpack.c.bf16 %v1162_v62, %v1161_v61 }
 0x3e0   :  { %15828 = vmatpush3.bf16.msra.mxu0 %v15827_v3  ;;  %v138_v3 = vld [vmem:[%s20775_s0 + $0xfe] sm:$0x3] }
 0x3e1   :  { %15840 = vmatpush3.bf16.msra.mxu1 %v15839_v4  ;;  %15841 = vmatprep.subr.bf16.mxu0 %v15892_v0 }
 0x3e2   :  { %15853 = vmatprep.subr.bf16.mxu1 %v15892_v0 }
 0x3e3   :  { %14256 = vmatmul.mubr.msk.f32.vlgmr.msra.gmra.mrb[122].mxu0 %vm1163_vm1, %v133_v10 }
 0x3e4   :  { %14275 = vmatmul.mubr.msk.f32.vlgmr.msra.gmra.mrb[122].mxu1 %vm1163_vm1, %v134_v12  ;;  %15843 = vmatpush3.bf16.msra.mxu0 %v15842_v11 }
 0x3e5   :  { %15855 = vmatpush3.bf16.msra.mxu1 %v15854_v13  ;;  %15844 = vmatprep.subr.bf16.mxu0 %v15892_v0 }
 0x3e6   :  { %v8241_v22 = vpop.f32.mrb[96].mxu0  ;;  %15856 = vmatprep.subr.bf16.mxu1 %v15892_v0  ;;  %14293 = vmatprep.mubr.msk.f32.mxu0 %vm15893_vm0, %v15894_v8 }
 0x3e7   :  { %10605 = vst.msk [vmem:[%s20776_s2 + $0xc0] sm:$0x3] %vm10508_vm2, %v8241_v22  ;;  %v8314_v25 = vpop.f32.mrb[96].mxu1  ;;  %v13763_v26 = vpop.f32.mrb[97].mxu0  ;;  %14312 = vmatprep.mubr.msk.f32.mxu1 %vm15893_vm0, %v15894_v8 }
 0x3e8   :  { %10606 = vst.msk [vmem:[%s20776_s2 + $0xc2] sm:$0x3] %vm10508_vm2, %v8314_v25  ;;  %v13782_v27 = vpop.f32.mrb[97].mxu1  ;;  %15846 = vmatpush3.bf16.msra.mxu0 %v15845_v18 }
 0x3e9   :  { %15858 = vmatpush3.bf16.msra.mxu1 %v15857_v19  ;;  %15847 = vmatprep.subr.bf16.mxu0 %v15892_v0 }
 0x3ea   :  { %15859 = vmatprep.subr.bf16.mxu1 %v15892_v0 }
 0x3ec   :  { %15849 = vmatpush3.bf16.msra.mxu0 %v15848_v28 }
 0x3ed   :  { %15861 = vmatpush3.bf16.msra.mxu1 %v15860_v29  ;;  %15850 = vmatprep.subr.bf16.mxu0 %v15892_v0 }
 0x3ee   :  { %15862 = vmatprep.subr.bf16.mxu1 %v15892_v0 }
 0x3f0   :  { %15852 = vmatpush3.bf16.msra.mxu0 %v15851_v34 }
 0x3f1   :  { %15864 = vmatpush3.bf16.msra.mxu1 %v15863_v35  ;;  %15865 = vmatprep.subr.bf16.mxu0 %v15892_v0 }
 0x3f2   :  { %15877 = vmatprep.subr.bf16.mxu1 %v15892_v0 }
 0x3f3   :  { %14294 = vmatmul.mubr.msk.f32.vlgmr.msra.gmra.mrb[124].mxu0 %vm1163_vm1, %v135_v40 }
 0x3f4   :  { %14313 = vmatmul.mubr.msk.f32.vlgmr.msra.gmra.mrb[124].mxu1 %vm1163_vm1, %v136_v42  ;;  %15867 = vmatpush3.bf16.msra.mxu0 %v15866_v41 }
 0x3f5   :  { %15879 = vmatpush3.bf16.msra.mxu1 %v15878_v43  ;;  %15868 = vmatprep.subr.bf16.mxu0 %v15892_v0 }
 0x3f6   :  { %v8387_v52 = vpop.f32.mrb[98].mxu0  ;;  %15880 = vmatprep.subr.bf16.mxu1 %v15892_v0  ;;  %14331 = vmatprep.mubr.msk.f32.mxu0 %vm15893_vm0, %v15894_v8 }
 0x3f7   :  { %10607 = vst.msk [vmem:[%s20776_s2 + $0xc4] sm:$0x3] %vm10508_vm2, %v8387_v52  ;;  %v8460_v55 = vpop.f32.mrb[98].mxu1  ;;  %v13801_v56 = vpop.f32.mrb[99].mxu0  ;;  %14350 = vmatprep.mubr.msk.f32.mxu1 %vm15893_vm0, %v15894_v8  ;;  %v1154_v8 = vld [vmem:[%s20774_s1 + $0x1fb8] sm:$0xff] }
 0x3f8   :  { %10608 = vst.msk [vmem:[%s20776_s2 + $0xc6] sm:$0x3] %vm10508_vm2, %v8460_v55  ;;  %v13820_v57 = vpop.f32.mrb[99].mxu1  ;;  %15870 = vmatpush3.bf16.msra.mxu0 %v15869_v48  ;;  %v15875_v63 = vpack.c.bf16 %v1154_v8, %v1153_v60 }
 0x3f9   :  { %15882 = vmatpush3.bf16.msra.mxu1 %v15881_v49  ;;  %15871 = vmatprep.subr.bf16.mxu0 %v15892_v0 }
 0x3fa   :  { %15883 = vmatprep.subr.bf16.mxu1 %v15892_v0 }
 0x3fc   :  { %15873 = vmatpush3.bf16.msra.mxu0 %v15872_v58 }
 0x3fd   :  { %15885 = vmatpush3.bf16.msra.mxu1 %v15884_v59  ;;  %15874 = vmatprep.subr.bf16.mxu0 %v15892_v0 }
 0x3fe   :  { %15886 = vmatprep.subr.bf16.mxu1 %v15892_v0 }
 0x400   :  { %15876 = vmatpush3.bf16.msra.mxu0 %v15875_v63 }
 0x401   :  { %15888 = vmatpush3.bf16.msra.mxu1 %v15887_v1 }
 0x403   :  { %14332 = vmatmul.mubr.msk.f32.vlgmr.msra.gmra.mrb[126].mxu0 %vm1163_vm1, %v137_v2 }
 0x404   :  { %14351 = vmatmul.mubr.msk.f32.vlgmr.msra.gmra.mrb[126].mxu1 %vm1163_vm1, %v138_v3 }
 0x406   :  { %v8533_v4 = vpop.f32.mrb[100].mxu0 }
 0x407   :  { %10609 = vst.msk [vmem:[%s20776_s2 + $0xc8] sm:$0x3] %vm10508_vm2, %v8533_v4  ;;  %v8606_v0 = vpop.f32.mrb[100].mxu1  ;;  %v13839_v5 = vpop.f32.mrb[101].mxu0 }
 0x408   :  { %10610 = vst.msk [vmem:[%s20776_s2 + $0xca] sm:$0x3] %vm10508_vm2, %v8606_v0  ;;  %v13858_v6 = vpop.f32.mrb[101].mxu1 }
 0x416   :  { %v8679_v7 = vpop.f32.mrb[102].mxu0 }
 0x417   :  { %10611 = vst.msk [vmem:[%s20776_s2 + $0xcc] sm:$0x3] %vm10508_vm2, %v8679_v7  ;;  %v8752_v9 = vpop.f32.mrb[102].mxu1  ;;  %v13877_v10 = vpop.f32.mrb[103].mxu0 }
 0x418   :  { %10612 = vst.msk [vmem:[%s20776_s2 + $0xce] sm:$0x3] %vm10508_vm2, %v8752_v9  ;;  %v13896_v11 = vpop.f32.mrb[103].mxu1 }
 0x426   :  { %v8825_v12 = vpop.f32.mrb[104].mxu0 }
 0x427   :  { %10613 = vst.msk [vmem:[%s20776_s2 + $0xd0] sm:$0x3] %vm10508_vm2, %v8825_v12  ;;  %v8898_v13 = vpop.f32.mrb[104].mxu1  ;;  %v13915_v14 = vpop.f32.mrb[105].mxu0 }
 0x428   :  { %10614 = vst.msk [vmem:[%s20776_s2 + $0xd2] sm:$0x3] %vm10508_vm2, %v8898_v13  ;;  %v13934_v15 = vpop.f32.mrb[105].mxu1 }
 0x436   :  { %v8971_v16 = vpop.f32.mrb[106].mxu0 }
 0x437   :  { %10615 = vst.msk [vmem:[%s20776_s2 + $0xd4] sm:$0x3] %vm10508_vm2, %v8971_v16  ;;  %v9044_v17 = vpop.f32.mrb[106].mxu1  ;;  %v13953_v18 = vpop.f32.mrb[107].mxu0 }
 0x438   :  { %10616 = vst.msk [vmem:[%s20776_s2 + $0xd6] sm:$0x3] %vm10508_vm2, %v9044_v17  ;;  %v13972_v19 = vpop.f32.mrb[107].mxu1 }
 0x446   :  { %v9117_v20 = vpop.f32.mrb[108].mxu0 }
 0x447   :  { %10617 = vst.msk [vmem:[%s20776_s2 + $0xd8] sm:$0x3] %vm10508_vm2, %v9117_v20  ;;  %v9190_v21 = vpop.f32.mrb[108].mxu1  ;;  %v13991_v22 = vpop.f32.mrb[109].mxu0 }
 0x448   :  { %10618 = vst.msk [vmem:[%s20776_s2 + $0xda] sm:$0x3] %vm10508_vm2, %v9190_v21  ;;  %v14010_v23 = vpop.f32.mrb[109].mxu1 }
 0x456   :  { %v9263_v24 = vpop.f32.mrb[110].mxu0 }
 0x457   :  { %10619 = vst.msk [vmem:[%s20776_s2 + $0xdc] sm:$0x3] %vm10508_vm2, %v9263_v24  ;;  %v9336_v25 = vpop.f32.mrb[110].mxu1  ;;  %v14029_v26 = vpop.f32.mrb[111].mxu0 }
 0x458   :  { %10620 = vst.msk [vmem:[%s20776_s2 + $0xde] sm:$0x3] %vm10508_vm2, %v9336_v25  ;;  %v14048_v27 = vpop.f32.mrb[111].mxu1 }
 0x466   :  { %v9409_v28 = vpop.f32.mrb[112].mxu0 }
 0x467   :  { %10621 = vst.msk [vmem:[%s20776_s2 + $0xe0] sm:$0x3] %vm10508_vm2, %v9409_v28  ;;  %v9482_v29 = vpop.f32.mrb[112].mxu1  ;;  %v14067_v30 = vpop.f32.mrb[113].mxu0 }
 0x468   :  { %10622 = vst.msk [vmem:[%s20776_s2 + $0xe2] sm:$0x3] %vm10508_vm2, %v9482_v29  ;;  %v14086_v31 = vpop.f32.mrb[113].mxu1 }
 0x476   :  { %v9555_v32 = vpop.f32.mrb[114].mxu0 }
 0x477   :  { %10623 = vst.msk [vmem:[%s20776_s2 + $0xe4] sm:$0x3] %vm10508_vm2, %v9555_v32  ;;  %v9628_v33 = vpop.f32.mrb[114].mxu1  ;;  %v14105_v34 = vpop.f32.mrb[115].mxu0 }
 0x478   :  { %10624 = vst.msk [vmem:[%s20776_s2 + $0xe6] sm:$0x3] %vm10508_vm2, %v9628_v33  ;;  %v14124_v35 = vpop.f32.mrb[115].mxu1 }
 0x486   :  { %v9701_v36 = vpop.f32.mrb[116].mxu0 }
 0x487   :  { %10625 = vst.msk [vmem:[%s20776_s2 + $0xe8] sm:$0x3] %vm10508_vm2, %v9701_v36  ;;  %v9774_v37 = vpop.f32.mrb[116].mxu1  ;;  %v14143_v38 = vpop.f32.mrb[117].mxu0 }
 0x488   :  { %10626 = vst.msk [vmem:[%s20776_s2 + $0xea] sm:$0x3] %vm10508_vm2, %v9774_v37  ;;  %v14162_v39 = vpop.f32.mrb[117].mxu1 }
 0x496   :  { %v9847_v40 = vpop.f32.mrb[118].mxu0 }
 0x497   :  { %10627 = vst.msk [vmem:[%s20776_s2 + $0xec] sm:$0x3] %vm10508_vm2, %v9847_v40  ;;  %v9920_v41 = vpop.f32.mrb[118].mxu1  ;;  %v14181_v42 = vpop.f32.mrb[119].mxu0 }
 0x498   :  { %10628 = vst.msk [vmem:[%s20776_s2 + $0xee] sm:$0x3] %vm10508_vm2, %v9920_v41  ;;  %v14200_v43 = vpop.f32.mrb[119].mxu1 }
 0x4a6   :  { %v9993_v44 = vpop.f32.mrb[120].mxu0 }
 0x4a7   :  { %10629 = vst.msk [vmem:[%s20776_s2 + $0xf0] sm:$0x3] %vm10508_vm2, %v9993_v44  ;;  %v10066_v45 = vpop.f32.mrb[120].mxu1  ;;  %v14219_v46 = vpop.f32.mrb[121].mxu0 }
 0x4a8   :  { %10630 = vst.msk [vmem:[%s20776_s2 + $0xf2] sm:$0x3] %vm10508_vm2, %v10066_v45  ;;  %v14238_v47 = vpop.f32.mrb[121].mxu1 }
 0x4b6   :  { %v10139_v48 = vpop.f32.mrb[122].mxu0 }
 0x4b7   :  { %10631 = vst.msk [vmem:[%s20776_s2 + $0xf4] sm:$0x3] %vm10508_vm2, %v10139_v48  ;;  %v10212_v49 = vpop.f32.mrb[122].mxu1  ;;  %v14257_v50 = vpop.f32.mrb[123].mxu0 }
 0x4b8   :  { %10632 = vst.msk [vmem:[%s20776_s2 + $0xf6] sm:$0x3] %vm10508_vm2, %v10212_v49  ;;  %v14276_v51 = vpop.f32.mrb[123].mxu1 }
 0x4c6   :  { %v10285_v52 = vpop.f32.mrb[124].mxu0 }
 0x4c7   :  { %10633 = vst.msk [vmem:[%s20776_s2 + $0xf8] sm:$0x3] %vm10508_vm2, %v10285_v52  ;;  %v10358_v53 = vpop.f32.mrb[124].mxu1  ;;  %v14295_v54 = vpop.f32.mrb[125].mxu0 }
 0x4c8   :  { %10634 = vst.msk [vmem:[%s20776_s2 + $0xfa] sm:$0x3] %vm10508_vm2, %v10358_v53  ;;  %v14314_v55 = vpop.f32.mrb[125].mxu1 }
 0x4d6   :  { %v10431_v56 = vpop.f32.mrb[126].mxu0 }
 0x4d7   :  { %10635 = vst.msk [vmem:[%s20776_s2 + $0xfc] sm:$0x3] %vm10508_vm2, %v10431_v56  ;;  %v10504_v57 = vpop.f32.mrb[126].mxu1  ;;  %v14333_v58 = vpop.f32.mrb[127].mxu0 }
 0x4d8   :  { %10636 = vst.msk [vmem:[%s20776_s2 + $0xfe] sm:$0x3] %vm10508_vm2, %v10504_v57  ;;  %v14352_v59 = vpop.f32.mrb[127].mxu1 }

// kernel: fnn2d_forward.14
= control target key start
LH: loop header
LB: loop body
LE: loop exit
PB: predicated region body
PF: predicated region fallthrough
CT: control target
= control target key end

     0   :  { %v332_v3 = vmov 0.0   ;;  %v333_v8 = vmov 0   ;;  %vm61_vm0 = vcmask 261120   ;;  %s535_s1 = inlined_call_operand.vmem [shape: f32[32,512], index: 1, kind: input, shape index: {}]   ;;  %s536_s2 = inlined_call_operand.vmem [shape: f32[32,1], index: 2, kind: input, shape index: {}]   ;;  %s537_s0 = inlined_call_operand.vmem [shape: f32[32,32], index: 0, kind: input, shape index: {}]   ;;  %s538_s3 = inlined_call_operand.vmem [shape: f32[32,512], index: 3, kind: input, shape index: {}]   ;;  %s539_s4 = inlined_call_operand.vmem [shape: f32[32,512], index: 4, kind: output, shape index: {}]  }
   0x1   :  { %v22_v0 = vld [vmem:[%s535_s1 + $0x8] sm:$0xff]  ;;  %v24_v2 = vld [vmem:[%s535_s1 + $0x18] sm:$0xff]  ;;  %138 = vmatprep.mubr.f32.mxu0 %v332_v3  ;;  %227 = vmatprep.mubr.f32.mxu1 %v332_v3  ;;  %v21_v6 = vld [vmem:[%s535_s1] sm:$0xff] }
   0x2   :  { %v26_v1 = vld [vmem:[%s535_s1 + $0x28] sm:$0xff]  ;;  %v28_v5 = vld [vmem:[%s535_s1 + $0x38] sm:$0xff]  ;;  %v25_v7 = vld [vmem:[%s535_s1 + $0x20] sm:$0xff]  ;;  %330 = vset.pattern.permute.xlu0 %v333_v8  ;;  %331 = vset.pattern.permute.xlu1 %v333_v8 }
   0x3   :  { %v312_v4 = vpack.c.bf16 %v26_v1, %v22_v0  ;;  %v320_v9 = vpack.c.bf16 %v28_v5, %v24_v2  ;;  %v314_v10 = vpack.c.bf16 %v25_v7, %v21_v6  ;;  %v23_v11 = vld [vmem:[%s535_s1 + $0x10] sm:$0xff]  ;;  %v30_v13 = vld [vmem:[%s535_s1 + $0x48] sm:$0xff]  ;;  %v32_v16 = vld [vmem:[%s535_s1 + $0x58] sm:$0xff] }
   0x4   :  { %v27_v12 = vld [vmem:[%s535_s1 + $0x30] sm:$0xff]  ;;  %v34_v15 = vld [vmem:[%s535_s1 + $0x68] sm:$0xff]  ;;  %v36_v17 = vld [vmem:[%s535_s1 + $0x78] sm:$0xff] }
   0x5   :  { %313 = vmatprep.subr.bf16.mxu0 %v312_v4  ;;  %v322_v14 = vpack.c.bf16 %v27_v12, %v23_v11  ;;  %321 = vmatprep.subr.bf16.mxu1 %v320_v9  ;;  %v316_v18 = vpack.c.bf16 %v34_v15, %v30_v13  ;;  %v324_v19 = vpack.c.bf16 %v36_v17, %v32_v16  ;;  %v29_v20 = vld [vmem:[%s535_s1 + $0x40] sm:$0xff]  ;;  %v31_v22 = vld [vmem:[%s535_s1 + $0x50] sm:$0xff]  ;;  %v38_v29 = vld [vmem:[%s536_s2 + $0x8] sm:$0xff] }
   0x6   :  { %315 = vmatpush1.bf16.msra.mxu0 %v314_v10  ;;  %v33_v21 = vld [vmem:[%s535_s1 + $0x60] sm:$0xff]  ;;  %v35_v24 = vld [vmem:[%s535_s1 + $0x70] sm:$0xff]  ;;  %v40_v30 = vld [vmem:[%s536_s2 + $0x18] sm:$0xff] }
   0x7   :  { %323 = vmatpush1.bf16.msra.mxu1 %v322_v14  ;;  %v318_v23 = vpack.c.bf16 %v33_v21, %v29_v20  ;;  %317 = vmatprep.subr.bf16.mxu0 %v316_v18  ;;  %v326_v25 = vpack.c.bf16 %v35_v24, %v31_v22  ;;  %v37_v26 = vld [vmem:[%s536_s2] sm:$0xff]  ;;  %v39_v27 = vld [vmem:[%s536_s2 + $0x10] sm:$0xff]  ;;  %v18_v31 = vld [vmem:[%s537_s0 + $0x8] sm:$0xff] }
   0x8   :  { %325 = vmatprep.subr.bf16.mxu1 %v324_v19  ;;  %43 = vperm.xlu0 %330, %v37_v26   ;;  %v17_v28 = vld [vmem:[%s537_s0] sm:$0xff]  ;;  %v19_v32 = vld [vmem:[%s537_s0 + $0x10] sm:$0xff]  ;;  %v20_v33 = vld [vmem:[%s537_s0 + $0x18] sm:$0xff] }
   0x9   :  { %53 = vperm.xlu1 %331, %v39_v27   ;;  %v252_v36 = vld [vmem:[%s538_s3] sm:$0xff]  ;;  %v254_v39 = vld [vmem:[%s538_s3 + $0x10] sm:$0xff]  ;;  %v253_v41 = vld [vmem:[%s538_s3 + $0x8] sm:$0xff] }
   0xa   :  { %319 = vmatpush1.bf16.msra.mxu0 %v318_v23  ;;  %v255_v45 = vld [vmem:[%s538_s3 + $0x18] sm:$0xff]  ;;  %v256_v52 = vld [vmem:[%s538_s3 + $0x20] sm:$0xff]  ;;  %v258_v56 = vld [vmem:[%s538_s3 + $0x30] sm:$0xff] }
   0xb   :  { %327 = vmatpush1.bf16.msra.mxu1 %v326_v25  ;;  %v257_v58 = vld [vmem:[%s538_s3 + $0x28] sm:$0xff]  ;;  %v259_v63 = vld [vmem:[%s538_s3 + $0x38] sm:$0xff]  ;;  %v260_v5 = vld [vmem:[%s538_s3 + $0x40] sm:$0xff] }
   0xc   :  { %48 = vperm.xlu0 %330, %v38_v29   ;;  %v262_v9 = vld [vmem:[%s538_s3 + $0x50] sm:$0xff]  ;;  %v261_v11 = vld [vmem:[%s538_s3 + $0x48] sm:$0xff]  ;;  %v263_v15 = vld [vmem:[%s538_s3 + $0x58] sm:$0xff] }
   0xd   :  { %304 = vmatmul.mubr.msk.f32.vlgmr.msra.gmra.mrb[0].mxu0 %vm61_vm0, %v17_v28  ;;  %58 = vperm.xlu1 %331, %v40_v30   ;;  %v264_v22 = vld [vmem:[%s538_s3 + $0x60] sm:$0xff]  ;;  %v266_v26 = vld [vmem:[%s538_s3 + $0x70] sm:$0xff] }
   0xe   :  { %308 = vmatmul.mubr.msk.f32.vlgmr.msra.gmra.mrb[0].mxu1 %vm61_vm0, %v17_v28  ;;  %144 = vmatprep.mubr.f32.mxu0 %v332_v3  ;;  %v265_v28 = vld [vmem:[%s538_s3 + $0x68] sm:$0xff] }
   0xf   :  { %233 = vmatprep.mubr.f32.mxu1 %v332_v3 }
  0x11   :  { %305 = vmatmul.mubr.msk.f32.gmra.mrb[2].mxu0 %vm61_vm0, %v18_v31 }
  0x12   :  { %309 = vmatmul.mubr.msk.f32.gmra.mrb[2].mxu1 %vm61_vm0, %v18_v31  ;;  %150 = vmatprep.mubr.f32.mxu0 %v332_v3 }
  0x13   :  { %239 = vmatprep.mubr.f32.mxu1 %v332_v3 }
  0x15   :  { %306 = vmatmul.mubr.msk.f32.gmra.mrb[4].mxu0 %vm61_vm0, %v19_v32 }
  0x16   :  { %310 = vmatmul.mubr.msk.f32.gmra.mrb[4].mxu1 %vm61_vm0, %v19_v32  ;;  %156 = vmatprep.mubr.f32.mxu0 %v332_v3  ;;  %v267_v32 = vld [vmem:[%s538_s3 + $0x78] sm:$0xff] }
  0x17   :  { %245 = vmatprep.mubr.f32.mxu1 %v332_v3 }
  0x19   :  { %307 = vmatmul.mubr.msk.f32.gmra.mrb[6].mxu0 %vm61_vm0, %v20_v33 }
  0x1a   :  { %311 = vmatmul.mubr.msk.f32.gmra.mrb[6].mxu1 %vm61_vm0, %v20_v33 }
  0x87   :  { %v44_v34 = vpop.permute.xlu0 %43 }
  0x88   :  { %v54_v60 = vpop.permute.xlu1 %53 }
  0x8b   :  { %v49_v46 = vpop.permute.xlu0 %48 }
  0x8c   :  { %v59_v19 = vpop.permute.xlu1 %58 }
  0xe0   :  { %v140_v35 = vpop.f32.mrb[0].mxu0 }
  0xe1   :  { %v141_v37 = vadd.f32 %v140_v35, %v44_v34  ;;  %v229_v38 = vpop.f32.mrb[0].mxu1  ;;  %v142_v40 = vpop.f32.mrb[1].mxu0 }
  0xe2   :  { %v230_v42 = vadd.f32 %v229_v38, %v44_v34  ;;  %v143_v43 = vadd.f32 %v142_v40, %v44_v34  ;;  %v231_v44 = vpop.f32.mrb[1].mxu1 }
  0xe3   :  { %v268_v47 = vadd.f32 %v252_v36, %v141_v37  ;;  %v232_v48 = vadd.f32 %v231_v44, %v44_v34 }
  0xe4   :  { %v270_v49 = vadd.f32 %v254_v39, %v230_v42  ;;  %v269_v50 = vadd.f32 %v253_v41, %v143_v43  ;;  %v146_v51 = vpop.f32.mrb[2].mxu0 }
  0xe5   :  { %284 = vst [vmem:[%s539_s4] sm:$0xff] %v268_v47  ;;  %v271_v53 = vadd.f32 %v255_v45, %v232_v48  ;;  %v147_v54 = vadd.f32 %v146_v51, %v49_v46  ;;  %v235_v55 = vpop.f32.mrb[2].mxu1  ;;  %v148_v57 = vpop.f32.mrb[3].mxu0 }
  0xe6   :  { %286 = vst [vmem:[%s539_s4 + $0x10] sm:$0xff] %v270_v49  ;;  %285 = vst [vmem:[%s539_s4 + $0x8] sm:$0xff] %v269_v50  ;;  %v236_v59 = vadd.f32 %v235_v55, %v49_v46  ;;  %v149_v61 = vadd.f32 %v148_v57, %v49_v46  ;;  %v237_v62 = vpop.f32.mrb[3].mxu1 }
  0xe7   :  { %287 = vst [vmem:[%s539_s4 + $0x18] sm:$0xff] %v271_v53  ;;  %v272_v0 = vadd.f32 %v256_v52, %v147_v54  ;;  %v238_v1 = vadd.f32 %v237_v62, %v49_v46 }
  0xe8   :  { %v274_v2 = vadd.f32 %v258_v56, %v236_v59  ;;  %v273_v3 = vadd.f32 %v257_v58, %v149_v61  ;;  %v152_v4 = vpop.f32.mrb[4].mxu0 }
  0xe9   :  { %288 = vst [vmem:[%s539_s4 + $0x20] sm:$0xff] %v272_v0  ;;  %v275_v6 = vadd.f32 %v259_v63, %v238_v1  ;;  %v153_v7 = vadd.f32 %v152_v4, %v54_v60  ;;  %v241_v8 = vpop.f32.mrb[4].mxu1  ;;  %v154_v10 = vpop.f32.mrb[5].mxu0 }
  0xea   :  { %290 = vst [vmem:[%s539_s4 + $0x30] sm:$0xff] %v274_v2  ;;  %289 = vst [vmem:[%s539_s4 + $0x28] sm:$0xff] %v273_v3  ;;  %v242_v12 = vadd.f32 %v241_v8, %v54_v60  ;;  %v155_v13 = vadd.f32 %v154_v10, %v54_v60  ;;  %v243_v14 = vpop.f32.mrb[5].mxu1 }
  0xeb   :  { %291 = vst [vmem:[%s539_s4 + $0x38] sm:$0xff] %v275_v6  ;;  %v276_v16 = vadd.f32 %v260_v5, %v153_v7  ;;  %v244_v17 = vadd.f32 %v243_v14, %v54_v60 }
  0xec   :  { %v278_v18 = vadd.f32 %v262_v9, %v242_v12  ;;  %v277_v20 = vadd.f32 %v261_v11, %v155_v13  ;;  %v158_v21 = vpop.f32.mrb[6].mxu0 }
  0xed   :  { %292 = vst [vmem:[%s539_s4 + $0x40] sm:$0xff] %v276_v16  ;;  %v279_v23 = vadd.f32 %v263_v15, %v244_v17  ;;  %v159_v24 = vadd.f32 %v158_v21, %v59_v19  ;;  %v247_v25 = vpop.f32.mrb[6].mxu1  ;;  %v160_v27 = vpop.f32.mrb[7].mxu0 }
  0xee   :  { %294 = vst [vmem:[%s539_s4 + $0x50] sm:$0xff] %v278_v18  ;;  %293 = vst [vmem:[%s539_s4 + $0x48] sm:$0xff] %v277_v20  ;;  %v248_v29 = vadd.f32 %v247_v25, %v59_v19  ;;  %v161_v30 = vadd.f32 %v160_v27, %v59_v19  ;;  %v249_v31 = vpop.f32.mrb[7].mxu1 }
  0xef   :  { %295 = vst [vmem:[%s539_s4 + $0x58] sm:$0xff] %v279_v23  ;;  %v280_v33 = vadd.f32 %v264_v22, %v159_v24  ;;  %v250_v34 = vadd.f32 %v249_v31, %v59_v19 }
  0xf0   :  { %v282_v35 = vadd.f32 %v266_v26, %v248_v29  ;;  %v281_v36 = vadd.f32 %v265_v28, %v161_v30 }
  0xf1   :  { %296 = vst [vmem:[%s539_s4 + $0x60] sm:$0xff] %v280_v33  ;;  %v283_v37 = vadd.f32 %v267_v32, %v250_v34 }
  0xf2   :  { %298 = vst [vmem:[%s539_s4 + $0x70] sm:$0xff] %v282_v35  ;;  %297 = vst [vmem:[%s539_s4 + $0x68] sm:$0xff] %v281_v36 }
  0xf3   :  { %299 = vst [vmem:[%s539_s4 + $0x78] sm:$0xff] %v283_v37 }

// kernel: fnn2d_forward.15
= control target key start
LH: loop header
LB: loop body
LE: loop exit
PB: predicated region body
PF: predicated region fallthrough
CT: control target
= control target key end

     0   :  { %v707_v3 = vmov 0.0   ;;  %v708_v9 = vmov 0   ;;  %vm94_vm0 = vcmask 261120   ;;  %vm388_vm1 = vcmask 523264   ;;  %s879_s4 = inlined_call_operand.vmem [shape: f32[32,512], index: 4, kind: input, shape index: {}]   ;;  %s880_s3 = inlined_call_operand.<no memory space> [shape: f32[1,1], index: 3, kind: input, shape index: {}]   ;;  %s881_s0 = inlined_call_operand.vmem [shape: f32[64,32], index: 0, kind: input, shape index: {}]   ;;  %s882_s1 = inlined_call_operand.vmem [shape: f32[64,1], index: 1, kind: input, shape index: {}]   ;;  %s883_s2 = inlined_call_operand.vmem [shape: f32[1,64], index: 2, kind: input, shape index: {}]   ;;  %s884_s5 = inlined_call_operand.vmem [shape: f32[1,512], index: 5, kind: output, shape index: {}]  }
   0x1   :  { %v31_v0 = vld [vmem:[%s879_s4 + $0x8] sm:$0xff]  ;;  %v33_v2 = vld [vmem:[%s879_s4 + $0x18] sm:$0xff]  ;;  %183 = vmatprep.mubr.f32.mxu0 %v707_v3  ;;  %296 = vmatprep.mubr.f32.mxu1 %v707_v3  ;;  %v10_v4 = vstv %s880_s3  ;;  %v30_v7 = vld [vmem:[%s879_s4] sm:$0xff] }
   0x2   :  { %v35_v1 = vld [vmem:[%s879_s4 + $0x28] sm:$0xff]  ;;  %v37_v6 = vld [vmem:[%s879_s4 + $0x38] sm:$0xff]  ;;  %v34_v8 = vld [vmem:[%s879_s4 + $0x20] sm:$0xff]  ;;  %641 = vset.pattern.permute.xlu0 %v708_v9  ;;  %642 = vset.pattern.permute.xlu1 %v708_v9  ;;  %11 = vst [vmem:[#allocation2] sm:$0x1] %v10_v4 }
   0x3   :  { %v590_v5 = vpack.c.bf16 %v35_v1, %v31_v0  ;;  %v598_v10 = vpack.c.bf16 %v37_v6, %v33_v2  ;;  %v592_v11 = vpack.c.bf16 %v34_v8, %v30_v7  ;;  %v32_v12 = vld [vmem:[%s879_s4 + $0x10] sm:$0xff]  ;;  %v39_v14 = vld [vmem:[%s879_s4 + $0x48] sm:$0xff]  ;;  %v41_v17 = vld [vmem:[%s879_s4 + $0x58] sm:$0xff] }
   0x4   :  { %v36_v13 = vld [vmem:[%s879_s4 + $0x30] sm:$0xff]  ;;  %v43_v16 = vld [vmem:[%s879_s4 + $0x68] sm:$0xff]  ;;  %v45_v18 = vld [vmem:[%s879_s4 + $0x78] sm:$0xff] }
   0x5   :  { %591 = vmatprep.subr.bf16.mxu0 %v590_v5  ;;  %v600_v15 = vpack.c.bf16 %v36_v13, %v32_v12  ;;  %599 = vmatprep.subr.bf16.mxu1 %v598_v10  ;;  %v594_v19 = vpack.c.bf16 %v43_v16, %v39_v14  ;;  %v602_v20 = vpack.c.bf16 %v45_v18, %v41_v17  ;;  %v38_v21 = vld [vmem:[%s879_s4 + $0x40] sm:$0xff]  ;;  %v40_v23 = vld [vmem:[%s879_s4 + $0x50] sm:$0xff]  ;;  %v47_v30 = vld [vmem:[%s882_s1 + $0x8] sm:$0xff] }
   0x6   :  { %593 = vmatpush1.bf16.msra.mxu0 %v592_v11  ;;  %v42_v22 = vld [vmem:[%s879_s4 + $0x60] sm:$0xff]  ;;  %v44_v25 = vld [vmem:[%s879_s4 + $0x70] sm:$0xff]  ;;  %v49_v31 = vld [vmem:[%s882_s1 + $0x18] sm:$0xff] }
   0x7   :  { %601 = vmatpush1.bf16.msra.mxu1 %v600_v15  ;;  %v596_v24 = vpack.c.bf16 %v42_v22, %v38_v21  ;;  %595 = vmatprep.subr.bf16.mxu0 %v594_v19  ;;  %v604_v26 = vpack.c.bf16 %v44_v25, %v40_v23  ;;  %v22_v27 = vld [vmem:[%s881_s0] sm:$0xff]  ;;  %v48_v29 = vld [vmem:[%s882_s1 + $0x10] sm:$0xff]  ;;  %v23_v32 = vld [vmem:[%s881_s0 + $0x8] sm:$0xff] }
   0x8   :  { %603 = vmatprep.subr.bf16.mxu1 %v602_v20  ;;  %v46_v28 = vld [vmem:[%s882_s1] sm:$0xff]  ;;  %66 = vperm.xlu1 %642, %v48_v29   ;;  %v51_v34 = vld [vmem:[%s882_s1 + $0x28] sm:$0xff]  ;;  %v24_v35 = vld [vmem:[%s881_s0 + $0x10] sm:$0xff] }
   0x9   :  { %56 = vperm.xlu0 %641, %v46_v28   ;;  %v50_v33 = vld [vmem:[%s882_s1 + $0x20] sm:$0xff]  ;;  %v52_v36 = vld [vmem:[%s882_s1 + $0x30] sm:$0xff]  ;;  %v53_v37 = vld [vmem:[%s882_s1 + $0x38] sm:$0xff] }
   0xa   :  { %597 = vmatpush1.bf16.msra.mxu0 %v596_v24  ;;  %v25_v38 = vld [vmem:[%s881_s0 + $0x18] sm:$0xff]  ;;  %v378_v39 = vld [vmem:[#allocation2] sm:$0x1]  ;;  %v27_v41 = vld [vmem:[%s881_s0 + $0x28] sm:$0xff] }
   0xb   :  { %605 = vmatpush1.bf16.msra.mxu1 %v604_v26  ;;  %v26_v40 = vld [vmem:[%s881_s0 + $0x20] sm:$0xff]  ;;  %v28_v42 = vld [vmem:[%s881_s0 + $0x30] sm:$0xff]  ;;  %v29_v43 = vld [vmem:[%s881_s0 + $0x38] sm:$0xff] }
   0xc   :  { %71 = vperm.xlu1 %642, %v49_v31  }
   0xd   :  { %572 = vmatmul.mubr.msk.f32.vlgmr.msra.gmra.mrb[0].mxu0 %vm94_vm0, %v22_v27  ;;  %61 = vperm.xlu0 %641, %v47_v30  }
   0xe   :  { %580 = vmatmul.mubr.msk.f32.vlgmr.msra.gmra.mrb[0].mxu1 %vm94_vm0, %v22_v27  ;;  %189 = vmatprep.mubr.f32.mxu0 %v707_v3 }
   0xf   :  { %302 = vmatprep.mubr.f32.mxu1 %v707_v3 }
  0x10   :  { %81 = vperm.xlu1 %642, %v51_v34  }
  0x11   :  { %573 = vmatmul.mubr.msk.f32.gmra.mrb[2].mxu0 %vm94_vm0, %v23_v32  ;;  %76 = vperm.xlu0 %641, %v50_v33  }
  0x12   :  { %581 = vmatmul.mubr.msk.f32.gmra.mrb[2].mxu1 %vm94_vm0, %v23_v32  ;;  %195 = vmatprep.mubr.f32.mxu0 %v707_v3 }
  0x13   :  { %308 = vmatprep.mubr.f32.mxu1 %v707_v3 }
  0x14   :  { %91 = vperm.xlu1 %642, %v53_v37  }
  0x15   :  { %574 = vmatmul.mubr.msk.f32.gmra.mrb[4].mxu0 %vm94_vm0, %v24_v35  ;;  %86 = vperm.xlu0 %641, %v52_v36  }
  0x16   :  { %582 = vmatmul.mubr.msk.f32.gmra.mrb[4].mxu1 %vm94_vm0, %v24_v35  ;;  %201 = vmatprep.mubr.f32.mxu0 %v707_v3 }
  0x17   :  { %314 = vmatprep.mubr.f32.mxu1 %v707_v3 }
  0x19   :  { %575 = vmatmul.mubr.msk.f32.gmra.mrb[6].mxu0 %vm94_vm0, %v25_v38  ;;  %381 = vperm.xlu0 %641, %v378_v39  }
  0x1a   :  { %583 = vmatmul.mubr.msk.f32.gmra.mrb[6].mxu1 %vm94_vm0, %v25_v38  ;;  %207 = vmatprep.mubr.f32.mxu0 %v707_v3 }
  0x1b   :  { %320 = vmatprep.mubr.f32.mxu1 %v707_v3 }
  0x1d   :  { %576 = vmatmul.mubr.msk.f32.gmra.mrb[8].mxu0 %vm94_vm0, %v26_v40 }
  0x1e   :  { %584 = vmatmul.mubr.msk.f32.gmra.mrb[8].mxu1 %vm94_vm0, %v26_v40  ;;  %213 = vmatprep.mubr.f32.mxu0 %v707_v3 }
  0x1f   :  { %326 = vmatprep.mubr.f32.mxu1 %v707_v3 }
  0x21   :  { %577 = vmatmul.mubr.msk.f32.gmra.mrb[10].mxu0 %vm94_vm0, %v27_v41 }
  0x22   :  { %585 = vmatmul.mubr.msk.f32.gmra.mrb[10].mxu1 %vm94_vm0, %v27_v41  ;;  %219 = vmatprep.mubr.f32.mxu0 %v707_v3 }
  0x23   :  { %332 = vmatprep.mubr.f32.mxu1 %v707_v3 }
  0x25   :  { %578 = vmatmul.mubr.msk.f32.gmra.mrb[12].mxu0 %vm94_vm0, %v28_v42 }
  0x26   :  { %586 = vmatmul.mubr.msk.f32.gmra.mrb[12].mxu1 %vm94_vm0, %v28_v42  ;;  %225 = vmatprep.mubr.f32.mxu0 %v707_v3 }
  0x27   :  { %338 = vmatprep.mubr.f32.mxu1 %v707_v3 }
  0x29   :  { %579 = vmatmul.mubr.msk.f32.gmra.mrb[14].mxu0 %vm94_vm0, %v29_v43 }
  0x2a   :  { %587 = vmatmul.mubr.msk.f32.gmra.mrb[14].mxu1 %vm94_vm0, %v29_v43  ;;  %456 = vmatprep.mubr.f32.mxu0 %v707_v3 }
  0x2b   :  { %527 = vmatprep.mubr.f32.mxu1 %v707_v3 }
  0x87   :  { %v67_v58 = vpop.permute.xlu1 %66 }
  0x88   :  { %v57_v44 = vpop.permute.xlu0 %56 }
  0x8b   :  { %v72_v7 = vpop.permute.xlu1 %71 }
  0x8c   :  { %v62_v53 = vpop.permute.xlu0 %61 }
  0x8f   :  { %v82_v35 = vpop.permute.xlu1 %81 }
  0x90   :  { %v77_v20 = vpop.permute.xlu0 %76 }
  0xe0   :  { %v185_v45 = vpop.f32.mrb[0].mxu0 }
  0xe1   :  { %v186_v46 = vadd.f32 %v185_v45, %v57_v44  ;;  %v298_v47 = vpop.f32.mrb[0].mxu1  ;;  %v187_v48 = vpop.f32.mrb[1].mxu0 }
  0xe2   :  { %v299_v49 = vadd.f32 %v298_v47, %v57_v44  ;;  %v188_v50 = vadd.f32 %v187_v48, %v57_v44  ;;  %v300_v51 = vpop.f32.mrb[1].mxu1 }
  0xe3   :  { %643 = vtanh.f32 %v186_v46  ;;  %v301_v52 = vadd.f32 %v300_v51, %v57_v44 }
  0xe4   :  { %645 = vtanh.f32 %v299_v49  ;;  %v191_v54 = vpop.f32.mrb[2].mxu0 }
  0xe5   :  { %647 = vtanh.f32 %v188_v50  ;;  %v192_v55 = vadd.f32 %v191_v54, %v62_v53  ;;  %v304_v56 = vpop.f32.mrb[2].mxu1  ;;  %v193_v57 = vpop.f32.mrb[3].mxu0 }
  0xe6   :  { %649 = vtanh.f32 %v301_v52  ;;  %v305_v59 = vadd.f32 %v304_v56, %v62_v53  ;;  %v194_v60 = vadd.f32 %v193_v57, %v62_v53  ;;  %v306_v61 = vpop.f32.mrb[3].mxu1  ;;  %v87_v50 = vpop.permute.xlu0 %86 }
  0xe7   :  { %651 = vtanh.f32 %v192_v55  ;;  %v307_v62 = vadd.f32 %v306_v61, %v62_v53 }
  0xe8   :  { %653 = vtanh.f32 %v305_v59  ;;  %v197_v63 = vpop.f32.mrb[4].mxu0 }
  0xe9   :  { %655 = vtanh.f32 %v194_v60  ;;  %v198_v0 = vadd.f32 %v197_v63, %v67_v58  ;;  %v310_v1 = vpop.f32.mrb[4].mxu1  ;;  %v199_v2 = vpop.f32.mrb[5].mxu0 }
  0xea   :  { %657 = vtanh.f32 %v307_v62  ;;  %v311_v3 = vadd.f32 %v310_v1, %v67_v58  ;;  %v200_v4 = vadd.f32 %v199_v2, %v67_v58  ;;  %v312_v5 = vpop.f32.mrb[5].mxu1  ;;  %v92_v1 = vpop.permute.xlu1 %91 }
  0xeb   :  { %659 = vtanh.f32 %v198_v0  ;;  %v313_v6 = vadd.f32 %v312_v5, %v67_v58 }
  0xec   :  { %661 = vtanh.f32 %v311_v3  ;;  %v203_v8 = vpop.f32.mrb[6].mxu0 }
  0xed   :  { %v644_v9 = vpop.eup %643  ;;  %663 = vtanh.f32 %v200_v4  ;;  %v204_v10 = vadd.f32 %v203_v8, %v72_v7  ;;  %v316_v11 = vpop.f32.mrb[6].mxu1 }
  0xee   :  { %v205_v12 = vpop.f32.mrb[7].mxu0  ;;  %v646_v13 = vpop.eup %645  ;;  %665 = vtanh.f32 %v313_v6  ;;  %v317_v14 = vadd.f32 %v316_v11, %v72_v7 }
  0xef   :  { %v206_v15 = vadd.f32 %v205_v12, %v72_v7  ;;  %v318_v16 = vpop.f32.mrb[7].mxu1  ;;  %v648_v17 = vpop.eup %647  ;;  %667 = vtanh.f32 %v204_v10 }
  0xf0   :  { %v319_v18 = vadd.f32 %v318_v16, %v72_v7  ;;  %v650_v19 = vpop.eup %649  ;;  %669 = vtanh.f32 %v317_v14  ;;  %v209_v21 = vpop.f32.mrb[8].mxu0 }
  0xf1   :  { %v652_v22 = vpop.eup %651  ;;  %671 = vtanh.f32 %v206_v15  ;;  %v210_v23 = vadd.f32 %v209_v21, %v77_v20  ;;  %v322_v24 = vpop.f32.mrb[8].mxu1 }
  0xf2   :  { %v211_v25 = vpop.f32.mrb[9].mxu0  ;;  %v654_v26 = vpop.eup %653  ;;  %673 = vtanh.f32 %v319_v18  ;;  %v323_v27 = vadd.f32 %v322_v24, %v77_v20  ;;  %v608_v30 = vpack.c.bf16 %v652_v22, %v644_v9 }
  0xf3   :  { %v212_v28 = vadd.f32 %v211_v25, %v77_v20  ;;  %v324_v29 = vpop.f32.mrb[9].mxu1  ;;  %v656_v31 = vpop.eup %655  ;;  %675 = vtanh.f32 %v210_v23  ;;  %v624_v33 = vpack.c.bf16 %v654_v26, %v646_v13 }
  0xf4   :  { %v325_v32 = vadd.f32 %v324_v29, %v77_v20  ;;  %v658_v34 = vpop.eup %657  ;;  %677 = vtanh.f32 %v323_v27  ;;  %v215_v36 = vpop.f32.mrb[10].mxu0  ;;  %v606_v37 = vpack.c.bf16 %v656_v31, %v648_v17 }
  0xf5   :  { %v660_v38 = vpop.eup %659  ;;  %679 = vtanh.f32 %v212_v28  ;;  %v216_v39 = vadd.f32 %v215_v36, %v82_v35  ;;  %v328_v40 = vpop.f32.mrb[10].mxu1  ;;  %v622_v42 = vpack.c.bf16 %v658_v34, %v650_v19  ;;  %v377_v36 = vld [vmem:[%s883_s2] sm:$0x1] }
  0xf6   :  { %v217_v41 = vpop.f32.mrb[11].mxu0  ;;  %v662_v43 = vpop.eup %661  ;;  %681 = vtanh.f32 %v325_v32  ;;  %v329_v44 = vadd.f32 %v328_v40, %v82_v35  ;;  %607 = vmatprep.subr.bf16.mxu0 %v606_v37  ;;  %v384_v37 = vlaneseq }
  0xf7   :  { %v218_v45 = vadd.f32 %v217_v41, %v82_v35  ;;  %v330_v46 = vpop.f32.mrb[11].mxu1  ;;  %v664_v47 = vpop.eup %663  ;;  %683 = vtanh.f32 %v216_v39  ;;  %623 = vmatprep.subr.bf16.mxu1 %v622_v42  ;;  %609 = vmatpush1.bf16.msra.mxu0 %v608_v30  ;;  %v709_v39 = vmov 1966171168  }
  0xf8   :  { %v331_v48 = vadd.f32 %v330_v46, %v82_v35  ;;  %v666_v49 = vpop.eup %665  ;;  %685 = vtanh.f32 %v329_v44  ;;  %625 = vmatpush1.bf16.msra.mxu1 %v624_v33  ;;  %v221_v51 = vpop.f32.mrb[12].mxu0  ;;  %v541_v40 = vunpack.c.l.s4 %v709_v39  ;;  %vm565_vm2 = vcmp.lt.s32.totalorder %v384_v37, 512 }
  0xf9   :  { %v668_v52 = vpop.eup %667  ;;  %687 = vtanh.f32 %v218_v45  ;;  %v222_v53 = vadd.f32 %v221_v51, %v87_v50  ;;  %v334_v54 = vpop.f32.mrb[12].mxu1 }
  0xfa   :  { %v223_v55 = vpop.f32.mrb[13].mxu0  ;;  %v670_v56 = vpop.eup %669  ;;  %689 = vtanh.f32 %v331_v48  ;;  %v335_v57 = vadd.f32 %v334_v54, %v87_v50  ;;  %v612_v60 = vpack.c.bf16 %v668_v52, %v660_v38  ;;  %v385_v38 = vshrl.u32 %v384_v37, 7 }
  0xfb   :  { %v224_v58 = vadd.f32 %v223_v55, %v87_v50  ;;  %v336_v59 = vpop.f32.mrb[13].mxu1  ;;  %v672_v61 = vpop.eup %671  ;;  %691 = vtanh.f32 %v222_v53  ;;  %v628_v63 = vpack.c.bf16 %v670_v56, %v662_v43  ;;  %v542_v43 = vunpack.c.0.s8 %v541_v40 }
  0xfc   :  { %v337_v62 = vadd.f32 %v336_v59, %v87_v50  ;;  %v674_v0 = vpop.eup %673  ;;  %693 = vtanh.f32 %v335_v57  ;;  %v227_v2 = vpop.f32.mrb[14].mxu0  ;;  %v610_v3 = vpack.c.bf16 %v672_v61, %v664_v47  ;;  %v386_v41 = vsub.s32 0, %v385_v38 }
  0xfd   :  { %v676_v4 = vpop.eup %675  ;;  %695 = vtanh.f32 %v224_v58  ;;  %v228_v5 = vadd.f32 %v227_v2, %v92_v1  ;;  %v340_v6 = vpop.f32.mrb[14].mxu1  ;;  %v626_v8 = vpack.c.bf16 %v674_v0, %v666_v49  ;;  %v545_v49 = vsub.s32 %v542_v43, %v385_v38 }
  0xfe   :  { %v229_v7 = vpop.f32.mrb[15].mxu0  ;;  %v678_v9 = vpop.eup %677  ;;  %697 = vtanh.f32 %v337_v62  ;;  %v341_v10 = vadd.f32 %v340_v6, %v92_v1  ;;  %611 = vmatprep.subr.bf16.mxu0 %v610_v3 }
  0xff   :  { %v230_v11 = vadd.f32 %v229_v7, %v92_v1  ;;  %v342_v12 = vpop.f32.mrb[15].mxu1  ;;  %v680_v13 = vpop.eup %679  ;;  %699 = vtanh.f32 %v228_v5  ;;  %627 = vmatprep.subr.bf16.mxu1 %v626_v8  ;;  %613 = vmatpush1.bf16.msra.mxu0 %v612_v60 }
 0x100   :  { %v343_v14 = vadd.f32 %v342_v12, %v92_v1  ;;  %v682_v15 = vpop.eup %681  ;;  %701 = vtanh.f32 %v341_v10  ;;  %629 = vmatpush1.bf16.msra.mxu1 %v628_v63  ;;  %v382_v42 = vpop.permute.xlu0 %381 }
 0x101   :  { %v684_v16 = vpop.eup %683  ;;  %703 = vtanh.f32 %v230_v11  ;;  %v387_v44 = vrot.slane %v382_v42, %v386_v41 }
 0x102   :  { %v686_v17 = vpop.eup %685  ;;  %705 = vtanh.f32 %v343_v14  ;;  %v616_v18 = vpack.c.bf16 %v684_v16, %v676_v4 }
 0x103   :  { %v688_v19 = vpop.eup %687  ;;  %v632_v20 = vpack.c.bf16 %v686_v17, %v678_v9 }
 0x104   :  { %v690_v21 = vpop.eup %689  ;;  %v614_v22 = vpack.c.bf16 %v688_v19, %v680_v13 }
 0x105   :  { %v692_v23 = vpop.eup %691  ;;  %v630_v24 = vpack.c.bf16 %v690_v21, %v682_v15 }
 0x106   :  { %v694_v25 = vpop.eup %693  ;;  %615 = vmatprep.subr.bf16.mxu0 %v614_v22 }
 0x107   :  { %v696_v26 = vpop.eup %695  ;;  %631 = vmatprep.subr.bf16.mxu1 %v630_v24  ;;  %617 = vmatpush1.bf16.msra.mxu0 %v616_v18 }
 0x108   :  { %v698_v27 = vpop.eup %697  ;;  %633 = vmatpush1.bf16.msra.mxu1 %v632_v20 }
 0x109   :  { %v700_v28 = vpop.eup %699 }
 0x10a   :  { %v702_v29 = vpop.eup %701  ;;  %v620_v30 = vpack.c.bf16 %v700_v28, %v692_v23 }
 0x10b   :  { %v704_v31 = vpop.eup %703  ;;  %v636_v32 = vpack.c.bf16 %v702_v29, %v694_v25 }
 0x10c   :  { %v706_v33 = vpop.eup %705  ;;  %v618_v34 = vpack.c.bf16 %v704_v31, %v696_v26 }
 0x10d   :  { %v634_v35 = vpack.c.bf16 %v706_v33, %v698_v27 }
 0x10e   :  { %619 = vmatprep.subr.bf16.mxu0 %v618_v34 }
 0x10f   :  { %635 = vmatprep.subr.bf16.mxu1 %v634_v35  ;;  %621 = vmatpush1.bf16.msra.mxu0 %v620_v30 }
 0x110   :  { %637 = vmatpush1.bf16.msra.mxu1 %v636_v32 }
 0x112   :  { %588 = vmatmul.mubr.msk.f32.vlgmr.msra.gmra.mrb[16].mxu0 %vm388_vm1, %v377_v36 }
 0x113   :  { %589 = vmatmul.mubr.msk.f32.vlgmr.msra.gmra.mrb[16].mxu1 %vm388_vm1, %v377_v36 }
 0x1e5   :  { %v458_v45 = vpop.f32.mrb[16].mxu0 }
 0x1e6   :  { %v459_v46 = vadd.f32 %v458_v45, %v387_v44  ;;  %v529_v47 = vpop.f32.mrb[16].mxu1  ;;  %v460_v48 = vpop.f32.mrb[17].mxu0 }
 0x1e7   :  { %v530_v50 = vadd.f32 %v529_v47, %v387_v44  ;;  %v461_v51 = vadd.f32 %v460_v48, %v387_v44  ;;  %v531_v52 = vpop.f32.mrb[17].mxu1 }
 0x1e8   :  { %v532_v53 = vadd.f32 %v531_v52, %v387_v44 }
 0x1e9   :  { %v538_v54 = vcombine.low %v459_v46, %v461_v51 }
 0x1ea   :  { %v539_v55 = vcombine.low %v530_v50, %v532_v53 }
 0x1eb   :  { %v546_v56 = vrot.slane %v538_v54, %v545_v49 }
 0x1ec   :  { %v553_v57 = vrot.slane %v539_v55, %v545_v49 }
 0x1ee   :  { %v554_v58 = vcombine.low %v546_v56, %v553_v57 }
 0x1f0   :  { %v561_v59 = vrot.slane %v554_v58, %v545_v49 }
 0x1f2   :  { %567 = vst.msk [vmem:[%s884_s5] sm:$0xf] %vm565_vm2, %v561_v59 }

</bundles_post_ra>
